<compile_context>
chip_gen: v6e
topology: v6e:2x2x1
jax: 0.10.0
libtpu: 0.0.40
codegen_flags: <defaults>
</compile_context>

<pallas_src>
import functools

import jax
import jax.numpy as jnp
from jax import lax
from jax.experimental import pallas as pl
from jax.experimental.pallas import tpu as pltpu


IMG_LANES = 128          # per-image conv-position chunk (10x10 grid zero-padded to 128)
N_PARITY = 4             # conv2 tap parities (alpha, beta) in {0,1}^2


# ------------------------------ Pallas kernel -------------------------------

def _diffnet_fused_kernel(p1_ref, w1_ref, b1_ref, w2_ref, b2_ref,
                          wfc1_ref, bfc1_ref, wfc2_ref, bfc2_ref,
                          o_ref, p2s_ref):
    """Fused Diffnet forward for one block of Bt images.

    p1_ref  : [192, 4*Bt*128] conv1 im2col of (x-y); columns ordered
              (parity P of the conv1 output position, image, r'*10+c' padded to 128)
    w1_ref  : [16, 192]   conv1 weight matrix          b1_ref : [16, 1]
    w2_ref  : [32, 256]   conv2 weights, cols = (tap i*4+j, c1)     b2_ref : [32, 1]
    wfc1_ref: [4096, H]   fc1 weights re-ordered to (c2, 10x10 pos padded to 128)
    bfc1_ref: [1, H]      wfc2_ref: [H, 2]     bfc2_ref: [1, 2]
    o_ref   : [Bt, 2]
    p2s_ref : [256, Bt*128] VMEM scratch holding conv2's im2col
    """
    Bt = o_ref.shape[0]
    BLK = Bt * IMG_LANES
    C1 = w1_ref.shape[0]       # 16
    C2 = w2_ref.shape[0]       # 32

    # ---- conv1 + ReLU, one matmul per parity block.  A stride-2 / kernel-4 conv2 tap
    # only ever reads one parity of conv1's output grid, so its im2col slab is just a
    # lane-shifted copy of that parity block.
    for P in range(N_PARITY):
        alpha, beta = P // 2, P % 2
        h1p = jnp.dot(w1_ref[...], p1_ref[:, P * BLK:(P + 1) * BLK],
                      preferred_element_type=jnp.float32)              # [16, Bt*128]
        h1p = jnp.maximum(h1p + b1_ref[...], 0.0)
        for a in range(2):
            for b in range(2):
                t = (2 * a + alpha) * 4 + (2 * b + beta)               # conv2 tap i*4+j
                s = a * 10 + b                                         # in-image lane shift
                r0 = t * C1
                if s == 0:
                    p2s_ref[r0:r0 + C1, :] = h1p
                else:
                    # manual roll (two static-slice stores): shifted-out lanes only ever
                    # feed zero-weighted (invalid / padded) output positions.
                    p2s_ref[r0:r0 + C1, :BLK - s] = h1p[:, s:]
                    p2s_ref[r0:r0 + C1, BLK - s:] = h1p[:, :s]

    # ---- conv2 + ReLU: single K=256 MXU pass over the whole image block.
    h2 = jnp.dot(w2_ref[...], p2s_ref[...], preferred_element_type=jnp.float32)
    h2 = jnp.maximum(h2 + b2_ref[...], 0.0)                            # [32, Bt*128]

    # ---- regroup (c2 on sublanes, positions on lanes) into per-image fc1 rows.
    rows = []
    for img in range(Bt):
        base = img * IMG_LANES
        rows.append(jnp.concatenate(
            [h2[c2:c2 + 1, base:base + IMG_LANES] for c2 in range(C2)], axis=1))
    lhs = jnp.concatenate(rows, axis=0)                                # [Bt, 32*128]

    # ---- fc1 + ReLU and fc2, batched over the Bt images of this grid step.
    z = jnp.dot(lhs, wfc1_ref[...], preferred_element_type=jnp.float32)
    z = jnp.maximum(z + bfc1_ref[...], 0.0)                            # [Bt, H]
    o_ref[...] = (jnp.dot(z, wfc2_ref[...], preferred_element_type=jnp.float32)
                  + bfc2_ref[...])


# ----------------------------- glue / wrappers ------------------------------

def _build_conv1_patches(d, Bt):
    """NCHW diff images -> [B//Bt, 192, 4*Bt*128] conv1 im2col in the kernel's layout."""
    B = d.shape[0]
    NB = B // Bt
    KH = KW = 8
    ST = 4
    OH = OW = 20
    taps = []
    for i in range(KH):
        for j in range(KW):
            taps.append(d[:, :, i:i + ST * (OH - 1) + 1:ST, j:j + ST * (OW - 1) + 1:ST])
    p = jnp.stack(taps, axis=2)                        # [B, 3, 64, 20, 20]
    p = p.reshape(B, 3 * KH * KW, OH, OW)              # rows ordered (c_in, kh, kw)
    # split conv1 output coords into (r', alpha) x (c', beta)
    p = p.reshape(B, 192, OH // 2, 2, OW // 2, 2)      # (b, k, r', alpha, c', beta)
    p = jnp.transpose(p, (0, 3, 5, 1, 2, 4))           # (b, alpha, beta, k, r', c')
    p = p.reshape(B, N_PARITY, 192, 100)
    p = jnp.pad(p, ((0, 0), (0, 0), (0, 0), (0, IMG_LANES - 100)))
    p = p.reshape(NB, Bt, N_PARITY, 192, IMG_LANES)
    p = jnp.transpose(p, (0, 3, 2, 1, 4))              # (nb, k, parity, img, pos)
    return p.reshape(NB, 192, N_PARITY * Bt * IMG_LANES)


def diffnet_forward(params, x, y, block_images=4):
    B = x.shape[0]
    Bt = block_images
    while B % Bt:
        Bt //= 2
    NB = B // Bt

    c1w, c1b = params["conv1_w"], params["conv1_b"]
    c2w, c2b = params["conv2_w"], params["conv2_b"]
    C1out = c1w.shape[0]
    C2out = c2w.shape[0]
    H = params["fc1_w"].shape[0]

    # ---- layout glue (plain JAX, tiny) ----
    p1 = _build_conv1_patches(x - y, Bt)                        # [NB, 192, 4*Bt*128]
    w1m = c1w.reshape(C1out, 192)                                # [16, 192]
    b1m = c1b.reshape(C1out, 1)
    w2flat = jnp.transpose(c2w, (0, 2, 3, 1)).reshape(C2out, 256)   # cols = (i*4+j, c1)
    b2m = c2b.reshape(C2out, 1)
    # fc1 weights re-ordered to the kernel's (c2, 10x10-grid pos zero-padded to 128) layout
    wf1 = params["fc1_w"].reshape(H, C2out, 9, 9)
    wf1 = jnp.pad(wf1, ((0, 0), (0, 0), (0, 1), (0, 1)))        # 9x9 -> 10x10 (zeros)
    wf1 = jnp.pad(wf1.reshape(H, C2out, 100),
                  ((0, 0), (0, 0), (0, IMG_LANES - 100)))       # 100 -> 128 (zeros)
    wfc1g = jnp.transpose(wf1.reshape(H, C2out * IMG_LANES))    # [4096, H]
    bfc1 = params["fc1_b"].reshape(1, H)
    wfc2 = jnp.transpose(params["fc2_w"])                       # [H, 2]
    bfc2 = params["fc2_b"].reshape(1, 2)

    lanes = N_PARITY * Bt * IMG_LANES
    flops = 2 * B * (C1out * 192 * (N_PARITY * IMG_LANES)
                     + C2out * 256 * IMG_LANES
                     + C2out * IMG_LANES * H + H * 2)
    bytes_accessed = 4 * (p1.size + w1m.size + b1m.size + w2flat.size + b2m.size
                          + wfc1g.size + bfc1.size + wfc2.size + bfc2.size + B * 2)

    out = pl.pallas_call(
        _diffnet_fused_kernel,
        out_shape=jax.ShapeDtypeStruct((NB, Bt, 2), jnp.float32),
        grid=(NB,),
        in_specs=[
            pl.BlockSpec((None, 192, lanes), lambda nb: (nb, 0, 0)),   # per-step patches
            pl.BlockSpec((C1out, 192), lambda nb: (0, 0)),             # weights: constant
            pl.BlockSpec((C1out, 1), lambda nb: (0, 0)),               #   block index ->
            pl.BlockSpec((C2out, 256), lambda nb: (0, 0)),             #   DMA'd once and
            pl.BlockSpec((C2out, 1), lambda nb: (0, 0)),               #   kept in VMEM
            pl.BlockSpec((C2out * IMG_LANES, H), lambda nb: (0, 0)),
            pl.BlockSpec((1, H), lambda nb: (0, 0)),
            pl.BlockSpec((H, 2), lambda nb: (0, 0)),
            pl.BlockSpec((1, 2), lambda nb: (0, 0)),
        ],
        out_specs=pl.BlockSpec((None, Bt, 2), lambda nb: (nb, 0, 0)),
        scratch_shapes=[pltpu.VMEM((256, Bt * IMG_LANES), jnp.float32)],
        compiler_params=pltpu.CompilerParams(
            dimension_semantics=("parallel",),
            vmem_limit_bytes=32 * 1024 * 1024),
        cost_estimate=pl.CostEstimate(flops=int(flops), transcendentals=0,
                                      bytes_accessed=int(bytes_accessed)),
    )(p1, w1m, b1m, w2flat, b2m, wfc1g, bfc1, wfc2, bfc2)
    return out.reshape(B, 2)


# ----------------------------- reference (pure JAX) --------------------------

def _reference_forward(params, x, y):
    def conv(inp, w, b, s):
        o = lax.conv_general_dilated(inp, w, (s, s), "VALID",
                                     dimension_numbers=("NCHW", "OIHW", "NCHW"))
        return jnp.maximum(o + b[None, :, None, None], 0.0)

    h = conv(x - y, params["conv1_w"], params["conv1_b"], 4)
    h = conv(h, params["conv2_w"], params["conv2_b"], 2)
    f = h.reshape(h.shape[0], -1)
    z = jnp.maximum(f @ params["fc1_w"].T + params["fc1_b"], 0.0)
    return z @ params["fc2_w"].T + params["fc2_b"]


# ------------------------------------ main -----------------------------------

def make_params(key, hidden_size):
    ks = jax.random.split(key, 8)
    return {
        "conv1_w": 0.05 * jax.random.normal(ks[0], (16, 3, 8, 8), jnp.float32),
        "conv1_b": 0.01 * jax.random.normal(ks[1], (16,), jnp.float32),
        "conv2_w": 0.05 * jax.random.normal(ks[2], (32, 16, 4, 4), jnp.float32),
        "conv2_b": 0.01 * jax.random.normal(ks[3], (32,), jnp.float32),
        "fc1_w": 0.02 * jax.random.normal(ks[4], (hidden_size, 2592), jnp.float32),
        "fc1_b": 0.01 * jax.random.normal(ks[5], (hidden_size,), jnp.float32),
        "fc2_w": 0.1 * jax.random.normal(ks[6], (2, hidden_size), jnp.float32),
        "fc2_b": 0.01 * jax.random.normal(ks[7], (2,), jnp.float32),
    }


if __name__ == "__main__":
    key = jax.random.PRNGKey(0)
    kp, kx, ky = jax.random.split(key, 3)

    hidden_size = 32                 # module default is 256; small hidden for the test
    B = 8                            # 2 grid steps of 4 images -> exercises batched path
    params = make_params(kp, hidden_size)
    # 84x84x3 input is what the module's hard-coded 2592 (= 32*9*9) flatten implies.
    x = jax.random.normal(kx, (B, 3, 84, 84), jnp.float32)
    y = jax.random.normal(ky, (B, 3, 84, 84), jnp.float32)

    fwd = jax.jit(functools.partial(diffnet_forward, params, block_images=4))
    out = jax.block_until_ready(fwd(x, y))

    ref = _reference_forward(params, x, y)
    assert out.shape == (B, 2), out.shape
    assert jnp.allclose(out, ref, atol=1e-3, rtol=1e-3), (out, ref)
    print("KERNEL_OK")
</pallas_src>

<mosaic_0001>
module attributes {stable_mosaic.version = 11 : i64} {
  func.func @_diffnet_fused_kernel(%arg0: i32, %arg1: memref<1x192x2048xf32, #tpu.memory_space<vmem>>, %arg2: memref<16x192xf32, #tpu.memory_space<vmem>>, %arg3: memref<16x1xf32, #tpu.memory_space<vmem>>, %arg4: memref<32x256xf32, #tpu.memory_space<vmem>>, %arg5: memref<32x1xf32, #tpu.memory_space<vmem>>, %arg6: memref<4096x32xf32, #tpu.memory_space<vmem>>, %arg7: memref<1x32xf32, #tpu.memory_space<vmem>>, %arg8: memref<32x2xf32, #tpu.memory_space<vmem>>, %arg9: memref<1x2xf32, #tpu.memory_space<vmem>>, %arg10: memref<1x4x2xf32, #tpu.memory_space<vmem>>, %arg11: memref<256x512xf32, #tpu.memory_space<vmem>>) attributes {dimension_semantics = [#tpu.dimension_semantics<parallel>], iteration_bounds = array<i64: 2>, scalar_prefetch = 0 : i64, scratch_operands = 1 : i64, tpu.core_type = #tpu.core_type<tc>, window_params = [{transform_indices = @transform_0, window_bounds = array<i64: 1, 192, 2048>}, {pipeline_mode = #tpu.pipeline_mode<synchronous>, transform_indices = @transform_1, window_bounds = array<i64: 16, 192>}, {pipeline_mode = #tpu.pipeline_mode<synchronous>, transform_indices = @transform_2, window_bounds = array<i64: 16, 1>}, {pipeline_mode = #tpu.pipeline_mode<synchronous>, transform_indices = @transform_3, window_bounds = array<i64: 32, 256>}, {pipeline_mode = #tpu.pipeline_mode<synchronous>, transform_indices = @transform_4, window_bounds = array<i64: 32, 1>}, {pipeline_mode = #tpu.pipeline_mode<synchronous>, transform_indices = @transform_5, window_bounds = array<i64: 4096, 32>}, {pipeline_mode = #tpu.pipeline_mode<synchronous>, transform_indices = @transform_6, window_bounds = array<i64: 1, 32>}, {pipeline_mode = #tpu.pipeline_mode<synchronous>, transform_indices = @transform_7, window_bounds = array<i64: 32, 2>}, {pipeline_mode = #tpu.pipeline_mode<synchronous>, transform_indices = @transform_8, window_bounds = array<i64: 1, 2>}, {transform_indices = @transform_9, window_bounds = array<i64: 1, 4, 2>}]} {
    %c0 = arith.constant 0 : index
    %c0_0 = arith.constant 0 : index
    %0 = vector.load %arg2[%c0, %c0_0] : memref<16x192xf32, #tpu.memory_space<vmem>>, vector<16x192xf32>
    %c0_1 = arith.constant 0 : index
    %c0_2 = arith.constant 0 : index
    %c0_3 = arith.constant 0 : index
    %1 = vector.load %arg1[%c0_1, %c0_2, %c0_3] : memref<1x192x2048xf32, #tpu.memory_space<vmem>>, vector<1x192x512xf32>
    %2 = vector.shape_cast %1 : vector<1x192x512xf32> to vector<192x512xf32>
    %cst = arith.constant dense<0.000000e+00> : vector<16x512xf32>
    %3 = tpu.matmul %0, %2, %cst {dimension_numbers = #tpu.dot_dimension_numbers<[1], [0], [0], [1], [0, 0, 1, 1], [], []>} : vector<16x192xf32>, vector<192x512xf32>, vector<16x512xf32> -> vector<16x512xf32>
    %c0_4 = arith.constant 0 : index
    %c0_5 = arith.constant 0 : index
    %4 = vector.load %arg3[%c0_4, %c0_5] : memref<16x1xf32, #tpu.memory_space<vmem>>, vector<16x1xf32>
    %5 = vector.broadcast %4 : vector<16x1xf32> to vector<16x512xf32>
    %6 = arith.addf %3, %5 : vector<16x512xf32>
    %cst_6 = arith.constant 0.000000e+00 : f32
    %7 = vector.broadcast %cst_6 : f32 to vector<16x512xf32>
    %8 = arith.maximumf %6, %7 : vector<16x512xf32>
    %c0_7 = arith.constant 0 : index
    %c0_8 = arith.constant 0 : index
    %9 = vector.load %arg11[%c0_7, %c0_8] : memref<256x512xf32, #tpu.memory_space<vmem>>, vector<16x512xf32>
    tpu.vector_store %arg11[%c0_7, %c0_8], %8 {strides = array<i32>} : memref<256x512xf32, #tpu.memory_space<vmem>>, vector<16x512xf32>,
    %10 = vector.extract_strided_slice %8 {offsets = [0, 1], sizes = [16, 511], strides = [1, 1]} : vector<16x512xf32> to vector<16x511xf32>
    %c32 = arith.constant 32 : index
    %c0_9 = arith.constant 0 : index
    %11 = vector.load %arg11[%c32, %c0_9] : memref<256x512xf32, #tpu.memory_space<vmem>>, vector<16x511xf32>
    tpu.vector_store %arg11[%c32, %c0_9], %10 {strides = array<i32>} : memref<256x512xf32, #tpu.memory_space<vmem>>, vector<16x511xf32>,
    %12 = vector.extract_strided_slice %8 {offsets = [0, 0], sizes = [16, 1], strides = [1, 1]} : vector<16x512xf32> to vector<16x1xf32>
    %c32_10 = arith.constant 32 : index
    %c511 = arith.constant 511 : index
    %13 = vector.load %arg11[%c32_10, %c511] : memref<256x512xf32, #tpu.memory_space<vmem>>, vector<16x1xf32>
    tpu.vector_store %arg11[%c32_10, %c511], %12 {strides = array<i32>} : memref<256x512xf32, #tpu.memory_space<vmem>>, vector<16x1xf32>,
    %14 = vector.extract_strided_slice %8 {offsets = [0, 10], sizes = [16, 502], strides = [1, 1]} : vector<16x512xf32> to vector<16x502xf32>
    %c128 = arith.constant 128 : index
    %c0_11 = arith.constant 0 : index
    %15 = vector.load %arg11[%c128, %c0_11] : memref<256x512xf32, #tpu.memory_space<vmem>>, vector<16x502xf32>
    tpu.vector_store %arg11[%c128, %c0_11], %14 {strides = array<i32>} : memref<256x512xf32, #tpu.memory_space<vmem>>, vector<16x502xf32>,
    %16 = vector.extract_strided_slice %8 {offsets = [0, 0], sizes = [16, 10], strides = [1, 1]} : vector<16x512xf32> to vector<16x10xf32>
    %c128_12 = arith.constant 128 : index
    %c502 = arith.constant 502 : index
    %17 = vector.load %arg11[%c128_12, %c502] : memref<256x512xf32, #tpu.memory_space<vmem>>, vector<16x10xf32>
    tpu.vector_store %arg11[%c128_12, %c502], %16 {strides = array<i32>} : memref<256x512xf32, #tpu.memory_space<vmem>>, vector<16x10xf32>,
    %18 = vector.extract_strided_slice %8 {offsets = [0, 11], sizes = [16, 501], strides = [1, 1]} : vector<16x512xf32> to vector<16x501xf32>
    %c160 = arith.constant 160 : index
    %c0_13 = arith.constant 0 : index
    %19 = vector.load %arg11[%c160, %c0_13] : memref<256x512xf32, #tpu.memory_space<vmem>>, vector<16x501xf32>
    tpu.vector_store %arg11[%c160, %c0_13], %18 {strides = array<i32>} : memref<256x512xf32, #tpu.memory_space<vmem>>, vector<16x501xf32>,
    %20 = vector.extract_strided_slice %8 {offsets = [0, 0], sizes = [16, 11], strides = [1, 1]} : vector<16x512xf32> to vector<16x11xf32>
    %c160_14 = arith.constant 160 : index
    %c501 = arith.constant 501 : index
    %21 = vector.load %arg11[%c160_14, %c501] : memref<256x512xf32, #tpu.memory_space<vmem>>, vector<16x11xf32>
    tpu.vector_store %arg11[%c160_14, %c501], %20 {strides = array<i32>} : memref<256x512xf32, #tpu.memory_space<vmem>>, vector<16x11xf32>,
    %c0_15 = arith.constant 0 : index
    %c0_16 = arith.constant 0 : index
    %22 = vector.load %arg2[%c0_15, %c0_16] : memref<16x192xf32, #tpu.memory_space<vmem>>, vector<16x192xf32>
    %c0_17 = arith.constant 0 : index
    %c0_18 = arith.constant 0 : index
    %c512 = arith.constant 512 : index
    %23 = vector.load %arg1[%c0_17, %c0_18, %c512] : memref<1x192x2048xf32, #tpu.memory_space<vmem>>, vector<1x192x512xf32>
    %24 = vector.shape_cast %23 : vector<1x192x512xf32> to vector<192x512xf32>
    %cst_19 = arith.constant dense<0.000000e+00> : vector<16x512xf32>
    %25 = tpu.matmul %22, %24, %cst_19 {dimension_numbers = #tpu.dot_dimension_numbers<[1], [0], [0], [1], [0, 0, 1, 1], [], []>} : vector<16x192xf32>, vector<192x512xf32>, vector<16x512xf32> -> vector<16x512xf32>
    %c0_20 = arith.constant 0 : index
    %c0_21 = arith.constant 0 : index
    %26 = vector.load %arg3[%c0_20, %c0_21] : memref<16x1xf32, #tpu.memory_space<vmem>>, vector<16x1xf32>
    %27 = vector.broadcast %26 : vector<16x1xf32> to vector<16x512xf32>
    %28 = arith.addf %25, %27 : vector<16x512xf32>
    %cst_22 = arith.constant 0.000000e+00 : f32
    %29 = vector.broadcast %cst_22 : f32 to vector<16x512xf32>
    %30 = arith.maximumf %28, %29 : vector<16x512xf32>
    %c16 = arith.constant 16 : index
    %c0_23 = arith.constant 0 : index
    %31 = vector.load %arg11[%c16, %c0_23] : memref<256x512xf32, #tpu.memory_space<vmem>>, vector<16x512xf32>
    tpu.vector_store %arg11[%c16, %c0_23], %30 {strides = array<i32>} : memref<256x512xf32, #tpu.memory_space<vmem>>, vector<16x512xf32>,
    %32 = vector.extract_strided_slice %30 {offsets = [0, 1], sizes = [16, 511], strides = [1, 1]} : vector<16x512xf32> to vector<16x511xf32>
    %c48 = arith.constant 48 : index
    %c0_24 = arith.constant 0 : index
    %33 = vector.load %arg11[%c48, %c0_24] : memref<256x512xf32, #tpu.memory_space<vmem>>, vector<16x511xf32>
    tpu.vector_store %arg11[%c48, %c0_24], %32 {strides = array<i32>} : memref<256x512xf32, #tpu.memory_space<vmem>>, vector<16x511xf32>,
    %34 = vector.extract_strided_slice %30 {offsets = [0, 0], sizes = [16, 1], strides = [1, 1]} : vector<16x512xf32> to vector<16x1xf32>
    %c48_25 = arith.constant 48 : index
    %c511_26 = arith.constant 511 : index
    %35 = vector.load %arg11[%c48_25, %c511_26] : memref<256x512xf32, #tpu.memory_space<vmem>>, vector<16x1xf32>
    tpu.vector_store %arg11[%c48_25, %c511_26], %34 {strides = array<i32>} : memref<256x512xf32, #tpu.memory_space<vmem>>, vector<16x1xf32>,
    %36 = vector.extract_strided_slice %30 {offsets = [0, 10], sizes = [16, 502], strides = [1, 1]} : vector<16x512xf32> to vector<16x502xf32>
    %c144 = arith.constant 144 : index
    %c0_27 = arith.constant 0 : index
    %37 = vector.load %arg11[%c144, %c0_27] : memref<256x512xf32, #tpu.memory_space<vmem>>, vector<16x502xf32>
    tpu.vector_store %arg11[%c144, %c0_27], %36 {strides = array<i32>} : memref<256x512xf32, #tpu.memory_space<vmem>>, vector<16x502xf32>,
    %38 = vector.extract_strided_slice %30 {offsets = [0, 0], sizes = [16, 10], strides = [1, 1]} : vector<16x512xf32> to vector<16x10xf32>
    %c144_28 = arith.constant 144 : index
    %c502_29 = arith.constant 502 : index
    %39 = vector.load %arg11[%c144_28, %c502_29] : memref<256x512xf32, #tpu.memory_space<vmem>>, vector<16x10xf32>
    tpu.vector_store %arg11[%c144_28, %c502_29], %38 {strides = array<i32>} : memref<256x512xf32, #tpu.memory_space<vmem>>, vector<16x10xf32>,
    %40 = vector.extract_strided_slice %30 {offsets = [0, 11], sizes = [16, 501], strides = [1, 1]} : vector<16x512xf32> to vector<16x501xf32>
    %c176 = arith.constant 176 : index
    %c0_30 = arith.constant 0 : index
    %41 = vector.load %arg11[%c176, %c0_30] : memref<256x512xf32, #tpu.memory_space<vmem>>, vector<16x501xf32>
    tpu.vector_store %arg11[%c176, %c0_30], %40 {strides = array<i32>} : memref<256x512xf32, #tpu.memory_space<vmem>>, vector<16x501xf32>,
    %42 = vector.extract_strided_slice %30 {offsets = [0, 0], sizes = [16, 11], strides = [1, 1]} : vector<16x512xf32> to vector<16x11xf32>
    %c176_31 = arith.constant 176 : index
    %c501_32 = arith.constant 501 : index
    %43 = vector.load %arg11[%c176_31, %c501_32] : memref<256x512xf32, #tpu.memory_space<vmem>>, vector<16x11xf32>
    tpu.vector_store %arg11[%c176_31, %c501_32], %42 {strides = array<i32>} : memref<256x512xf32, #tpu.memory_space<vmem>>, vector<16x11xf32>,
    %c0_33 = arith.constant 0 : index
    %c0_34 = arith.constant 0 : index
    %44 = vector.load %arg2[%c0_33, %c0_34] : memref<16x192xf32, #tpu.memory_space<vmem>>, vector<16x192xf32>
    %c0_35 = arith.constant 0 : index
    %c0_36 = arith.constant 0 : index
    %c1024 = arith.constant 1024 : index
    %45 = vector.load %arg1[%c0_35, %c0_36, %c1024] : memref<1x192x2048xf32, #tpu.memory_space<vmem>>, vector<1x192x512xf32>
    %46 = vector.shape_cast %45 : vector<1x192x512xf32> to vector<192x512xf32>
    %cst_37 = arith.constant dense<0.000000e+00> : vector<16x512xf32>
    %47 = tpu.matmul %44, %46, %cst_37 {dimension_numbers = #tpu.dot_dimension_numbers<[1], [0], [0], [1], [0, 0, 1, 1], [], []>} : vector<16x192xf32>, vector<192x512xf32>, vector<16x512xf32> -> vector<16x512xf32>
    %c0_38 = arith.constant 0 : index
    %c0_39 = arith.constant 0 : index
    %48 = vector.load %arg3[%c0_38, %c0_39] : memref<16x1xf32, #tpu.memory_space<vmem>>, vector<16x1xf32>
    %49 = vector.broadcast %48 : vector<16x1xf32> to vector<16x512xf32>
    %50 = arith.addf %47, %49 : vector<16x512xf32>
    %cst_40 = arith.constant 0.000000e+00 : f32
    %51 = vector.broadcast %cst_40 : f32 to vector<16x512xf32>
    %52 = arith.maximumf %50, %51 : vector<16x512xf32>
    %c64 = arith.constant 64 : index
    %c0_41 = arith.constant 0 : index
    %53 = vector.load %arg11[%c64, %c0_41] : memref<256x512xf32, #tpu.memory_space<vmem>>, vector<16x512xf32>
    tpu.vector_store %arg11[%c64, %c0_41], %52 {strides = array<i32>} : memref<256x512xf32, #tpu.memory_space<vmem>>, vector<16x512xf32>,
    %54 = vector.extract_strided_slice %52 {offsets = [0, 1], sizes = [16, 511], strides = [1, 1]} : vector<16x512xf32> to vector<16x511xf32>
    %c96 = arith.constant 96 : index
    %c0_42 = arith.constant 0 : index
    %55 = vector.load %arg11[%c96, %c0_42] : memref<256x512xf32, #tpu.memory_space<vmem>>, vector<16x511xf32>
    tpu.vector_store %arg11[%c96, %c0_42], %54 {strides = array<i32>} : memref<256x512xf32, #tpu.memory_space<vmem>>, vector<16x511xf32>,
    %56 = vector.extract_strided_slice %52 {offsets = [0, 0], sizes = [16, 1], strides = [1, 1]} : vector<16x512xf32> to vector<16x1xf32>
    %c96_43 = arith.constant 96 : index
    %c511_44 = arith.constant 511 : index
    %57 = vector.load %arg11[%c96_43, %c511_44] : memref<256x512xf32, #tpu.memory_space<vmem>>, vector<16x1xf32>
    tpu.vector_store %arg11[%c96_43, %c511_44], %56 {strides = array<i32>} : memref<256x512xf32, #tpu.memory_space<vmem>>, vector<16x1xf32>,
    %58 = vector.extract_strided_slice %52 {offsets = [0, 10], sizes = [16, 502], strides = [1, 1]} : vector<16x512xf32> to vector<16x502xf32>
    %c192 = arith.constant 192 : index
    %c0_45 = arith.constant 0 : index
    %59 = vector.load %arg11[%c192, %c0_45] : memref<256x512xf32, #tpu.memory_space<vmem>>, vector<16x502xf32>
    tpu.vector_store %arg11[%c192, %c0_45], %58 {strides = array<i32>} : memref<256x512xf32, #tpu.memory_space<vmem>>, vector<16x502xf32>,
    %60 = vector.extract_strided_slice %52 {offsets = [0, 0], sizes = [16, 10], strides = [1, 1]} : vector<16x512xf32> to vector<16x10xf32>
    %c192_46 = arith.constant 192 : index
    %c502_47 = arith.constant 502 : index
    %61 = vector.load %arg11[%c192_46, %c502_47] : memref<256x512xf32, #tpu.memory_space<vmem>>, vector<16x10xf32>
    tpu.vector_store %arg11[%c192_46, %c502_47], %60 {strides = array<i32>} : memref<256x512xf32, #tpu.memory_space<vmem>>, vector<16x10xf32>,
    %62 = vector.extract_strided_slice %52 {offsets = [0, 11], sizes = [16, 501], strides = [1, 1]} : vector<16x512xf32> to vector<16x501xf32>
    %c224 = arith.constant 224 : index
    %c0_48 = arith.constant 0 : index
    %63 = vector.load %arg11[%c224, %c0_48] : memref<256x512xf32, #tpu.memory_space<vmem>>, vector<16x501xf32>
    tpu.vector_store %arg11[%c224, %c0_48], %62 {strides = array<i32>} : memref<256x512xf32, #tpu.memory_space<vmem>>, vector<16x501xf32>,
    %64 = vector.extract_strided_slice %52 {offsets = [0, 0], sizes = [16, 11], strides = [1, 1]} : vector<16x512xf32> to vector<16x11xf32>
    %c224_49 = arith.constant 224 : index
    %c501_50 = arith.constant 501 : index
    %65 = vector.load %arg11[%c224_49, %c501_50] : memref<256x512xf32, #tpu.memory_space<vmem>>, vector<16x11xf32>
    tpu.vector_store %arg11[%c224_49, %c501_50], %64 {strides = array<i32>} : memref<256x512xf32, #tpu.memory_space<vmem>>, vector<16x11xf32>,
    %c0_51 = arith.constant 0 : index
    %c0_52 = arith.constant 0 : index
    %66 = vector.load %arg2[%c0_51, %c0_52] : memref<16x192xf32, #tpu.memory_space<vmem>>, vector<16x192xf32>
    %c0_53 = arith.constant 0 : index
    %c0_54 = arith.constant 0 : index
    %c1536 = arith.constant 1536 : index
    %67 = vector.load %arg1[%c0_53, %c0_54, %c1536] : memref<1x192x2048xf32, #tpu.memory_space<vmem>>, vector<1x192x512xf32>
    %68 = vector.shape_cast %67 : vector<1x192x512xf32> to vector<192x512xf32>
    %cst_55 = arith.constant dense<0.000000e+00> : vector<16x512xf32>
    %69 = tpu.matmul %66, %68, %cst_55 {dimension_numbers = #tpu.dot_dimension_numbers<[1], [0], [0], [1], [0, 0, 1, 1], [], []>} : vector<16x192xf32>, vector<192x512xf32>, vector<16x512xf32> -> vector<16x512xf32>
    %c0_56 = arith.constant 0 : index
    %c0_57 = arith.constant 0 : index
    %70 = vector.load %arg3[%c0_56, %c0_57] : memref<16x1xf32, #tpu.memory_space<vmem>>, vector<16x1xf32>
    %71 = vector.broadcast %70 : vector<16x1xf32> to vector<16x512xf32>
    %72 = arith.addf %69, %71 : vector<16x512xf32>
    %cst_58 = arith.constant 0.000000e+00 : f32
    %73 = vector.broadcast %cst_58 : f32 to vector<16x512xf32>
    %74 = arith.maximumf %72, %73 : vector<16x512xf32>
    %c80 = arith.constant 80 : index
    %c0_59 = arith.constant 0 : index
    %75 = vector.load %arg11[%c80, %c0_59] : memref<256x512xf32, #tpu.memory_space<vmem>>, vector<16x512xf32>
    tpu.vector_store %arg11[%c80, %c0_59], %74 {strides = array<i32>} : memref<256x512xf32, #tpu.memory_space<vmem>>, vector<16x512xf32>,
    %76 = vector.extract_strided_slice %74 {offsets = [0, 1], sizes = [16, 511], strides = [1, 1]} : vector<16x512xf32> to vector<16x511xf32>
    %c112 = arith.constant 112 : index
    %c0_60 = arith.constant 0 : index
    %77 = vector.load %arg11[%c112, %c0_60] : memref<256x512xf32, #tpu.memory_space<vmem>>, vector<16x511xf32>
    tpu.vector_store %arg11[%c112, %c0_60], %76 {strides = array<i32>} : memref<256x512xf32, #tpu.memory_space<vmem>>, vector<16x511xf32>,
    %78 = vector.extract_strided_slice %74 {offsets = [0, 0], sizes = [16, 1], strides = [1, 1]} : vector<16x512xf32> to vector<16x1xf32>
    %c112_61 = arith.constant 112 : index
    %c511_62 = arith.constant 511 : index
    %79 = vector.load %arg11[%c112_61, %c511_62] : memref<256x512xf32, #tpu.memory_space<vmem>>, vector<16x1xf32>
    tpu.vector_store %arg11[%c112_61, %c511_62], %78 {strides = array<i32>} : memref<256x512xf32, #tpu.memory_space<vmem>>, vector<16x1xf32>,
    %80 = vector.extract_strided_slice %74 {offsets = [0, 10], sizes = [16, 502], strides = [1, 1]} : vector<16x512xf32> to vector<16x502xf32>
    %c208 = arith.constant 208 : index
    %c0_63 = arith.constant 0 : index
    %81 = vector.load %arg11[%c208, %c0_63] : memref<256x512xf32, #tpu.memory_space<vmem>>, vector<16x502xf32>
    tpu.vector_store %arg11[%c208, %c0_63], %80 {strides = array<i32>} : memref<256x512xf32, #tpu.memory_space<vmem>>, vector<16x502xf32>,
    %82 = vector.extract_strided_slice %74 {offsets = [0, 0], sizes = [16, 10], strides = [1, 1]} : vector<16x512xf32> to vector<16x10xf32>
    %c208_64 = arith.constant 208 : index
    %c502_65 = arith.constant 502 : index
    %83 = vector.load %arg11[%c208_64, %c502_65] : memref<256x512xf32, #tpu.memory_space<vmem>>, vector<16x10xf32>
    tpu.vector_store %arg11[%c208_64, %c502_65], %82 {strides = array<i32>} : memref<256x512xf32, #tpu.memory_space<vmem>>, vector<16x10xf32>,
    %84 = vector.extract_strided_slice %74 {offsets = [0, 11], sizes = [16, 501], strides = [1, 1]} : vector<16x512xf32> to vector<16x501xf32>
    %c240 = arith.constant 240 : index
    %c0_66 = arith.constant 0 : index
    %85 = vector.load %arg11[%c240, %c0_66] : memref<256x512xf32, #tpu.memory_space<vmem>>, vector<16x501xf32>
    tpu.vector_store %arg11[%c240, %c0_66], %84 {strides = array<i32>} : memref<256x512xf32, #tpu.memory_space<vmem>>, vector<16x501xf32>,
    %86 = vector.extract_strided_slice %74 {offsets = [0, 0], sizes = [16, 11], strides = [1, 1]} : vector<16x512xf32> to vector<16x11xf32>
    %c240_67 = arith.constant 240 : index
    %c501_68 = arith.constant 501 : index
    %87 = vector.load %arg11[%c240_67, %c501_68] : memref<256x512xf32, #tpu.memory_space<vmem>>, vector<16x11xf32>
    tpu.vector_store %arg11[%c240_67, %c501_68], %86 {strides = array<i32>} : memref<256x512xf32, #tpu.memory_space<vmem>>, vector<16x11xf32>,
    %c0_69 = arith.constant 0 : index
    %c0_70 = arith.constant 0 : index
    %88 = vector.load %arg4[%c0_69, %c0_70] : memref<32x256xf32, #tpu.memory_space<vmem>>, vector<32x256xf32>
    %c0_71 = arith.constant 0 : index
    %c0_72 = arith.constant 0 : index
    %89 = vector.load %arg11[%c0_71, %c0_72] : memref<256x512xf32, #tpu.memory_space<vmem>>, vector<256x512xf32>
    %cst_73 = arith.constant dense<0.000000e+00> : vector<32x512xf32>
    %90 = tpu.matmul %88, %89, %cst_73 {dimension_numbers = #tpu.dot_dimension_numbers<[1], [0], [0], [1], [0, 0, 1, 1], [], []>} : vector<32x256xf32>, vector<256x512xf32>, vector<32x512xf32> -> vector<32x512xf32>
    %c0_74 = arith.constant 0 : index
    %c0_75 = arith.constant 0 : index
    %91 = vector.load %arg5[%c0_74, %c0_75] : memref<32x1xf32, #tpu.memory_space<vmem>>, vector<32x1xf32>
    %92 = vector.broadcast %91 : vector<32x1xf32> to vector<32x512xf32>
    %93 = arith.addf %90, %92 : vector<32x512xf32>
    %cst_76 = arith.constant 0.000000e+00 : f32
    %94 = vector.broadcast %cst_76 : f32 to vector<32x512xf32>
    %95 = arith.maximumf %93, %94 : vector<32x512xf32>
    %96 = vector.extract_strided_slice %95 {offsets = [0, 0], sizes = [1, 128], strides = [1, 1]} : vector<32x512xf32> to vector<1x128xf32>
    %97 = vector.extract_strided_slice %95 {offsets = [1, 0], sizes = [1, 128], strides = [1, 1]} : vector<32x512xf32> to vector<1x128xf32>
    %98 = vector.extract_strided_slice %95 {offsets = [2, 0], sizes = [1, 128], strides = [1, 1]} : vector<32x512xf32> to vector<1x128xf32>
    %99 = vector.extract_strided_slice %95 {offsets = [3, 0], sizes = [1, 128], strides = [1, 1]} : vector<32x512xf32> to vector<1x128xf32>
    %100 = vector.extract_strided_slice %95 {offsets = [4, 0], sizes = [1, 128], strides = [1, 1]} : vector<32x512xf32> to vector<1x128xf32>
    %101 = vector.extract_strided_slice %95 {offsets = [5, 0], sizes = [1, 128], strides = [1, 1]} : vector<32x512xf32> to vector<1x128xf32>
    %102 = vector.extract_strided_slice %95 {offsets = [6, 0], sizes = [1, 128], strides = [1, 1]} : vector<32x512xf32> to vector<1x128xf32>
    %103 = vector.extract_strided_slice %95 {offsets = [7, 0], sizes = [1, 128], strides = [1, 1]} : vector<32x512xf32> to vector<1x128xf32>
    %104 = vector.extract_strided_slice %95 {offsets = [8, 0], sizes = [1, 128], strides = [1, 1]} : vector<32x512xf32> to vector<1x128xf32>
    %105 = vector.extract_strided_slice %95 {offsets = [9, 0], sizes = [1, 128], strides = [1, 1]} : vector<32x512xf32> to vector<1x128xf32>
    %106 = vector.extract_strided_slice %95 {offsets = [10, 0], sizes = [1, 128], strides = [1, 1]} : vector<32x512xf32> to vector<1x128xf32>
    %107 = vector.extract_strided_slice %95 {offsets = [11, 0], sizes = [1, 128], strides = [1, 1]} : vector<32x512xf32> to vector<1x128xf32>
    %108 = vector.extract_strided_slice %95 {offsets = [12, 0], sizes = [1, 128], strides = [1, 1]} : vector<32x512xf32> to vector<1x128xf32>
    %109 = vector.extract_strided_slice %95 {offsets = [13, 0], sizes = [1, 128], strides = [1, 1]} : vector<32x512xf32> to vector<1x128xf32>
    %110 = vector.extract_strided_slice %95 {offsets = [14, 0], sizes = [1, 128], strides = [1, 1]} : vector<32x512xf32> to vector<1x128xf32>
    %111 = vector.extract_strided_slice %95 {offsets = [15, 0], sizes = [1, 128], strides = [1, 1]} : vector<32x512xf32> to vector<1x128xf32>
    %112 = vector.extract_strided_slice %95 {offsets = [16, 0], sizes = [1, 128], strides = [1, 1]} : vector<32x512xf32> to vector<1x128xf32>
    %113 = vector.extract_strided_slice %95 {offsets = [17, 0], sizes = [1, 128], strides = [1, 1]} : vector<32x512xf32> to vector<1x128xf32>
    %114 = vector.extract_strided_slice %95 {offsets = [18, 0], sizes = [1, 128], strides = [1, 1]} : vector<32x512xf32> to vector<1x128xf32>
    %115 = vector.extract_strided_slice %95 {offsets = [19, 0], sizes = [1, 128], strides = [1, 1]} : vector<32x512xf32> to vector<1x128xf32>
    %116 = vector.extract_strided_slice %95 {offsets = [20, 0], sizes = [1, 128], strides = [1, 1]} : vector<32x512xf32> to vector<1x128xf32>
    %117 = vector.extract_strided_slice %95 {offsets = [21, 0], sizes = [1, 128], strides = [1, 1]} : vector<32x512xf32> to vector<1x128xf32>
    %118 = vector.extract_strided_slice %95 {offsets = [22, 0], sizes = [1, 128], strides = [1, 1]} : vector<32x512xf32> to vector<1x128xf32>
    %119 = vector.extract_strided_slice %95 {offsets = [23, 0], sizes = [1, 128], strides = [1, 1]} : vector<32x512xf32> to vector<1x128xf32>
    %120 = vector.extract_strided_slice %95 {offsets = [24, 0], sizes = [1, 128], strides = [1, 1]} : vector<32x512xf32> to vector<1x128xf32>
    %121 = vector.extract_strided_slice %95 {offsets = [25, 0], sizes = [1, 128], strides = [1, 1]} : vector<32x512xf32> to vector<1x128xf32>
    %122 = vector.extract_strided_slice %95 {offsets = [26, 0], sizes = [1, 128], strides = [1, 1]} : vector<32x512xf32> to vector<1x128xf32>
    %123 = vector.extract_strided_slice %95 {offsets = [27, 0], sizes = [1, 128], strides = [1, 1]} : vector<32x512xf32> to vector<1x128xf32>
    %124 = vector.extract_strided_slice %95 {offsets = [28, 0], sizes = [1, 128], strides = [1, 1]} : vector<32x512xf32> to vector<1x128xf32>
    %125 = vector.extract_strided_slice %95 {offsets = [29, 0], sizes = [1, 128], strides = [1, 1]} : vector<32x512xf32> to vector<1x128xf32>
    %126 = vector.extract_strided_slice %95 {offsets = [30, 0], sizes = [1, 128], strides = [1, 1]} : vector<32x512xf32> to vector<1x128xf32>
    %127 = vector.extract_strided_slice %95 {offsets = [31, 0], sizes = [1, 128], strides = [1, 1]} : vector<32x512xf32> to vector<1x128xf32>
    %128 = tpu.concatenate %96, %97, %98, %99, %100, %101, %102, %103, %104, %105, %106, %107, %108, %109, %110, %111 in 1 : vector<1x128xf32>, vector<1x128xf32>, vector<1x128xf32>, vector<1x128xf32>, vector<1x128xf32>, vector<1x128xf32>, vector<1x128xf32>, vector<1x128xf32>, vector<1x128xf32>, vector<1x128xf32>, vector<1x128xf32>, vector<1x128xf32>, vector<1x128xf32>, vector<1x128xf32>, vector<1x128xf32>, vector<1x128xf32> -> vector<1x2048xf32>
    %129 = tpu.concatenate %112, %113, %114, %115, %116, %117, %118, %119, %120, %121, %122, %123, %124, %125, %126, %127 in 1 : vector<1x128xf32>, vector<1x128xf32>, vector<1x128xf32>, vector<1x128xf32>, vector<1x128xf32>, vector<1x128xf32>, vector<1x128xf32>, vector<1x128xf32>, vector<1x128xf32>, vector<1x128xf32>, vector<1x128xf32>, vector<1x128xf32>, vector<1x128xf32>, vector<1x128xf32>, vector<1x128xf32>, vector<1x128xf32> -> vector<1x2048xf32>
    %130 = tpu.concatenate %128, %129 in 1 : vector<1x2048xf32>, vector<1x2048xf32> -> vector<1x4096xf32>
    %131 = vector.extract_strided_slice %95 {offsets = [0, 128], sizes = [1, 128], strides = [1, 1]} : vector<32x512xf32> to vector<1x128xf32>
    %132 = vector.extract_strided_slice %95 {offsets = [1, 128], sizes = [1, 128], strides = [1, 1]} : vector<32x512xf32> to vector<1x128xf32>
    %133 = vector.extract_strided_slice %95 {offsets = [2, 128], sizes = [1, 128], strides = [1, 1]} : vector<32x512xf32> to vector<1x128xf32>
    %134 = vector.extract_strided_slice %95 {offsets = [3, 128], sizes = [1, 128], strides = [1, 1]} : vector<32x512xf32> to vector<1x128xf32>
    %135 = vector.extract_strided_slice %95 {offsets = [4, 128], sizes = [1, 128], strides = [1, 1]} : vector<32x512xf32> to vector<1x128xf32>
    %136 = vector.extract_strided_slice %95 {offsets = [5, 128], sizes = [1, 128], strides = [1, 1]} : vector<32x512xf32> to vector<1x128xf32>
    %137 = vector.extract_strided_slice %95 {offsets = [6, 128], sizes = [1, 128], strides = [1, 1]} : vector<32x512xf32> to vector<1x128xf32>
    %138 = vector.extract_strided_slice %95 {offsets = [7, 128], sizes = [1, 128], strides = [1, 1]} : vector<32x512xf32> to vector<1x128xf32>
    %139 = vector.extract_strided_slice %95 {offsets = [8, 128], sizes = [1, 128], strides = [1, 1]} : vector<32x512xf32> to vector<1x128xf32>
    %140 = vector.extract_strided_slice %95 {offsets = [9, 128], sizes = [1, 128], strides = [1, 1]} : vector<32x512xf32> to vector<1x128xf32>
    %141 = vector.extract_strided_slice %95 {offsets = [10, 128], sizes = [1, 128], strides = [1, 1]} : vector<32x512xf32> to vector<1x128xf32>
    %142 = vector.extract_strided_slice %95 {offsets = [11, 128], sizes = [1, 128], strides = [1, 1]} : vector<32x512xf32> to vector<1x128xf32>
    %143 = vector.extract_strided_slice %95 {offsets = [12, 128], sizes = [1, 128], strides = [1, 1]} : vector<32x512xf32> to vector<1x128xf32>
    %144 = vector.extract_strided_slice %95 {offsets = [13, 128], sizes = [1, 128], strides = [1, 1]} : vector<32x512xf32> to vector<1x128xf32>
    %145 = vector.extract_strided_slice %95 {offsets = [14, 128], sizes = [1, 128], strides = [1, 1]} : vector<32x512xf32> to vector<1x128xf32>
    %146 = vector.extract_strided_slice %95 {offsets = [15, 128], sizes = [1, 128], strides = [1, 1]} : vector<32x512xf32> to vector<1x128xf32>
    %147 = vector.extract_strided_slice %95 {offsets = [16, 128], sizes = [1, 128], strides = [1, 1]} : vector<32x512xf32> to vector<1x128xf32>
    %148 = vector.extract_strided_slice %95 {offsets = [17, 128], sizes = [1, 128], strides = [1, 1]} : vector<32x512xf32> to vector<1x128xf32>
    %149 = vector.extract_strided_slice %95 {offsets = [18, 128], sizes = [1, 128], strides = [1, 1]} : vector<32x512xf32> to vector<1x128xf32>
    %150 = vector.extract_strided_slice %95 {offsets = [19, 128], sizes = [1, 128], strides = [1, 1]} : vector<32x512xf32> to vector<1x128xf32>
    %151 = vector.extract_strided_slice %95 {offsets = [20, 128], sizes = [1, 128], strides = [1, 1]} : vector<32x512xf32> to vector<1x128xf32>
    %152 = vector.extract_strided_slice %95 {offsets = [21, 128], sizes = [1, 128], strides = [1, 1]} : vector<32x512xf32> to vector<1x128xf32>
    %153 = vector.extract_strided_slice %95 {offsets = [22, 128], sizes = [1, 128], strides = [1, 1]} : vector<32x512xf32> to vector<1x128xf32>
    %154 = vector.extract_strided_slice %95 {offsets = [23, 128], sizes = [1, 128], strides = [1, 1]} : vector<32x512xf32> to vector<1x128xf32>
    %155 = vector.extract_strided_slice %95 {offsets = [24, 128], sizes = [1, 128], strides = [1, 1]} : vector<32x512xf32> to vector<1x128xf32>
    %156 = vector.extract_strided_slice %95 {offsets = [25, 128], sizes = [1, 128], strides = [1, 1]} : vector<32x512xf32> to vector<1x128xf32>
    %157 = vector.extract_strided_slice %95 {offsets = [26, 128], sizes = [1, 128], strides = [1, 1]} : vector<32x512xf32> to vector<1x128xf32>
    %158 = vector.extract_strided_slice %95 {offsets = [27, 128], sizes = [1, 128], strides = [1, 1]} : vector<32x512xf32> to vector<1x128xf32>
    %159 = vector.extract_strided_slice %95 {offsets = [28, 128], sizes = [1, 128], strides = [1, 1]} : vector<32x512xf32> to vector<1x128xf32>
    %160 = vector.extract_strided_slice %95 {offsets = [29, 128], sizes = [1, 128], strides = [1, 1]} : vector<32x512xf32> to vector<1x128xf32>
    %161 = vector.extract_strided_slice %95 {offsets = [30, 128], sizes = [1, 128], strides = [1, 1]} : vector<32x512xf32> to vector<1x128xf32>
    %162 = vector.extract_strided_slice %95 {offsets = [31, 128], sizes = [1, 128], strides = [1, 1]} : vector<32x512xf32> to vector<1x128xf32>
    %163 = tpu.concatenate %131, %132, %133, %134, %135, %136, %137, %138, %139, %140, %141, %142, %143, %144, %145, %146 in 1 : vector<1x128xf32>, vector<1x128xf32>, vector<1x128xf32>, vector<1x128xf32>, vector<1x128xf32>, vector<1x128xf32>, vector<1x128xf32>, vector<1x128xf32>, vector<1x128xf32>, vector<1x128xf32>, vector<1x128xf32>, vector<1x128xf32>, vector<1x128xf32>, vector<1x128xf32>, vector<1x128xf32>, vector<1x128xf32> -> vector<1x2048xf32>
    %164 = tpu.concatenate %147, %148, %149, %150, %151, %152, %153, %154, %155, %156, %157, %158, %159, %160, %161, %162 in 1 : vector<1x128xf32>, vector<1x128xf32>, vector<1x128xf32>, vector<1x128xf32>, vector<1x128xf32>, vector<1x128xf32>, vector<1x128xf32>, vector<1x128xf32>, vector<1x128xf32>, vector<1x128xf32>, vector<1x128xf32>, vector<1x128xf32>, vector<1x128xf32>, vector<1x128xf32>, vector<1x128xf32>, vector<1x128xf32> -> vector<1x2048xf32>
    %165 = tpu.concatenate %163, %164 in 1 : vector<1x2048xf32>, vector<1x2048xf32> -> vector<1x4096xf32>
    %166 = vector.extract_strided_slice %95 {offsets = [0, 256], sizes = [1, 128], strides = [1, 1]} : vector<32x512xf32> to vector<1x128xf32>
    %167 = vector.extract_strided_slice %95 {offsets = [1, 256], sizes = [1, 128], strides = [1, 1]} : vector<32x512xf32> to vector<1x128xf32>
    %168 = vector.extract_strided_slice %95 {offsets = [2, 256], sizes = [1, 128], strides = [1, 1]} : vector<32x512xf32> to vector<1x128xf32>
    %169 = vector.extract_strided_slice %95 {offsets = [3, 256], sizes = [1, 128], strides = [1, 1]} : vector<32x512xf32> to vector<1x128xf32>
    %170 = vector.extract_strided_slice %95 {offsets = [4, 256], sizes = [1, 128], strides = [1, 1]} : vector<32x512xf32> to vector<1x128xf32>
    %171 = vector.extract_strided_slice %95 {offsets = [5, 256], sizes = [1, 128], strides = [1, 1]} : vector<32x512xf32> to vector<1x128xf32>
    %172 = vector.extract_strided_slice %95 {offsets = [6, 256], sizes = [1, 128], strides = [1, 1]} : vector<32x512xf32> to vector<1x128xf32>
    %173 = vector.extract_strided_slice %95 {offsets = [7, 256], sizes = [1, 128], strides = [1, 1]} : vector<32x512xf32> to vector<1x128xf32>
    %174 = vector.extract_strided_slice %95 {offsets = [8, 256], sizes = [1, 128], strides = [1, 1]} : vector<32x512xf32> to vector<1x128xf32>
    %175 = vector.extract_strided_slice %95 {offsets = [9, 256], sizes = [1, 128], strides = [1, 1]} : vector<32x512xf32> to vector<1x128xf32>
    %176 = vector.extract_strided_slice %95 {offsets = [10, 256], sizes = [1, 128], strides = [1, 1]} : vector<32x512xf32> to vector<1x128xf32>
    %177 = vector.extract_strided_slice %95 {offsets = [11, 256], sizes = [1, 128], strides = [1, 1]} : vector<32x512xf32> to vector<1x128xf32>
    %178 = vector.extract_strided_slice %95 {offsets = [12, 256], sizes = [1, 128], strides = [1, 1]} : vector<32x512xf32> to vector<1x128xf32>
    %179 = vector.extract_strided_slice %95 {offsets = [13, 256], sizes = [1, 128], strides = [1, 1]} : vector<32x512xf32> to vector<1x128xf32>
    %180 = vector.extract_strided_slice %95 {offsets = [14, 256], sizes = [1, 128], strides = [1, 1]} : vector<32x512xf32> to vector<1x128xf32>
    %181 = vector.extract_strided_slice %95 {offsets = [15, 256], sizes = [1, 128], strides = [1, 1]} : vector<32x512xf32> to vector<1x128xf32>
    %182 = vector.extract_strided_slice %95 {offsets = [16, 256], sizes = [1, 128], strides = [1, 1]} : vector<32x512xf32> to vector<1x128xf32>
    %183 = vector.extract_strided_slice %95 {offsets = [17, 256], sizes = [1, 128], strides = [1, 1]} : vector<32x512xf32> to vector<1x128xf32>
    %184 = vector.extract_strided_slice %95 {offsets = [18, 256], sizes = [1, 128], strides = [1, 1]} : vector<32x512xf32> to vector<1x128xf32>
    %185 = vector.extract_strided_slice %95 {offsets = [19, 256], sizes = [1, 128], strides = [1, 1]} : vector<32x512xf32> to vector<1x128xf32>
    %186 = vector.extract_strided_slice %95 {offsets = [20, 256], sizes = [1, 128], strides = [1, 1]} : vector<32x512xf32> to vector<1x128xf32>
    %187 = vector.extract_strided_slice %95 {offsets = [21, 256], sizes = [1, 128], strides = [1, 1]} : vector<32x512xf32> to vector<1x128xf32>
    %188 = vector.extract_strided_slice %95 {offsets = [22, 256], sizes = [1, 128], strides = [1, 1]} : vector<32x512xf32> to vector<1x128xf32>
    %189 = vector.extract_strided_slice %95 {offsets = [23, 256], sizes = [1, 128], strides = [1, 1]} : vector<32x512xf32> to vector<1x128xf32>
    %190 = vector.extract_strided_slice %95 {offsets = [24, 256], sizes = [1, 128], strides = [1, 1]} : vector<32x512xf32> to vector<1x128xf32>
    %191 = vector.extract_strided_slice %95 {offsets = [25, 256], sizes = [1, 128], strides = [1, 1]} : vector<32x512xf32> to vector<1x128xf32>
    %192 = vector.extract_strided_slice %95 {offsets = [26, 256], sizes = [1, 128], strides = [1, 1]} : vector<32x512xf32> to vector<1x128xf32>
    %193 = vector.extract_strided_slice %95 {offsets = [27, 256], sizes = [1, 128], strides = [1, 1]} : vector<32x512xf32> to vector<1x128xf32>
    %194 = vector.extract_strided_slice %95 {offsets = [28, 256], sizes = [1, 128], strides = [1, 1]} : vector<32x512xf32> to vector<1x128xf32>
    %195 = vector.extract_strided_slice %95 {offsets = [29, 256], sizes = [1, 128], strides = [1, 1]} : vector<32x512xf32> to vector<1x128xf32>
    %196 = vector.extract_strided_slice %95 {offsets = [30, 256], sizes = [1, 128], strides = [1, 1]} : vector<32x512xf32> to vector<1x128xf32>
    %197 = vector.extract_strided_slice %95 {offsets = [31, 256], sizes = [1, 128], strides = [1, 1]} : vector<32x512xf32> to vector<1x128xf32>
    %198 = tpu.concatenate %166, %167, %168, %169, %170, %171, %172, %173, %174, %175, %176, %177, %178, %179, %180, %181 in 1 : vector<1x128xf32>, vector<1x128xf32>, vector<1x128xf32>, vector<1x128xf32>, vector<1x128xf32>, vector<1x128xf32>, vector<1x128xf32>, vector<1x128xf32>, vector<1x128xf32>, vector<1x128xf32>, vector<1x128xf32>, vector<1x128xf32>, vector<1x128xf32>, vector<1x128xf32>, vector<1x128xf32>, vector<1x128xf32> -> vector<1x2048xf32>
    %199 = tpu.concatenate %182, %183, %184, %185, %186, %187, %188, %189, %190, %191, %192, %193, %194, %195, %196, %197 in 1 : vector<1x128xf32>, vector<1x128xf32>, vector<1x128xf32>, vector<1x128xf32>, vector<1x128xf32>, vector<1x128xf32>, vector<1x128xf32>, vector<1x128xf32>, vector<1x128xf32>, vector<1x128xf32>, vector<1x128xf32>, vector<1x128xf32>, vector<1x128xf32>, vector<1x128xf32>, vector<1x128xf32>, vector<1x128xf32> -> vector<1x2048xf32>
    %200 = tpu.concatenate %198, %199 in 1 : vector<1x2048xf32>, vector<1x2048xf32> -> vector<1x4096xf32>
    %201 = vector.extract_strided_slice %95 {offsets = [0, 384], sizes = [1, 128], strides = [1, 1]} : vector<32x512xf32> to vector<1x128xf32>
    %202 = vector.extract_strided_slice %95 {offsets = [1, 384], sizes = [1, 128], strides = [1, 1]} : vector<32x512xf32> to vector<1x128xf32>
    %203 = vector.extract_strided_slice %95 {offsets = [2, 384], sizes = [1, 128], strides = [1, 1]} : vector<32x512xf32> to vector<1x128xf32>
    %204 = vector.extract_strided_slice %95 {offsets = [3, 384], sizes = [1, 128], strides = [1, 1]} : vector<32x512xf32> to vector<1x128xf32>
    %205 = vector.extract_strided_slice %95 {offsets = [4, 384], sizes = [1, 128], strides = [1, 1]} : vector<32x512xf32> to vector<1x128xf32>
    %206 = vector.extract_strided_slice %95 {offsets = [5, 384], sizes = [1, 128], strides = [1, 1]} : vector<32x512xf32> to vector<1x128xf32>
    %207 = vector.extract_strided_slice %95 {offsets = [6, 384], sizes = [1, 128], strides = [1, 1]} : vector<32x512xf32> to vector<1x128xf32>
    %208 = vector.extract_strided_slice %95 {offsets = [7, 384], sizes = [1, 128], strides = [1, 1]} : vector<32x512xf32> to vector<1x128xf32>
    %209 = vector.extract_strided_slice %95 {offsets = [8, 384], sizes = [1, 128], strides = [1, 1]} : vector<32x512xf32> to vector<1x128xf32>
    %210 = vector.extract_strided_slice %95 {offsets = [9, 384], sizes = [1, 128], strides = [1, 1]} : vector<32x512xf32> to vector<1x128xf32>
    %211 = vector.extract_strided_slice %95 {offsets = [10, 384], sizes = [1, 128], strides = [1, 1]} : vector<32x512xf32> to vector<1x128xf32>
    %212 = vector.extract_strided_slice %95 {offsets = [11, 384], sizes = [1, 128], strides = [1, 1]} : vector<32x512xf32> to vector<1x128xf32>
    %213 = vector.extract_strided_slice %95 {offsets = [12, 384], sizes = [1, 128], strides = [1, 1]} : vector<32x512xf32> to vector<1x128xf32>
    %214 = vector.extract_strided_slice %95 {offsets = [13, 384], sizes = [1, 128], strides = [1, 1]} : vector<32x512xf32> to vector<1x128xf32>
    %215 = vector.extract_strided_slice %95 {offsets = [14, 384], sizes = [1, 128], strides = [1, 1]} : vector<32x512xf32> to vector<1x128xf32>
    %216 = vector.extract_strided_slice %95 {offsets = [15, 384], sizes = [1, 128], strides = [1, 1]} : vector<32x512xf32> to vector<1x128xf32>
    %217 = vector.extract_strided_slice %95 {offsets = [16, 384], sizes = [1, 128], strides = [1, 1]} : vector<32x512xf32> to vector<1x128xf32>
    %218 = vector.extract_strided_slice %95 {offsets = [17, 384], sizes = [1, 128], strides = [1, 1]} : vector<32x512xf32> to vector<1x128xf32>
    %219 = vector.extract_strided_slice %95 {offsets = [18, 384], sizes = [1, 128], strides = [1, 1]} : vector<32x512xf32> to vector<1x128xf32>
    %220 = vector.extract_strided_slice %95 {offsets = [19, 384], sizes = [1, 128], strides = [1, 1]} : vector<32x512xf32> to vector<1x128xf32>
    %221 = vector.extract_strided_slice %95 {offsets = [20, 384], sizes = [1, 128], strides = [1, 1]} : vector<32x512xf32> to vector<1x128xf32>
    %222 = vector.extract_strided_slice %95 {offsets = [21, 384], sizes = [1, 128], strides = [1, 1]} : vector<32x512xf32> to vector<1x128xf32>
    %223 = vector.extract_strided_slice %95 {offsets = [22, 384], sizes = [1, 128], strides = [1, 1]} : vector<32x512xf32> to vector<1x128xf32>
    %224 = vector.extract_strided_slice %95 {offsets = [23, 384], sizes = [1, 128], strides = [1, 1]} : vector<32x512xf32> to vector<1x128xf32>
    %225 = vector.extract_strided_slice %95 {offsets = [24, 384], sizes = [1, 128], strides = [1, 1]} : vector<32x512xf32> to vector<1x128xf32>
    %226 = vector.extract_strided_slice %95 {offsets = [25, 384], sizes = [1, 128], strides = [1, 1]} : vector<32x512xf32> to vector<1x128xf32>
    %227 = vector.extract_strided_slice %95 {offsets = [26, 384], sizes = [1, 128], strides = [1, 1]} : vector<32x512xf32> to vector<1x128xf32>
    %228 = vector.extract_strided_slice %95 {offsets = [27, 384], sizes = [1, 128], strides = [1, 1]} : vector<32x512xf32> to vector<1x128xf32>
    %229 = vector.extract_strided_slice %95 {offsets = [28, 384], sizes = [1, 128], strides = [1, 1]} : vector<32x512xf32> to vector<1x128xf32>
    %230 = vector.extract_strided_slice %95 {offsets = [29, 384], sizes = [1, 128], strides = [1, 1]} : vector<32x512xf32> to vector<1x128xf32>
    %231 = vector.extract_strided_slice %95 {offsets = [30, 384], sizes = [1, 128], strides = [1, 1]} : vector<32x512xf32> to vector<1x128xf32>
    %232 = vector.extract_strided_slice %95 {offsets = [31, 384], sizes = [1, 128], strides = [1, 1]} : vector<32x512xf32> to vector<1x128xf32>
    %233 = tpu.concatenate %201, %202, %203, %204, %205, %206, %207, %208, %209, %210, %211, %212, %213, %214, %215, %216 in 1 : vector<1x128xf32>, vector<1x128xf32>, vector<1x128xf32>, vector<1x128xf32>, vector<1x128xf32>, vector<1x128xf32>, vector<1x128xf32>, vector<1x128xf32>, vector<1x128xf32>, vector<1x128xf32>, vector<1x128xf32>, vector<1x128xf32>, vector<1x128xf32>, vector<1x128xf32>, vector<1x128xf32>, vector<1x128xf32> -> vector<1x2048xf32>
    %234 = tpu.concatenate %217, %218, %219, %220, %221, %222, %223, %224, %225, %226, %227, %228, %229, %230, %231, %232 in 1 : vector<1x128xf32>, vector<1x128xf32>, vector<1x128xf32>, vector<1x128xf32>, vector<1x128xf32>, vector<1x128xf32>, vector<1x128xf32>, vector<1x128xf32>, vector<1x128xf32>, vector<1x128xf32>, vector<1x128xf32>, vector<1x128xf32>, vector<1x128xf32>, vector<1x128xf32>, vector<1x128xf32>, vector<1x128xf32> -> vector<1x2048xf32>
    %235 = tpu.concatenate %233, %234 in 1 : vector<1x2048xf32>, vector<1x2048xf32> -> vector<1x4096xf32>
    %236 = tpu.concatenate %130, %165, %200, %235 in 0 : vector<1x4096xf32>, vector<1x4096xf32>, vector<1x4096xf32>, vector<1x4096xf32> -> vector<4x4096xf32>
    %c0_77 = arith.constant 0 : index
    %c0_78 = arith.constant 0 : index
    %237 = vector.load %arg6[%c0_77, %c0_78] : memref<4096x32xf32, #tpu.memory_space<vmem>>, vector<4096x32xf32>
    %cst_79 = arith.constant dense<0.000000e+00> : vector<4x32xf32>
    %238 = tpu.matmul %236, %237, %cst_79 {dimension_numbers = #tpu.dot_dimension_numbers<[1], [0], [0], [1], [0, 0, 1, 1], [], []>} : vector<4x4096xf32>, vector<4096x32xf32>, vector<4x32xf32> -> vector<4x32xf32>
    %c0_80 = arith.constant 0 : index
    %c0_81 = arith.constant 0 : index
    %239 = vector.load %arg7[%c0_80, %c0_81] : memref<1x32xf32, #tpu.memory_space<vmem>>, vector<1x32xf32>
    %240 = vector.broadcast %239 : vector<1x32xf32> to vector<4x32xf32>
    %241 = arith.addf %238, %240 : vector<4x32xf32>
    %cst_82 = arith.constant 0.000000e+00 : f32
    %242 = vector.broadcast %cst_82 : f32 to vector<4x32xf32>
    %243 = arith.maximumf %241, %242 : vector<4x32xf32>
    %c0_83 = arith.constant 0 : index
    %c0_84 = arith.constant 0 : index
    %244 = vector.load %arg8[%c0_83, %c0_84] : memref<32x2xf32, #tpu.memory_space<vmem>>, vector<32x2xf32>
    %cst_85 = arith.constant dense<0.000000e+00> : vector<4x2xf32>
    %245 = tpu.matmul %243, %244, %cst_85 {dimension_numbers = #tpu.dot_dimension_numbers<[1], [0], [0], [1], [0, 0, 1, 1], [], []>} : vector<4x32xf32>, vector<32x2xf32>, vector<4x2xf32> -> vector<4x2xf32>
    %c0_86 = arith.constant 0 : index
    %c0_87 = arith.constant 0 : index
    %246 = vector.load %arg9[%c0_86, %c0_87] : memref<1x2xf32, #tpu.memory_space<vmem>>, vector<1x2xf32>
    %247 = vector.broadcast %246 : vector<1x2xf32> to vector<4x2xf32>
    %248 = arith.addf %245, %247 : vector<4x2xf32>
    %c0_88 = arith.constant 0 : index
    %c0_89 = arith.constant 0 : index
    %c0_90 = arith.constant 0 : index
    %249 = vector.load %arg10[%c0_88, %c0_89, %c0_90] : memref<1x4x2xf32, #tpu.memory_space<vmem>>, vector<1x4x2xf32>
    %250 = vector.shape_cast %249 : vector<1x4x2xf32> to vector<4x2xf32>
    %251 = vector.shape_cast %248 : vector<4x2xf32> to vector<1x4x2xf32>
    tpu.vector_store %arg10[%c0_88, %c0_89, %c0_90], %251 {strides = array<i32>} : memref<1x4x2xf32, #tpu.memory_space<vmem>>, vector<1x4x2xf32>,
    return
  }
  func.func @transform_0(%arg0: i32) -> (i32, i32, i32) {
    %c0_i32 = arith.constant 0 : i32
    %c0_i32_0 = arith.constant 0 : i32
    %c0_i32_1 = arith.constant 0 : i32
    return %arg0, %c0_i32, %c0_i32_0 : i32, i32, i32
  }
  func.func @transform_1(%arg0: i32) -> (i32, i32) {
    %c0_i32 = arith.constant 0 : i32
    %c0_i32_0 = arith.constant 0 : i32
    %c0_i32_1 = arith.constant 0 : i32
    return %c0_i32, %c0_i32_0 : i32, i32
  }
  func.func @transform_2(%arg0: i32) -> (i32, i32) {
    %c0_i32 = arith.constant 0 : i32
    %c0_i32_0 = arith.constant 0 : i32
    %c0_i32_1 = arith.constant 0 : i32
    return %c0_i32, %c0_i32_0 : i32, i32
  }
  func.func @transform_3(%arg0: i32) -> (i32, i32) {
    %c0_i32 = arith.constant 0 : i32
    %c0_i32_0 = arith.constant 0 : i32
    %c0_i32_1 = arith.constant 0 : i32
    return %c0_i32, %c0_i32_0 : i32, i32
  }
  func.func @transform_4(%arg0: i32) -> (i32, i32) {
    %c0_i32 = arith.constant 0 : i32
    %c0_i32_0 = arith.constant 0 : i32
    %c0_i32_1 = arith.constant 0 : i32
    return %c0_i32, %c0_i32_0 : i32, i32
  }
  func.func @transform_5(%arg0: i32) -> (i32, i32) {
    %c0_i32 = arith.constant 0 : i32
    %c0_i32_0 = arith.constant 0 : i32
    %c0_i32_1 = arith.constant 0 : i32
    return %c0_i32, %c0_i32_0 : i32, i32
  }
  func.func @transform_6(%arg0: i32) -> (i32, i32) {
    %c0_i32 = arith.constant 0 : i32
    %c0_i32_0 = arith.constant 0 : i32
    %c0_i32_1 = arith.constant 0 : i32
    return %c0_i32, %c0_i32_0 : i32, i32
  }
  func.func @transform_7(%arg0: i32) -> (i32, i32) {
    %c0_i32 = arith.constant 0 : i32
    %c0_i32_0 = arith.constant 0 : i32
    %c0_i32_1 = arith.constant 0 : i32
    return %c0_i32, %c0_i32_0 : i32, i32
  }
  func.func @transform_8(%arg0: i32) -> (i32, i32) {
    %c0_i32 = arith.constant 0 : i32
    %c0_i32_0 = arith.constant 0 : i32
    %c0_i32_1 = arith.constant 0 : i32
    return %c0_i32, %c0_i32_0 : i32, i32
  }
  func.func @transform_9(%arg0: i32) -> (i32, i32, i32) {
    %c0_i32 = arith.constant 0 : i32
    %c0_i32_0 = arith.constant 0 : i32
    %c0_i32_1 = arith.constant 0 : i32
    return %arg0, %c0_i32, %c0_i32_0 : i32, i32, i32
  }
}

</mosaic_0001>

<bundles_post_ra>
// kernel: sub.1
= control target key start
LH: loop header
LB: loop body
LE: loop exit
PB: predicated region body
PF: predicated region fallthrough
CT: control target
= control target key end

     0   :  { %3 = vsyncpa [#allocation1], 0  ;;  %s3626_s0 = inlined_call_operand.hbm [shape: f32[8,3,84,84], index: 0, kind: input, shape index: {}]   ;;  %s3627_s1 = inlined_call_operand.hbm [shape: f32[8,3,84,84], index: 1, kind: input, shape index: {}]   ;;  %s3628_s2 = inlined_call_operand.vmem [shape: f32[8,3,84,84], index: 2, kind: output, shape index: {}]  }
   0x1   :  { %4 = vsyncpa [#allocation3], 0  ;;  %s2845_s9 = smov [#allocation0]  }
   0x2   :  { %s8_s10 = sshll.u32 %s2845_s9, 4  ;;  %s9_s10 = int_to_ptr.vmem [resolvable:$true] %s8_s10 }
   0x3   :  { %s2809_s11 = scalar_lea.vmem %s9_s10, 32256  ;;  %p2814_p1 = scmp.lt.s32.totalorder %s9_s10, %s9_s10 }
   0x4   :  { %p2810_p0 = scmp.ne.s32.totalorder %s9_s10, %s2809_s11  ;;  %p2815_p2 = scmp.lt.s32.totalorder %s2809_s11, %s2809_s11 }
   0x6   :  { %p2816_p3 = por %p2815_p2, %p2814_p1 }
   0x8   :  { %p2817_p4 = pnand %p2816_p3, %p2810_p0 }
   0xa   :  { %2820 = shalt.err (!%p2817_p4)
}
   0xb   :  { %s2846_s12 = smov 128   ;;  %s2847_s13 = smov 8  }
   0xc   :  { %14 = dma.hbm_to_vmem [thread:$0]  %s3626_s0, 32256, %s9_s10, [#allocation1], %s2846_s12, %s2846_s12, %s2847_s13  }
   0xd   :  { %s2848_s0 = smov [#allocation2]  }
   0xe   :  { %s18_s16 = sshll.u32 %s2848_s0, 4  ;;  %s19_s16 = int_to_ptr.vmem [resolvable:$true] %s18_s16 }
   0xf   :  { %s2829_s17 = scalar_lea.vmem %s19_s16, 32256  ;;  %p2834_p6 = scmp.lt.s32.totalorder %s19_s16, %s19_s16 }
  0x10   :  { %p2830_p5 = scmp.ne.s32.totalorder %s19_s16, %s2829_s17  ;;  %p2835_p7 = scmp.lt.s32.totalorder %s2829_s17, %s2829_s17 }
  0x12   :  { %p2836_p8 = por %p2835_p7, %p2834_p6 }
  0x14   :  { %p2837_p9 = pnand %p2836_p8, %p2830_p5 }
  0x16   :  { %2840 = shalt.err (!%p2837_p9)
}
  0x17   :  { %24 = dma.hbm_to_vmem [thread:$0]  %s3627_s1, 32256, %s19_s16, [#allocation3], %s2846_s12, %s2846_s12, %s2847_s13  }
  0x18   :  { %2841 = dma.done.wait [#allocation1], 32256  }
  0x19   :  { %2842 = vsyncadd [#allocation1], 4294935040 }
  0x1a   :  { %2843 = dma.done.wait [#allocation3], 32256  }
  0x1b   :  { %2844 = vsyncadd [#allocation3], 4294935040  ;;  %v27_v0 = vld [vmem:[#allocation0] sm:$0xff]  ;;  %v55_v9 = vld [vmem:[#allocation0 + $0x8] sm:$0xff] }
  0x1c   :  { %v28_v1 = vld [vmem:[#allocation2] sm:$0xff]  ;;  %v57_v10 = vld [vmem:[#allocation2 + $0x8] sm:$0xff]  ;;  %v85_v18 = vld [vmem:[#allocation0 + $0x10] sm:$0xff] }
  0x1d   :  { %v35_v2 = vld [vmem:[#allocation0 + $0x2a0] sm:$0xff]  ;;  %v31_v3 = vsub.f32 %v27_v0, %v28_v1  ;;  %v65_v11 = vld [vmem:[#allocation0 + $0x2a8] sm:$0xff]  ;;  %v60_v12 = vsub.f32 %v55_v9, %v57_v10  ;;  %v87_v19 = vld [vmem:[#allocation2 + $0x10] sm:$0xff] }
  0x1e   :  { %v37_v4 = vld [vmem:[#allocation2 + $0x2a0] sm:$0xff]  ;;  %v67_v13 = vld [vmem:[#allocation2 + $0x2a8] sm:$0xff]  ;;  %v95_v20 = vld [vmem:[#allocation0 + $0x2b0] sm:$0xff]  ;;  %v90_v21 = vsub.f32 %v85_v18, %v87_v19 }
  0x1f   :  { %v45_v5 = vld [vmem:[#allocation0 + $0x540] sm:$0xff]  ;;  %v40_v7 = vsub.f32 %v35_v2, %v37_v4  ;;  %33 = vst [vmem:[%s3628_s2] sm:$0xff] %v31_v3  ;;  %v75_v14 = vld [vmem:[#allocation0 + $0x548] sm:$0xff]  ;;  %v70_v16 = vsub.f32 %v65_v11, %v67_v13  ;;  %2548 = vst [vmem:[%s3628_s2 + $0x8] sm:$0xff] %v60_v12 }
  0x20   :  { %v47_v6 = vld [vmem:[#allocation2 + $0x540] sm:$0xff]  ;;  %v77_v15 = vld [vmem:[#allocation2 + $0x548] sm:$0xff]  ;;  %v97_v22 = vld [vmem:[#allocation2 + $0x2b0] sm:$0xff]  ;;  %2551 = vst [vmem:[%s3628_s2 + $0x10] sm:$0xff] %v90_v21 }
  0x21   :  { %v50_v8 = vsub.f32 %v45_v5, %v47_v6  ;;  %2546 = vst [vmem:[%s3628_s2 + $0x2a0] sm:$0xff] %v40_v7  ;;  %v80_v17 = vsub.f32 %v75_v14, %v77_v15  ;;  %v105_v23 = vld [vmem:[#allocation0 + $0x550] sm:$0xff]  ;;  %2549 = vst [vmem:[%s3628_s2 + $0x2a8] sm:$0xff] %v70_v16  ;;  %v100_v25 = vsub.f32 %v95_v20, %v97_v22  ;;  %v115_v27 = vld [vmem:[#allocation0 + $0x18] sm:$0xff] }
  0x22   :  { %v107_v24 = vld [vmem:[#allocation2 + $0x550] sm:$0xff]  ;;  %v117_v28 = vld [vmem:[#allocation2 + $0x18] sm:$0xff]  ;;  %v145_v36 = vld [vmem:[#allocation0 + $0x20] sm:$0xff] }
  0x23   :  { %2547 = vst [vmem:[%s3628_s2 + $0x540] sm:$0xff] %v50_v8  ;;  %2550 = vst [vmem:[%s3628_s2 + $0x548] sm:$0xff] %v80_v17  ;;  %v110_v26 = vsub.f32 %v105_v23, %v107_v24  ;;  %v125_v29 = vld [vmem:[#allocation0 + $0x2b8] sm:$0xff]  ;;  %v120_v30 = vsub.f32 %v115_v27, %v117_v28  ;;  %v147_v37 = vld [vmem:[#allocation2 + $0x20] sm:$0xff] }
  0x24   :  { %v127_v31 = vld [vmem:[#allocation2 + $0x2b8] sm:$0xff]  ;;  %2552 = vst [vmem:[%s3628_s2 + $0x2b0] sm:$0xff] %v100_v25  ;;  %v155_v38 = vld [vmem:[#allocation0 + $0x2c0] sm:$0xff]  ;;  %v150_v39 = vsub.f32 %v145_v36, %v147_v37  ;;  %v175_v45 = vld [vmem:[#allocation0 + $0x28] sm:$0xff] }
  0x25   :  { %v135_v32 = vld [vmem:[#allocation0 + $0x558] sm:$0xff]  ;;  %2553 = vst [vmem:[%s3628_s2 + $0x550] sm:$0xff] %v110_v26  ;;  %v130_v34 = vsub.f32 %v125_v29, %v127_v31  ;;  %2554 = vst [vmem:[%s3628_s2 + $0x18] sm:$0xff] %v120_v30  ;;  %v157_v40 = vld [vmem:[#allocation2 + $0x2c0] sm:$0xff] }
  0x26   :  { %v137_v33 = vld [vmem:[#allocation2 + $0x558] sm:$0xff]  ;;  %v165_v41 = vld [vmem:[#allocation0 + $0x560] sm:$0xff]  ;;  %v160_v43 = vsub.f32 %v155_v38, %v157_v40  ;;  %v177_v46 = vld [vmem:[#allocation2 + $0x28] sm:$0xff]  ;;  %2557 = vst [vmem:[%s3628_s2 + $0x20] sm:$0xff] %v150_v39 }
  0x27   :  { %v140_v35 = vsub.f32 %v135_v32, %v137_v33  ;;  %v167_v42 = vld [vmem:[#allocation2 + $0x560] sm:$0xff]  ;;  %2555 = vst [vmem:[%s3628_s2 + $0x2b8] sm:$0xff] %v130_v34  ;;  %v185_v47 = vld [vmem:[#allocation0 + $0x2c8] sm:$0xff]  ;;  %v180_v48 = vsub.f32 %v175_v45, %v177_v46  ;;  %v205_v54 = vld [vmem:[#allocation0 + $0x30] sm:$0xff] }
  0x28   :  { %v170_v44 = vsub.f32 %v165_v41, %v167_v42  ;;  %v187_v49 = vld [vmem:[#allocation2 + $0x2c8] sm:$0xff]  ;;  %2558 = vst [vmem:[%s3628_s2 + $0x2c0] sm:$0xff] %v160_v43  ;;  %v207_v55 = vld [vmem:[#allocation2 + $0x30] sm:$0xff]  ;;  %v235_v63 = vld [vmem:[#allocation0 + $0x38] sm:$0xff] }
  0x29   :  { %2556 = vst [vmem:[%s3628_s2 + $0x558] sm:$0xff] %v140_v35  ;;  %v195_v50 = vld [vmem:[#allocation0 + $0x568] sm:$0xff]  ;;  %v190_v52 = vsub.f32 %v185_v47, %v187_v49  ;;  %v215_v56 = vld [vmem:[#allocation0 + $0x2d0] sm:$0xff]  ;;  %2560 = vst [vmem:[%s3628_s2 + $0x28] sm:$0xff] %v180_v48  ;;  %v210_v57 = vsub.f32 %v205_v54, %v207_v55 }
  0x2a   :  { %v197_v51 = vld [vmem:[#allocation2 + $0x568] sm:$0xff]  ;;  %2559 = vst [vmem:[%s3628_s2 + $0x560] sm:$0xff] %v170_v44  ;;  %v217_v58 = vld [vmem:[#allocation2 + $0x2d0] sm:$0xff]  ;;  %v237_v0 = vld [vmem:[#allocation2 + $0x38] sm:$0xff] }
  0x2b   :  { %v200_v53 = vsub.f32 %v195_v50, %v197_v51  ;;  %v225_v59 = vld [vmem:[#allocation0 + $0x570] sm:$0xff]  ;;  %2561 = vst [vmem:[%s3628_s2 + $0x2c8] sm:$0xff] %v190_v52  ;;  %v220_v61 = vsub.f32 %v215_v56, %v217_v58  ;;  %v245_v1 = vld [vmem:[#allocation0 + $0x2d8] sm:$0xff]  ;;  %2563 = vst [vmem:[%s3628_s2 + $0x30] sm:$0xff] %v210_v57  ;;  %v240_v2 = vsub.f32 %v235_v63, %v237_v0 }
  0x2c   :  { %v227_v60 = vld [vmem:[#allocation2 + $0x570] sm:$0xff]  ;;  %v247_v3 = vld [vmem:[#allocation2 + $0x2d8] sm:$0xff]  ;;  %v265_v8 = vld [vmem:[#allocation0 + $0x40] sm:$0xff] }
  0x2d   :  { %2562 = vst [vmem:[%s3628_s2 + $0x568] sm:$0xff] %v200_v53  ;;  %v230_v62 = vsub.f32 %v225_v59, %v227_v60  ;;  %v255_v4 = vld [vmem:[#allocation0 + $0x578] sm:$0xff]  ;;  %2564 = vst [vmem:[%s3628_s2 + $0x2d0] sm:$0xff] %v220_v61  ;;  %v250_v6 = vsub.f32 %v245_v1, %v247_v3  ;;  %v267_v9 = vld [vmem:[#allocation2 + $0x40] sm:$0xff] }
  0x2e   :  { %v257_v5 = vld [vmem:[#allocation2 + $0x578] sm:$0xff]  ;;  %v275_v10 = vld [vmem:[#allocation0 + $0x2e0] sm:$0xff]  ;;  %2566 = vst [vmem:[%s3628_s2 + $0x38] sm:$0xff] %v240_v2  ;;  %v270_v11 = vsub.f32 %v265_v8, %v267_v9  ;;  %v295_v17 = vld [vmem:[#allocation0 + $0x48] sm:$0xff] }
  0x2f   :  { %2565 = vst [vmem:[%s3628_s2 + $0x570] sm:$0xff] %v230_v62  ;;  %v260_v7 = vsub.f32 %v255_v4, %v257_v5  ;;  %v277_v12 = vld [vmem:[#allocation2 + $0x2e0] sm:$0xff]  ;;  %2567 = vst [vmem:[%s3628_s2 + $0x2d8] sm:$0xff] %v250_v6  ;;  %v297_v18 = vld [vmem:[#allocation2 + $0x48] sm:$0xff] }
  0x30   :  { %v285_v13 = vld [vmem:[#allocation0 + $0x580] sm:$0xff]  ;;  %v280_v15 = vsub.f32 %v275_v10, %v277_v12  ;;  %v305_v19 = vld [vmem:[#allocation0 + $0x2e8] sm:$0xff]  ;;  %2569 = vst [vmem:[%s3628_s2 + $0x40] sm:$0xff] %v270_v11  ;;  %v300_v20 = vsub.f32 %v295_v17, %v297_v18  ;;  %v325_v26 = vld [vmem:[#allocation0 + $0x50] sm:$0xff] }
  0x31   :  { %v287_v14 = vld [vmem:[#allocation2 + $0x580] sm:$0xff]  ;;  %2568 = vst [vmem:[%s3628_s2 + $0x578] sm:$0xff] %v260_v7  ;;  %v307_v21 = vld [vmem:[#allocation2 + $0x2e8] sm:$0xff]  ;;  %v327_v27 = vld [vmem:[#allocation2 + $0x50] sm:$0xff] }
  0x32   :  { %v290_v16 = vsub.f32 %v285_v13, %v287_v14  ;;  %v315_v22 = vld [vmem:[#allocation0 + $0x588] sm:$0xff]  ;;  %2570 = vst [vmem:[%s3628_s2 + $0x2e0] sm:$0xff] %v280_v15  ;;  %v310_v24 = vsub.f32 %v305_v19, %v307_v21  ;;  %v335_v28 = vld [vmem:[#allocation0 + $0x2f0] sm:$0xff]  ;;  %2572 = vst [vmem:[%s3628_s2 + $0x48] sm:$0xff] %v300_v20  ;;  %v330_v29 = vsub.f32 %v325_v26, %v327_v27 }
  0x33   :  { %v317_v23 = vld [vmem:[#allocation2 + $0x588] sm:$0xff]  ;;  %v337_v30 = vld [vmem:[#allocation2 + $0x2f0] sm:$0xff]  ;;  %v355_v35 = vld [vmem:[#allocation0 + $0x58] sm:$0xff] }
  0x34   :  { %2571 = vst [vmem:[%s3628_s2 + $0x580] sm:$0xff] %v290_v16  ;;  %v320_v25 = vsub.f32 %v315_v22, %v317_v23  ;;  %v345_v31 = vld [vmem:[#allocation0 + $0x590] sm:$0xff]  ;;  %2573 = vst [vmem:[%s3628_s2 + $0x2e8] sm:$0xff] %v310_v24  ;;  %v340_v33 = vsub.f32 %v335_v28, %v337_v30  ;;  %v357_v36 = vld [vmem:[#allocation2 + $0x58] sm:$0xff] }
  0x35   :  { %v347_v32 = vld [vmem:[#allocation2 + $0x590] sm:$0xff]  ;;  %v365_v37 = vld [vmem:[#allocation0 + $0x2f8] sm:$0xff]  ;;  %2575 = vst [vmem:[%s3628_s2 + $0x50] sm:$0xff] %v330_v29  ;;  %v360_v38 = vsub.f32 %v355_v35, %v357_v36  ;;  %v385_v44 = vld [vmem:[#allocation0 + $0x60] sm:$0xff] }
  0x36   :  { %2574 = vst [vmem:[%s3628_s2 + $0x588] sm:$0xff] %v320_v25  ;;  %v350_v34 = vsub.f32 %v345_v31, %v347_v32  ;;  %v367_v39 = vld [vmem:[#allocation2 + $0x2f8] sm:$0xff]  ;;  %2576 = vst [vmem:[%s3628_s2 + $0x2f0] sm:$0xff] %v340_v33  ;;  %v387_v45 = vld [vmem:[#allocation2 + $0x60] sm:$0xff] }
  0x37   :  { %v375_v40 = vld [vmem:[#allocation0 + $0x598] sm:$0xff]  ;;  %v370_v42 = vsub.f32 %v365_v37, %v367_v39  ;;  %v395_v46 = vld [vmem:[#allocation0 + $0x300] sm:$0xff]  ;;  %2578 = vst [vmem:[%s3628_s2 + $0x58] sm:$0xff] %v360_v38  ;;  %v390_v47 = vsub.f32 %v385_v44, %v387_v45  ;;  %v415_v53 = vld [vmem:[#allocation0 + $0x68] sm:$0xff] }
  0x38   :  { %v377_v41 = vld [vmem:[#allocation2 + $0x598] sm:$0xff]  ;;  %2577 = vst [vmem:[%s3628_s2 + $0x590] sm:$0xff] %v350_v34  ;;  %v397_v48 = vld [vmem:[#allocation2 + $0x300] sm:$0xff]  ;;  %v417_v54 = vld [vmem:[#allocation2 + $0x68] sm:$0xff] }
  0x39   :  { %v380_v43 = vsub.f32 %v375_v40, %v377_v41  ;;  %v405_v49 = vld [vmem:[#allocation0 + $0x5a0] sm:$0xff]  ;;  %2579 = vst [vmem:[%s3628_s2 + $0x2f8] sm:$0xff] %v370_v42  ;;  %v400_v51 = vsub.f32 %v395_v46, %v397_v48  ;;  %v425_v55 = vld [vmem:[#allocation0 + $0x308] sm:$0xff]  ;;  %2581 = vst [vmem:[%s3628_s2 + $0x60] sm:$0xff] %v390_v47  ;;  %v420_v56 = vsub.f32 %v415_v53, %v417_v54 }
  0x3a   :  { %v407_v50 = vld [vmem:[#allocation2 + $0x5a0] sm:$0xff]  ;;  %v427_v57 = vld [vmem:[#allocation2 + $0x308] sm:$0xff]  ;;  %v445_v62 = vld [vmem:[#allocation0 + $0x70] sm:$0xff] }
  0x3b   :  { %2580 = vst [vmem:[%s3628_s2 + $0x598] sm:$0xff] %v380_v43  ;;  %v410_v52 = vsub.f32 %v405_v49, %v407_v50  ;;  %v435_v58 = vld [vmem:[#allocation0 + $0x5a8] sm:$0xff]  ;;  %2582 = vst [vmem:[%s3628_s2 + $0x300] sm:$0xff] %v400_v51  ;;  %v430_v60 = vsub.f32 %v425_v55, %v427_v57  ;;  %v447_v63 = vld [vmem:[#allocation2 + $0x70] sm:$0xff] }
  0x3c   :  { %v437_v59 = vld [vmem:[#allocation2 + $0x5a8] sm:$0xff]  ;;  %v455_v0 = vld [vmem:[#allocation0 + $0x310] sm:$0xff]  ;;  %2584 = vst [vmem:[%s3628_s2 + $0x68] sm:$0xff] %v420_v56  ;;  %v450_v1 = vsub.f32 %v445_v62, %v447_v63  ;;  %v475_v7 = vld [vmem:[#allocation0 + $0x78] sm:$0xff] }
  0x3d   :  { %2583 = vst [vmem:[%s3628_s2 + $0x5a0] sm:$0xff] %v410_v52  ;;  %v440_v61 = vsub.f32 %v435_v58, %v437_v59  ;;  %v457_v2 = vld [vmem:[#allocation2 + $0x310] sm:$0xff]  ;;  %2585 = vst [vmem:[%s3628_s2 + $0x308] sm:$0xff] %v430_v60  ;;  %v477_v8 = vld [vmem:[#allocation2 + $0x78] sm:$0xff] }
  0x3e   :  { %v465_v3 = vld [vmem:[#allocation0 + $0x5b0] sm:$0xff]  ;;  %v460_v5 = vsub.f32 %v455_v0, %v457_v2  ;;  %v485_v9 = vld [vmem:[#allocation0 + $0x318] sm:$0xff]  ;;  %2587 = vst [vmem:[%s3628_s2 + $0x70] sm:$0xff] %v450_v1  ;;  %v480_v10 = vsub.f32 %v475_v7, %v477_v8  ;;  %v505_v16 = vld [vmem:[#allocation0 + $0x80] sm:$0xff] }
  0x3f   :  { %v467_v4 = vld [vmem:[#allocation2 + $0x5b0] sm:$0xff]  ;;  %2586 = vst [vmem:[%s3628_s2 + $0x5a8] sm:$0xff] %v440_v61  ;;  %v487_v11 = vld [vmem:[#allocation2 + $0x318] sm:$0xff]  ;;  %v507_v17 = vld [vmem:[#allocation2 + $0x80] sm:$0xff] }
  0x40   :  { %v470_v6 = vsub.f32 %v465_v3, %v467_v4  ;;  %v495_v12 = vld [vmem:[#allocation0 + $0x5b8] sm:$0xff]  ;;  %2588 = vst [vmem:[%s3628_s2 + $0x310] sm:$0xff] %v460_v5  ;;  %v490_v14 = vsub.f32 %v485_v9, %v487_v11  ;;  %v515_v18 = vld [vmem:[#allocation0 + $0x320] sm:$0xff]  ;;  %2590 = vst [vmem:[%s3628_s2 + $0x78] sm:$0xff] %v480_v10  ;;  %v510_v19 = vsub.f32 %v505_v16, %v507_v17 }
  0x41   :  { %v497_v13 = vld [vmem:[#allocation2 + $0x5b8] sm:$0xff]  ;;  %v517_v20 = vld [vmem:[#allocation2 + $0x320] sm:$0xff]  ;;  %v535_v25 = vld [vmem:[#allocation0 + $0x88] sm:$0xff] }
  0x42   :  { %2589 = vst [vmem:[%s3628_s2 + $0x5b0] sm:$0xff] %v470_v6  ;;  %v500_v15 = vsub.f32 %v495_v12, %v497_v13  ;;  %v525_v21 = vld [vmem:[#allocation0 + $0x5c0] sm:$0xff]  ;;  %2591 = vst [vmem:[%s3628_s2 + $0x318] sm:$0xff] %v490_v14  ;;  %v520_v23 = vsub.f32 %v515_v18, %v517_v20  ;;  %v537_v26 = vld [vmem:[#allocation2 + $0x88] sm:$0xff] }
  0x43   :  { %v527_v22 = vld [vmem:[#allocation2 + $0x5c0] sm:$0xff]  ;;  %v545_v27 = vld [vmem:[#allocation0 + $0x328] sm:$0xff]  ;;  %2593 = vst [vmem:[%s3628_s2 + $0x80] sm:$0xff] %v510_v19  ;;  %v540_v28 = vsub.f32 %v535_v25, %v537_v26  ;;  %v565_v34 = vld [vmem:[#allocation0 + $0x90] sm:$0xff] }
  0x44   :  { %2592 = vst [vmem:[%s3628_s2 + $0x5b8] sm:$0xff] %v500_v15  ;;  %v530_v24 = vsub.f32 %v525_v21, %v527_v22  ;;  %v547_v29 = vld [vmem:[#allocation2 + $0x328] sm:$0xff]  ;;  %2594 = vst [vmem:[%s3628_s2 + $0x320] sm:$0xff] %v520_v23  ;;  %v567_v35 = vld [vmem:[#allocation2 + $0x90] sm:$0xff] }
  0x45   :  { %v555_v30 = vld [vmem:[#allocation0 + $0x5c8] sm:$0xff]  ;;  %v550_v32 = vsub.f32 %v545_v27, %v547_v29  ;;  %v575_v36 = vld [vmem:[#allocation0 + $0x330] sm:$0xff]  ;;  %2596 = vst [vmem:[%s3628_s2 + $0x88] sm:$0xff] %v540_v28  ;;  %v570_v37 = vsub.f32 %v565_v34, %v567_v35  ;;  %v595_v43 = vld [vmem:[#allocation0 + $0x98] sm:$0xff] }
  0x46   :  { %v557_v31 = vld [vmem:[#allocation2 + $0x5c8] sm:$0xff]  ;;  %2595 = vst [vmem:[%s3628_s2 + $0x5c0] sm:$0xff] %v530_v24  ;;  %v577_v38 = vld [vmem:[#allocation2 + $0x330] sm:$0xff]  ;;  %v597_v44 = vld [vmem:[#allocation2 + $0x98] sm:$0xff] }
  0x47   :  { %v560_v33 = vsub.f32 %v555_v30, %v557_v31  ;;  %v585_v39 = vld [vmem:[#allocation0 + $0x5d0] sm:$0xff]  ;;  %2597 = vst [vmem:[%s3628_s2 + $0x328] sm:$0xff] %v550_v32  ;;  %v580_v41 = vsub.f32 %v575_v36, %v577_v38  ;;  %v605_v45 = vld [vmem:[#allocation0 + $0x338] sm:$0xff]  ;;  %2599 = vst [vmem:[%s3628_s2 + $0x90] sm:$0xff] %v570_v37  ;;  %v600_v46 = vsub.f32 %v595_v43, %v597_v44 }
  0x48   :  { %v587_v40 = vld [vmem:[#allocation2 + $0x5d0] sm:$0xff]  ;;  %v607_v47 = vld [vmem:[#allocation2 + $0x338] sm:$0xff]  ;;  %v625_v52 = vld [vmem:[#allocation0 + $0xa0] sm:$0xff] }
  0x49   :  { %2598 = vst [vmem:[%s3628_s2 + $0x5c8] sm:$0xff] %v560_v33  ;;  %v590_v42 = vsub.f32 %v585_v39, %v587_v40  ;;  %v615_v48 = vld [vmem:[#allocation0 + $0x5d8] sm:$0xff]  ;;  %2600 = vst [vmem:[%s3628_s2 + $0x330] sm:$0xff] %v580_v41  ;;  %v610_v50 = vsub.f32 %v605_v45, %v607_v47  ;;  %v627_v53 = vld [vmem:[#allocation2 + $0xa0] sm:$0xff] }
  0x4a   :  { %v617_v49 = vld [vmem:[#allocation2 + $0x5d8] sm:$0xff]  ;;  %v635_v54 = vld [vmem:[#allocation0 + $0x340] sm:$0xff]  ;;  %2602 = vst [vmem:[%s3628_s2 + $0x98] sm:$0xff] %v600_v46  ;;  %v630_v55 = vsub.f32 %v625_v52, %v627_v53  ;;  %v655_v61 = vld [vmem:[#allocation0 + $0xa8] sm:$0xff] }
  0x4b   :  { %2601 = vst [vmem:[%s3628_s2 + $0x5d0] sm:$0xff] %v590_v42  ;;  %v620_v51 = vsub.f32 %v615_v48, %v617_v49  ;;  %v637_v56 = vld [vmem:[#allocation2 + $0x340] sm:$0xff]  ;;  %2603 = vst [vmem:[%s3628_s2 + $0x338] sm:$0xff] %v610_v50  ;;  %v657_v62 = vld [vmem:[#allocation2 + $0xa8] sm:$0xff] }
  0x4c   :  { %v645_v57 = vld [vmem:[#allocation0 + $0x5e0] sm:$0xff]  ;;  %v640_v59 = vsub.f32 %v635_v54, %v637_v56  ;;  %v665_v63 = vld [vmem:[#allocation0 + $0x348] sm:$0xff]  ;;  %2605 = vst [vmem:[%s3628_s2 + $0xa0] sm:$0xff] %v630_v55  ;;  %v660_v0 = vsub.f32 %v655_v61, %v657_v62  ;;  %v685_v6 = vld [vmem:[#allocation0 + $0xb0] sm:$0xff] }
  0x4d   :  { %v647_v58 = vld [vmem:[#allocation2 + $0x5e0] sm:$0xff]  ;;  %2604 = vst [vmem:[%s3628_s2 + $0x5d8] sm:$0xff] %v620_v51  ;;  %v667_v1 = vld [vmem:[#allocation2 + $0x348] sm:$0xff]  ;;  %v687_v7 = vld [vmem:[#allocation2 + $0xb0] sm:$0xff] }
  0x4e   :  { %v650_v60 = vsub.f32 %v645_v57, %v647_v58  ;;  %v675_v2 = vld [vmem:[#allocation0 + $0x5e8] sm:$0xff]  ;;  %2606 = vst [vmem:[%s3628_s2 + $0x340] sm:$0xff] %v640_v59  ;;  %v670_v4 = vsub.f32 %v665_v63, %v667_v1  ;;  %v695_v8 = vld [vmem:[#allocation0 + $0x350] sm:$0xff]  ;;  %2608 = vst [vmem:[%s3628_s2 + $0xa8] sm:$0xff] %v660_v0  ;;  %v690_v9 = vsub.f32 %v685_v6, %v687_v7 }
  0x4f   :  { %v677_v3 = vld [vmem:[#allocation2 + $0x5e8] sm:$0xff]  ;;  %v697_v10 = vld [vmem:[#allocation2 + $0x350] sm:$0xff]  ;;  %v715_v15 = vld [vmem:[#allocation0 + $0xb8] sm:$0xff] }
  0x50   :  { %2607 = vst [vmem:[%s3628_s2 + $0x5e0] sm:$0xff] %v650_v60  ;;  %v680_v5 = vsub.f32 %v675_v2, %v677_v3  ;;  %v705_v11 = vld [vmem:[#allocation0 + $0x5f0] sm:$0xff]  ;;  %2609 = vst [vmem:[%s3628_s2 + $0x348] sm:$0xff] %v670_v4  ;;  %v700_v13 = vsub.f32 %v695_v8, %v697_v10  ;;  %v717_v16 = vld [vmem:[#allocation2 + $0xb8] sm:$0xff] }
  0x51   :  { %v707_v12 = vld [vmem:[#allocation2 + $0x5f0] sm:$0xff]  ;;  %v725_v17 = vld [vmem:[#allocation0 + $0x358] sm:$0xff]  ;;  %2611 = vst [vmem:[%s3628_s2 + $0xb0] sm:$0xff] %v690_v9  ;;  %v720_v18 = vsub.f32 %v715_v15, %v717_v16  ;;  %v745_v24 = vld [vmem:[#allocation0 + $0xc0] sm:$0xff] }
  0x52   :  { %2610 = vst [vmem:[%s3628_s2 + $0x5e8] sm:$0xff] %v680_v5  ;;  %v710_v14 = vsub.f32 %v705_v11, %v707_v12  ;;  %v727_v19 = vld [vmem:[#allocation2 + $0x358] sm:$0xff]  ;;  %2612 = vst [vmem:[%s3628_s2 + $0x350] sm:$0xff] %v700_v13  ;;  %v747_v25 = vld [vmem:[#allocation2 + $0xc0] sm:$0xff] }
  0x53   :  { %v735_v20 = vld [vmem:[#allocation0 + $0x5f8] sm:$0xff]  ;;  %v730_v22 = vsub.f32 %v725_v17, %v727_v19  ;;  %v755_v26 = vld [vmem:[#allocation0 + $0x360] sm:$0xff]  ;;  %2614 = vst [vmem:[%s3628_s2 + $0xb8] sm:$0xff] %v720_v18  ;;  %v750_v27 = vsub.f32 %v745_v24, %v747_v25  ;;  %v775_v33 = vld [vmem:[#allocation0 + $0xc8] sm:$0xff] }
  0x54   :  { %v737_v21 = vld [vmem:[#allocation2 + $0x5f8] sm:$0xff]  ;;  %2613 = vst [vmem:[%s3628_s2 + $0x5f0] sm:$0xff] %v710_v14  ;;  %v757_v28 = vld [vmem:[#allocation2 + $0x360] sm:$0xff]  ;;  %v777_v34 = vld [vmem:[#allocation2 + $0xc8] sm:$0xff] }
  0x55   :  { %v740_v23 = vsub.f32 %v735_v20, %v737_v21  ;;  %v765_v29 = vld [vmem:[#allocation0 + $0x600] sm:$0xff]  ;;  %2615 = vst [vmem:[%s3628_s2 + $0x358] sm:$0xff] %v730_v22  ;;  %v760_v31 = vsub.f32 %v755_v26, %v757_v28  ;;  %v785_v35 = vld [vmem:[#allocation0 + $0x368] sm:$0xff]  ;;  %2617 = vst [vmem:[%s3628_s2 + $0xc0] sm:$0xff] %v750_v27  ;;  %v780_v36 = vsub.f32 %v775_v33, %v777_v34 }
  0x56   :  { %v767_v30 = vld [vmem:[#allocation2 + $0x600] sm:$0xff]  ;;  %v787_v37 = vld [vmem:[#allocation2 + $0x368] sm:$0xff]  ;;  %v805_v42 = vld [vmem:[#allocation0 + $0xd0] sm:$0xff] }
  0x57   :  { %2616 = vst [vmem:[%s3628_s2 + $0x5f8] sm:$0xff] %v740_v23  ;;  %v770_v32 = vsub.f32 %v765_v29, %v767_v30  ;;  %v795_v38 = vld [vmem:[#allocation0 + $0x608] sm:$0xff]  ;;  %2618 = vst [vmem:[%s3628_s2 + $0x360] sm:$0xff] %v760_v31  ;;  %v790_v40 = vsub.f32 %v785_v35, %v787_v37  ;;  %v807_v43 = vld [vmem:[#allocation2 + $0xd0] sm:$0xff] }
  0x58   :  { %v797_v39 = vld [vmem:[#allocation2 + $0x608] sm:$0xff]  ;;  %v815_v44 = vld [vmem:[#allocation0 + $0x370] sm:$0xff]  ;;  %2620 = vst [vmem:[%s3628_s2 + $0xc8] sm:$0xff] %v780_v36  ;;  %v810_v45 = vsub.f32 %v805_v42, %v807_v43  ;;  %v835_v51 = vld [vmem:[#allocation0 + $0xd8] sm:$0xff] }
  0x59   :  { %2619 = vst [vmem:[%s3628_s2 + $0x600] sm:$0xff] %v770_v32  ;;  %v800_v41 = vsub.f32 %v795_v38, %v797_v39  ;;  %v817_v46 = vld [vmem:[#allocation2 + $0x370] sm:$0xff]  ;;  %2621 = vst [vmem:[%s3628_s2 + $0x368] sm:$0xff] %v790_v40  ;;  %v837_v52 = vld [vmem:[#allocation2 + $0xd8] sm:$0xff] }
  0x5a   :  { %v825_v47 = vld [vmem:[#allocation0 + $0x610] sm:$0xff]  ;;  %v820_v49 = vsub.f32 %v815_v44, %v817_v46  ;;  %v845_v53 = vld [vmem:[#allocation0 + $0x378] sm:$0xff]  ;;  %2623 = vst [vmem:[%s3628_s2 + $0xd0] sm:$0xff] %v810_v45  ;;  %v840_v54 = vsub.f32 %v835_v51, %v837_v52  ;;  %v865_v60 = vld [vmem:[#allocation0 + $0xe0] sm:$0xff] }
  0x5b   :  { %v827_v48 = vld [vmem:[#allocation2 + $0x610] sm:$0xff]  ;;  %2622 = vst [vmem:[%s3628_s2 + $0x608] sm:$0xff] %v800_v41  ;;  %v847_v55 = vld [vmem:[#allocation2 + $0x378] sm:$0xff]  ;;  %v867_v61 = vld [vmem:[#allocation2 + $0xe0] sm:$0xff] }
  0x5c   :  { %v830_v50 = vsub.f32 %v825_v47, %v827_v48  ;;  %v855_v56 = vld [vmem:[#allocation0 + $0x618] sm:$0xff]  ;;  %2624 = vst [vmem:[%s3628_s2 + $0x370] sm:$0xff] %v820_v49  ;;  %v850_v58 = vsub.f32 %v845_v53, %v847_v55  ;;  %v875_v62 = vld [vmem:[#allocation0 + $0x380] sm:$0xff]  ;;  %2626 = vst [vmem:[%s3628_s2 + $0xd8] sm:$0xff] %v840_v54  ;;  %v870_v63 = vsub.f32 %v865_v60, %v867_v61 }
  0x5d   :  { %v857_v57 = vld [vmem:[#allocation2 + $0x618] sm:$0xff]  ;;  %v877_v0 = vld [vmem:[#allocation2 + $0x380] sm:$0xff]  ;;  %v895_v5 = vld [vmem:[#allocation0 + $0xe8] sm:$0xff] }
  0x5e   :  { %2625 = vst [vmem:[%s3628_s2 + $0x610] sm:$0xff] %v830_v50  ;;  %v860_v59 = vsub.f32 %v855_v56, %v857_v57  ;;  %v885_v1 = vld [vmem:[#allocation0 + $0x620] sm:$0xff]  ;;  %2627 = vst [vmem:[%s3628_s2 + $0x378] sm:$0xff] %v850_v58  ;;  %v880_v3 = vsub.f32 %v875_v62, %v877_v0  ;;  %v897_v6 = vld [vmem:[#allocation2 + $0xe8] sm:$0xff] }
  0x5f   :  { %v887_v2 = vld [vmem:[#allocation2 + $0x620] sm:$0xff]  ;;  %v905_v7 = vld [vmem:[#allocation0 + $0x388] sm:$0xff]  ;;  %2629 = vst [vmem:[%s3628_s2 + $0xe0] sm:$0xff] %v870_v63  ;;  %v900_v8 = vsub.f32 %v895_v5, %v897_v6  ;;  %v925_v14 = vld [vmem:[#allocation0 + $0xf0] sm:$0xff] }
  0x60   :  { %2628 = vst [vmem:[%s3628_s2 + $0x618] sm:$0xff] %v860_v59  ;;  %v890_v4 = vsub.f32 %v885_v1, %v887_v2  ;;  %v907_v9 = vld [vmem:[#allocation2 + $0x388] sm:$0xff]  ;;  %2630 = vst [vmem:[%s3628_s2 + $0x380] sm:$0xff] %v880_v3  ;;  %v927_v15 = vld [vmem:[#allocation2 + $0xf0] sm:$0xff] }
  0x61   :  { %v915_v10 = vld [vmem:[#allocation0 + $0x628] sm:$0xff]  ;;  %v910_v12 = vsub.f32 %v905_v7, %v907_v9  ;;  %v935_v16 = vld [vmem:[#allocation0 + $0x390] sm:$0xff]  ;;  %2632 = vst [vmem:[%s3628_s2 + $0xe8] sm:$0xff] %v900_v8  ;;  %v930_v17 = vsub.f32 %v925_v14, %v927_v15  ;;  %v955_v23 = vld [vmem:[#allocation0 + $0xf8] sm:$0xff] }
  0x62   :  { %v917_v11 = vld [vmem:[#allocation2 + $0x628] sm:$0xff]  ;;  %2631 = vst [vmem:[%s3628_s2 + $0x620] sm:$0xff] %v890_v4  ;;  %v937_v18 = vld [vmem:[#allocation2 + $0x390] sm:$0xff]  ;;  %v957_v24 = vld [vmem:[#allocation2 + $0xf8] sm:$0xff] }
  0x63   :  { %v920_v13 = vsub.f32 %v915_v10, %v917_v11  ;;  %v945_v19 = vld [vmem:[#allocation0 + $0x630] sm:$0xff]  ;;  %2633 = vst [vmem:[%s3628_s2 + $0x388] sm:$0xff] %v910_v12  ;;  %v940_v21 = vsub.f32 %v935_v16, %v937_v18  ;;  %v965_v25 = vld [vmem:[#allocation0 + $0x398] sm:$0xff]  ;;  %2635 = vst [vmem:[%s3628_s2 + $0xf0] sm:$0xff] %v930_v17  ;;  %v960_v26 = vsub.f32 %v955_v23, %v957_v24 }
  0x64   :  { %v947_v20 = vld [vmem:[#allocation2 + $0x630] sm:$0xff]  ;;  %v967_v27 = vld [vmem:[#allocation2 + $0x398] sm:$0xff]  ;;  %v985_v32 = vld [vmem:[#allocation0 + $0x100] sm:$0xff] }
  0x65   :  { %2634 = vst [vmem:[%s3628_s2 + $0x628] sm:$0xff] %v920_v13  ;;  %v950_v22 = vsub.f32 %v945_v19, %v947_v20  ;;  %v975_v28 = vld [vmem:[#allocation0 + $0x638] sm:$0xff]  ;;  %2636 = vst [vmem:[%s3628_s2 + $0x390] sm:$0xff] %v940_v21  ;;  %v970_v30 = vsub.f32 %v965_v25, %v967_v27  ;;  %v987_v33 = vld [vmem:[#allocation2 + $0x100] sm:$0xff] }
  0x66   :  { %v977_v29 = vld [vmem:[#allocation2 + $0x638] sm:$0xff]  ;;  %v995_v34 = vld [vmem:[#allocation0 + $0x3a0] sm:$0xff]  ;;  %2638 = vst [vmem:[%s3628_s2 + $0xf8] sm:$0xff] %v960_v26  ;;  %v990_v35 = vsub.f32 %v985_v32, %v987_v33  ;;  %v1015_v41 = vld [vmem:[#allocation0 + $0x108] sm:$0xff] }
  0x67   :  { %2637 = vst [vmem:[%s3628_s2 + $0x630] sm:$0xff] %v950_v22  ;;  %v980_v31 = vsub.f32 %v975_v28, %v977_v29  ;;  %v997_v36 = vld [vmem:[#allocation2 + $0x3a0] sm:$0xff]  ;;  %2639 = vst [vmem:[%s3628_s2 + $0x398] sm:$0xff] %v970_v30  ;;  %v1017_v42 = vld [vmem:[#allocation2 + $0x108] sm:$0xff] }
  0x68   :  { %v1005_v37 = vld [vmem:[#allocation0 + $0x640] sm:$0xff]  ;;  %v1000_v39 = vsub.f32 %v995_v34, %v997_v36  ;;  %v1025_v43 = vld [vmem:[#allocation0 + $0x3a8] sm:$0xff]  ;;  %2641 = vst [vmem:[%s3628_s2 + $0x100] sm:$0xff] %v990_v35  ;;  %v1020_v44 = vsub.f32 %v1015_v41, %v1017_v42  ;;  %v1045_v50 = vld [vmem:[#allocation0 + $0x110] sm:$0xff] }
  0x69   :  { %v1007_v38 = vld [vmem:[#allocation2 + $0x640] sm:$0xff]  ;;  %2640 = vst [vmem:[%s3628_s2 + $0x638] sm:$0xff] %v980_v31  ;;  %v1027_v45 = vld [vmem:[#allocation2 + $0x3a8] sm:$0xff]  ;;  %v1047_v51 = vld [vmem:[#allocation2 + $0x110] sm:$0xff] }
  0x6a   :  { %v1010_v40 = vsub.f32 %v1005_v37, %v1007_v38  ;;  %v1035_v46 = vld [vmem:[#allocation0 + $0x648] sm:$0xff]  ;;  %2642 = vst [vmem:[%s3628_s2 + $0x3a0] sm:$0xff] %v1000_v39  ;;  %v1030_v48 = vsub.f32 %v1025_v43, %v1027_v45  ;;  %v1055_v52 = vld [vmem:[#allocation0 + $0x3b0] sm:$0xff]  ;;  %2644 = vst [vmem:[%s3628_s2 + $0x108] sm:$0xff] %v1020_v44  ;;  %v1050_v53 = vsub.f32 %v1045_v50, %v1047_v51 }
  0x6b   :  { %v1037_v47 = vld [vmem:[#allocation2 + $0x648] sm:$0xff]  ;;  %v1057_v54 = vld [vmem:[#allocation2 + $0x3b0] sm:$0xff]  ;;  %v1075_v59 = vld [vmem:[#allocation0 + $0x118] sm:$0xff] }
  0x6c   :  { %2643 = vst [vmem:[%s3628_s2 + $0x640] sm:$0xff] %v1010_v40  ;;  %v1040_v49 = vsub.f32 %v1035_v46, %v1037_v47  ;;  %v1065_v55 = vld [vmem:[#allocation0 + $0x650] sm:$0xff]  ;;  %2645 = vst [vmem:[%s3628_s2 + $0x3a8] sm:$0xff] %v1030_v48  ;;  %v1060_v57 = vsub.f32 %v1055_v52, %v1057_v54  ;;  %v1077_v60 = vld [vmem:[#allocation2 + $0x118] sm:$0xff] }
  0x6d   :  { %v1067_v56 = vld [vmem:[#allocation2 + $0x650] sm:$0xff]  ;;  %v1085_v61 = vld [vmem:[#allocation0 + $0x3b8] sm:$0xff]  ;;  %2647 = vst [vmem:[%s3628_s2 + $0x110] sm:$0xff] %v1050_v53  ;;  %v1080_v62 = vsub.f32 %v1075_v59, %v1077_v60  ;;  %v1105_v4 = vld [vmem:[#allocation0 + $0x120] sm:$0xff] }
  0x6e   :  { %2646 = vst [vmem:[%s3628_s2 + $0x648] sm:$0xff] %v1040_v49  ;;  %v1070_v58 = vsub.f32 %v1065_v55, %v1067_v56  ;;  %v1087_v63 = vld [vmem:[#allocation2 + $0x3b8] sm:$0xff]  ;;  %2648 = vst [vmem:[%s3628_s2 + $0x3b0] sm:$0xff] %v1060_v57  ;;  %v1107_v5 = vld [vmem:[#allocation2 + $0x120] sm:$0xff] }
  0x6f   :  { %v1095_v0 = vld [vmem:[#allocation0 + $0x658] sm:$0xff]  ;;  %v1090_v2 = vsub.f32 %v1085_v61, %v1087_v63  ;;  %v1115_v6 = vld [vmem:[#allocation0 + $0x3c0] sm:$0xff]  ;;  %2650 = vst [vmem:[%s3628_s2 + $0x118] sm:$0xff] %v1080_v62  ;;  %v1110_v7 = vsub.f32 %v1105_v4, %v1107_v5  ;;  %v1135_v13 = vld [vmem:[#allocation0 + $0x128] sm:$0xff] }
  0x70   :  { %v1097_v1 = vld [vmem:[#allocation2 + $0x658] sm:$0xff]  ;;  %2649 = vst [vmem:[%s3628_s2 + $0x650] sm:$0xff] %v1070_v58  ;;  %v1117_v8 = vld [vmem:[#allocation2 + $0x3c0] sm:$0xff]  ;;  %v1137_v14 = vld [vmem:[#allocation2 + $0x128] sm:$0xff] }
  0x71   :  { %v1100_v3 = vsub.f32 %v1095_v0, %v1097_v1  ;;  %v1125_v9 = vld [vmem:[#allocation0 + $0x660] sm:$0xff]  ;;  %2651 = vst [vmem:[%s3628_s2 + $0x3b8] sm:$0xff] %v1090_v2  ;;  %v1120_v11 = vsub.f32 %v1115_v6, %v1117_v8  ;;  %v1145_v15 = vld [vmem:[#allocation0 + $0x3c8] sm:$0xff]  ;;  %2653 = vst [vmem:[%s3628_s2 + $0x120] sm:$0xff] %v1110_v7  ;;  %v1140_v16 = vsub.f32 %v1135_v13, %v1137_v14 }
  0x72   :  { %v1127_v10 = vld [vmem:[#allocation2 + $0x660] sm:$0xff]  ;;  %v1147_v17 = vld [vmem:[#allocation2 + $0x3c8] sm:$0xff]  ;;  %v1165_v22 = vld [vmem:[#allocation0 + $0x130] sm:$0xff] }
  0x73   :  { %2652 = vst [vmem:[%s3628_s2 + $0x658] sm:$0xff] %v1100_v3  ;;  %v1130_v12 = vsub.f32 %v1125_v9, %v1127_v10  ;;  %v1155_v18 = vld [vmem:[#allocation0 + $0x668] sm:$0xff]  ;;  %2654 = vst [vmem:[%s3628_s2 + $0x3c0] sm:$0xff] %v1120_v11  ;;  %v1150_v20 = vsub.f32 %v1145_v15, %v1147_v17  ;;  %v1167_v23 = vld [vmem:[#allocation2 + $0x130] sm:$0xff] }
  0x74   :  { %v1157_v19 = vld [vmem:[#allocation2 + $0x668] sm:$0xff]  ;;  %v1175_v24 = vld [vmem:[#allocation0 + $0x3d0] sm:$0xff]  ;;  %2656 = vst [vmem:[%s3628_s2 + $0x128] sm:$0xff] %v1140_v16  ;;  %v1170_v25 = vsub.f32 %v1165_v22, %v1167_v23  ;;  %v1195_v31 = vld [vmem:[#allocation0 + $0x138] sm:$0xff] }
  0x75   :  { %2655 = vst [vmem:[%s3628_s2 + $0x660] sm:$0xff] %v1130_v12  ;;  %v1160_v21 = vsub.f32 %v1155_v18, %v1157_v19  ;;  %v1177_v26 = vld [vmem:[#allocation2 + $0x3d0] sm:$0xff]  ;;  %2657 = vst [vmem:[%s3628_s2 + $0x3c8] sm:$0xff] %v1150_v20  ;;  %v1197_v32 = vld [vmem:[#allocation2 + $0x138] sm:$0xff] }
  0x76   :  { %v1185_v27 = vld [vmem:[#allocation0 + $0x670] sm:$0xff]  ;;  %v1180_v29 = vsub.f32 %v1175_v24, %v1177_v26  ;;  %v1205_v33 = vld [vmem:[#allocation0 + $0x3d8] sm:$0xff]  ;;  %2659 = vst [vmem:[%s3628_s2 + $0x130] sm:$0xff] %v1170_v25  ;;  %v1200_v34 = vsub.f32 %v1195_v31, %v1197_v32  ;;  %v1225_v40 = vld [vmem:[#allocation0 + $0x140] sm:$0xff] }
  0x77   :  { %v1187_v28 = vld [vmem:[#allocation2 + $0x670] sm:$0xff]  ;;  %2658 = vst [vmem:[%s3628_s2 + $0x668] sm:$0xff] %v1160_v21  ;;  %v1207_v35 = vld [vmem:[#allocation2 + $0x3d8] sm:$0xff]  ;;  %v1227_v41 = vld [vmem:[#allocation2 + $0x140] sm:$0xff] }
  0x78   :  { %v1190_v30 = vsub.f32 %v1185_v27, %v1187_v28  ;;  %v1215_v36 = vld [vmem:[#allocation0 + $0x678] sm:$0xff]  ;;  %2660 = vst [vmem:[%s3628_s2 + $0x3d0] sm:$0xff] %v1180_v29  ;;  %v1210_v38 = vsub.f32 %v1205_v33, %v1207_v35  ;;  %v1235_v42 = vld [vmem:[#allocation0 + $0x3e0] sm:$0xff]  ;;  %2662 = vst [vmem:[%s3628_s2 + $0x138] sm:$0xff] %v1200_v34  ;;  %v1230_v43 = vsub.f32 %v1225_v40, %v1227_v41 }
  0x79   :  { %v1217_v37 = vld [vmem:[#allocation2 + $0x678] sm:$0xff]  ;;  %v1237_v44 = vld [vmem:[#allocation2 + $0x3e0] sm:$0xff]  ;;  %v1255_v49 = vld [vmem:[#allocation0 + $0x148] sm:$0xff] }
  0x7a   :  { %2661 = vst [vmem:[%s3628_s2 + $0x670] sm:$0xff] %v1190_v30  ;;  %v1220_v39 = vsub.f32 %v1215_v36, %v1217_v37  ;;  %v1245_v45 = vld [vmem:[#allocation0 + $0x680] sm:$0xff]  ;;  %2663 = vst [vmem:[%s3628_s2 + $0x3d8] sm:$0xff] %v1210_v38  ;;  %v1240_v47 = vsub.f32 %v1235_v42, %v1237_v44  ;;  %v1257_v50 = vld [vmem:[#allocation2 + $0x148] sm:$0xff] }
  0x7b   :  { %v1247_v46 = vld [vmem:[#allocation2 + $0x680] sm:$0xff]  ;;  %v1265_v51 = vld [vmem:[#allocation0 + $0x3e8] sm:$0xff]  ;;  %2665 = vst [vmem:[%s3628_s2 + $0x140] sm:$0xff] %v1230_v43  ;;  %v1260_v52 = vsub.f32 %v1255_v49, %v1257_v50  ;;  %v1285_v58 = vld [vmem:[#allocation0 + $0x150] sm:$0xff] }
  0x7c   :  { %2664 = vst [vmem:[%s3628_s2 + $0x678] sm:$0xff] %v1220_v39  ;;  %v1250_v48 = vsub.f32 %v1245_v45, %v1247_v46  ;;  %v1267_v53 = vld [vmem:[#allocation2 + $0x3e8] sm:$0xff]  ;;  %2666 = vst [vmem:[%s3628_s2 + $0x3e0] sm:$0xff] %v1240_v47  ;;  %v1287_v59 = vld [vmem:[#allocation2 + $0x150] sm:$0xff] }
  0x7d   :  { %v1275_v54 = vld [vmem:[#allocation0 + $0x688] sm:$0xff]  ;;  %v1270_v56 = vsub.f32 %v1265_v51, %v1267_v53  ;;  %v1295_v60 = vld [vmem:[#allocation0 + $0x3f0] sm:$0xff]  ;;  %2668 = vst [vmem:[%s3628_s2 + $0x148] sm:$0xff] %v1260_v52  ;;  %v1290_v61 = vsub.f32 %v1285_v58, %v1287_v59  ;;  %v1315_v3 = vld [vmem:[#allocation0 + $0x158] sm:$0xff] }
  0x7e   :  { %v1277_v55 = vld [vmem:[#allocation2 + $0x688] sm:$0xff]  ;;  %2667 = vst [vmem:[%s3628_s2 + $0x680] sm:$0xff] %v1250_v48  ;;  %v1297_v62 = vld [vmem:[#allocation2 + $0x3f0] sm:$0xff]  ;;  %v1317_v4 = vld [vmem:[#allocation2 + $0x158] sm:$0xff] }
  0x7f   :  { %v1280_v57 = vsub.f32 %v1275_v54, %v1277_v55  ;;  %v1305_v63 = vld [vmem:[#allocation0 + $0x690] sm:$0xff]  ;;  %2669 = vst [vmem:[%s3628_s2 + $0x3e8] sm:$0xff] %v1270_v56  ;;  %v1300_v1 = vsub.f32 %v1295_v60, %v1297_v62  ;;  %v1325_v5 = vld [vmem:[#allocation0 + $0x3f8] sm:$0xff]  ;;  %2671 = vst [vmem:[%s3628_s2 + $0x150] sm:$0xff] %v1290_v61  ;;  %v1320_v6 = vsub.f32 %v1315_v3, %v1317_v4 }
  0x80   :  { %v1307_v0 = vld [vmem:[#allocation2 + $0x690] sm:$0xff]  ;;  %v1327_v7 = vld [vmem:[#allocation2 + $0x3f8] sm:$0xff]  ;;  %v1345_v12 = vld [vmem:[#allocation0 + $0x160] sm:$0xff] }
  0x81   :  { %2670 = vst [vmem:[%s3628_s2 + $0x688] sm:$0xff] %v1280_v57  ;;  %v1310_v2 = vsub.f32 %v1305_v63, %v1307_v0  ;;  %v1335_v8 = vld [vmem:[#allocation0 + $0x698] sm:$0xff]  ;;  %2672 = vst [vmem:[%s3628_s2 + $0x3f0] sm:$0xff] %v1300_v1  ;;  %v1330_v10 = vsub.f32 %v1325_v5, %v1327_v7  ;;  %v1347_v13 = vld [vmem:[#allocation2 + $0x160] sm:$0xff] }
  0x82   :  { %v1337_v9 = vld [vmem:[#allocation2 + $0x698] sm:$0xff]  ;;  %v1355_v14 = vld [vmem:[#allocation0 + $0x400] sm:$0xff]  ;;  %2674 = vst [vmem:[%s3628_s2 + $0x158] sm:$0xff] %v1320_v6  ;;  %v1350_v15 = vsub.f32 %v1345_v12, %v1347_v13  ;;  %v1375_v21 = vld [vmem:[#allocation0 + $0x168] sm:$0xff] }
  0x83   :  { %2673 = vst [vmem:[%s3628_s2 + $0x690] sm:$0xff] %v1310_v2  ;;  %v1340_v11 = vsub.f32 %v1335_v8, %v1337_v9  ;;  %v1357_v16 = vld [vmem:[#allocation2 + $0x400] sm:$0xff]  ;;  %2675 = vst [vmem:[%s3628_s2 + $0x3f8] sm:$0xff] %v1330_v10  ;;  %v1377_v22 = vld [vmem:[#allocation2 + $0x168] sm:$0xff] }
  0x84   :  { %v1365_v17 = vld [vmem:[#allocation0 + $0x6a0] sm:$0xff]  ;;  %v1360_v19 = vsub.f32 %v1355_v14, %v1357_v16  ;;  %v1385_v23 = vld [vmem:[#allocation0 + $0x408] sm:$0xff]  ;;  %2677 = vst [vmem:[%s3628_s2 + $0x160] sm:$0xff] %v1350_v15  ;;  %v1380_v24 = vsub.f32 %v1375_v21, %v1377_v22  ;;  %v1405_v30 = vld [vmem:[#allocation0 + $0x170] sm:$0xff] }
  0x85   :  { %v1367_v18 = vld [vmem:[#allocation2 + $0x6a0] sm:$0xff]  ;;  %2676 = vst [vmem:[%s3628_s2 + $0x698] sm:$0xff] %v1340_v11  ;;  %v1387_v25 = vld [vmem:[#allocation2 + $0x408] sm:$0xff]  ;;  %v1407_v31 = vld [vmem:[#allocation2 + $0x170] sm:$0xff] }
  0x86   :  { %v1370_v20 = vsub.f32 %v1365_v17, %v1367_v18  ;;  %v1395_v26 = vld [vmem:[#allocation0 + $0x6a8] sm:$0xff]  ;;  %2678 = vst [vmem:[%s3628_s2 + $0x400] sm:$0xff] %v1360_v19  ;;  %v1390_v28 = vsub.f32 %v1385_v23, %v1387_v25  ;;  %v1415_v32 = vld [vmem:[#allocation0 + $0x410] sm:$0xff]  ;;  %2680 = vst [vmem:[%s3628_s2 + $0x168] sm:$0xff] %v1380_v24  ;;  %v1410_v33 = vsub.f32 %v1405_v30, %v1407_v31 }
  0x87   :  { %v1397_v27 = vld [vmem:[#allocation2 + $0x6a8] sm:$0xff]  ;;  %v1417_v34 = vld [vmem:[#allocation2 + $0x410] sm:$0xff]  ;;  %v1435_v39 = vld [vmem:[#allocation0 + $0x178] sm:$0xff] }
  0x88   :  { %2679 = vst [vmem:[%s3628_s2 + $0x6a0] sm:$0xff] %v1370_v20  ;;  %v1400_v29 = vsub.f32 %v1395_v26, %v1397_v27  ;;  %v1425_v35 = vld [vmem:[#allocation0 + $0x6b0] sm:$0xff]  ;;  %2681 = vst [vmem:[%s3628_s2 + $0x408] sm:$0xff] %v1390_v28  ;;  %v1420_v37 = vsub.f32 %v1415_v32, %v1417_v34  ;;  %v1437_v40 = vld [vmem:[#allocation2 + $0x178] sm:$0xff] }
  0x89   :  { %v1427_v36 = vld [vmem:[#allocation2 + $0x6b0] sm:$0xff]  ;;  %v1445_v41 = vld [vmem:[#allocation0 + $0x418] sm:$0xff]  ;;  %2683 = vst [vmem:[%s3628_s2 + $0x170] sm:$0xff] %v1410_v33  ;;  %v1440_v42 = vsub.f32 %v1435_v39, %v1437_v40  ;;  %v1465_v48 = vld [vmem:[#allocation0 + $0x180] sm:$0xff] }
  0x8a   :  { %2682 = vst [vmem:[%s3628_s2 + $0x6a8] sm:$0xff] %v1400_v29  ;;  %v1430_v38 = vsub.f32 %v1425_v35, %v1427_v36  ;;  %v1447_v43 = vld [vmem:[#allocation2 + $0x418] sm:$0xff]  ;;  %2684 = vst [vmem:[%s3628_s2 + $0x410] sm:$0xff] %v1420_v37  ;;  %v1467_v49 = vld [vmem:[#allocation2 + $0x180] sm:$0xff] }
  0x8b   :  { %v1455_v44 = vld [vmem:[#allocation0 + $0x6b8] sm:$0xff]  ;;  %v1450_v46 = vsub.f32 %v1445_v41, %v1447_v43  ;;  %v1475_v50 = vld [vmem:[#allocation0 + $0x420] sm:$0xff]  ;;  %2686 = vst [vmem:[%s3628_s2 + $0x178] sm:$0xff] %v1440_v42  ;;  %v1470_v51 = vsub.f32 %v1465_v48, %v1467_v49  ;;  %v1495_v57 = vld [vmem:[#allocation0 + $0x188] sm:$0xff] }
  0x8c   :  { %v1457_v45 = vld [vmem:[#allocation2 + $0x6b8] sm:$0xff]  ;;  %2685 = vst [vmem:[%s3628_s2 + $0x6b0] sm:$0xff] %v1430_v38  ;;  %v1477_v52 = vld [vmem:[#allocation2 + $0x420] sm:$0xff]  ;;  %v1497_v58 = vld [vmem:[#allocation2 + $0x188] sm:$0xff] }
  0x8d   :  { %v1460_v47 = vsub.f32 %v1455_v44, %v1457_v45  ;;  %v1485_v53 = vld [vmem:[#allocation0 + $0x6c0] sm:$0xff]  ;;  %2687 = vst [vmem:[%s3628_s2 + $0x418] sm:$0xff] %v1450_v46  ;;  %v1480_v55 = vsub.f32 %v1475_v50, %v1477_v52  ;;  %v1505_v59 = vld [vmem:[#allocation0 + $0x428] sm:$0xff]  ;;  %2689 = vst [vmem:[%s3628_s2 + $0x180] sm:$0xff] %v1470_v51  ;;  %v1500_v60 = vsub.f32 %v1495_v57, %v1497_v58 }
  0x8e   :  { %v1487_v54 = vld [vmem:[#allocation2 + $0x6c0] sm:$0xff]  ;;  %v1507_v61 = vld [vmem:[#allocation2 + $0x428] sm:$0xff]  ;;  %v1525_v2 = vld [vmem:[#allocation0 + $0x190] sm:$0xff] }
  0x8f   :  { %2688 = vst [vmem:[%s3628_s2 + $0x6b8] sm:$0xff] %v1460_v47  ;;  %v1490_v56 = vsub.f32 %v1485_v53, %v1487_v54  ;;  %v1515_v62 = vld [vmem:[#allocation0 + $0x6c8] sm:$0xff]  ;;  %2690 = vst [vmem:[%s3628_s2 + $0x420] sm:$0xff] %v1480_v55  ;;  %v1510_v0 = vsub.f32 %v1505_v59, %v1507_v61  ;;  %v1527_v3 = vld [vmem:[#allocation2 + $0x190] sm:$0xff] }
  0x90   :  { %v1517_v63 = vld [vmem:[#allocation2 + $0x6c8] sm:$0xff]  ;;  %v1535_v4 = vld [vmem:[#allocation0 + $0x430] sm:$0xff]  ;;  %2692 = vst [vmem:[%s3628_s2 + $0x188] sm:$0xff] %v1500_v60  ;;  %v1530_v5 = vsub.f32 %v1525_v2, %v1527_v3  ;;  %v1555_v11 = vld [vmem:[#allocation0 + $0x198] sm:$0xff] }
  0x91   :  { %2691 = vst [vmem:[%s3628_s2 + $0x6c0] sm:$0xff] %v1490_v56  ;;  %v1520_v1 = vsub.f32 %v1515_v62, %v1517_v63  ;;  %v1537_v6 = vld [vmem:[#allocation2 + $0x430] sm:$0xff]  ;;  %2693 = vst [vmem:[%s3628_s2 + $0x428] sm:$0xff] %v1510_v0  ;;  %v1557_v12 = vld [vmem:[#allocation2 + $0x198] sm:$0xff] }
  0x92   :  { %v1545_v7 = vld [vmem:[#allocation0 + $0x6d0] sm:$0xff]  ;;  %v1540_v9 = vsub.f32 %v1535_v4, %v1537_v6  ;;  %v1565_v13 = vld [vmem:[#allocation0 + $0x438] sm:$0xff]  ;;  %2695 = vst [vmem:[%s3628_s2 + $0x190] sm:$0xff] %v1530_v5  ;;  %v1560_v14 = vsub.f32 %v1555_v11, %v1557_v12  ;;  %v1585_v20 = vld [vmem:[#allocation0 + $0x1a0] sm:$0xff] }
  0x93   :  { %v1547_v8 = vld [vmem:[#allocation2 + $0x6d0] sm:$0xff]  ;;  %2694 = vst [vmem:[%s3628_s2 + $0x6c8] sm:$0xff] %v1520_v1  ;;  %v1567_v15 = vld [vmem:[#allocation2 + $0x438] sm:$0xff]  ;;  %v1587_v21 = vld [vmem:[#allocation2 + $0x1a0] sm:$0xff] }
  0x94   :  { %v1550_v10 = vsub.f32 %v1545_v7, %v1547_v8  ;;  %v1575_v16 = vld [vmem:[#allocation0 + $0x6d8] sm:$0xff]  ;;  %2696 = vst [vmem:[%s3628_s2 + $0x430] sm:$0xff] %v1540_v9  ;;  %v1570_v18 = vsub.f32 %v1565_v13, %v1567_v15  ;;  %v1595_v22 = vld [vmem:[#allocation0 + $0x440] sm:$0xff]  ;;  %2698 = vst [vmem:[%s3628_s2 + $0x198] sm:$0xff] %v1560_v14  ;;  %v1590_v23 = vsub.f32 %v1585_v20, %v1587_v21 }
  0x95   :  { %v1577_v17 = vld [vmem:[#allocation2 + $0x6d8] sm:$0xff]  ;;  %v1597_v24 = vld [vmem:[#allocation2 + $0x440] sm:$0xff]  ;;  %v1615_v29 = vld [vmem:[#allocation0 + $0x1a8] sm:$0xff] }
  0x96   :  { %2697 = vst [vmem:[%s3628_s2 + $0x6d0] sm:$0xff] %v1550_v10  ;;  %v1580_v19 = vsub.f32 %v1575_v16, %v1577_v17  ;;  %v1605_v25 = vld [vmem:[#allocation0 + $0x6e0] sm:$0xff]  ;;  %2699 = vst [vmem:[%s3628_s2 + $0x438] sm:$0xff] %v1570_v18  ;;  %v1600_v27 = vsub.f32 %v1595_v22, %v1597_v24  ;;  %v1617_v30 = vld [vmem:[#allocation2 + $0x1a8] sm:$0xff] }
  0x97   :  { %v1607_v26 = vld [vmem:[#allocation2 + $0x6e0] sm:$0xff]  ;;  %v1625_v31 = vld [vmem:[#allocation0 + $0x448] sm:$0xff]  ;;  %2701 = vst [vmem:[%s3628_s2 + $0x1a0] sm:$0xff] %v1590_v23  ;;  %v1620_v32 = vsub.f32 %v1615_v29, %v1617_v30  ;;  %v1645_v38 = vld [vmem:[#allocation0 + $0x1b0] sm:$0xff] }
  0x98   :  { %2700 = vst [vmem:[%s3628_s2 + $0x6d8] sm:$0xff] %v1580_v19  ;;  %v1610_v28 = vsub.f32 %v1605_v25, %v1607_v26  ;;  %v1627_v33 = vld [vmem:[#allocation2 + $0x448] sm:$0xff]  ;;  %2702 = vst [vmem:[%s3628_s2 + $0x440] sm:$0xff] %v1600_v27  ;;  %v1647_v39 = vld [vmem:[#allocation2 + $0x1b0] sm:$0xff] }
  0x99   :  { %v1635_v34 = vld [vmem:[#allocation0 + $0x6e8] sm:$0xff]  ;;  %v1630_v36 = vsub.f32 %v1625_v31, %v1627_v33  ;;  %v1655_v40 = vld [vmem:[#allocation0 + $0x450] sm:$0xff]  ;;  %2704 = vst [vmem:[%s3628_s2 + $0x1a8] sm:$0xff] %v1620_v32  ;;  %v1650_v41 = vsub.f32 %v1645_v38, %v1647_v39  ;;  %v1675_v47 = vld [vmem:[#allocation0 + $0x1b8] sm:$0xff] }
  0x9a   :  { %v1637_v35 = vld [vmem:[#allocation2 + $0x6e8] sm:$0xff]  ;;  %2703 = vst [vmem:[%s3628_s2 + $0x6e0] sm:$0xff] %v1610_v28  ;;  %v1657_v42 = vld [vmem:[#allocation2 + $0x450] sm:$0xff]  ;;  %v1677_v48 = vld [vmem:[#allocation2 + $0x1b8] sm:$0xff] }
  0x9b   :  { %v1640_v37 = vsub.f32 %v1635_v34, %v1637_v35  ;;  %v1665_v43 = vld [vmem:[#allocation0 + $0x6f0] sm:$0xff]  ;;  %2705 = vst [vmem:[%s3628_s2 + $0x448] sm:$0xff] %v1630_v36  ;;  %v1660_v45 = vsub.f32 %v1655_v40, %v1657_v42  ;;  %v1685_v49 = vld [vmem:[#allocation0 + $0x458] sm:$0xff]  ;;  %2707 = vst [vmem:[%s3628_s2 + $0x1b0] sm:$0xff] %v1650_v41  ;;  %v1680_v50 = vsub.f32 %v1675_v47, %v1677_v48 }
  0x9c   :  { %v1667_v44 = vld [vmem:[#allocation2 + $0x6f0] sm:$0xff]  ;;  %v1687_v51 = vld [vmem:[#allocation2 + $0x458] sm:$0xff]  ;;  %v1705_v56 = vld [vmem:[#allocation0 + $0x1c0] sm:$0xff] }
  0x9d   :  { %2706 = vst [vmem:[%s3628_s2 + $0x6e8] sm:$0xff] %v1640_v37  ;;  %v1670_v46 = vsub.f32 %v1665_v43, %v1667_v44  ;;  %v1695_v52 = vld [vmem:[#allocation0 + $0x6f8] sm:$0xff]  ;;  %2708 = vst [vmem:[%s3628_s2 + $0x450] sm:$0xff] %v1660_v45  ;;  %v1690_v54 = vsub.f32 %v1685_v49, %v1687_v51  ;;  %v1707_v57 = vld [vmem:[#allocation2 + $0x1c0] sm:$0xff] }
  0x9e   :  { %v1697_v53 = vld [vmem:[#allocation2 + $0x6f8] sm:$0xff]  ;;  %v1715_v58 = vld [vmem:[#allocation0 + $0x460] sm:$0xff]  ;;  %2710 = vst [vmem:[%s3628_s2 + $0x1b8] sm:$0xff] %v1680_v50  ;;  %v1710_v59 = vsub.f32 %v1705_v56, %v1707_v57  ;;  %v1735_v1 = vld [vmem:[#allocation0 + $0x1c8] sm:$0xff] }
  0x9f   :  { %2709 = vst [vmem:[%s3628_s2 + $0x6f0] sm:$0xff] %v1670_v46  ;;  %v1700_v55 = vsub.f32 %v1695_v52, %v1697_v53  ;;  %v1717_v60 = vld [vmem:[#allocation2 + $0x460] sm:$0xff]  ;;  %2711 = vst [vmem:[%s3628_s2 + $0x458] sm:$0xff] %v1690_v54  ;;  %v1737_v2 = vld [vmem:[#allocation2 + $0x1c8] sm:$0xff] }
  0xa0   :  { %v1725_v61 = vld [vmem:[#allocation0 + $0x700] sm:$0xff]  ;;  %v1720_v63 = vsub.f32 %v1715_v58, %v1717_v60  ;;  %v1745_v3 = vld [vmem:[#allocation0 + $0x468] sm:$0xff]  ;;  %2713 = vst [vmem:[%s3628_s2 + $0x1c0] sm:$0xff] %v1710_v59  ;;  %v1740_v4 = vsub.f32 %v1735_v1, %v1737_v2  ;;  %v1765_v10 = vld [vmem:[#allocation0 + $0x1d0] sm:$0xff] }
  0xa1   :  { %v1727_v62 = vld [vmem:[#allocation2 + $0x700] sm:$0xff]  ;;  %2712 = vst [vmem:[%s3628_s2 + $0x6f8] sm:$0xff] %v1700_v55  ;;  %v1747_v5 = vld [vmem:[#allocation2 + $0x468] sm:$0xff]  ;;  %v1767_v11 = vld [vmem:[#allocation2 + $0x1d0] sm:$0xff] }
  0xa2   :  { %v1730_v0 = vsub.f32 %v1725_v61, %v1727_v62  ;;  %v1755_v6 = vld [vmem:[#allocation0 + $0x708] sm:$0xff]  ;;  %2714 = vst [vmem:[%s3628_s2 + $0x460] sm:$0xff] %v1720_v63  ;;  %v1750_v8 = vsub.f32 %v1745_v3, %v1747_v5  ;;  %v1775_v12 = vld [vmem:[#allocation0 + $0x470] sm:$0xff]  ;;  %2716 = vst [vmem:[%s3628_s2 + $0x1c8] sm:$0xff] %v1740_v4  ;;  %v1770_v13 = vsub.f32 %v1765_v10, %v1767_v11 }
  0xa3   :  { %v1757_v7 = vld [vmem:[#allocation2 + $0x708] sm:$0xff]  ;;  %v1777_v14 = vld [vmem:[#allocation2 + $0x470] sm:$0xff]  ;;  %v1795_v19 = vld [vmem:[#allocation0 + $0x1d8] sm:$0xff] }
  0xa4   :  { %2715 = vst [vmem:[%s3628_s2 + $0x700] sm:$0xff] %v1730_v0  ;;  %v1760_v9 = vsub.f32 %v1755_v6, %v1757_v7  ;;  %v1785_v15 = vld [vmem:[#allocation0 + $0x710] sm:$0xff]  ;;  %2717 = vst [vmem:[%s3628_s2 + $0x468] sm:$0xff] %v1750_v8  ;;  %v1780_v17 = vsub.f32 %v1775_v12, %v1777_v14  ;;  %v1797_v20 = vld [vmem:[#allocation2 + $0x1d8] sm:$0xff] }
  0xa5   :  { %v1787_v16 = vld [vmem:[#allocation2 + $0x710] sm:$0xff]  ;;  %v1805_v21 = vld [vmem:[#allocation0 + $0x478] sm:$0xff]  ;;  %2719 = vst [vmem:[%s3628_s2 + $0x1d0] sm:$0xff] %v1770_v13  ;;  %v1800_v22 = vsub.f32 %v1795_v19, %v1797_v20  ;;  %v1825_v28 = vld [vmem:[#allocation0 + $0x1e0] sm:$0xff] }
  0xa6   :  { %2718 = vst [vmem:[%s3628_s2 + $0x708] sm:$0xff] %v1760_v9  ;;  %v1790_v18 = vsub.f32 %v1785_v15, %v1787_v16  ;;  %v1807_v23 = vld [vmem:[#allocation2 + $0x478] sm:$0xff]  ;;  %2720 = vst [vmem:[%s3628_s2 + $0x470] sm:$0xff] %v1780_v17  ;;  %v1827_v29 = vld [vmem:[#allocation2 + $0x1e0] sm:$0xff] }
  0xa7   :  { %v1815_v24 = vld [vmem:[#allocation0 + $0x718] sm:$0xff]  ;;  %v1810_v26 = vsub.f32 %v1805_v21, %v1807_v23  ;;  %v1835_v30 = vld [vmem:[#allocation0 + $0x480] sm:$0xff]  ;;  %2722 = vst [vmem:[%s3628_s2 + $0x1d8] sm:$0xff] %v1800_v22  ;;  %v1830_v31 = vsub.f32 %v1825_v28, %v1827_v29  ;;  %v1855_v37 = vld [vmem:[#allocation0 + $0x1e8] sm:$0xff] }
  0xa8   :  { %v1817_v25 = vld [vmem:[#allocation2 + $0x718] sm:$0xff]  ;;  %2721 = vst [vmem:[%s3628_s2 + $0x710] sm:$0xff] %v1790_v18  ;;  %v1837_v32 = vld [vmem:[#allocation2 + $0x480] sm:$0xff]  ;;  %v1857_v38 = vld [vmem:[#allocation2 + $0x1e8] sm:$0xff] }
  0xa9   :  { %v1820_v27 = vsub.f32 %v1815_v24, %v1817_v25  ;;  %v1845_v33 = vld [vmem:[#allocation0 + $0x720] sm:$0xff]  ;;  %2723 = vst [vmem:[%s3628_s2 + $0x478] sm:$0xff] %v1810_v26  ;;  %v1840_v35 = vsub.f32 %v1835_v30, %v1837_v32  ;;  %v1865_v39 = vld [vmem:[#allocation0 + $0x488] sm:$0xff]  ;;  %2725 = vst [vmem:[%s3628_s2 + $0x1e0] sm:$0xff] %v1830_v31  ;;  %v1860_v40 = vsub.f32 %v1855_v37, %v1857_v38 }
  0xaa   :  { %v1847_v34 = vld [vmem:[#allocation2 + $0x720] sm:$0xff]  ;;  %v1867_v41 = vld [vmem:[#allocation2 + $0x488] sm:$0xff]  ;;  %v1885_v46 = vld [vmem:[#allocation0 + $0x1f0] sm:$0xff] }
  0xab   :  { %2724 = vst [vmem:[%s3628_s2 + $0x718] sm:$0xff] %v1820_v27  ;;  %v1850_v36 = vsub.f32 %v1845_v33, %v1847_v34  ;;  %v1875_v42 = vld [vmem:[#allocation0 + $0x728] sm:$0xff]  ;;  %2726 = vst [vmem:[%s3628_s2 + $0x480] sm:$0xff] %v1840_v35  ;;  %v1870_v44 = vsub.f32 %v1865_v39, %v1867_v41  ;;  %v1887_v47 = vld [vmem:[#allocation2 + $0x1f0] sm:$0xff] }
  0xac   :  { %v1877_v43 = vld [vmem:[#allocation2 + $0x728] sm:$0xff]  ;;  %v1895_v48 = vld [vmem:[#allocation0 + $0x490] sm:$0xff]  ;;  %2728 = vst [vmem:[%s3628_s2 + $0x1e8] sm:$0xff] %v1860_v40  ;;  %v1890_v49 = vsub.f32 %v1885_v46, %v1887_v47  ;;  %v1915_v55 = vld [vmem:[#allocation0 + $0x1f8] sm:$0xff] }
  0xad   :  { %2727 = vst [vmem:[%s3628_s2 + $0x720] sm:$0xff] %v1850_v36  ;;  %v1880_v45 = vsub.f32 %v1875_v42, %v1877_v43  ;;  %v1897_v50 = vld [vmem:[#allocation2 + $0x490] sm:$0xff]  ;;  %2729 = vst [vmem:[%s3628_s2 + $0x488] sm:$0xff] %v1870_v44  ;;  %v1917_v56 = vld [vmem:[#allocation2 + $0x1f8] sm:$0xff] }
  0xae   :  { %v1905_v51 = vld [vmem:[#allocation0 + $0x730] sm:$0xff]  ;;  %v1900_v53 = vsub.f32 %v1895_v48, %v1897_v50  ;;  %v1925_v57 = vld [vmem:[#allocation0 + $0x498] sm:$0xff]  ;;  %2731 = vst [vmem:[%s3628_s2 + $0x1f0] sm:$0xff] %v1890_v49  ;;  %v1920_v58 = vsub.f32 %v1915_v55, %v1917_v56  ;;  %v1945_v0 = vld [vmem:[#allocation0 + $0x200] sm:$0xff] }
  0xaf   :  { %v1907_v52 = vld [vmem:[#allocation2 + $0x730] sm:$0xff]  ;;  %2730 = vst [vmem:[%s3628_s2 + $0x728] sm:$0xff] %v1880_v45  ;;  %v1927_v59 = vld [vmem:[#allocation2 + $0x498] sm:$0xff]  ;;  %v1947_v1 = vld [vmem:[#allocation2 + $0x200] sm:$0xff] }
  0xb0   :  { %v1910_v54 = vsub.f32 %v1905_v51, %v1907_v52  ;;  %v1935_v60 = vld [vmem:[#allocation0 + $0x738] sm:$0xff]  ;;  %2732 = vst [vmem:[%s3628_s2 + $0x490] sm:$0xff] %v1900_v53  ;;  %v1930_v62 = vsub.f32 %v1925_v57, %v1927_v59  ;;  %v1955_v2 = vld [vmem:[#allocation0 + $0x4a0] sm:$0xff]  ;;  %2734 = vst [vmem:[%s3628_s2 + $0x1f8] sm:$0xff] %v1920_v58  ;;  %v1950_v3 = vsub.f32 %v1945_v0, %v1947_v1 }
  0xb1   :  { %v1937_v61 = vld [vmem:[#allocation2 + $0x738] sm:$0xff]  ;;  %v1957_v4 = vld [vmem:[#allocation2 + $0x4a0] sm:$0xff]  ;;  %v1975_v9 = vld [vmem:[#allocation0 + $0x208] sm:$0xff] }
  0xb2   :  { %2733 = vst [vmem:[%s3628_s2 + $0x730] sm:$0xff] %v1910_v54  ;;  %v1940_v63 = vsub.f32 %v1935_v60, %v1937_v61  ;;  %v1965_v5 = vld [vmem:[#allocation0 + $0x740] sm:$0xff]  ;;  %2735 = vst [vmem:[%s3628_s2 + $0x498] sm:$0xff] %v1930_v62  ;;  %v1960_v7 = vsub.f32 %v1955_v2, %v1957_v4  ;;  %v1977_v10 = vld [vmem:[#allocation2 + $0x208] sm:$0xff] }
  0xb3   :  { %v1967_v6 = vld [vmem:[#allocation2 + $0x740] sm:$0xff]  ;;  %v1985_v11 = vld [vmem:[#allocation0 + $0x4a8] sm:$0xff]  ;;  %2737 = vst [vmem:[%s3628_s2 + $0x200] sm:$0xff] %v1950_v3  ;;  %v1980_v12 = vsub.f32 %v1975_v9, %v1977_v10  ;;  %v2005_v18 = vld [vmem:[#allocation0 + $0x210] sm:$0xff] }
  0xb4   :  { %2736 = vst [vmem:[%s3628_s2 + $0x738] sm:$0xff] %v1940_v63  ;;  %v1970_v8 = vsub.f32 %v1965_v5, %v1967_v6  ;;  %v1987_v13 = vld [vmem:[#allocation2 + $0x4a8] sm:$0xff]  ;;  %2738 = vst [vmem:[%s3628_s2 + $0x4a0] sm:$0xff] %v1960_v7  ;;  %v2007_v19 = vld [vmem:[#allocation2 + $0x210] sm:$0xff] }
  0xb5   :  { %v1995_v14 = vld [vmem:[#allocation0 + $0x748] sm:$0xff]  ;;  %v1990_v16 = vsub.f32 %v1985_v11, %v1987_v13  ;;  %v2015_v20 = vld [vmem:[#allocation0 + $0x4b0] sm:$0xff]  ;;  %2740 = vst [vmem:[%s3628_s2 + $0x208] sm:$0xff] %v1980_v12  ;;  %v2010_v21 = vsub.f32 %v2005_v18, %v2007_v19  ;;  %v2035_v27 = vld [vmem:[#allocation0 + $0x218] sm:$0xff] }
  0xb6   :  { %v1997_v15 = vld [vmem:[#allocation2 + $0x748] sm:$0xff]  ;;  %2739 = vst [vmem:[%s3628_s2 + $0x740] sm:$0xff] %v1970_v8  ;;  %v2017_v22 = vld [vmem:[#allocation2 + $0x4b0] sm:$0xff]  ;;  %v2037_v28 = vld [vmem:[#allocation2 + $0x218] sm:$0xff] }
  0xb7   :  { %v2000_v17 = vsub.f32 %v1995_v14, %v1997_v15  ;;  %v2025_v23 = vld [vmem:[#allocation0 + $0x750] sm:$0xff]  ;;  %2741 = vst [vmem:[%s3628_s2 + $0x4a8] sm:$0xff] %v1990_v16  ;;  %v2020_v25 = vsub.f32 %v2015_v20, %v2017_v22  ;;  %v2045_v29 = vld [vmem:[#allocation0 + $0x4b8] sm:$0xff]  ;;  %2743 = vst [vmem:[%s3628_s2 + $0x210] sm:$0xff] %v2010_v21  ;;  %v2040_v30 = vsub.f32 %v2035_v27, %v2037_v28 }
  0xb8   :  { %v2027_v24 = vld [vmem:[#allocation2 + $0x750] sm:$0xff]  ;;  %v2047_v31 = vld [vmem:[#allocation2 + $0x4b8] sm:$0xff]  ;;  %v2065_v36 = vld [vmem:[#allocation0 + $0x220] sm:$0xff] }
  0xb9   :  { %2742 = vst [vmem:[%s3628_s2 + $0x748] sm:$0xff] %v2000_v17  ;;  %v2030_v26 = vsub.f32 %v2025_v23, %v2027_v24  ;;  %v2055_v32 = vld [vmem:[#allocation0 + $0x758] sm:$0xff]  ;;  %2744 = vst [vmem:[%s3628_s2 + $0x4b0] sm:$0xff] %v2020_v25  ;;  %v2050_v34 = vsub.f32 %v2045_v29, %v2047_v31  ;;  %v2067_v37 = vld [vmem:[#allocation2 + $0x220] sm:$0xff] }
  0xba   :  { %v2057_v33 = vld [vmem:[#allocation2 + $0x758] sm:$0xff]  ;;  %v2075_v38 = vld [vmem:[#allocation0 + $0x4c0] sm:$0xff]  ;;  %2746 = vst [vmem:[%s3628_s2 + $0x218] sm:$0xff] %v2040_v30  ;;  %v2070_v39 = vsub.f32 %v2065_v36, %v2067_v37  ;;  %v2095_v45 = vld [vmem:[#allocation0 + $0x228] sm:$0xff] }
  0xbb   :  { %2745 = vst [vmem:[%s3628_s2 + $0x750] sm:$0xff] %v2030_v26  ;;  %v2060_v35 = vsub.f32 %v2055_v32, %v2057_v33  ;;  %v2077_v40 = vld [vmem:[#allocation2 + $0x4c0] sm:$0xff]  ;;  %2747 = vst [vmem:[%s3628_s2 + $0x4b8] sm:$0xff] %v2050_v34  ;;  %v2097_v46 = vld [vmem:[#allocation2 + $0x228] sm:$0xff] }
  0xbc   :  { %v2085_v41 = vld [vmem:[#allocation0 + $0x760] sm:$0xff]  ;;  %v2080_v43 = vsub.f32 %v2075_v38, %v2077_v40  ;;  %v2105_v47 = vld [vmem:[#allocation0 + $0x4c8] sm:$0xff]  ;;  %2749 = vst [vmem:[%s3628_s2 + $0x220] sm:$0xff] %v2070_v39  ;;  %v2100_v48 = vsub.f32 %v2095_v45, %v2097_v46  ;;  %v2125_v54 = vld [vmem:[#allocation0 + $0x230] sm:$0xff] }
  0xbd   :  { %v2087_v42 = vld [vmem:[#allocation2 + $0x760] sm:$0xff]  ;;  %2748 = vst [vmem:[%s3628_s2 + $0x758] sm:$0xff] %v2060_v35  ;;  %v2107_v49 = vld [vmem:[#allocation2 + $0x4c8] sm:$0xff]  ;;  %v2127_v55 = vld [vmem:[#allocation2 + $0x230] sm:$0xff] }
  0xbe   :  { %v2090_v44 = vsub.f32 %v2085_v41, %v2087_v42  ;;  %v2115_v50 = vld [vmem:[#allocation0 + $0x768] sm:$0xff]  ;;  %2750 = vst [vmem:[%s3628_s2 + $0x4c0] sm:$0xff] %v2080_v43  ;;  %v2110_v52 = vsub.f32 %v2105_v47, %v2107_v49  ;;  %v2135_v56 = vld [vmem:[#allocation0 + $0x4d0] sm:$0xff]  ;;  %2752 = vst [vmem:[%s3628_s2 + $0x228] sm:$0xff] %v2100_v48  ;;  %v2130_v57 = vsub.f32 %v2125_v54, %v2127_v55 }
  0xbf   :  { %v2117_v51 = vld [vmem:[#allocation2 + $0x768] sm:$0xff]  ;;  %v2137_v58 = vld [vmem:[#allocation2 + $0x4d0] sm:$0xff]  ;;  %v2155_v63 = vld [vmem:[#allocation0 + $0x238] sm:$0xff] }
  0xc0   :  { %2751 = vst [vmem:[%s3628_s2 + $0x760] sm:$0xff] %v2090_v44  ;;  %v2120_v53 = vsub.f32 %v2115_v50, %v2117_v51  ;;  %v2145_v59 = vld [vmem:[#allocation0 + $0x770] sm:$0xff]  ;;  %2753 = vst [vmem:[%s3628_s2 + $0x4c8] sm:$0xff] %v2110_v52  ;;  %v2140_v61 = vsub.f32 %v2135_v56, %v2137_v58  ;;  %v2157_v0 = vld [vmem:[#allocation2 + $0x238] sm:$0xff] }
  0xc1   :  { %v2147_v60 = vld [vmem:[#allocation2 + $0x770] sm:$0xff]  ;;  %v2165_v1 = vld [vmem:[#allocation0 + $0x4d8] sm:$0xff]  ;;  %2755 = vst [vmem:[%s3628_s2 + $0x230] sm:$0xff] %v2130_v57  ;;  %v2160_v2 = vsub.f32 %v2155_v63, %v2157_v0  ;;  %v2185_v8 = vld [vmem:[#allocation0 + $0x240] sm:$0xff] }
  0xc2   :  { %2754 = vst [vmem:[%s3628_s2 + $0x768] sm:$0xff] %v2120_v53  ;;  %v2150_v62 = vsub.f32 %v2145_v59, %v2147_v60  ;;  %v2167_v3 = vld [vmem:[#allocation2 + $0x4d8] sm:$0xff]  ;;  %2756 = vst [vmem:[%s3628_s2 + $0x4d0] sm:$0xff] %v2140_v61  ;;  %v2187_v9 = vld [vmem:[#allocation2 + $0x240] sm:$0xff] }
  0xc3   :  { %v2175_v4 = vld [vmem:[#allocation0 + $0x778] sm:$0xff]  ;;  %v2170_v6 = vsub.f32 %v2165_v1, %v2167_v3  ;;  %v2195_v10 = vld [vmem:[#allocation0 + $0x4e0] sm:$0xff]  ;;  %2758 = vst [vmem:[%s3628_s2 + $0x238] sm:$0xff] %v2160_v2  ;;  %v2190_v11 = vsub.f32 %v2185_v8, %v2187_v9  ;;  %v2215_v17 = vld [vmem:[#allocation0 + $0x248] sm:$0xff] }
  0xc4   :  { %v2177_v5 = vld [vmem:[#allocation2 + $0x778] sm:$0xff]  ;;  %2757 = vst [vmem:[%s3628_s2 + $0x770] sm:$0xff] %v2150_v62  ;;  %v2197_v12 = vld [vmem:[#allocation2 + $0x4e0] sm:$0xff]  ;;  %v2217_v18 = vld [vmem:[#allocation2 + $0x248] sm:$0xff] }
  0xc5   :  { %v2180_v7 = vsub.f32 %v2175_v4, %v2177_v5  ;;  %v2205_v13 = vld [vmem:[#allocation0 + $0x780] sm:$0xff]  ;;  %2759 = vst [vmem:[%s3628_s2 + $0x4d8] sm:$0xff] %v2170_v6  ;;  %v2200_v15 = vsub.f32 %v2195_v10, %v2197_v12  ;;  %v2225_v19 = vld [vmem:[#allocation0 + $0x4e8] sm:$0xff]  ;;  %2761 = vst [vmem:[%s3628_s2 + $0x240] sm:$0xff] %v2190_v11  ;;  %v2220_v20 = vsub.f32 %v2215_v17, %v2217_v18 }
  0xc6   :  { %v2207_v14 = vld [vmem:[#allocation2 + $0x780] sm:$0xff]  ;;  %v2227_v21 = vld [vmem:[#allocation2 + $0x4e8] sm:$0xff]  ;;  %v2245_v26 = vld [vmem:[#allocation0 + $0x250] sm:$0xff] }
  0xc7   :  { %2760 = vst [vmem:[%s3628_s2 + $0x778] sm:$0xff] %v2180_v7  ;;  %v2210_v16 = vsub.f32 %v2205_v13, %v2207_v14  ;;  %v2235_v22 = vld [vmem:[#allocation0 + $0x788] sm:$0xff]  ;;  %2762 = vst [vmem:[%s3628_s2 + $0x4e0] sm:$0xff] %v2200_v15  ;;  %v2230_v24 = vsub.f32 %v2225_v19, %v2227_v21  ;;  %v2247_v27 = vld [vmem:[#allocation2 + $0x250] sm:$0xff] }
  0xc8   :  { %v2237_v23 = vld [vmem:[#allocation2 + $0x788] sm:$0xff]  ;;  %v2255_v28 = vld [vmem:[#allocation0 + $0x4f0] sm:$0xff]  ;;  %2764 = vst [vmem:[%s3628_s2 + $0x248] sm:$0xff] %v2220_v20  ;;  %v2250_v29 = vsub.f32 %v2245_v26, %v2247_v27  ;;  %v2275_v35 = vld [vmem:[#allocation0 + $0x258] sm:$0xff] }
  0xc9   :  { %2763 = vst [vmem:[%s3628_s2 + $0x780] sm:$0xff] %v2210_v16  ;;  %v2240_v25 = vsub.f32 %v2235_v22, %v2237_v23  ;;  %v2257_v30 = vld [vmem:[#allocation2 + $0x4f0] sm:$0xff]  ;;  %2765 = vst [vmem:[%s3628_s2 + $0x4e8] sm:$0xff] %v2230_v24  ;;  %v2277_v36 = vld [vmem:[#allocation2 + $0x258] sm:$0xff] }
  0xca   :  { %v2265_v31 = vld [vmem:[#allocation0 + $0x790] sm:$0xff]  ;;  %v2260_v33 = vsub.f32 %v2255_v28, %v2257_v30  ;;  %v2285_v37 = vld [vmem:[#allocation0 + $0x4f8] sm:$0xff]  ;;  %2767 = vst [vmem:[%s3628_s2 + $0x250] sm:$0xff] %v2250_v29  ;;  %v2280_v38 = vsub.f32 %v2275_v35, %v2277_v36  ;;  %v2305_v44 = vld [vmem:[#allocation0 + $0x260] sm:$0xff] }
  0xcb   :  { %v2267_v32 = vld [vmem:[#allocation2 + $0x790] sm:$0xff]  ;;  %2766 = vst [vmem:[%s3628_s2 + $0x788] sm:$0xff] %v2240_v25  ;;  %v2287_v39 = vld [vmem:[#allocation2 + $0x4f8] sm:$0xff]  ;;  %v2307_v45 = vld [vmem:[#allocation2 + $0x260] sm:$0xff] }
  0xcc   :  { %v2270_v34 = vsub.f32 %v2265_v31, %v2267_v32  ;;  %v2295_v40 = vld [vmem:[#allocation0 + $0x798] sm:$0xff]  ;;  %2768 = vst [vmem:[%s3628_s2 + $0x4f0] sm:$0xff] %v2260_v33  ;;  %v2290_v42 = vsub.f32 %v2285_v37, %v2287_v39  ;;  %v2315_v46 = vld [vmem:[#allocation0 + $0x500] sm:$0xff]  ;;  %2770 = vst [vmem:[%s3628_s2 + $0x258] sm:$0xff] %v2280_v38  ;;  %v2310_v47 = vsub.f32 %v2305_v44, %v2307_v45 }
  0xcd   :  { %v2297_v41 = vld [vmem:[#allocation2 + $0x798] sm:$0xff]  ;;  %v2317_v48 = vld [vmem:[#allocation2 + $0x500] sm:$0xff]  ;;  %v2335_v53 = vld [vmem:[#allocation0 + $0x268] sm:$0xff] }
  0xce   :  { %2769 = vst [vmem:[%s3628_s2 + $0x790] sm:$0xff] %v2270_v34  ;;  %v2300_v43 = vsub.f32 %v2295_v40, %v2297_v41  ;;  %v2325_v49 = vld [vmem:[#allocation0 + $0x7a0] sm:$0xff]  ;;  %2771 = vst [vmem:[%s3628_s2 + $0x4f8] sm:$0xff] %v2290_v42  ;;  %v2320_v51 = vsub.f32 %v2315_v46, %v2317_v48  ;;  %v2337_v54 = vld [vmem:[#allocation2 + $0x268] sm:$0xff] }
  0xcf   :  { %v2327_v50 = vld [vmem:[#allocation2 + $0x7a0] sm:$0xff]  ;;  %v2345_v55 = vld [vmem:[#allocation0 + $0x508] sm:$0xff]  ;;  %2773 = vst [vmem:[%s3628_s2 + $0x260] sm:$0xff] %v2310_v47  ;;  %v2340_v56 = vsub.f32 %v2335_v53, %v2337_v54  ;;  %v2365_v62 = vld [vmem:[#allocation0 + $0x270] sm:$0xff] }
  0xd0   :  { %2772 = vst [vmem:[%s3628_s2 + $0x798] sm:$0xff] %v2300_v43  ;;  %v2330_v52 = vsub.f32 %v2325_v49, %v2327_v50  ;;  %v2347_v57 = vld [vmem:[#allocation2 + $0x508] sm:$0xff]  ;;  %2774 = vst [vmem:[%s3628_s2 + $0x500] sm:$0xff] %v2320_v51  ;;  %v2367_v63 = vld [vmem:[#allocation2 + $0x270] sm:$0xff] }
  0xd1   :  { %v2355_v58 = vld [vmem:[#allocation0 + $0x7a8] sm:$0xff]  ;;  %v2350_v60 = vsub.f32 %v2345_v55, %v2347_v57  ;;  %v2375_v0 = vld [vmem:[#allocation0 + $0x510] sm:$0xff]  ;;  %2776 = vst [vmem:[%s3628_s2 + $0x268] sm:$0xff] %v2340_v56  ;;  %v2370_v1 = vsub.f32 %v2365_v62, %v2367_v63  ;;  %v2395_v7 = vld [vmem:[#allocation0 + $0x278] sm:$0xff] }
  0xd2   :  { %v2357_v59 = vld [vmem:[#allocation2 + $0x7a8] sm:$0xff]  ;;  %2775 = vst [vmem:[%s3628_s2 + $0x7a0] sm:$0xff] %v2330_v52  ;;  %v2377_v2 = vld [vmem:[#allocation2 + $0x510] sm:$0xff]  ;;  %v2397_v8 = vld [vmem:[#allocation2 + $0x278] sm:$0xff] }
  0xd3   :  { %v2360_v61 = vsub.f32 %v2355_v58, %v2357_v59  ;;  %v2385_v3 = vld [vmem:[#allocation0 + $0x7b0] sm:$0xff]  ;;  %2777 = vst [vmem:[%s3628_s2 + $0x508] sm:$0xff] %v2350_v60  ;;  %v2380_v5 = vsub.f32 %v2375_v0, %v2377_v2  ;;  %v2405_v9 = vld [vmem:[#allocation0 + $0x518] sm:$0xff]  ;;  %2779 = vst [vmem:[%s3628_s2 + $0x270] sm:$0xff] %v2370_v1  ;;  %v2400_v10 = vsub.f32 %v2395_v7, %v2397_v8 }
  0xd4   :  { %v2387_v4 = vld [vmem:[#allocation2 + $0x7b0] sm:$0xff]  ;;  %v2407_v11 = vld [vmem:[#allocation2 + $0x518] sm:$0xff]  ;;  %v2425_v16 = vld [vmem:[#allocation0 + $0x280] sm:$0xff] }
  0xd5   :  { %2778 = vst [vmem:[%s3628_s2 + $0x7a8] sm:$0xff] %v2360_v61  ;;  %v2390_v6 = vsub.f32 %v2385_v3, %v2387_v4  ;;  %v2415_v12 = vld [vmem:[#allocation0 + $0x7b8] sm:$0xff]  ;;  %2780 = vst [vmem:[%s3628_s2 + $0x510] sm:$0xff] %v2380_v5  ;;  %v2410_v14 = vsub.f32 %v2405_v9, %v2407_v11  ;;  %v2427_v17 = vld [vmem:[#allocation2 + $0x280] sm:$0xff] }
  0xd6   :  { %v2417_v13 = vld [vmem:[#allocation2 + $0x7b8] sm:$0xff]  ;;  %v2435_v18 = vld [vmem:[#allocation0 + $0x520] sm:$0xff]  ;;  %2782 = vst [vmem:[%s3628_s2 + $0x278] sm:$0xff] %v2400_v10  ;;  %v2430_v19 = vsub.f32 %v2425_v16, %v2427_v17  ;;  %v2455_v25 = vld [vmem:[#allocation0 + $0x288] sm:$0xff] }
  0xd7   :  { %2781 = vst [vmem:[%s3628_s2 + $0x7b0] sm:$0xff] %v2390_v6  ;;  %v2420_v15 = vsub.f32 %v2415_v12, %v2417_v13  ;;  %v2437_v20 = vld [vmem:[#allocation2 + $0x520] sm:$0xff]  ;;  %2783 = vst [vmem:[%s3628_s2 + $0x518] sm:$0xff] %v2410_v14  ;;  %v2457_v26 = vld [vmem:[#allocation2 + $0x288] sm:$0xff] }
  0xd8   :  { %v2445_v21 = vld [vmem:[#allocation0 + $0x7c0] sm:$0xff]  ;;  %v2440_v23 = vsub.f32 %v2435_v18, %v2437_v20  ;;  %v2465_v27 = vld [vmem:[#allocation0 + $0x528] sm:$0xff]  ;;  %2785 = vst [vmem:[%s3628_s2 + $0x280] sm:$0xff] %v2430_v19  ;;  %v2460_v28 = vsub.f32 %v2455_v25, %v2457_v26  ;;  %v2485_v34 = vld [vmem:[#allocation0 + $0x290] sm:$0xff] }
  0xd9   :  { %v2447_v22 = vld [vmem:[#allocation2 + $0x7c0] sm:$0xff]  ;;  %2784 = vst [vmem:[%s3628_s2 + $0x7b8] sm:$0xff] %v2420_v15  ;;  %v2467_v29 = vld [vmem:[#allocation2 + $0x528] sm:$0xff]  ;;  %v2487_v35 = vld [vmem:[#allocation2 + $0x290] sm:$0xff] }
  0xda   :  { %v2450_v24 = vsub.f32 %v2445_v21, %v2447_v22  ;;  %v2475_v30 = vld [vmem:[#allocation0 + $0x7c8] sm:$0xff]  ;;  %2786 = vst [vmem:[%s3628_s2 + $0x520] sm:$0xff] %v2440_v23  ;;  %v2470_v32 = vsub.f32 %v2465_v27, %v2467_v29  ;;  %v2495_v36 = vld [vmem:[#allocation0 + $0x530] sm:$0xff]  ;;  %2788 = vst [vmem:[%s3628_s2 + $0x288] sm:$0xff] %v2460_v28  ;;  %v2490_v37 = vsub.f32 %v2485_v34, %v2487_v35 }
  0xdb   :  { %v2477_v31 = vld [vmem:[#allocation2 + $0x7c8] sm:$0xff]  ;;  %v2497_v38 = vld [vmem:[#allocation2 + $0x530] sm:$0xff]  ;;  %v2515_v43 = vld [vmem:[#allocation0 + $0x298] sm:$0xff] }
  0xdc   :  { %2787 = vst [vmem:[%s3628_s2 + $0x7c0] sm:$0xff] %v2450_v24  ;;  %v2480_v33 = vsub.f32 %v2475_v30, %v2477_v31  ;;  %v2505_v39 = vld [vmem:[#allocation0 + $0x7d0] sm:$0xff]  ;;  %2789 = vst [vmem:[%s3628_s2 + $0x528] sm:$0xff] %v2470_v32  ;;  %v2500_v41 = vsub.f32 %v2495_v36, %v2497_v38  ;;  %v2517_v44 = vld [vmem:[#allocation2 + $0x298] sm:$0xff] }
  0xdd   :  { %v2507_v40 = vld [vmem:[#allocation2 + $0x7d0] sm:$0xff]  ;;  %v2525_v45 = vld [vmem:[#allocation0 + $0x538] sm:$0xff]  ;;  %2791 = vst [vmem:[%s3628_s2 + $0x290] sm:$0xff] %v2490_v37  ;;  %v2520_v46 = vsub.f32 %v2515_v43, %v2517_v44 }
  0xde   :  { %2790 = vst [vmem:[%s3628_s2 + $0x7c8] sm:$0xff] %v2480_v33  ;;  %v2510_v42 = vsub.f32 %v2505_v39, %v2507_v40  ;;  %v2527_v47 = vld [vmem:[#allocation2 + $0x538] sm:$0xff]  ;;  %2792 = vst [vmem:[%s3628_s2 + $0x530] sm:$0xff] %v2500_v41 }
  0xdf   :  { %v2535_v48 = vld [vmem:[#allocation0 + $0x7d8] sm:$0xff]  ;;  %v2530_v50 = vsub.f32 %v2525_v45, %v2527_v47  ;;  %2794 = vst [vmem:[%s3628_s2 + $0x298] sm:$0xff] %v2520_v46 }
  0xe0   :  { %v2537_v49 = vld [vmem:[#allocation2 + $0x7d8] sm:$0xff]  ;;  %2793 = vst [vmem:[%s3628_s2 + $0x7d0] sm:$0xff] %v2510_v42 }
  0xe1   :  { %v2540_v51 = vsub.f32 %v2535_v48, %v2537_v49  ;;  %2795 = vst [vmem:[%s3628_s2 + $0x538] sm:$0xff] %v2530_v50 }
  0xe3   :  { %2796 = vst [vmem:[%s3628_s2 + $0x7d8] sm:$0xff] %v2540_v51 }
  0xe4   :  { %2544 = vsyncpa [#allocation1], 1 }
  0xe5   :  { %2545 = vsyncpa [#allocation3], 1 }

// kernel: diffnet_forward.1
= control target key start
LH: loop header
LB: loop body
LE: loop exit
PB: predicated region body
PF: predicated region fallthrough
CT: control target
= control target key end

     0   :  { %s5354_s30 = smov 0   ;;  %s8401_s0 = inlined_call_operand.vmem [shape: f32[2,192,2048], index: 0, kind: input, shape index: {}]   ;;  %s8402_s1 = inlined_call_operand.vmem [shape: f32[16,192], index: 1, kind: input, shape index: {}]   ;;  %s8403_s2 = inlined_call_operand.vmem [shape: f32[16,1], index: 2, kind: input, shape index: {}]   ;;  %s8404_s3 = inlined_call_operand.vmem [shape: f32[32,256], index: 3, kind: input, shape index: {}]   ;;  %s8405_s4 = inlined_call_operand.vmem [shape: f32[32,1], index: 4, kind: input, shape index: {}]   ;;  %s8406_s5 = inlined_call_operand.vmem [shape: f32[4096,32], index: 5, kind: input, shape index: {}]   ;;  %s8407_s6 = inlined_call_operand.vmem [shape: f32[1,32], index: 6, kind: input, shape index: {}]   ;;  %s8408_s7 = inlined_call_operand.vmem [shape: f32[32,2], index: 7, kind: input, shape index: {}]   ;;  %s8409_s8 = inlined_call_operand.vmem [shape: f32[1,2], index: 8, kind: input, shape index: {}]   ;;  %s8410_s9 = inlined_call_operand.vmem [shape: f32[2,4,2], index: 9, kind: output, shape index: {}]  }
   0x1 LB: > { %s4595_s10 = sadd.s32 4294967295, %s5296_s30   ;;  %p4599_p0 = scmp.ge.s32.totalorder %s5296_s30, 1  ;;  %s5296_s30 = sphi %s5354_s30, %s19_s30  }
   0x2   : > { %p287_p1 = scmp.lt.s32.totalorder %s5296_s30, 3 }
   0x4   : > { %p288_p2 = pnand %p4599_p0, %p287_p1 }
   0x6   : > { %291 = sbr.rel (%p288_p2) target bundleno = 1487 (0x5cf), region = 56 }
   0xb   : > { %p322_p3 = scmp.lt.s32.totalorder %s4595_s10, 1  ;;  %v5365_v0 = vld [vmem:[%s8402_s1 + $0x8] sm:$0xff]  ;;  %vm443_vm0 = vcmask 523264   ;;  %v5298_v2 = vmov 0   ;;  %v5380_v3 = vld [vmem:[%s8403_s2] sm:$0xff]  ;;  %s5299_s16 = smov 127  }
   0xc   : > { %4602 = vmatprep.mubr.msk.f32.mxu0 %vm443_vm0, %v5365_v0  ;;  %4604 = vmatprep.mubr.msk.f32.mxu1 %vm443_vm0, %v5365_v0  ;;  %v1283_v1 = vld [vmem:[%s8403_s2 + $0x8] sm:$0xff]  ;;  %s5300_s17 = smov 117   ;;  %s5301_s18 = smov 118   ;;  %vm644_vm1 = vcmask 1039360   ;;  %vm669_vm2 = vcmask 1048568   ;;  %vm732_vm3 = vcmask 957440  }
   0xd   : > { %s8434_s10 = smov (!%p322_p3, %s4595_s10), 1  ;;  %5287 = vset.pattern.permute.xlu1 %v5298_v2  ;;  %5286 = vset.pattern.permute.xlu0 %v5298_v2  ;;  %vm757_vm4 = vcmask 1048488   ;;  %vm688_vm5 = vcmask 965632   ;;  %vm713_vm6 = vcmask 1048496   ;;  %vm2716_vm7 = vcmask 1040384  }
   0xe   : > { %1291 = vperm.xlu1 %5287, %v1283_v1   ;;  %1713 = vperm.xlu0 %5286, %v1283_v1   ;;  %s5271_s15 = smul.u32 3072, %s8434_s10  ;;  %vm2749_vm8 = vcmask 1041408   ;;  %vm2782_vm9 = vcmask 1042432   ;;  %vm5303_vm10 = vmmov 0   ;;  %vm4466_vm11 = vcmask 261120   ;;  %s4601_s13 = sshll.u32 %s8434_s10, 2 }
   0xf   : > { %vm4540_vm12 = vcmask 11264  }
  0x10   : > { %s5385_s20 = scalar_lea.vmem %s8401_s0, %s5271_s15 }
  0x11   : > { %v396_v4 = vld [vmem:[%s5385_s20 + $0x788] sm:$0xff]  ;;  %v398_v5 = vld [vmem:[%s5385_s20 + $0x798] sm:$0xff]  ;;  %v395_v6 = vld [vmem:[%s5385_s20 + $0x780] sm:$0xff] }
  0x12   : > { %1286 = vperm.xlu1 %5287, %v5380_v3   ;;  %1708 = vperm.xlu0 %5286, %v5380_v3   ;;  %v397_v7 = vld [vmem:[%s5385_s20 + $0x790] sm:$0xff]  ;;  %v392_v8 = vld [vmem:[%s5385_s20 + $0x708] sm:$0xff]  ;;  %v394_v9 = vld [vmem:[%s5385_s20 + $0x718] sm:$0xff] }
  0x13   : > { %450 = vmatprep.subr.mxu0 %v396_v4  ;;  %527 = vmatprep.subr.mxu1 %v398_v5  ;;  %v391_v10 = vld [vmem:[%s5385_s20 + $0x700] sm:$0xff]  ;;  %v393_v11 = vld [vmem:[%s5385_s20 + $0x710] sm:$0xff]  ;;  %v388_v12 = vld [vmem:[%s5385_s20 + $0x688] sm:$0xff] }
  0x14   : > { %451 = vmatpush1.msra.mxu0 %v395_v6  ;;  %528 = vmatpush1.msra.mxu1 %v397_v7  ;;  %v390_v13 = vld [vmem:[%s5385_s20 + $0x698] sm:$0xff]  ;;  %v387_v14 = vld [vmem:[%s5385_s20 + $0x680] sm:$0xff]  ;;  %v389_v15 = vld [vmem:[%s5385_s20 + $0x690] sm:$0xff] }
  0x15   : > { %452 = vmatprep.subr.mxu0 %v392_v8  ;;  %529 = vmatprep.subr.mxu1 %v394_v9  ;;  %v384_v16 = vld [vmem:[%s5385_s20 + $0x608] sm:$0xff]  ;;  %v386_v17 = vld [vmem:[%s5385_s20 + $0x618] sm:$0xff]  ;;  %v383_v18 = vld [vmem:[%s5385_s20 + $0x600] sm:$0xff] }
  0x16   : > { %453 = vmatpush1.msra.mxu0 %v391_v10  ;;  %530 = vmatpush1.msra.mxu1 %v393_v11  ;;  %v385_v19 = vld [vmem:[%s5385_s20 + $0x610] sm:$0xff]  ;;  %v380_v20 = vld [vmem:[%s5385_s20 + $0x588] sm:$0xff]  ;;  %v382_v21 = vld [vmem:[%s5385_s20 + $0x598] sm:$0xff] }
  0x17   : > { %454 = vmatprep.subr.mxu0 %v388_v12  ;;  %531 = vmatprep.subr.mxu1 %v390_v13  ;;  %v379_v22 = vld [vmem:[%s5385_s20 + $0x580] sm:$0xff]  ;;  %v381_v23 = vld [vmem:[%s5385_s20 + $0x590] sm:$0xff]  ;;  %v376_v24 = vld [vmem:[%s5385_s20 + $0x508] sm:$0xff] }
  0x18   : > { %455 = vmatpush1.msra.mxu0 %v387_v14  ;;  %532 = vmatpush1.msra.mxu1 %v389_v15  ;;  %v378_v25 = vld [vmem:[%s5385_s20 + $0x518] sm:$0xff]  ;;  %v375_v26 = vld [vmem:[%s5385_s20 + $0x500] sm:$0xff]  ;;  %v377_v27 = vld [vmem:[%s5385_s20 + $0x510] sm:$0xff] }
  0x19   : > { %456 = vmatprep.subr.mxu0 %v384_v16  ;;  %533 = vmatprep.subr.mxu1 %v386_v17  ;;  %v372_v28 = vld [vmem:[%s5385_s20 + $0x488] sm:$0xff]  ;;  %v374_v29 = vld [vmem:[%s5385_s20 + $0x498] sm:$0xff]  ;;  %v371_v30 = vld [vmem:[%s5385_s20 + $0x480] sm:$0xff] }
  0x1a   : > { %457 = vmatpush1.msra.mxu0 %v383_v18  ;;  %534 = vmatpush1.msra.mxu1 %v385_v19  ;;  %v373_v31 = vld [vmem:[%s5385_s20 + $0x490] sm:$0xff]  ;;  %v368_v32 = vld [vmem:[%s5385_s20 + $0x408] sm:$0xff]  ;;  %v370_v33 = vld [vmem:[%s5385_s20 + $0x418] sm:$0xff] }
  0x1b   : > { %458 = vmatprep.subr.mxu0 %v380_v20  ;;  %535 = vmatprep.subr.mxu1 %v382_v21  ;;  %v367_v34 = vld [vmem:[%s5385_s20 + $0x400] sm:$0xff]  ;;  %v369_v35 = vld [vmem:[%s5385_s20 + $0x410] sm:$0xff]  ;;  %v364_v36 = vld [vmem:[%s5385_s20 + $0x388] sm:$0xff] }
  0x1c   : > { %459 = vmatpush1.msra.mxu0 %v379_v22  ;;  %536 = vmatpush1.msra.mxu1 %v381_v23  ;;  %v366_v37 = vld [vmem:[%s5385_s20 + $0x398] sm:$0xff]  ;;  %v363_v38 = vld [vmem:[%s5385_s20 + $0x380] sm:$0xff]  ;;  %v365_v39 = vld [vmem:[%s5385_s20 + $0x390] sm:$0xff] }
  0x1d   : > { %460 = vmatprep.subr.mxu0 %v376_v24  ;;  %537 = vmatprep.subr.mxu1 %v378_v25  ;;  %v360_v40 = vld [vmem:[%s5385_s20 + $0x308] sm:$0xff]  ;;  %v362_v41 = vld [vmem:[%s5385_s20 + $0x318] sm:$0xff]  ;;  %v359_v42 = vld [vmem:[%s5385_s20 + $0x300] sm:$0xff] }
  0x1e   : > { %461 = vmatpush1.msra.mxu0 %v375_v26  ;;  %538 = vmatpush1.msra.mxu1 %v377_v27  ;;  %v361_v43 = vld [vmem:[%s5385_s20 + $0x310] sm:$0xff]  ;;  %v356_v44 = vld [vmem:[%s5385_s20 + $0x288] sm:$0xff]  ;;  %v358_v45 = vld [vmem:[%s5385_s20 + $0x298] sm:$0xff] }
  0x1f   : > { %462 = vmatprep.subr.mxu0 %v372_v28  ;;  %539 = vmatprep.subr.mxu1 %v374_v29  ;;  %v355_v46 = vld [vmem:[%s5385_s20 + $0x280] sm:$0xff]  ;;  %v357_v47 = vld [vmem:[%s5385_s20 + $0x290] sm:$0xff]  ;;  %v352_v48 = vld [vmem:[%s5385_s20 + $0x208] sm:$0xff] }
  0x20   : > { %463 = vmatpush1.msra.mxu0 %v371_v30  ;;  %540 = vmatpush1.msra.mxu1 %v373_v31  ;;  %v354_v49 = vld [vmem:[%s5385_s20 + $0x218] sm:$0xff]  ;;  %v351_v50 = vld [vmem:[%s5385_s20 + $0x200] sm:$0xff]  ;;  %v353_v51 = vld [vmem:[%s5385_s20 + $0x210] sm:$0xff] }
  0x21   : > { %464 = vmatprep.subr.mxu0 %v368_v32  ;;  %541 = vmatprep.subr.mxu1 %v370_v33  ;;  %v348_v52 = vld [vmem:[%s5385_s20 + $0x188] sm:$0xff]  ;;  %v350_v53 = vld [vmem:[%s5385_s20 + $0x198] sm:$0xff]  ;;  %v347_v54 = vld [vmem:[%s5385_s20 + $0x180] sm:$0xff] }
  0x22   : > { %465 = vmatpush1.msra.mxu0 %v367_v34  ;;  %542 = vmatpush1.msra.mxu1 %v369_v35  ;;  %v349_v55 = vld [vmem:[%s5385_s20 + $0x190] sm:$0xff]  ;;  %v344_v56 = vld [vmem:[%s5385_s20 + $0x108] sm:$0xff]  ;;  %v346_v57 = vld [vmem:[%s5385_s20 + $0x118] sm:$0xff] }
  0x23   : > { %466 = vmatprep.subr.mxu0 %v364_v36  ;;  %543 = vmatprep.subr.mxu1 %v366_v37  ;;  %v343_v58 = vld [vmem:[%s5385_s20 + $0x100] sm:$0xff]  ;;  %v345_v59 = vld [vmem:[%s5385_s20 + $0x110] sm:$0xff]  ;;  %v340_v60 = vld [vmem:[%s5385_s20 + $0x88] sm:$0xff] }
  0x24   : > { %467 = vmatpush1.msra.mxu0 %v363_v38  ;;  %544 = vmatpush1.msra.mxu1 %v365_v39  ;;  %v342_v61 = vld [vmem:[%s5385_s20 + $0x98] sm:$0xff]  ;;  %v339_v62 = vld [vmem:[%s5385_s20 + $0x80] sm:$0xff]  ;;  %v341_v63 = vld [vmem:[%s5385_s20 + $0x90] sm:$0xff] }
  0x25   : > { %468 = vmatprep.subr.mxu0 %v360_v40  ;;  %545 = vmatprep.subr.mxu1 %v362_v41  ;;  %v336_v1 = vld [vmem:[%s5385_s20 + $0x8] sm:$0xff]  ;;  %v338_v2 = vld [vmem:[%s5385_s20 + $0x18] sm:$0xff]  ;;  %v335_v4 = vld [vmem:[%s5385_s20] sm:$0xff] }
  0x26   : > { %469 = vmatpush1.msra.mxu0 %v359_v42  ;;  %546 = vmatpush1.msra.mxu1 %v361_v43  ;;  %v337_v5 = vld [vmem:[%s5385_s20 + $0x10] sm:$0xff]  ;;  %v428_v6 = vld [vmem:[%s5385_s20 + $0xb88] sm:$0xff]  ;;  %v430_v7 = vld [vmem:[%s5385_s20 + $0xb98] sm:$0xff] }
  0x27   : > { %470 = vmatprep.subr.mxu0 %v356_v44  ;;  %547 = vmatprep.subr.mxu1 %v358_v45  ;;  %v427_v8 = vld [vmem:[%s5385_s20 + $0xb80] sm:$0xff]  ;;  %v429_v9 = vld [vmem:[%s5385_s20 + $0xb90] sm:$0xff]  ;;  %v424_v10 = vld [vmem:[%s5385_s20 + $0xb08] sm:$0xff] }
  0x28   : > { %471 = vmatpush1.msra.mxu0 %v355_v46  ;;  %548 = vmatpush1.msra.mxu1 %v357_v47  ;;  %v426_v11 = vld [vmem:[%s5385_s20 + $0xb18] sm:$0xff]  ;;  %v423_v12 = vld [vmem:[%s5385_s20 + $0xb00] sm:$0xff]  ;;  %v425_v13 = vld [vmem:[%s5385_s20 + $0xb10] sm:$0xff] }
  0x29   : > { %472 = vmatprep.subr.mxu0 %v352_v48  ;;  %549 = vmatprep.subr.mxu1 %v354_v49  ;;  %v420_v14 = vld [vmem:[%s5385_s20 + $0xa88] sm:$0xff]  ;;  %v422_v15 = vld [vmem:[%s5385_s20 + $0xa98] sm:$0xff]  ;;  %v419_v16 = vld [vmem:[%s5385_s20 + $0xa80] sm:$0xff] }
  0x2a   : > { %473 = vmatpush1.msra.mxu0 %v351_v50  ;;  %550 = vmatpush1.msra.mxu1 %v353_v51  ;;  %v421_v17 = vld [vmem:[%s5385_s20 + $0xa90] sm:$0xff]  ;;  %v416_v18 = vld [vmem:[%s5385_s20 + $0xa08] sm:$0xff]  ;;  %v418_v19 = vld [vmem:[%s5385_s20 + $0xa18] sm:$0xff] }
  0x2b   : > { %474 = vmatprep.subr.mxu0 %v348_v52  ;;  %551 = vmatprep.subr.mxu1 %v350_v53  ;;  %v415_v20 = vld [vmem:[%s5385_s20 + $0xa00] sm:$0xff]  ;;  %v417_v21 = vld [vmem:[%s5385_s20 + $0xa10] sm:$0xff]  ;;  %v412_v22 = vld [vmem:[%s5385_s20 + $0x988] sm:$0xff] }
  0x2c   : > { %475 = vmatpush1.msra.mxu0 %v347_v54  ;;  %552 = vmatpush1.msra.mxu1 %v349_v55  ;;  %v414_v23 = vld [vmem:[%s5385_s20 + $0x998] sm:$0xff]  ;;  %v411_v24 = vld [vmem:[%s5385_s20 + $0x980] sm:$0xff]  ;;  %v413_v25 = vld [vmem:[%s5385_s20 + $0x990] sm:$0xff] }
  0x2d   : > { %476 = vmatprep.subr.mxu0 %v344_v56  ;;  %553 = vmatprep.subr.mxu1 %v346_v57  ;;  %v408_v26 = vld [vmem:[%s5385_s20 + $0x908] sm:$0xff]  ;;  %v410_v27 = vld [vmem:[%s5385_s20 + $0x918] sm:$0xff]  ;;  %v407_v28 = vld [vmem:[%s5385_s20 + $0x900] sm:$0xff] }
  0x2e   : > { %477 = vmatpush1.msra.mxu0 %v343_v58  ;;  %554 = vmatpush1.msra.mxu1 %v345_v59  ;;  %v409_v29 = vld [vmem:[%s5385_s20 + $0x910] sm:$0xff]  ;;  %v404_v30 = vld [vmem:[%s5385_s20 + $0x888] sm:$0xff]  ;;  %v406_v31 = vld [vmem:[%s5385_s20 + $0x898] sm:$0xff] }
  0x2f   : > { %478 = vmatprep.subr.mxu0 %v340_v60  ;;  %555 = vmatprep.subr.mxu1 %v342_v61  ;;  %v403_v32 = vld [vmem:[%s5385_s20 + $0x880] sm:$0xff]  ;;  %v405_v33 = vld [vmem:[%s5385_s20 + $0x890] sm:$0xff]  ;;  %v400_v34 = vld [vmem:[%s5385_s20 + $0x808] sm:$0xff] }
  0x30   : > { %479 = vmatpush1.msra.mxu0 %v339_v62  ;;  %556 = vmatpush1.msra.mxu1 %v341_v63  ;;  %v402_v35 = vld [vmem:[%s5385_s20 + $0x818] sm:$0xff]  ;;  %v399_v36 = vld [vmem:[%s5385_s20 + $0x800] sm:$0xff]  ;;  %v401_v37 = vld [vmem:[%s5385_s20 + $0x810] sm:$0xff] }
  0x31   : > { %480 = vmatprep.subr.mxu0 %v336_v1  ;;  %557 = vmatprep.subr.mxu1 %v338_v2  ;;  %v5488_v38 = vld [vmem:[%s8402_s1] sm:$0xff]  ;;  %v825_v39 = vld [vmem:[%s5385_s20 + $0x7a8] sm:$0xff]  ;;  %v827_v40 = vld [vmem:[%s5385_s20 + $0x7b8] sm:$0xff] }
  0x32   : > { %481 = vmatpush1.msra.mxu0 %v335_v4  ;;  %558 = vmatpush1.msra.mxu1 %v337_v5  ;;  %v824_v41 = vld [vmem:[%s5385_s20 + $0x7a0] sm:$0xff]  ;;  %v826_v42 = vld [vmem:[%s5385_s20 + $0x7b0] sm:$0xff]  ;;  %v821_v43 = vld [vmem:[%s5385_s20 + $0x728] sm:$0xff] }
  0x33   : > { %498 = vmatprep.subr.mxu0 %v428_v6  ;;  %575 = vmatprep.subr.mxu1 %v430_v7  ;;  %v823_v44 = vld [vmem:[%s5385_s20 + $0x738] sm:$0xff]  ;;  %v820_v45 = vld [vmem:[%s5385_s20 + $0x720] sm:$0xff]  ;;  %v822_v46 = vld [vmem:[%s5385_s20 + $0x730] sm:$0xff] }
  0x34   : > { %499 = vmatpush2.msra.mxu0 %v427_v8  ;;  %576 = vmatpush2.msra.mxu1 %v429_v9  ;;  %v817_v47 = vld [vmem:[%s5385_s20 + $0x6a8] sm:$0xff]  ;;  %v819_v48 = vld [vmem:[%s5385_s20 + $0x6b8] sm:$0xff]  ;;  %v816_v49 = vld [vmem:[%s5385_s20 + $0x6a0] sm:$0xff] }
  0x35   : > { %500 = vmatprep.subr.mxu0 %v424_v10  ;;  %577 = vmatprep.subr.mxu1 %v426_v11  ;;  %v818_v50 = vld [vmem:[%s5385_s20 + $0x6b0] sm:$0xff]  ;;  %v813_v51 = vld [vmem:[%s5385_s20 + $0x628] sm:$0xff]  ;;  %v815_v52 = vld [vmem:[%s5385_s20 + $0x638] sm:$0xff] }
  0x36   : > { %501 = vmatpush2.msra.mxu0 %v423_v12  ;;  %578 = vmatpush2.msra.mxu1 %v425_v13  ;;  %v812_v53 = vld [vmem:[%s5385_s20 + $0x620] sm:$0xff]  ;;  %v814_v54 = vld [vmem:[%s5385_s20 + $0x630] sm:$0xff]  ;;  %v809_v55 = vld [vmem:[%s5385_s20 + $0x5a8] sm:$0xff] }
  0x37   : > { %502 = vmatprep.subr.mxu0 %v420_v14  ;;  %579 = vmatprep.subr.mxu1 %v422_v15  ;;  %v811_v56 = vld [vmem:[%s5385_s20 + $0x5b8] sm:$0xff]  ;;  %v808_v57 = vld [vmem:[%s5385_s20 + $0x5a0] sm:$0xff]  ;;  %v810_v58 = vld [vmem:[%s5385_s20 + $0x5b0] sm:$0xff] }
  0x38   : > { %503 = vmatpush2.msra.mxu0 %v419_v16  ;;  %580 = vmatpush2.msra.mxu1 %v421_v17  ;;  %v805_v59 = vld [vmem:[%s5385_s20 + $0x528] sm:$0xff]  ;;  %v807_v60 = vld [vmem:[%s5385_s20 + $0x538] sm:$0xff]  ;;  %v804_v61 = vld [vmem:[%s5385_s20 + $0x520] sm:$0xff] }
  0x39   : > { %504 = vmatprep.subr.mxu0 %v416_v18  ;;  %581 = vmatprep.subr.mxu1 %v418_v19  ;;  %v806_v62 = vld [vmem:[%s5385_s20 + $0x530] sm:$0xff]  ;;  %v801_v63 = vld [vmem:[%s5385_s20 + $0x4a8] sm:$0xff]  ;;  %v803_v1 = vld [vmem:[%s5385_s20 + $0x4b8] sm:$0xff] }
  0x3a   : > { %505 = vmatpush2.msra.mxu0 %v415_v20  ;;  %582 = vmatpush2.msra.mxu1 %v417_v21  ;;  %v800_v2 = vld [vmem:[%s5385_s20 + $0x4a0] sm:$0xff]  ;;  %v802_v4 = vld [vmem:[%s5385_s20 + $0x4b0] sm:$0xff]  ;;  %v797_v5 = vld [vmem:[%s5385_s20 + $0x428] sm:$0xff] }
  0x3b   : > { %506 = vmatprep.subr.mxu0 %v412_v22  ;;  %583 = vmatprep.subr.mxu1 %v414_v23  ;;  %v799_v6 = vld [vmem:[%s5385_s20 + $0x438] sm:$0xff]  ;;  %v796_v7 = vld [vmem:[%s5385_s20 + $0x420] sm:$0xff]  ;;  %v798_v8 = vld [vmem:[%s5385_s20 + $0x430] sm:$0xff] }
  0x3c   : > { %507 = vmatpush2.msra.mxu0 %v411_v24  ;;  %584 = vmatpush2.msra.mxu1 %v413_v25  ;;  %v793_v9 = vld [vmem:[%s5385_s20 + $0x3a8] sm:$0xff]  ;;  %v795_v10 = vld [vmem:[%s5385_s20 + $0x3b8] sm:$0xff]  ;;  %v792_v11 = vld [vmem:[%s5385_s20 + $0x3a0] sm:$0xff] }
  0x3d   : > { %508 = vmatprep.subr.mxu0 %v408_v26  ;;  %585 = vmatprep.subr.mxu1 %v410_v27  ;;  %v794_v12 = vld [vmem:[%s5385_s20 + $0x3b0] sm:$0xff]  ;;  %v789_v13 = vld [vmem:[%s5385_s20 + $0x328] sm:$0xff]  ;;  %v791_v14 = vld [vmem:[%s5385_s20 + $0x338] sm:$0xff] }
  0x3e   : > { %509 = vmatpush2.msra.mxu0 %v407_v28  ;;  %586 = vmatpush2.msra.mxu1 %v409_v29  ;;  %v788_v15 = vld [vmem:[%s5385_s20 + $0x320] sm:$0xff]  ;;  %v790_v16 = vld [vmem:[%s5385_s20 + $0x330] sm:$0xff]  ;;  %v785_v17 = vld [vmem:[%s5385_s20 + $0x2a8] sm:$0xff] }
  0x3f   : > { %510 = vmatprep.subr.mxu0 %v404_v30  ;;  %587 = vmatprep.subr.mxu1 %v406_v31  ;;  %v787_v18 = vld [vmem:[%s5385_s20 + $0x2b8] sm:$0xff]  ;;  %v784_v19 = vld [vmem:[%s5385_s20 + $0x2a0] sm:$0xff]  ;;  %v786_v20 = vld [vmem:[%s5385_s20 + $0x2b0] sm:$0xff] }
  0x40   : > { %511 = vmatpush2.msra.mxu0 %v403_v32  ;;  %588 = vmatpush2.msra.mxu1 %v405_v33  ;;  %v781_v21 = vld [vmem:[%s5385_s20 + $0x228] sm:$0xff]  ;;  %v783_v22 = vld [vmem:[%s5385_s20 + $0x238] sm:$0xff]  ;;  %v780_v23 = vld [vmem:[%s5385_s20 + $0x220] sm:$0xff] }
  0x41   : > { %512 = vmatprep.subr.mxu0 %v400_v34  ;;  %589 = vmatprep.subr.mxu1 %v402_v35  ;;  %v782_v24 = vld [vmem:[%s5385_s20 + $0x230] sm:$0xff]  ;;  %v777_v25 = vld [vmem:[%s5385_s20 + $0x1a8] sm:$0xff]  ;;  %v779_v26 = vld [vmem:[%s5385_s20 + $0x1b8] sm:$0xff] }
  0x42   : > { %513 = vmatpush2.msra.mxu0 %v399_v36  ;;  %590 = vmatpush2.msra.mxu1 %v401_v37  ;;  %v776_v27 = vld [vmem:[%s5385_s20 + $0x1a0] sm:$0xff]  ;;  %v778_v28 = vld [vmem:[%s5385_s20 + $0x1b0] sm:$0xff]  ;;  %v773_v29 = vld [vmem:[%s5385_s20 + $0x128] sm:$0xff] }
  0x43   : > { %515 = vmatmul.mubr.f32.vlgmr.msra.gmra.mxu0 %v5488_v38  ;;  %592 = vmatmul.mubr.f32.vlgmr.msra.gmra.mxu1 %v5488_v38  ;;  %v775_v30 = vld [vmem:[%s5385_s20 + $0x138] sm:$0xff]  ;;  %v772_v31 = vld [vmem:[%s5385_s20 + $0x120] sm:$0xff]  ;;  %v774_v32 = vld [vmem:[%s5385_s20 + $0x130] sm:$0xff] }
  0x44   : > { %878 = vmatprep.subr.mxu0 %v825_v39  ;;  %955 = vmatprep.subr.mxu1 %v827_v40  ;;  %v769_v33 = vld [vmem:[%s5385_s20 + $0xa8] sm:$0xff]  ;;  %v771_v34 = vld [vmem:[%s5385_s20 + $0xb8] sm:$0xff]  ;;  %v768_v35 = vld [vmem:[%s5385_s20 + $0xa0] sm:$0xff] }
  0x45   : > { %879 = vmatpush1.msra.mxu0 %v824_v41  ;;  %956 = vmatpush1.msra.mxu1 %v826_v42  ;;  %v770_v36 = vld [vmem:[%s5385_s20 + $0xb0] sm:$0xff]  ;;  %v765_v37 = vld [vmem:[%s5385_s20 + $0x28] sm:$0xff]  ;;  %v767_v39 = vld [vmem:[%s5385_s20 + $0x38] sm:$0xff] }
  0x46   : > { %880 = vmatprep.subr.mxu0 %v821_v43  ;;  %957 = vmatprep.subr.mxu1 %v823_v44  ;;  %v764_v40 = vld [vmem:[%s5385_s20 + $0x20] sm:$0xff]  ;;  %v766_v41 = vld [vmem:[%s5385_s20 + $0x30] sm:$0xff]  ;;  %v857_v42 = vld [vmem:[%s5385_s20 + $0xba8] sm:$0xff] }
  0x47   : > { %881 = vmatpush1.msra.mxu0 %v820_v45  ;;  %958 = vmatpush1.msra.mxu1 %v822_v46  ;;  %v859_v43 = vld [vmem:[%s5385_s20 + $0xbb8] sm:$0xff]  ;;  %v856_v44 = vld [vmem:[%s5385_s20 + $0xba0] sm:$0xff]  ;;  %v858_v45 = vld [vmem:[%s5385_s20 + $0xbb0] sm:$0xff] }
  0x48   : > { %882 = vmatprep.subr.mxu0 %v817_v47  ;;  %959 = vmatprep.subr.mxu1 %v819_v48  ;;  %v853_v46 = vld [vmem:[%s5385_s20 + $0xb28] sm:$0xff]  ;;  %v855_v47 = vld [vmem:[%s5385_s20 + $0xb38] sm:$0xff]  ;;  %v852_v48 = vld [vmem:[%s5385_s20 + $0xb20] sm:$0xff] }
  0x49   : > { %883 = vmatpush1.msra.mxu0 %v816_v49  ;;  %960 = vmatpush1.msra.mxu1 %v818_v50  ;;  %v854_v49 = vld [vmem:[%s5385_s20 + $0xb30] sm:$0xff]  ;;  %v849_v50 = vld [vmem:[%s5385_s20 + $0xaa8] sm:$0xff] }
  0x4a   : > { %884 = vmatprep.subr.mxu0 %v813_v51  ;;  %961 = vmatprep.subr.mxu1 %v815_v52  ;;  %v851_v51 = vld [vmem:[%s5385_s20 + $0xab8] sm:$0xff]  ;;  %v848_v52 = vld [vmem:[%s5385_s20 + $0xaa0] sm:$0xff] }
  0x4b   : > { %885 = vmatpush1.msra.mxu0 %v812_v53  ;;  %962 = vmatpush1.msra.mxu1 %v814_v54  ;;  %v850_v53 = vld [vmem:[%s5385_s20 + $0xab0] sm:$0xff]  ;;  %v845_v54 = vld [vmem:[%s5385_s20 + $0xa28] sm:$0xff] }
  0x4c   : > { %886 = vmatprep.subr.mxu0 %v809_v55  ;;  %963 = vmatprep.subr.mxu1 %v811_v56  ;;  %v847_v55 = vld [vmem:[%s5385_s20 + $0xa38] sm:$0xff] }
  0x4d   : > { %887 = vmatpush1.msra.mxu0 %v808_v57  ;;  %964 = vmatpush1.msra.mxu1 %v810_v58  ;;  %v5573_v56 = vld [vmem:[%s8402_s1 + $0x18] sm:$0xff]  ;;  %v844_v57 = vld [vmem:[%s5385_s20 + $0xa20] sm:$0xff]  ;;  %v846_v58 = vld [vmem:[%s5385_s20 + $0xa30] sm:$0xff] }
  0x4e   : > { %888 = vmatprep.subr.mxu0 %v805_v59  ;;  %965 = vmatprep.subr.mxu1 %v807_v60  ;;  %v5580_v59 = vld [vmem:[%s8402_s1 + $0x10] sm:$0xff]  ;;  %v841_v60 = vld [vmem:[%s5385_s20 + $0x9a8] sm:$0xff] }
  0x4f   : > { %889 = vmatpush1.msra.mxu0 %v804_v61  ;;  %966 = vmatpush1.msra.mxu1 %v806_v62  ;;  %v843_v61 = vld [vmem:[%s5385_s20 + $0x9b8] sm:$0xff]  ;;  %v840_v62 = vld [vmem:[%s5385_s20 + $0x9a0] sm:$0xff] }
  0x50   : > { %890 = vmatprep.subr.mxu0 %v801_v63  ;;  %967 = vmatprep.subr.mxu1 %v803_v1  ;;  %v842_v63 = vld [vmem:[%s5385_s20 + $0x9b0] sm:$0xff]  ;;  %v837_v1 = vld [vmem:[%s5385_s20 + $0x928] sm:$0xff] }
  0x51   : > { %891 = vmatpush1.msra.mxu0 %v800_v2  ;;  %968 = vmatpush1.msra.mxu1 %v802_v4  ;;  %v839_v2 = vld [vmem:[%s5385_s20 + $0x938] sm:$0xff]  ;;  %v836_v4 = vld [vmem:[%s5385_s20 + $0x920] sm:$0xff] }
  0x52   : > { %892 = vmatprep.subr.mxu0 %v797_v5  ;;  %969 = vmatprep.subr.mxu1 %v799_v6  ;;  %v838_v5 = vld [vmem:[%s5385_s20 + $0x930] sm:$0xff]  ;;  %v833_v6 = vld [vmem:[%s5385_s20 + $0x8a8] sm:$0xff] }
  0x53   : > { %893 = vmatpush1.msra.mxu0 %v796_v7  ;;  %970 = vmatpush1.msra.mxu1 %v798_v8  ;;  %v835_v7 = vld [vmem:[%s5385_s20 + $0x8b8] sm:$0xff]  ;;  %v832_v8 = vld [vmem:[%s5385_s20 + $0x8a0] sm:$0xff] }
  0x54   : > { %894 = vmatprep.subr.mxu0 %v793_v9  ;;  %971 = vmatprep.subr.mxu1 %v795_v10  ;;  %v834_v9 = vld [vmem:[%s5385_s20 + $0x8b0] sm:$0xff]  ;;  %v829_v10 = vld [vmem:[%s5385_s20 + $0x828] sm:$0xff] }
  0x55   : > { %895 = vmatpush1.msra.mxu0 %v792_v11  ;;  %972 = vmatpush1.msra.mxu1 %v794_v12  ;;  %v831_v11 = vld [vmem:[%s5385_s20 + $0x838] sm:$0xff]  ;;  %v828_v12 = vld [vmem:[%s5385_s20 + $0x820] sm:$0xff] }
  0x56   : > { %896 = vmatprep.subr.mxu0 %v789_v13  ;;  %973 = vmatprep.subr.mxu1 %v791_v14  ;;  %v830_v13 = vld [vmem:[%s5385_s20 + $0x830] sm:$0xff]  ;;  %v1247_v14 = vld [vmem:[%s5385_s20 + $0x7c8] sm:$0xff] }
  0x57   : > { %897 = vmatpush1.msra.mxu0 %v788_v15  ;;  %974 = vmatpush1.msra.mxu1 %v790_v16  ;;  %v1249_v15 = vld [vmem:[%s5385_s20 + $0x7d8] sm:$0xff]  ;;  %v1246_v16 = vld [vmem:[%s5385_s20 + $0x7c0] sm:$0xff] }
  0x58   : > { %898 = vmatprep.subr.mxu0 %v785_v17  ;;  %975 = vmatprep.subr.mxu1 %v787_v18  ;;  %v1248_v17 = vld [vmem:[%s5385_s20 + $0x7d0] sm:$0xff]  ;;  %v1243_v18 = vld [vmem:[%s5385_s20 + $0x748] sm:$0xff] }
  0x59   : > { %899 = vmatpush1.msra.mxu0 %v784_v19  ;;  %976 = vmatpush1.msra.mxu1 %v786_v20  ;;  %v1245_v19 = vld [vmem:[%s5385_s20 + $0x758] sm:$0xff]  ;;  %v1242_v20 = vld [vmem:[%s5385_s20 + $0x740] sm:$0xff] }
  0x5a   : > { %900 = vmatprep.subr.mxu0 %v781_v21  ;;  %977 = vmatprep.subr.mxu1 %v783_v22  ;;  %v1239_v21 = vld [vmem:[%s5385_s20 + $0x6c8] sm:$0xff]  ;;  %v1241_v22 = vld [vmem:[%s5385_s20 + $0x6d8] sm:$0xff] }
  0x5b   : > { %901 = vmatpush1.msra.mxu0 %v780_v23  ;;  %978 = vmatpush1.msra.mxu1 %v782_v24  ;;  %v1238_v23 = vld [vmem:[%s5385_s20 + $0x6c0] sm:$0xff]  ;;  %v1240_v24 = vld [vmem:[%s5385_s20 + $0x6d0] sm:$0xff] }
  0x5c   : > { %902 = vmatprep.subr.mxu0 %v777_v25  ;;  %979 = vmatprep.subr.mxu1 %v779_v26  ;;  %v1235_v25 = vld [vmem:[%s5385_s20 + $0x648] sm:$0xff]  ;;  %v1237_v26 = vld [vmem:[%s5385_s20 + $0x658] sm:$0xff] }
  0x5d   : > { %903 = vmatpush1.msra.mxu0 %v776_v27  ;;  %980 = vmatpush1.msra.mxu1 %v778_v28  ;;  %v1234_v27 = vld [vmem:[%s5385_s20 + $0x640] sm:$0xff]  ;;  %v1236_v28 = vld [vmem:[%s5385_s20 + $0x650] sm:$0xff] }
  0x5e   : > { %904 = vmatprep.subr.mxu0 %v773_v29  ;;  %981 = vmatprep.subr.mxu1 %v775_v30  ;;  %v1231_v29 = vld [vmem:[%s5385_s20 + $0x5c8] sm:$0xff]  ;;  %v1233_v30 = vld [vmem:[%s5385_s20 + $0x5d8] sm:$0xff] }
  0x5f   : > { %905 = vmatpush1.msra.mxu0 %v772_v31  ;;  %982 = vmatpush1.msra.mxu1 %v774_v32  ;;  %v1230_v31 = vld [vmem:[%s5385_s20 + $0x5c0] sm:$0xff]  ;;  %v1232_v32 = vld [vmem:[%s5385_s20 + $0x5d0] sm:$0xff] }
  0x60   : > { %906 = vmatprep.subr.mxu0 %v769_v33  ;;  %983 = vmatprep.subr.mxu1 %v771_v34  ;;  %v1227_v33 = vld [vmem:[%s5385_s20 + $0x548] sm:$0xff]  ;;  %v1229_v34 = vld [vmem:[%s5385_s20 + $0x558] sm:$0xff] }
  0x61   : > { %907 = vmatpush1.msra.mxu0 %v768_v35  ;;  %984 = vmatpush1.msra.mxu1 %v770_v36  ;;  %v1226_v35 = vld [vmem:[%s5385_s20 + $0x540] sm:$0xff]  ;;  %v1228_v36 = vld [vmem:[%s5385_s20 + $0x550] sm:$0xff] }
  0x62   : > { %908 = vmatprep.subr.mxu0 %v765_v37  ;;  %985 = vmatprep.subr.mxu1 %v767_v39  ;;  %v1223_v37 = vld [vmem:[%s5385_s20 + $0x4c8] sm:$0xff]  ;;  %v1225_v39 = vld [vmem:[%s5385_s20 + $0x4d8] sm:$0xff] }
  0x63   : > { %909 = vmatpush1.msra.mxu0 %v764_v40  ;;  %986 = vmatpush1.msra.mxu1 %v766_v41  ;;  %v1222_v40 = vld [vmem:[%s5385_s20 + $0x4c0] sm:$0xff]  ;;  %v1224_v41 = vld [vmem:[%s5385_s20 + $0x4d0] sm:$0xff] }
  0x64   : > { %926 = vmatprep.subr.mxu0 %v857_v42  ;;  %1003 = vmatprep.subr.mxu1 %v859_v43  ;;  %v1219_v42 = vld [vmem:[%s5385_s20 + $0x448] sm:$0xff]  ;;  %v1221_v43 = vld [vmem:[%s5385_s20 + $0x458] sm:$0xff] }
  0x65   : > { %927 = vmatpush2.msra.mxu0 %v856_v44  ;;  %1004 = vmatpush2.msra.mxu1 %v858_v45  ;;  %v1218_v44 = vld [vmem:[%s5385_s20 + $0x440] sm:$0xff]  ;;  %v1220_v45 = vld [vmem:[%s5385_s20 + $0x450] sm:$0xff] }
  0x66   : > { %928 = vmatprep.subr.mxu0 %v853_v46  ;;  %1005 = vmatprep.subr.mxu1 %v855_v47  ;;  %v1215_v46 = vld [vmem:[%s5385_s20 + $0x3c8] sm:$0xff]  ;;  %v1217_v47 = vld [vmem:[%s5385_s20 + $0x3d8] sm:$0xff] }
  0x67   : > { %929 = vmatpush2.msra.mxu0 %v852_v48  ;;  %1006 = vmatpush2.msra.mxu1 %v854_v49  ;;  %v1214_v48 = vld [vmem:[%s5385_s20 + $0x3c0] sm:$0xff]  ;;  %v1216_v49 = vld [vmem:[%s5385_s20 + $0x3d0] sm:$0xff] }
  0x68   : > { %930 = vmatprep.subr.mxu0 %v849_v50  ;;  %1007 = vmatprep.subr.mxu1 %v851_v51  ;;  %v1211_v50 = vld [vmem:[%s5385_s20 + $0x348] sm:$0xff]  ;;  %v1213_v51 = vld [vmem:[%s5385_s20 + $0x358] sm:$0xff] }
  0x69   : > { %931 = vmatpush2.msra.mxu0 %v848_v52  ;;  %1008 = vmatpush2.msra.mxu1 %v850_v53  ;;  %v1210_v52 = vld [vmem:[%s5385_s20 + $0x340] sm:$0xff]  ;;  %v1212_v53 = vld [vmem:[%s5385_s20 + $0x350] sm:$0xff] }
  0x6a   : > { %932 = vmatprep.subr.mxu0 %v845_v54  ;;  %1009 = vmatprep.subr.mxu1 %v847_v55  ;;  %v1207_v54 = vld [vmem:[%s5385_s20 + $0x2c8] sm:$0xff]  ;;  %v1209_v55 = vld [vmem:[%s5385_s20 + $0x2d8] sm:$0xff] }
  0x6b   : > { %4603 = vmatprep.mubr.msk.f32.mxu0 %vm443_vm0, %v5573_v56  ;;  %4605 = vmatprep.mubr.msk.f32.mxu1 %vm443_vm0, %v5573_v56 }
  0x6c   : > { %933 = vmatpush2.msra.mxu0 %v844_v57  ;;  %1010 = vmatpush2.msra.mxu1 %v846_v58  ;;  %v1206_v57 = vld [vmem:[%s5385_s20 + $0x2c0] sm:$0xff]  ;;  %v1208_v58 = vld [vmem:[%s5385_s20 + $0x2d0] sm:$0xff] }
  0x6d   : > { %521 = vmatmul.mubr.f32.gmra.mxu0 %v5580_v59  ;;  %598 = vmatmul.mubr.f32.gmra.mxu1 %v5580_v59 }
  0x6e   : > { %934 = vmatprep.subr.mxu0 %v841_v60  ;;  %1011 = vmatprep.subr.mxu1 %v843_v61  ;;  %v1203_v60 = vld [vmem:[%s5385_s20 + $0x248] sm:$0xff]  ;;  %v1205_v61 = vld [vmem:[%s5385_s20 + $0x258] sm:$0xff] }
  0x6f   : > { %935 = vmatpush2.msra.mxu0 %v840_v62  ;;  %1012 = vmatpush2.msra.mxu1 %v842_v63  ;;  %v1202_v62 = vld [vmem:[%s5385_s20 + $0x240] sm:$0xff]  ;;  %v1204_v63 = vld [vmem:[%s5385_s20 + $0x250] sm:$0xff] }
  0x70   : > { %936 = vmatprep.subr.mxu0 %v837_v1  ;;  %1013 = vmatprep.subr.mxu1 %v839_v2  ;;  %v1199_v1 = vld [vmem:[%s5385_s20 + $0x1c8] sm:$0xff]  ;;  %v1201_v2 = vld [vmem:[%s5385_s20 + $0x1d8] sm:$0xff] }
  0x71   : > { %937 = vmatpush2.msra.mxu0 %v836_v4  ;;  %1014 = vmatpush2.msra.mxu1 %v838_v5  ;;  %v1198_v4 = vld [vmem:[%s5385_s20 + $0x1c0] sm:$0xff]  ;;  %v1200_v5 = vld [vmem:[%s5385_s20 + $0x1d0] sm:$0xff] }
  0x72   : > { %938 = vmatprep.subr.mxu0 %v833_v6  ;;  %1015 = vmatprep.subr.mxu1 %v835_v7  ;;  %v1195_v6 = vld [vmem:[%s5385_s20 + $0x148] sm:$0xff]  ;;  %v1194_v7 = vld [vmem:[%s5385_s20 + $0x140] sm:$0xff] }
  0x73   : > { %939 = vmatpush2.msra.mxu0 %v832_v8  ;;  %1016 = vmatpush2.msra.mxu1 %v834_v9  ;;  %v1196_v8 = vld [vmem:[%s5385_s20 + $0x150] sm:$0xff]  ;;  %v1191_v9 = vld [vmem:[%s5385_s20 + $0xc8] sm:$0xff] }
  0x74   : > { %940 = vmatprep.subr.mxu0 %v829_v10  ;;  %1017 = vmatprep.subr.mxu1 %v831_v11  ;;  %v1193_v10 = vld [vmem:[%s5385_s20 + $0xd8] sm:$0xff]  ;;  %v1190_v11 = vld [vmem:[%s5385_s20 + $0xc0] sm:$0xff] }
  0x75   : > { %941 = vmatpush2.msra.mxu0 %v828_v12  ;;  %4606 = vmatprep.mubr.msk.f32.mxu0 %vm443_vm0, %v5365_v0  ;;  %v1192_v12 = vld [vmem:[%s5385_s20 + $0xd0] sm:$0xff] }
  0x76   : > { %1018 = vmatpush2.msra.mxu1 %v830_v13  ;;  %4608 = vmatprep.mubr.msk.f32.mxu1 %vm443_vm0, %v5365_v0  ;;  %v1244_v0 = vld [vmem:[%s5385_s20 + $0x750] sm:$0xff]  ;;  %v1187_v13 = vld [vmem:[%s5385_s20 + $0x48] sm:$0xff] }
  0x77   : > { %943 = vmatmul.mubr.f32.vlgmr.msra.gmra.mxu0 %v5488_v38  ;;  %1020 = vmatmul.mubr.f32.vlgmr.msra.gmra.mxu1 %v5488_v38 }
  0x78   : > { %1300 = vmatprep.subr.mxu0 %v1247_v14  ;;  %1377 = vmatprep.subr.mxu1 %v1249_v15  ;;  %v1189_v14 = vld [vmem:[%s5385_s20 + $0x58] sm:$0xff]  ;;  %v1186_v15 = vld [vmem:[%s5385_s20 + $0x40] sm:$0xff] }
  0x79   : > { %1301 = vmatpush1.msra.mxu0 %v1246_v16  ;;  %1378 = vmatpush1.msra.mxu1 %v1248_v17  ;;  %v1188_v16 = vld [vmem:[%s5385_s20 + $0x50] sm:$0xff]  ;;  %v1279_v17 = vld [vmem:[%s5385_s20 + $0xbc8] sm:$0xff] }
  0x7a   : > { %1302 = vmatprep.subr.mxu0 %v1243_v18  ;;  %1379 = vmatprep.subr.mxu1 %v1245_v19  ;;  %v1281_v18 = vld [vmem:[%s5385_s20 + $0xbd8] sm:$0xff]  ;;  %v1278_v19 = vld [vmem:[%s5385_s20 + $0xbc0] sm:$0xff] }
  0x7b   : > { %4607 = vmatprep.mubr.msk.f32.mxu0 %vm443_vm0, %v5573_v56  ;;  %4609 = vmatprep.mubr.msk.f32.mxu1 %vm443_vm0, %v5573_v56 }
  0x7c   : > { %1303 = vmatpush1.msra.mxu0 %v1242_v20  ;;  %1380 = vmatpush1.msra.mxu1 %v1244_v0  ;;  %v1280_v20 = vld [vmem:[%s5385_s20 + $0xbd0] sm:$0xff]  ;;  %v1275_v0 = vld [vmem:[%s5385_s20 + $0xb48] sm:$0xff] }
  0x7d   : > { %949 = vmatmul.mubr.f32.gmra.mxu0 %v5580_v59  ;;  %1026 = vmatmul.mubr.f32.gmra.mxu1 %v5580_v59 }
  0x7e   : > { %1304 = vmatprep.subr.mxu0 %v1239_v21  ;;  %1381 = vmatprep.subr.mxu1 %v1241_v22  ;;  %v1277_v21 = vld [vmem:[%s5385_s20 + $0xb58] sm:$0xff]  ;;  %v1274_v22 = vld [vmem:[%s5385_s20 + $0xb40] sm:$0xff] }
  0x7f   : > { %1305 = vmatpush1.msra.mxu0 %v1238_v23  ;;  %1382 = vmatpush1.msra.mxu1 %v1240_v24  ;;  %v1276_v23 = vld [vmem:[%s5385_s20 + $0xb50] sm:$0xff]  ;;  %v1271_v24 = vld [vmem:[%s5385_s20 + $0xac8] sm:$0xff] }
  0x80   : > { %1306 = vmatprep.subr.mxu0 %v1235_v25  ;;  %1383 = vmatprep.subr.mxu1 %v1237_v26  ;;  %v1273_v25 = vld [vmem:[%s5385_s20 + $0xad8] sm:$0xff]  ;;  %v1270_v26 = vld [vmem:[%s5385_s20 + $0xac0] sm:$0xff] }
  0x81   : > { %1307 = vmatpush1.msra.mxu0 %v1234_v27  ;;  %1384 = vmatpush1.msra.mxu1 %v1236_v28  ;;  %v1272_v27 = vld [vmem:[%s5385_s20 + $0xad0] sm:$0xff]  ;;  %v1267_v28 = vld [vmem:[%s5385_s20 + $0xa48] sm:$0xff] }
  0x82   : > { %1308 = vmatprep.subr.mxu0 %v1231_v29  ;;  %1385 = vmatprep.subr.mxu1 %v1233_v30  ;;  %v1269_v29 = vld [vmem:[%s5385_s20 + $0xa58] sm:$0xff]  ;;  %v1266_v30 = vld [vmem:[%s5385_s20 + $0xa40] sm:$0xff] }
  0x83   : > { %1309 = vmatpush1.msra.mxu0 %v1230_v31  ;;  %1386 = vmatpush1.msra.mxu1 %v1232_v32  ;;  %v1268_v31 = vld [vmem:[%s5385_s20 + $0xa50] sm:$0xff]  ;;  %v1263_v32 = vld [vmem:[%s5385_s20 + $0x9c8] sm:$0xff] }
  0x84   : > { %1310 = vmatprep.subr.mxu0 %v1227_v33  ;;  %1387 = vmatprep.subr.mxu1 %v1229_v34  ;;  %v1265_v33 = vld [vmem:[%s5385_s20 + $0x9d8] sm:$0xff]  ;;  %v1262_v34 = vld [vmem:[%s5385_s20 + $0x9c0] sm:$0xff] }
  0x85   : > { %1311 = vmatpush1.msra.mxu0 %v1226_v35  ;;  %1388 = vmatpush1.msra.mxu1 %v1228_v36  ;;  %v1264_v35 = vld [vmem:[%s5385_s20 + $0x9d0] sm:$0xff]  ;;  %v1259_v36 = vld [vmem:[%s5385_s20 + $0x948] sm:$0xff] }
  0x86   : > { %1312 = vmatprep.subr.mxu0 %v1223_v37  ;;  %1389 = vmatprep.subr.mxu1 %v1225_v39  ;;  %v1261_v37 = vld [vmem:[%s5385_s20 + $0x958] sm:$0xff]  ;;  %v1258_v39 = vld [vmem:[%s5385_s20 + $0x940] sm:$0xff] }
  0x87   : > { %1313 = vmatpush1.msra.mxu0 %v1222_v40  ;;  %1390 = vmatpush1.msra.mxu1 %v1224_v41  ;;  %v1260_v40 = vld [vmem:[%s5385_s20 + $0x950] sm:$0xff]  ;;  %v1255_v41 = vld [vmem:[%s5385_s20 + $0x8c8] sm:$0xff] }
  0x88   : > { %1314 = vmatprep.subr.mxu0 %v1219_v42  ;;  %1391 = vmatprep.subr.mxu1 %v1221_v43  ;;  %v1257_v42 = vld [vmem:[%s5385_s20 + $0x8d8] sm:$0xff]  ;;  %v1254_v43 = vld [vmem:[%s5385_s20 + $0x8c0] sm:$0xff] }
  0x89   : > { %1315 = vmatpush1.msra.mxu0 %v1218_v44  ;;  %1392 = vmatpush1.msra.mxu1 %v1220_v45  ;;  %v1256_v44 = vld [vmem:[%s5385_s20 + $0x8d0] sm:$0xff]  ;;  %v1251_v45 = vld [vmem:[%s5385_s20 + $0x848] sm:$0xff] }
  0x8a   : > { %1316 = vmatprep.subr.mxu0 %v1215_v46  ;;  %1393 = vmatprep.subr.mxu1 %v1217_v47  ;;  %v1253_v46 = vld [vmem:[%s5385_s20 + $0x858] sm:$0xff]  ;;  %v1250_v47 = vld [vmem:[%s5385_s20 + $0x840] sm:$0xff] }
  0x8b   : > { %864 = vperm.xlu1 %5287, %v5380_v3   ;;  %1317 = vmatpush1.msra.mxu0 %v1214_v48  ;;  %v1252_v48 = vld [vmem:[%s5385_s20 + $0x850] sm:$0xff] }
  0x8c   : > { %1394 = vmatpush1.msra.mxu1 %v1216_v49  ;;  %1318 = vmatprep.subr.mxu0 %v1211_v50  ;;  %v5288_v49 = vld [vmem:[%s8402_s1 + $0x8] sm:$0xff] }
  0x8d   : > { %1395 = vmatprep.subr.mxu1 %v1213_v51  ;;  %1319 = vmatpush1.msra.mxu0 %v1210_v52  ;;  %v1669_v50 = vld [vmem:[%s5385_s20 + $0x7e8] sm:$0xff]  ;;  %v1671_v51 = vld [vmem:[%s5385_s20 + $0x7f8] sm:$0xff]  ;;  %v1668_v52 = vld [vmem:[%s5385_s20 + $0x7e0] sm:$0xff] }
  0x8e   : > { %1396 = vmatpush1.msra.mxu1 %v1212_v53  ;;  %1320 = vmatprep.subr.mxu0 %v1207_v54  ;;  %v1670_v53 = vld [vmem:[%s5385_s20 + $0x7f0] sm:$0xff]  ;;  %v1665_v54 = vld [vmem:[%s5385_s20 + $0x768] sm:$0xff] }
  0x8f   : > { %1397 = vmatprep.subr.mxu1 %v1209_v55  ;;  %435 = vperm.xlu1 %5287, %v5380_v3   ;;  %v1197_v3 = vld [vmem:[%s5385_s20 + $0x158] sm:$0xff] }
  0x90   : > { %1321 = vmatpush1.msra.mxu0 %v1206_v57  ;;  %1398 = vmatpush1.msra.mxu1 %v1208_v58  ;;  %v1667_v55 = vld [vmem:[%s5385_s20 + $0x778] sm:$0xff]  ;;  %v1664_v57 = vld [vmem:[%s5385_s20 + $0x760] sm:$0xff]  ;;  %v1666_v58 = vld [vmem:[%s5385_s20 + $0x770] sm:$0xff] }
  0x91   : > { %1322 = vmatprep.subr.mxu0 %v1203_v60  ;;  %1399 = vmatprep.subr.mxu1 %v1205_v61  ;;  %v1663_v60 = vld [vmem:[%s5385_s20 + $0x6f8] sm:$0xff]  ;;  %v1660_v61 = vld [vmem:[%s5385_s20 + $0x6e0] sm:$0xff] }
  0x92   : > { %1323 = vmatpush1.msra.mxu0 %v1202_v62  ;;  %1400 = vmatpush1.msra.mxu1 %v1204_v63  ;;  %v1662_v62 = vld [vmem:[%s5385_s20 + $0x6f0] sm:$0xff]  ;;  %v1657_v63 = vld [vmem:[%s5385_s20 + $0x668] sm:$0xff] }
  0x93   : > { %1324 = vmatprep.subr.mxu0 %v1199_v1  ;;  %1401 = vmatprep.subr.mxu1 %v1201_v2  ;;  %v1659_v1 = vld [vmem:[%s5385_s20 + $0x678] sm:$0xff]  ;;  %v1656_v2 = vld [vmem:[%s5385_s20 + $0x660] sm:$0xff] }
  0x94   : > { %1325 = vmatpush1.msra.mxu0 %v1198_v4  ;;  %1402 = vmatpush1.msra.mxu1 %v1200_v5  ;;  %v1658_v4 = vld [vmem:[%s5385_s20 + $0x670] sm:$0xff]  ;;  %v1653_v5 = vld [vmem:[%s5385_s20 + $0x5e8] sm:$0xff] }
  0x95   : > { %1326 = vmatprep.subr.mxu0 %v1195_v6  ;;  %1403 = vmatprep.subr.mxu1 %v1197_v3  ;;  %v1655_v6 = vld [vmem:[%s5385_s20 + $0x5f8] sm:$0xff]  ;;  %v1652_v3 = vld [vmem:[%s5385_s20 + $0x5e0] sm:$0xff] }
  0x96   : > { %1327 = vmatpush1.msra.mxu0 %v1194_v7  ;;  %1404 = vmatpush1.msra.mxu1 %v1196_v8  ;;  %v1654_v7 = vld [vmem:[%s5385_s20 + $0x5f0] sm:$0xff]  ;;  %v1649_v8 = vld [vmem:[%s5385_s20 + $0x568] sm:$0xff] }
  0x97   : > { %1328 = vmatprep.subr.mxu0 %v1191_v9  ;;  %1405 = vmatprep.subr.mxu1 %v1193_v10  ;;  %v1651_v9 = vld [vmem:[%s5385_s20 + $0x578] sm:$0xff]  ;;  %v1648_v10 = vld [vmem:[%s5385_s20 + $0x560] sm:$0xff] }
  0x98   : > { %1329 = vmatpush1.msra.mxu0 %v1190_v11  ;;  %1406 = vmatpush1.msra.mxu1 %v1192_v12  ;;  %v5289_v11 = vld [vmem:[%s8403_s2 + $0x8] sm:$0xff]  ;;  %v1650_v12 = vld [vmem:[%s5385_s20 + $0x570] sm:$0xff] }
  0x99   : > { %1330 = vmatprep.subr.mxu0 %v1187_v13  ;;  %1407 = vmatprep.subr.mxu1 %v1189_v14  ;;  %v1645_v13 = vld [vmem:[%s5385_s20 + $0x4e8] sm:$0xff]  ;;  %v1647_v14 = vld [vmem:[%s5385_s20 + $0x4f8] sm:$0xff] }
  0x9a   : > { %1331 = vmatpush1.msra.mxu0 %v1186_v15  ;;  %1408 = vmatpush1.msra.mxu1 %v1188_v16  ;;  %v1644_v15 = vld [vmem:[%s5385_s20 + $0x4e0] sm:$0xff]  ;;  %v1646_v16 = vld [vmem:[%s5385_s20 + $0x4f0] sm:$0xff] }
  0x9b   : > { %1348 = vmatprep.subr.mxu0 %v1279_v17  ;;  %1425 = vmatprep.subr.mxu1 %v1281_v18  ;;  %v1641_v17 = vld [vmem:[%s5385_s20 + $0x468] sm:$0xff]  ;;  %v1643_v18 = vld [vmem:[%s5385_s20 + $0x478] sm:$0xff] }
  0x9c   : > { %1349 = vmatpush2.msra.mxu0 %v1278_v19  ;;  %1426 = vmatpush2.msra.mxu1 %v1280_v20  ;;  %v1640_v19 = vld [vmem:[%s5385_s20 + $0x460] sm:$0xff]  ;;  %v1642_v20 = vld [vmem:[%s5385_s20 + $0x470] sm:$0xff] }
  0x9d   : > { %1350 = vmatprep.subr.mxu0 %v1275_v0  ;;  %1427 = vmatprep.subr.mxu1 %v1277_v21  ;;  %v1637_v0 = vld [vmem:[%s5385_s20 + $0x3e8] sm:$0xff]  ;;  %v1639_v21 = vld [vmem:[%s5385_s20 + $0x3f8] sm:$0xff] }
  0x9e   : > { %1351 = vmatpush2.msra.mxu0 %v1274_v22  ;;  %1428 = vmatpush2.msra.mxu1 %v1276_v23  ;;  %v1636_v22 = vld [vmem:[%s5385_s20 + $0x3e0] sm:$0xff]  ;;  %v1638_v23 = vld [vmem:[%s5385_s20 + $0x3f0] sm:$0xff] }
  0x9f   : > { %1352 = vmatprep.subr.mxu0 %v1271_v24  ;;  %1429 = vmatprep.subr.mxu1 %v1273_v25  ;;  %v1633_v24 = vld [vmem:[%s5385_s20 + $0x368] sm:$0xff]  ;;  %v1635_v25 = vld [vmem:[%s5385_s20 + $0x378] sm:$0xff] }
  0xa0   : > { %1353 = vmatpush2.msra.mxu0 %v1270_v26  ;;  %1430 = vmatpush2.msra.mxu1 %v1272_v27  ;;  %v1632_v26 = vld [vmem:[%s5385_s20 + $0x360] sm:$0xff]  ;;  %v1634_v27 = vld [vmem:[%s5385_s20 + $0x370] sm:$0xff] }
  0xa1   : > { %1354 = vmatprep.subr.mxu0 %v1267_v28  ;;  %1431 = vmatprep.subr.mxu1 %v1269_v29  ;;  %v1629_v28 = vld [vmem:[%s5385_s20 + $0x2e8] sm:$0xff]  ;;  %v1631_v29 = vld [vmem:[%s5385_s20 + $0x2f8] sm:$0xff] }
  0xa2   : > { %1355 = vmatpush2.msra.mxu0 %v1266_v30  ;;  %1432 = vmatpush2.msra.mxu1 %v1268_v31  ;;  %v1628_v30 = vld [vmem:[%s5385_s20 + $0x2e0] sm:$0xff]  ;;  %v1630_v31 = vld [vmem:[%s5385_s20 + $0x2f0] sm:$0xff] }
  0xa3   : > { %1356 = vmatprep.subr.mxu0 %v1263_v32  ;;  %1433 = vmatprep.subr.mxu1 %v1265_v33  ;;  %v1625_v32 = vld [vmem:[%s5385_s20 + $0x268] sm:$0xff]  ;;  %v1627_v33 = vld [vmem:[%s5385_s20 + $0x278] sm:$0xff] }
  0xa4   : > { %1357 = vmatpush2.msra.mxu0 %v1262_v34  ;;  %1434 = vmatpush2.msra.mxu1 %v1264_v35  ;;  %v1624_v34 = vld [vmem:[%s5385_s20 + $0x260] sm:$0xff]  ;;  %v1626_v35 = vld [vmem:[%s5385_s20 + $0x270] sm:$0xff] }
  0xa5   : > { %1358 = vmatprep.subr.mxu0 %v1259_v36  ;;  %1435 = vmatprep.subr.mxu1 %v1261_v37  ;;  %v1621_v36 = vld [vmem:[%s5385_s20 + $0x1e8] sm:$0xff]  ;;  %v1623_v37 = vld [vmem:[%s5385_s20 + $0x1f8] sm:$0xff] }
  0xa6   : > { %1359 = vmatpush2.msra.mxu0 %v1258_v39  ;;  %1436 = vmatpush2.msra.mxu1 %v1260_v40  ;;  %v1620_v39 = vld [vmem:[%s5385_s20 + $0x1e0] sm:$0xff]  ;;  %v1622_v40 = vld [vmem:[%s5385_s20 + $0x1f0] sm:$0xff] }
  0xa7   : > { %1360 = vmatprep.subr.mxu0 %v1255_v41  ;;  %1437 = vmatprep.subr.mxu1 %v1257_v42  ;;  %v1617_v41 = vld [vmem:[%s5385_s20 + $0x168] sm:$0xff]  ;;  %v1619_v42 = vld [vmem:[%s5385_s20 + $0x178] sm:$0xff] }
  0xa8   : > { %1361 = vmatpush2.msra.mxu0 %v1254_v43  ;;  %1438 = vmatpush2.msra.mxu1 %v1256_v44  ;;  %v1616_v43 = vld [vmem:[%s5385_s20 + $0x160] sm:$0xff]  ;;  %v1618_v44 = vld [vmem:[%s5385_s20 + $0x170] sm:$0xff] }
  0xa9   : > { %1362 = vmatprep.subr.mxu0 %v1251_v45  ;;  %1439 = vmatprep.subr.mxu1 %v1253_v46  ;;  %v1613_v45 = vld [vmem:[%s5385_s20 + $0xe8] sm:$0xff]  ;;  %v1615_v46 = vld [vmem:[%s5385_s20 + $0xf8] sm:$0xff] }
  0xaa   : > { %1363 = vmatpush2.msra.mxu0 %v1250_v47  ;;  %4610 = vmatprep.mubr.msk.f32.mxu0 %vm443_vm0, %v5288_v49  ;;  %v1612_v47 = vld [vmem:[%s5385_s20 + $0xe0] sm:$0xff] }
  0xab   : > { %1440 = vmatpush2.msra.mxu1 %v1252_v48  ;;  %4612 = vmatprep.mubr.msk.f32.mxu1 %vm443_vm0, %v5288_v49  ;;  %v1614_v48 = vld [vmem:[%s5385_s20 + $0xf0] sm:$0xff]  ;;  %v1609_v49 = vld [vmem:[%s5385_s20 + $0x68] sm:$0xff] }
  0xac   : > { %1365 = vmatmul.mubr.f32.vlgmr.msra.gmra.mxu0 %v5488_v38  ;;  %1442 = vmatmul.mubr.f32.vlgmr.msra.gmra.mxu1 %v5488_v38  ;;  %v1661_v38 = vld [vmem:[%s5385_s20 + $0x6e8] sm:$0xff] }
  0xad   : > { %1722 = vmatprep.subr.mxu0 %v1669_v50  ;;  %1799 = vmatprep.subr.mxu1 %v1671_v51  ;;  %v1611_v50 = vld [vmem:[%s5385_s20 + $0x78] sm:$0xff]  ;;  %v1608_v51 = vld [vmem:[%s5385_s20 + $0x60] sm:$0xff] }
  0xae   : > { %1723 = vmatpush1.msra.mxu0 %v1668_v52  ;;  %1800 = vmatpush1.msra.mxu1 %v1670_v53  ;;  %v1610_v52 = vld [vmem:[%s5385_s20 + $0x70] sm:$0xff]  ;;  %v1701_v53 = vld [vmem:[%s5385_s20 + $0xbe8] sm:$0xff] }
  0xaf   : > { %1724 = vmatprep.subr.mxu0 %v1665_v54  ;;  %1801 = vmatprep.subr.mxu1 %v1667_v55  ;;  %v1703_v54 = vld [vmem:[%s5385_s20 + $0xbf8] sm:$0xff]  ;;  %v1700_v55 = vld [vmem:[%s5385_s20 + $0xbe0] sm:$0xff] }
  0xb0   : > { %4611 = vmatprep.mubr.msk.f32.mxu0 %vm443_vm0, %v5573_v56  ;;  %4613 = vmatprep.mubr.msk.f32.mxu1 %vm443_vm0, %v5573_v56 }
  0xb1   : > { %1725 = vmatpush1.msra.mxu0 %v1664_v57  ;;  %1802 = vmatpush1.msra.mxu1 %v1666_v58  ;;  %v1702_v57 = vld [vmem:[%s5385_s20 + $0xbf0] sm:$0xff]  ;;  %v1697_v58 = vld [vmem:[%s5385_s20 + $0xb68] sm:$0xff] }
  0xb2   : > { %1371 = vmatmul.mubr.f32.gmra.mxu0 %v5580_v59  ;;  %1448 = vmatmul.mubr.f32.gmra.mxu1 %v5580_v59 }
  0xb3   : > { %1726 = vmatprep.subr.mxu0 %v1661_v38  ;;  %1803 = vmatprep.subr.mxu1 %v1663_v60  ;;  %v1699_v38 = vld [vmem:[%s5385_s20 + $0xb78] sm:$0xff]  ;;  %v1696_v60 = vld [vmem:[%s5385_s20 + $0xb60] sm:$0xff] }
  0xb4   : > { %1727 = vmatpush1.msra.mxu0 %v1660_v61  ;;  %1804 = vmatpush1.msra.mxu1 %v1662_v62  ;;  %v1698_v61 = vld [vmem:[%s5385_s20 + $0xb70] sm:$0xff]  ;;  %v1693_v62 = vld [vmem:[%s5385_s20 + $0xae8] sm:$0xff] }
  0xb5   : > { %1728 = vmatprep.subr.mxu0 %v1657_v63  ;;  %1805 = vmatprep.subr.mxu1 %v1659_v1  ;;  %v1695_v63 = vld [vmem:[%s5385_s20 + $0xaf8] sm:$0xff]  ;;  %v1692_v1 = vld [vmem:[%s5385_s20 + $0xae0] sm:$0xff] }
  0xb6   : > { %1729 = vmatpush1.msra.mxu0 %v1656_v2  ;;  %1806 = vmatpush1.msra.mxu1 %v1658_v4  ;;  %v1694_v2 = vld [vmem:[%s5385_s20 + $0xaf0] sm:$0xff]  ;;  %v1689_v4 = vld [vmem:[%s5385_s20 + $0xa68] sm:$0xff] }
  0xb7   : > { %1730 = vmatprep.subr.mxu0 %v1653_v5  ;;  %1807 = vmatprep.subr.mxu1 %v1655_v6  ;;  %v1691_v5 = vld [vmem:[%s5385_s20 + $0xa78] sm:$0xff]  ;;  %v1688_v6 = vld [vmem:[%s5385_s20 + $0xa60] sm:$0xff] }
  0xb8   : > { %869 = vperm.xlu0 %5286, %v5289_v11   ;;  %1731 = vmatpush1.msra.mxu0 %v1652_v3  ;;  %v1690_v3 = vld [vmem:[%s5385_s20 + $0xa70] sm:$0xff] }
  0xb9   : > { %1808 = vmatpush1.msra.mxu1 %v1654_v7  ;;  %1732 = vmatprep.subr.mxu0 %v1649_v8  ;;  %v1685_v7 = vld [vmem:[%s5385_s20 + $0x9e8] sm:$0xff]  ;;  %v1687_v8 = vld [vmem:[%s5385_s20 + $0x9f8] sm:$0xff] }
  0xba   : > { %1809 = vmatprep.subr.mxu1 %v1651_v9  ;;  %1733 = vmatpush1.msra.mxu0 %v1648_v10  ;;  %v1684_v9 = vld [vmem:[%s5385_s20 + $0x9e0] sm:$0xff]  ;;  %v1686_v10 = vld [vmem:[%s5385_s20 + $0x9f0] sm:$0xff] }
  0xbb   : > { %1810 = vmatpush1.msra.mxu1 %v1650_v12  ;;  %1734 = vmatprep.subr.mxu0 %v1645_v13  ;;  %v1683_v12 = vld [vmem:[%s5385_s20 + $0x978] sm:$0xff]  ;;  %v1680_v13 = vld [vmem:[%s5385_s20 + $0x960] sm:$0xff] }
  0xbc   : > { %1811 = vmatprep.subr.mxu1 %v1647_v14  ;;  %440 = vperm.xlu0 %5286, %v5289_v11   ;;  %v1681_v11 = vld [vmem:[%s5385_s20 + $0x968] sm:$0xff]  ;;  %v1682_v14 = vld [vmem:[%s5385_s20 + $0x970] sm:$0xff] }
  0xbd   : > { %1735 = vmatpush1.msra.mxu0 %v1644_v15  ;;  %1812 = vmatpush1.msra.mxu1 %v1646_v16  ;;  %v1677_v15 = vld [vmem:[%s5385_s20 + $0x8e8] sm:$0xff]  ;;  %v1679_v16 = vld [vmem:[%s5385_s20 + $0x8f8] sm:$0xff] }
  0xbe   : > { %1736 = vmatprep.subr.mxu0 %v1641_v17  ;;  %1813 = vmatprep.subr.mxu1 %v1643_v18  ;;  %v1676_v17 = vld [vmem:[%s5385_s20 + $0x8e0] sm:$0xff]  ;;  %v1678_v18 = vld [vmem:[%s5385_s20 + $0x8f0] sm:$0xff] }
  0xbf   : > { %1737 = vmatpush1.msra.mxu0 %v1640_v19  ;;  %1814 = vmatpush1.msra.mxu1 %v1642_v20  ;;  %v1673_v19 = vld [vmem:[%s5385_s20 + $0x868] sm:$0xff]  ;;  %v1675_v20 = vld [vmem:[%s5385_s20 + $0x878] sm:$0xff] }
  0xc0   : > { %1738 = vmatprep.subr.mxu0 %v1637_v0  ;;  %1815 = vmatprep.subr.mxu1 %v1639_v21  ;;  %v1672_v0 = vld [vmem:[%s5385_s20 + $0x860] sm:$0xff]  ;;  %v1605_v21 = vld [vmem:[%s8402_s1 + $0x8] sm:$0xff] }
  0xc1   : > { %1739 = vmatpush1.msra.mxu0 %v1636_v22  ;;  %1816 = vmatpush1.msra.mxu1 %v1638_v23  ;;  %v1674_v22 = vld [vmem:[%s5385_s20 + $0x870] sm:$0xff]  ;;  %v1604_v23 = vld [vmem:[%s8402_s1] sm:$0xff] }
  0xc2   : > { %1740 = vmatprep.subr.mxu0 %v1633_v24  ;;  %1817 = vmatprep.subr.mxu1 %v1635_v25  ;;  %v5840_v24 = vpop.permute.xlu1 %1291 }
  0xc3   : > { %1741 = vmatpush1.msra.mxu0 %v1632_v26  ;;  %1818 = vmatpush1.msra.mxu1 %v1634_v27 }
  0xc4   : > { %1742 = vmatprep.subr.mxu0 %v1629_v28  ;;  %1819 = vmatprep.subr.mxu1 %v1631_v29 }
  0xc5   : > { %1743 = vmatpush1.msra.mxu0 %v1628_v30  ;;  %1820 = vmatpush1.msra.mxu1 %v1630_v31 }
  0xc6   : > { %1744 = vmatprep.subr.mxu0 %v1625_v32  ;;  %1821 = vmatprep.subr.mxu1 %v1627_v33  ;;  %v5842_v25 = vpop.permute.xlu1 %1286 }
  0xc7   : > { %1745 = vmatpush1.msra.mxu0 %v1624_v34  ;;  %1822 = vmatpush1.msra.mxu1 %v1626_v35 }
  0xc8   : > { %1746 = vmatprep.subr.mxu0 %v1621_v36  ;;  %1823 = vmatprep.subr.mxu1 %v1623_v37 }
  0xc9   : > { %1747 = vmatpush1.msra.mxu0 %v1620_v39  ;;  %1824 = vmatpush1.msra.mxu1 %v1622_v40  ;;  %v5864_v39 = vpop.permute.xlu0 %1713 }
  0xca   : > { %1748 = vmatprep.subr.mxu0 %v1617_v41  ;;  %1825 = vmatprep.subr.mxu1 %v1619_v42 }
  0xcb   : > { %1749 = vmatpush1.msra.mxu0 %v1616_v43  ;;  %1826 = vmatpush1.msra.mxu1 %v1618_v44 }
  0xcc   : > { %1750 = vmatprep.subr.mxu0 %v1613_v45  ;;  %1827 = vmatprep.subr.mxu1 %v1615_v46 }
  0xcd   : > { %1751 = vmatpush1.msra.mxu0 %v1612_v47  ;;  %1828 = vmatpush1.msra.mxu1 %v1614_v48  ;;  %v5866_v40 = vpop.permute.xlu0 %1708 }
  0xce   : > { %1752 = vmatprep.subr.mxu0 %v1609_v49  ;;  %1829 = vmatprep.subr.mxu1 %v1611_v50 }
  0xcf   : > { %1753 = vmatpush1.msra.mxu0 %v1608_v51  ;;  %1830 = vmatpush1.msra.mxu1 %v1610_v52 }
  0xd0   : > { %1770 = vmatprep.subr.mxu0 %v1701_v53  ;;  %1847 = vmatprep.subr.mxu1 %v1703_v54 }
  0xd1   : > { %1771 = vmatpush2.msra.mxu0 %v1700_v55  ;;  %1848 = vmatpush2.msra.mxu1 %v1702_v57 }
  0xd2   : > { %1772 = vmatprep.subr.mxu0 %v1697_v58  ;;  %1849 = vmatprep.subr.mxu1 %v1699_v38 }
  0xd3   : > { %1773 = vmatpush2.msra.mxu0 %v1696_v60  ;;  %1850 = vmatpush2.msra.mxu1 %v1698_v61 }
  0xd4   : > { %1774 = vmatprep.subr.mxu0 %v1693_v62  ;;  %1851 = vmatprep.subr.mxu1 %v1695_v63 }
  0xd5   : > { %1775 = vmatpush2.msra.mxu0 %v1692_v1  ;;  %1852 = vmatpush2.msra.mxu1 %v1694_v2 }
  0xd6   : > { %1776 = vmatprep.subr.mxu0 %v1689_v4  ;;  %1853 = vmatprep.subr.mxu1 %v1691_v5 }
  0xd7   : > { %1777 = vmatpush2.msra.mxu0 %v1688_v6  ;;  %1854 = vmatpush2.msra.mxu1 %v1690_v3 }
  0xd8   : > { %1778 = vmatprep.subr.mxu0 %v1685_v7  ;;  %1855 = vmatprep.subr.mxu1 %v1687_v8 }
  0xd9   : > { %1779 = vmatpush2.msra.mxu0 %v1684_v9  ;;  %1856 = vmatpush2.msra.mxu1 %v1686_v10 }
  0xda   : > { %1780 = vmatprep.subr.mxu0 %v1681_v11  ;;  %1857 = vmatprep.subr.mxu1 %v1683_v12 }
  0xdb   : > { %1781 = vmatpush2.msra.mxu0 %v1680_v13  ;;  %1858 = vmatpush2.msra.mxu1 %v1682_v14 }
  0xdc   : > { %1782 = vmatprep.subr.mxu0 %v1677_v15  ;;  %1859 = vmatprep.subr.mxu1 %v1679_v16 }
  0xdd   : > { %1783 = vmatpush2.msra.mxu0 %v1676_v17  ;;  %1860 = vmatpush2.msra.mxu1 %v1678_v18 }
  0xde   : > { %1784 = vmatprep.subr.mxu0 %v1673_v19  ;;  %1861 = vmatprep.subr.mxu1 %v1675_v20 }
  0xdf   : > { %1785 = vmatpush2.msra.mxu0 %v1672_v0  ;;  %4614 = vmatprep.mubr.msk.f32.mxu0 %vm443_vm0, %v1605_v21 }
  0xe0   : > { %1862 = vmatpush2.msra.mxu1 %v1674_v22  ;;  %4616 = vmatprep.mubr.msk.f32.mxu1 %vm443_vm0, %v1605_v21 }
  0xe1   : > { %1787 = vmatmul.mubr.f32.vlgmr.msra.gmra.mxu0 %v1604_v23  ;;  %1864 = vmatmul.mubr.f32.vlgmr.msra.gmra.mxu1 %v1604_v23 }
  0xe2   : > { %4615 = vmatprep.mubr.msk.f32.mxu0 %vm443_vm0, %v5573_v56  ;;  %4617 = vmatprep.mubr.msk.f32.mxu1 %vm443_vm0, %v5573_v56 }
  0xe5   : > { %1793 = vmatmul.mubr.f32.gmra.mxu0 %v5580_v59  ;;  %1870 = vmatmul.mubr.f32.gmra.mxu1 %v5580_v59 }
 0x103   : > { %v516_v26 = vpop.f32.mrf.mxu0  ;;  %v593_v27 = vpop.f32.mrf.mxu1 }
 0x105   : > { %v518_v29 = vpop.f32.mrf.mxu0  ;;  %v595_v30 = vpop.f32.mrf.mxu1 }
 0x106   : > { %v865_v28 = vpop.permute.xlu1 %864 }
 0x10a   : > { %v436_v31 = vpop.permute.xlu1 %435 }
 0x10b   : > { %v517_v32 = vadd.f32 %v516_v26, %v436_v31  ;;  %v594_v33 = vadd.f32 %v593_v27, %v436_v31  ;;  %v519_v34 = vadd.f32 %v518_v29, %v436_v31  ;;  %v596_v35 = vadd.f32 %v595_v30, %v436_v31 }
 0x10d   : > { %v5844_v36 = vmax.f32 %v517_v32, 0.0  ;;  %v5846_v56 = vmax.f32 %v594_v33, 0.0  ;;  %v5848_v37 = vmax.f32 %v519_v34, 0.0  ;;  %v5850_v59 = vmax.f32 %v596_v35, 0.0 }
 0x10f   : > { %612 = vst [vmem:[#allocation2] sm:$0xff] %v5844_v36  ;;  %614 = vst [vmem:[#allocation2 + $0x10] sm:$0xff] %v5846_v56  ;;  %632 = vrot.lane.b32.xlu1 %v5846_v56, %s5299_s16  ;;  %628 = vrot.lane.b32.xlu0 %v5844_v36, %s5299_s16 }
 0x110   : > { %613 = vst [vmem:[#allocation2 + $0x8] sm:$0xff] %v5848_v37  ;;  %615 = vst [vmem:[#allocation2 + $0x18] sm:$0xff] %v5850_v59 }
 0x113   : > { %634 = vrot.lane.b32.xlu1 %v5850_v59, %s5299_s16  ;;  %630 = vrot.lane.b32.xlu0 %v5848_v37, %s5299_s16 }
 0x12d   : > { %v522_v41 = vpop.f32.mrf.mxu0  ;;  %v599_v43 = vpop.f32.mrf.mxu1 }
 0x12f   : > { %v524_v44 = vpop.f32.mrf.mxu0  ;;  %v601_v45 = vpop.f32.mrf.mxu1 }
 0x133   : > { %v870_v42 = vpop.permute.xlu0 %869 }
 0x137   : > { %v441_v46 = vpop.permute.xlu0 %440  ;;  %v944_v47 = vpop.f32.mrf.mxu0 }
 0x138   : > { %v523_v48 = vadd.f32 %v522_v41, %v441_v46  ;;  %v600_v49 = vadd.f32 %v599_v43, %v441_v46  ;;  %v525_v50 = vadd.f32 %v524_v44, %v441_v46  ;;  %v602_v51 = vadd.f32 %v601_v45, %v441_v46  ;;  %v1021_v52 = vpop.f32.mrf.mxu1 }
 0x139   : > { %v945_v53 = vadd.f32 %v944_v47, %v865_v28  ;;  %v1022_v54 = vadd.f32 %v1021_v52, %v865_v28  ;;  %v946_v55 = vpop.f32.mrf.mxu0 }
 0x13a   : > { %v5868_v57 = vmax.f32 %v523_v48, 0.0  ;;  %v5870_v58 = vmax.f32 %v600_v49, 0.0  ;;  %v5872_v38 = vmax.f32 %v525_v50, 0.0  ;;  %v5874_v60 = vmax.f32 %v602_v51, 0.0  ;;  %v1023_v61 = vpop.f32.mrf.mxu1 }
 0x13b   : > { %v5876_v62 = vmax.f32 %v945_v53, 0.0  ;;  %v5878_v63 = vmax.f32 %v1022_v54, 0.0  ;;  %v947_v1 = vadd.f32 %v946_v55, %v865_v28  ;;  %v1024_v2 = vadd.f32 %v1023_v61, %v865_v28 }
 0x13c   : > { %616 = vst [vmem:[#allocation2 + $0x20] sm:$0xff] %v5868_v57  ;;  %618 = vst [vmem:[#allocation2 + $0x30] sm:$0xff] %v5870_v58  ;;  %640 = vrot.lane.b32.xlu1 %v5870_v58, %s5299_s16  ;;  %636 = vrot.lane.b32.xlu0 %v5868_v57, %s5299_s16 }
 0x13d   : > { %617 = vst [vmem:[#allocation2 + $0x28] sm:$0xff] %v5872_v38  ;;  %619 = vst [vmem:[#allocation2 + $0x38] sm:$0xff] %v5874_v60  ;;  %v5890_v4 = vmax.f32 %v947_v1, 0.0  ;;  %v5892_v5 = vmax.f32 %v1024_v2, 0.0  ;;  %v950_v6 = vpop.f32.mrf.mxu0  ;;  %v1027_v3 = vpop.f32.mrf.mxu1 }
 0x13e   : > { %1040 = vst [vmem:[#allocation2 + $0x40] sm:$0xff] %v5876_v62  ;;  %1042 = vst [vmem:[#allocation2 + $0x50] sm:$0xff] %v5878_v63  ;;  %v951_v7 = vadd.f32 %v950_v6, %v870_v42  ;;  %v1028_v8 = vadd.f32 %v1027_v3, %v870_v42 }
 0x13f   : > { %1041 = vst [vmem:[#allocation2 + $0x48] sm:$0xff] %v5890_v4  ;;  %1043 = vst [vmem:[#allocation2 + $0x58] sm:$0xff] %v5892_v5  ;;  %v952_v9 = vpop.f32.mrf.mxu0  ;;  %v1029_v10 = vpop.f32.mrf.mxu1 }
 0x140   : > { %642 = vrot.lane.b32.xlu1 %v5874_v60, %s5299_s16  ;;  %638 = vrot.lane.b32.xlu0 %v5872_v38, %s5299_s16  ;;  %v5900_v11 = vmax.f32 %v951_v7, 0.0  ;;  %v5902_v12 = vmax.f32 %v1028_v8, 0.0  ;;  %v953_v13 = vadd.f32 %v952_v9, %v870_v42  ;;  %v1030_v14 = vadd.f32 %v1029_v10, %v870_v42 }
 0x142   : > { %1044 = vst [vmem:[#allocation2 + $0x60] sm:$0xff] %v5900_v11  ;;  %1046 = vst [vmem:[#allocation2 + $0x70] sm:$0xff] %v5902_v12  ;;  %v5906_v15 = vmax.f32 %v953_v13, 0.0  ;;  %v5908_v16 = vmax.f32 %v1030_v14, 0.0 }
 0x144   : > { %1060 = vrot.lane.b32.xlu1 %v5878_v63, %s5299_s16  ;;  %1056 = vrot.lane.b32.xlu0 %v5876_v62, %s5299_s16 }
 0x148   : > { %1062 = vrot.lane.b32.xlu1 %v5892_v5, %s5299_s16  ;;  %1058 = vrot.lane.b32.xlu0 %v5890_v4, %s5299_s16 }
 0x14c   : > { %1068 = vrot.lane.b32.xlu1 %v5902_v12, %s5299_s16  ;;  %1064 = vrot.lane.b32.xlu0 %v5900_v11, %s5299_s16 }
 0x150   : > { %1152 = vrot.lane.b32.xlu1 %v5902_v12, %s5300_s17  ;;  %1148 = vrot.lane.b32.xlu0 %v5900_v11, %s5300_s17 }
 0x154   : > { %1070 = vrot.lane.b32.xlu1 %v5908_v16, %s5299_s16  ;;  %1066 = vrot.lane.b32.xlu0 %v5906_v15, %s5299_s16 }
 0x158   : > { %1154 = vrot.lane.b32.xlu1 %v5908_v16, %s5300_s17  ;;  %1150 = vrot.lane.b32.xlu0 %v5906_v15, %s5300_s17 }
 0x16c   : > { %v1366_v17 = vpop.f32.mrf.mxu0  ;;  %v1443_v18 = vpop.f32.mrf.mxu1 }
 0x16d   : > { %v1367_v19 = vadd.f32 %v1366_v17, %v5842_v25  ;;  %v1444_v20 = vadd.f32 %v1443_v18, %v5842_v25 }
 0x16e   : > { %v1368_v0 = vpop.f32.mrf.mxu0  ;;  %v1445_v21 = vpop.f32.mrf.mxu1 }
 0x16f   : > { %v5936_v22 = vmax.f32 %v1367_v19, 0.0  ;;  %v5938_v23 = vmax.f32 %v1444_v20, 0.0  ;;  %v1369_v26 = vadd.f32 %v1368_v0, %v5842_v25  ;;  %v1446_v27 = vadd.f32 %v1445_v21, %v5842_v25 }
 0x171   : > { %v5942_v28 = vmax.f32 %v1369_v26, 0.0  ;;  %v5944_v29 = vmax.f32 %v1446_v27, 0.0  ;;  %1482 = vrot.lane.b32.xlu1 %v5938_v23, %s5299_s16  ;;  %1478 = vrot.lane.b32.xlu0 %v5936_v22, %s5299_s16 }
 0x172   : > { %v1372_v30 = vpop.f32.mrf.mxu0  ;;  %v1449_v31 = vpop.f32.mrf.mxu1 }
 0x173   : > { %v1373_v32 = vadd.f32 %v1372_v30, %v5840_v24  ;;  %v1450_v33 = vadd.f32 %v1449_v31, %v5840_v24 }
 0x174   : > { %v1374_v34 = vpop.f32.mrf.mxu0  ;;  %v1451_v35 = vpop.f32.mrf.mxu1 }
 0x175   : > { %v5952_v41 = vmax.f32 %v1373_v32, 0.0  ;;  %v5954_v25 = vmax.f32 %v1450_v33, 0.0  ;;  %v1375_v42 = vadd.f32 %v1374_v34, %v5840_v24  ;;  %v1452_v43 = vadd.f32 %v1451_v35, %v5840_v24  ;;  %1566 = vrot.lane.b32.xlu1 %v5938_v23, %s5300_s17  ;;  %1562 = vrot.lane.b32.xlu0 %v5936_v22, %s5300_s17 }
 0x177   : > { %v5962_v44 = vmax.f32 %v1375_v42, 0.0  ;;  %v5964_v45 = vmax.f32 %v1452_v43, 0.0 }
 0x179   : > { %1524 = vrot.lane.b32.xlu1 %v5938_v23, %s5301_s18  ;;  %1520 = vrot.lane.b32.xlu0 %v5936_v22, %s5301_s18 }
 0x17d   : > { %1484 = vrot.lane.b32.xlu1 %v5944_v29, %s5299_s16  ;;  %1480 = vrot.lane.b32.xlu0 %v5942_v28, %s5299_s16 }
 0x181   : > { %1568 = vrot.lane.b32.xlu1 %v5944_v29, %s5300_s17  ;;  %1564 = vrot.lane.b32.xlu0 %v5942_v28, %s5300_s17  ;;  %v633_v24 = vpop.permute.xlu1 %632  ;;  %v629_v46 = vpop.permute.xlu0 %628 }
 0x185   : > { %1526 = vrot.lane.b32.xlu1 %v5944_v29, %s5301_s18  ;;  %1522 = vrot.lane.b32.xlu0 %v5942_v28, %s5301_s18  ;;  %v635_v47 = vpop.permute.xlu1 %634  ;;  %v631_v48 = vpop.permute.xlu0 %630 }
 0x186   : > { %v5983_v49 = vsel %vm644_vm1, %v633_v24, %v635_v47  ;;  %662 = vst.msk [vmem:[#allocation2 + $0x98] sm:$0xff] %vm644_vm1, %v635_v47  ;;  %v5987_v50 = vsel %vm644_vm1, %v629_v46, %v631_v48  ;;  %v5990_v51 = vsel %vm644_vm1, %v631_v48, %v633_v24 }
 0x187   : > { %670 = vst.msk [vmem:[#allocation2 + $0x98] sm:$0xff] %vm669_vm2, %v629_v46 }
 0x189   : > { %1490 = vrot.lane.b32.xlu1 %v5954_v25, %s5299_s16  ;;  %1486 = vrot.lane.b32.xlu0 %v5952_v41, %s5299_s16 }
 0x18d   : > { %1574 = vrot.lane.b32.xlu1 %v5954_v25, %s5300_s17  ;;  %1570 = vrot.lane.b32.xlu0 %v5952_v41, %s5300_s17 }
 0x191   : > { %1532 = vrot.lane.b32.xlu1 %v5954_v25, %s5301_s18  ;;  %1528 = vrot.lane.b32.xlu0 %v5952_v41, %s5301_s18 }
 0x195   : > { %1492 = vrot.lane.b32.xlu1 %v5964_v45, %s5299_s16  ;;  %1488 = vrot.lane.b32.xlu0 %v5962_v44, %s5299_s16 }
 0x199   : > { %1576 = vrot.lane.b32.xlu1 %v5964_v45, %s5300_s17  ;;  %1572 = vrot.lane.b32.xlu0 %v5962_v44, %s5300_s17 }
 0x19d   : > { %1534 = vrot.lane.b32.xlu1 %v5964_v45, %s5301_s18  ;;  %1530 = vrot.lane.b32.xlu0 %v5962_v44, %s5301_s18 }
 0x1a1   : > { %v1788_v52 = vpop.f32.mrf.mxu0  ;;  %v1865_v53 = vpop.f32.mrf.mxu1 }
 0x1a2   : > { %v1789_v54 = vadd.f32 %v1788_v52, %v5866_v40  ;;  %v1866_v55 = vadd.f32 %v1865_v53, %v5866_v40 }
 0x1a3   : > { %v1790_v61 = vpop.f32.mrf.mxu0  ;;  %v1867_v1 = vpop.f32.mrf.mxu1 }
 0x1a4   : > { %v6019_v2 = vmax.f32 %v1789_v54, 0.0  ;;  %v6021_v6 = vmax.f32 %v1866_v55, 0.0  ;;  %v1791_v3 = vadd.f32 %v1790_v61, %v5866_v40  ;;  %v1868_v7 = vadd.f32 %v1867_v1, %v5866_v40 }
 0x1a5   : > { %v1794_v8 = vpop.f32.mrf.mxu0  ;;  %v1871_v9 = vpop.f32.mrf.mxu1 }
 0x1a6   : > { %v6025_v10 = vmax.f32 %v1791_v3, 0.0  ;;  %v6027_v13 = vmax.f32 %v1868_v7, 0.0  ;;  %v1795_v14 = vadd.f32 %v1794_v8, %v5864_v39  ;;  %v1872_v17 = vadd.f32 %v1871_v9, %v5864_v39  ;;  %1904 = vrot.lane.b32.xlu1 %v6021_v6, %s5299_s16  ;;  %1900 = vrot.lane.b32.xlu0 %v6019_v2, %s5299_s16 }
 0x1a7   : > { %v1796_v18 = vpop.f32.mrf.mxu0  ;;  %v1873_v19 = vpop.f32.mrf.mxu1 }
 0x1a8   : > { %v6035_v20 = vmax.f32 %v1795_v14, 0.0  ;;  %v6037_v40 = vmax.f32 %v1872_v17, 0.0  ;;  %v1797_v0 = vadd.f32 %v1796_v18, %v5864_v39  ;;  %v1874_v21 = vadd.f32 %v1873_v19, %v5864_v39 }
 0x1aa   : > { %v6041_v26 = vmax.f32 %v1797_v0, 0.0  ;;  %v6043_v27 = vmax.f32 %v1874_v21, 0.0  ;;  %1988 = vrot.lane.b32.xlu1 %v6021_v6, %s5300_s17  ;;  %1984 = vrot.lane.b32.xlu0 %v6019_v2, %s5300_s17 }
 0x1ae   : > { %1946 = vrot.lane.b32.xlu1 %v6021_v6, %s5301_s18  ;;  %1942 = vrot.lane.b32.xlu0 %v6019_v2, %s5301_s18  ;;  %v641_v30 = vpop.permute.xlu1 %640  ;;  %v637_v31 = vpop.permute.xlu0 %636 }
 0x1b2   : > { %1906 = vrot.lane.b32.xlu1 %v6027_v13, %s5299_s16  ;;  %1902 = vrot.lane.b32.xlu0 %v6025_v10, %s5299_s16  ;;  %v643_v39 = vpop.permute.xlu1 %642  ;;  %v639_v32 = vpop.permute.xlu0 %638 }
 0x1b3   : > { %v6058_v33 = vsel %vm644_vm1, %v641_v30, %v643_v39  ;;  %666 = vst.msk [vmem:[#allocation2 + $0xb8] sm:$0xff] %vm644_vm1, %v643_v39  ;;  %v6062_v34 = vsel %vm644_vm1, %v637_v31, %v639_v32  ;;  %v6065_v35 = vsel %vm644_vm1, %v639_v32, %v641_v30 }
 0x1b4   : > { %671 = vst.msk [vmem:[#allocation2 + $0xb8] sm:$0xff] %vm669_vm2, %v637_v31 }
 0x1b6   : > { %1990 = vrot.lane.b32.xlu1 %v6027_v13, %s5300_s17  ;;  %1986 = vrot.lane.b32.xlu0 %v6025_v10, %s5300_s17  ;;  %v1061_v42 = vpop.permute.xlu1 %1060  ;;  %v1057_v43 = vpop.permute.xlu0 %1056 }
 0x1ba   : > { %1948 = vrot.lane.b32.xlu1 %v6027_v13, %s5301_s18  ;;  %1944 = vrot.lane.b32.xlu0 %v6025_v10, %s5301_s18  ;;  %v1063_v24 = vpop.permute.xlu1 %1062  ;;  %v1059_v46 = vpop.permute.xlu0 %1058 }
 0x1bb   : > { %v6077_v47 = vsel %vm644_vm1, %v1061_v42, %v1063_v24  ;;  %1089 = vst.msk [vmem:[#allocation2 + $0xd8] sm:$0xff] %vm644_vm1, %v1063_v24  ;;  %v6081_v48 = vsel %vm644_vm1, %v1057_v43, %v1059_v46  ;;  %v6084_v52 = vsel %vm644_vm1, %v1059_v46, %v1061_v42 }
 0x1bc   : > { %1096 = vst.msk [vmem:[#allocation2 + $0xd8] sm:$0xff] %vm669_vm2, %v1057_v43 }
 0x1be   : > { %1912 = vrot.lane.b32.xlu1 %v6037_v40, %s5299_s16  ;;  %1908 = vrot.lane.b32.xlu0 %v6035_v20, %s5299_s16  ;;  %v1069_v53 = vpop.permute.xlu1 %1068  ;;  %v1065_v54 = vpop.permute.xlu0 %1064 }
 0x1c2   : > { %1996 = vrot.lane.b32.xlu1 %v6037_v40, %s5300_s17  ;;  %1992 = vrot.lane.b32.xlu0 %v6035_v20, %s5300_s17  ;;  %v1153_v55 = vpop.permute.xlu1 %1152  ;;  %v1149_v61 = vpop.permute.xlu0 %1148 }
 0x1c6   : > { %1954 = vrot.lane.b32.xlu1 %v6037_v40, %s5301_s18  ;;  %1950 = vrot.lane.b32.xlu0 %v6035_v20, %s5301_s18  ;;  %v1071_v1 = vpop.permute.xlu1 %1070  ;;  %v1067_v3 = vpop.permute.xlu0 %1066 }
 0x1c7   : > { %v6100_v7 = vsel %vm644_vm1, %v1069_v53, %v1071_v1  ;;  %1093 = vst.msk [vmem:[#allocation2 + $0xf8] sm:$0xff] %vm644_vm1, %v1071_v1  ;;  %v6104_v8 = vsel %vm644_vm1, %v1065_v54, %v1067_v3  ;;  %v6107_v9 = vsel %vm644_vm1, %v1067_v3, %v1069_v53 }
 0x1c8   : > { %1097 = vst.msk [vmem:[#allocation2 + $0xf8] sm:$0xff] %vm669_vm2, %v1065_v54 }
 0x1ca   : > { %1914 = vrot.lane.b32.xlu1 %v6043_v27, %s5299_s16  ;;  %1910 = vrot.lane.b32.xlu0 %v6041_v26, %s5299_s16  ;;  %v1155_v14 = vpop.permute.xlu1 %1154  ;;  %v1151_v17 = vpop.permute.xlu0 %1150 }
 0x1cb   : > { %v6115_v18 = vsel %vm732_vm3, %v1153_v55, %v1155_v14  ;;  %1177 = vst.msk [vmem:[#allocation2 + $0x2f8] sm:$0xff] %vm732_vm3, %v1155_v14  ;;  %v6119_v19 = vsel %vm732_vm3, %v1149_v61, %v1151_v17  ;;  %v6122_v0 = vsel %vm732_vm3, %v1151_v17, %v1153_v55 }
 0x1cc   : > { %8411 = vst [vmem:[#allocation3_spill] sm:$0xff] %v6115_v18  ;;  %8412 = vst [vmem:[#allocation4_spill] sm:$0xff] %v6119_v19 }
 0x1cd   : > { %8413 = vst [vmem:[#allocation5_spill] sm:$0xff] %v6122_v0  ;;  %1181 = vst.msk [vmem:[#allocation2 + $0x2f8] sm:$0xff] %vm757_vm4, %v1149_v61 }
 0x1ce   : > { %1144 = vrot.lane.b32.xlu1 %v5878_v63, %s5300_s17  ;;  %1142 = vrot.lane.b32.xlu0 %v5890_v4, %s5300_s17 }
 0x1d2   : > { %1146 = vrot.lane.b32.xlu1 %v5892_v5, %s5300_s17  ;;  %1140 = vrot.lane.b32.xlu0 %v5876_v62, %s5300_s17 }
 0x1d6   : > { %728 = vrot.lane.b32.xlu1 %v5870_v58, %s5300_s17  ;;  %726 = vrot.lane.b32.xlu0 %v5872_v38, %s5300_s17 }
 0x1da   : > { %730 = vrot.lane.b32.xlu1 %v5874_v60, %s5300_s17  ;;  %724 = vrot.lane.b32.xlu0 %v5868_v57, %s5300_s17 }
 0x1de   : > { %720 = vrot.lane.b32.xlu1 %v5846_v56, %s5300_s17  ;;  %718 = vrot.lane.b32.xlu0 %v5848_v37, %s5300_s17 }
 0x1e2   : > { %722 = vrot.lane.b32.xlu1 %v5850_v59, %s5300_s17  ;;  %716 = vrot.lane.b32.xlu0 %v5844_v36, %s5300_s17 }
 0x1e3   : > { %v1483_v21 = vpop.permute.xlu1 %1482  ;;  %v1479_v30 = vpop.permute.xlu0 %1478 }
 0x1e6   : > { %1110 = vrot.lane.b32.xlu1 %v5902_v12, %s5301_s18  ;;  %1108 = vrot.lane.b32.xlu0 %v5906_v15, %s5301_s18 }
 0x1e7   : > { %v1567_v31 = vpop.permute.xlu1 %1566  ;;  %v1563_v39 = vpop.permute.xlu0 %1562 }
 0x1ea   : > { %1998 = vrot.lane.b32.xlu1 %v6043_v27, %s5300_s17  ;;  %1994 = vrot.lane.b32.xlu0 %v6041_v26, %s5300_s17 }
 0x1eb   : > { %v1525_v32 = vpop.permute.xlu1 %1524  ;;  %v1521_v42 = vpop.permute.xlu0 %1520 }
 0x1ee   : > { %1112 = vrot.lane.b32.xlu1 %v5908_v16, %s5301_s18  ;;  %1106 = vrot.lane.b32.xlu0 %v5900_v11, %s5301_s18 }
 0x1ef   : > { %v1485_v12 = vpop.permute.xlu1 %1484  ;;  %v1481_v43 = vpop.permute.xlu0 %1480 }
 0x1f0   : > { %v6162_v24 = vsel %vm644_vm1, %v1483_v21, %v1485_v12  ;;  %1511 = vst.msk [vmem:[#allocation2 + $0x198] sm:$0xff] %vm644_vm1, %v1485_v12  ;;  %v6166_v46 = vsel %vm644_vm1, %v1479_v30, %v1481_v43  ;;  %v6169_v53 = vsel %vm644_vm1, %v1481_v43, %v1483_v21 }
 0x1f1   : > { %1518 = vst.msk [vmem:[#allocation2 + $0x198] sm:$0xff] %vm669_vm2, %v1479_v30 }
 0x1f2   : > { %1956 = vrot.lane.b32.xlu1 %v6043_v27, %s5301_s18  ;;  %1952 = vrot.lane.b32.xlu0 %v6041_v26, %s5301_s18 }
 0x1f3   : > { %v1569_v11 = vpop.permute.xlu1 %1568  ;;  %v1565_v54 = vpop.permute.xlu0 %1564 }
 0x1f4   : > { %v6177_v55 = vsel %vm732_vm3, %v1567_v31, %v1569_v11  ;;  %1595 = vst.msk [vmem:[#allocation2 + $0x398] sm:$0xff] %vm732_vm3, %v1569_v11  ;;  %v6181_v61 = vsel %vm732_vm3, %v1563_v39, %v1565_v54  ;;  %v6184_v1 = vsel %vm732_vm3, %v1565_v54, %v1567_v31  ;;  %v2027_v31 = vld [vmem:[%s8404_s3 + $0x8] sm:$0xff]  ;;  %v2165_v54 = vld [vmem:[%s8405_s4 + $0x18] sm:$0xff] }
 0x1f5   : > { %8414 = vst [vmem:[#allocation6_spill] sm:$0xff] %v6177_v55  ;;  %1602 = vst.msk [vmem:[#allocation2 + $0x398] sm:$0xff] %vm757_vm4, %v1563_v39  ;;  %2250 = vmatprep.mubr.f32.mxu0 %v2027_v31  ;;  %2339 = vmatprep.mubr.f32.mxu1 %v2027_v31 }
 0x1f6   : > { %1102 = vrot.lane.b32.xlu1 %v5878_v63, %s5301_s18  ;;  %1100 = vrot.lane.b32.xlu0 %v5890_v4, %s5301_s18 }
 0x1f7   : > { %v1527_v3 = vpop.permute.xlu1 %1526  ;;  %v1523_v14 = vpop.permute.xlu0 %1522 }
 0x1f8   : > { %v6192_v17 = vsel %vm688_vm5, %v1525_v32, %v1527_v3  ;;  %1553 = vst.msk [vmem:[#allocation2 + $0x318] sm:$0xff] %vm688_vm5, %v1527_v3  ;;  %v6196_v21 = vsel %vm688_vm5, %v1521_v42, %v1523_v14  ;;  %v6199_v30 = vsel %vm688_vm5, %v1523_v14, %v1525_v32  ;;  %v2164_v3 = vld [vmem:[%s8405_s4 + $0x10] sm:$0xff] }
 0x1f9   : > { %8415 = vst [vmem:[#allocation7_spill] sm:$0xff] %v6192_v17  ;;  %8416 = vst [vmem:[#allocation8_spill] sm:$0xff] %v6196_v21 }
 0x1fa   : > { %8417 = vst [vmem:[#allocation9_spill] sm:$0xff] %v6199_v30  ;;  %1560 = vst.msk [vmem:[#allocation2 + $0x318] sm:$0xff] %vm713_vm6, %v1521_v42  ;;  %1104 = vrot.lane.b32.xlu1 %v5892_v5, %s5301_s18  ;;  %1098 = vrot.lane.b32.xlu0 %v5876_v62, %s5301_s18 }
 0x1fb   : > { %v1491_v63 = vpop.permute.xlu1 %1490  ;;  %v1487_v4 = vpop.permute.xlu0 %1486 }
 0x1fe   : > { %684 = vrot.lane.b32.xlu1 %v5870_v58, %s5301_s18  ;;  %682 = vrot.lane.b32.xlu0 %v5872_v38, %s5301_s18 }
 0x1ff   : > { %v1575_v39 = vpop.permute.xlu1 %1574  ;;  %v1571_v32 = vpop.permute.xlu0 %1570 }
 0x202   : > { %686 = vrot.lane.b32.xlu1 %v5874_v60, %s5301_s18  ;;  %680 = vrot.lane.b32.xlu0 %v5868_v57, %s5301_s18 }
 0x203   : > { %v1533_v62 = vpop.permute.xlu1 %1532  ;;  %v1529_v5 = vpop.permute.xlu0 %1528 }
 0x206   : > { %676 = vrot.lane.b32.xlu1 %v5846_v56, %s5301_s18  ;;  %674 = vrot.lane.b32.xlu0 %v5848_v37, %s5301_s18  ;;  %v2163_v56 = vld [vmem:[%s8405_s4 + $0x8] sm:$0xff]  ;;  %v2162_v37 = vld [vmem:[%s8405_s4] sm:$0xff] }
 0x207   : > { %v1493_v58 = vpop.permute.xlu1 %1492  ;;  %v1489_v38 = vpop.permute.xlu0 %1488 }
 0x208   : > { %v6222_v42 = vsel %vm644_vm1, %v1491_v63, %v1493_v58  ;;  %1515 = vst.msk [vmem:[#allocation2 + $0x1b8] sm:$0xff] %vm644_vm1, %v1493_v58  ;;  %v6226_v60 = vsel %vm644_vm1, %v1487_v4, %v1489_v38  ;;  %v6229_v57 = vsel %vm644_vm1, %v1489_v38, %v1491_v63 }
 0x209   : > { %1519 = vst.msk [vmem:[#allocation2 + $0x1b8] sm:$0xff] %vm669_vm2, %v1487_v4 }
 0x20a   : > { %678 = vrot.lane.b32.xlu1 %v5850_v59, %s5301_s18  ;;  %672 = vrot.lane.b32.xlu0 %v5844_v36, %s5301_s18  ;;  %s330_s18 = scalar_lea.vmem %s8410_s9, %s4601_s13 }
 0x20b   : > { %v1577_v12 = vpop.permute.xlu1 %1576  ;;  %v1573_v43 = vpop.permute.xlu0 %1572 }
 0x20c   : > { %v6243_v11 = vsel %vm732_vm3, %v1575_v39, %v1577_v12  ;;  %1599 = vst.msk [vmem:[#allocation2 + $0x3b8] sm:$0xff] %vm732_vm3, %v1577_v12  ;;  %v6247_v59 = vsel %vm732_vm3, %v1571_v32, %v1573_v43  ;;  %v6250_v36 = vsel %vm732_vm3, %v1573_v43, %v1575_v39 }
 0x20d   : > { %8418 = vst [vmem:[#allocation10_spill] sm:$0xff] %v6243_v11  ;;  %1603 = vst.msk [vmem:[#allocation2 + $0x3b8] sm:$0xff] %vm757_vm4, %v1571_v32 }
 0x20e   : > { %2173 = vperm.xlu1 %5287, %v2163_v56   ;;  %2168 = vperm.xlu0 %5286, %v2162_v37  }
 0x20f   : > { %v1535_v14 = vpop.permute.xlu1 %1534  ;;  %v1531_v63 = vpop.permute.xlu0 %1530 }
 0x210   : > { %v6260_v4 = vsel %vm688_vm5, %v1533_v62, %v1535_v14  ;;  %1557 = vst.msk [vmem:[#allocation2 + $0x338] sm:$0xff] %vm688_vm5, %v1535_v14  ;;  %v6264_v31 = vsel %vm688_vm5, %v1529_v5, %v1531_v63  ;;  %v6267_v39 = vsel %vm688_vm5, %v1531_v63, %v1533_v62 }
 0x211   : > { %8419 = vst [vmem:[#allocation11_spill] sm:$0xff] %v6260_v4  ;;  %8420 = vst [vmem:[#allocation12_spill] sm:$0xff] %v6264_v31 }
 0x212   : > { %1561 = vst.msk [vmem:[#allocation2 + $0x338] sm:$0xff] %vm713_vm6, %v1529_v5  ;;  %2183 = vperm.xlu1 %5287, %v2165_v54   ;;  %2178 = vperm.xlu0 %5286, %v2164_v3  }
 0x218   : > { %v1905_v32 = vpop.permute.xlu1 %1904  ;;  %v1901_v58 = vpop.permute.xlu0 %1900 }
 0x21c   : > { %v1989_v38 = vpop.permute.xlu1 %1988  ;;  %v1985_v56 = vpop.permute.xlu0 %1984 }
 0x220   : > { %v1947_v37 = vpop.permute.xlu1 %1946  ;;  %v1943_v12 = vpop.permute.xlu0 %1942 }
 0x224   : > { %v1907_v43 = vpop.permute.xlu1 %1906  ;;  %v1903_v18 = vpop.permute.xlu0 %1902 }
 0x225   : > { %v1918_v14 = vsel %vm644_vm1, %v1905_v32, %v1907_v43  ;;  %1933 = vst.msk [vmem:[#allocation2 + $0x1d8] sm:$0xff] %vm644_vm1, %v1907_v43  ;;  %v1916_v17 = vsel %vm644_vm1, %v1901_v58, %v1903_v18  ;;  %v1917_v62 = vsel %vm644_vm1, %v1903_v18, %v1905_v32 }
 0x226   : > { %1940 = vst.msk [vmem:[#allocation2 + $0x1d8] sm:$0xff] %vm669_vm2, %v1901_v58 }
 0x228   : > { %v1991_v5 = vpop.permute.xlu1 %1990  ;;  %v1987_v54 = vpop.permute.xlu0 %1986 }
 0x229   : > { %v6276_v3 = vsel %vm732_vm3, %v1989_v38, %v1991_v5  ;;  %2017 = vst.msk [vmem:[#allocation2 + $0x3d8] sm:$0xff] %vm732_vm3, %v1991_v5  ;;  %v6280_v63 = vsel %vm732_vm3, %v1985_v56, %v1987_v54  ;;  %v6283_v4 = vsel %vm732_vm3, %v1987_v54, %v1989_v38 }
 0x22a   : > { %2024 = vst.msk [vmem:[#allocation2 + $0x3d8] sm:$0xff] %vm757_vm4, %v1985_v56 }
 0x22c   : > { %v1949_v43 = vpop.permute.xlu1 %1948  ;;  %v1945_v19 = vpop.permute.xlu0 %1944 }
 0x22d   : > { %v6287_v18 = vsel %vm688_vm5, %v1947_v37, %v1949_v43  ;;  %1975 = vst.msk [vmem:[#allocation2 + $0x358] sm:$0xff] %vm688_vm5, %v1949_v43  ;;  %v6291_v32 = vsel %vm688_vm5, %v1943_v12, %v1945_v19  ;;  %v6294_v58 = vsel %vm688_vm5, %v1945_v19, %v1947_v37 }
 0x22e   : > { %8421 = vst [vmem:[#allocation13_spill] sm:$0xff] %v6287_v18  ;;  %1982 = vst.msk [vmem:[#allocation2 + $0x358] sm:$0xff] %vm713_vm6, %v1943_v12 }
 0x230   : > { %v1913_v5 = vpop.permute.xlu1 %1912  ;;  %v1909_v38 = vpop.permute.xlu0 %1908 }
 0x234   : > { %v6297_v54 = vpop.permute.xlu1 %1996  ;;  %v6299_v56 = vpop.permute.xlu0 %1992 }
 0x238   : > { %v6301_v0 = vpop.permute.xlu1 %1954  ;;  %v6303_v21 = vpop.permute.xlu0 %1950 }
 0x23c   : > { %v1915_v18 = vpop.permute.xlu1 %1914  ;;  %v1911_v43 = vpop.permute.xlu0 %1910 }
 0x23d   : > { %v1921_v55 = vsel %vm644_vm1, %v1913_v5, %v1915_v18  ;;  %1937 = vst.msk [vmem:[#allocation2 + $0x1f8] sm:$0xff] %vm644_vm1, %v1915_v18  ;;  %v1919_v19 = vsel %vm644_vm1, %v1909_v38, %v1911_v43  ;;  %v1920_v37 = vsel %vm644_vm1, %v1911_v43, %v1913_v5 }
 0x23e   : > { %1941 = vst.msk [vmem:[#allocation2 + $0x1f8] sm:$0xff] %vm669_vm2, %v1909_v38  ;;  %2186 = vmatprep.subr.mxu0 %v1920_v37 }
 0x23f   : > { %2187 = vmatpush1.msra.mxu0 %v1919_v19  ;;  %v2044_v19 = vld [vmem:[#allocation2 + $0x50] sm:$0xff] }
 0x240   : > { %v1145_v12 = vpop.permute.xlu1 %1144  ;;  %v1143_v30 = vpop.permute.xlu0 %1142  ;;  %2188 = vmatprep.subr.mxu0 %v1917_v62 }
 0x241   : > { %v6311_v31 = vsel %vm732_vm3, %v1143_v30, %v1145_v12  ;;  %2189 = vmatpush1.msra.mxu0 %v1916_v17  ;;  %v2093_v17 = vld [vmem:[#allocation2 + $0x1d8] sm:$0xff] }
 0x242   : > { %2190 = vmatprep.subr.mxu0 %v6229_v57  ;;  %v2089_v57 = vld [vmem:[#allocation2 + $0x1b8] sm:$0xff] }
 0x243   : > { %2191 = vmatpush1.msra.mxu0 %v6226_v60 }
 0x244   : > { %v1147_v18 = vpop.permute.xlu1 %1146  ;;  %v1141_v11 = vpop.permute.xlu0 %1140  ;;  %2192 = vmatprep.subr.mxu0 %v6169_v53 }
 0x245   : > { %v6317_v5 = vsel %vm732_vm3, %v1145_v12, %v1147_v18  ;;  %1173 = vst.msk [vmem:[#allocation2 + $0x2d8] sm:$0xff] %vm732_vm3, %v1147_v18  ;;  %v6321_v38 = vsel %vm732_vm3, %v1141_v11, %v1143_v30  ;;  %v2097_v62 = vld [vmem:[#allocation2 + $0x1f8] sm:$0xff]  ;;  %2193 = vmatpush1.msra.mxu0 %v6166_v46  ;;  %v2036_v18 = vld [vmem:[#allocation2 + $0x10] sm:$0xff] }
 0x246   : > { %1180 = vst.msk [vmem:[#allocation2 + $0x2d8] sm:$0xff] %vm757_vm4, %v1141_v11  ;;  %2275 = vmatprep.subr.mxu1 %v2097_v62  ;;  %2194 = vmatprep.subr.mxu0 %v6041_v26  ;;  %v2085_v26 = vld [vmem:[#allocation2 + $0x198] sm:$0xff] }
 0x247   : > { %2276 = vmatpush1.msra.mxu1 %v1921_v55  ;;  %2195 = vmatpush1.msra.mxu0 %v6035_v20  ;;  %v2045_v11 = vld [vmem:[#allocation2 + $0x58] sm:$0xff] }
 0x248   : > { %v729_v53 = vpop.permute.xlu1 %728  ;;  %2277 = vmatprep.subr.mxu1 %v2093_v17  ;;  %v727_v60 = vpop.permute.xlu0 %726  ;;  %2196 = vmatprep.subr.mxu0 %v6025_v10 }
 0x249   : > { %v6329_v30 = vsel %vm732_vm3, %v727_v60, %v729_v53  ;;  %2278 = vmatpush1.msra.mxu1 %v1918_v14  ;;  %2197 = vmatpush1.msra.mxu0 %v6019_v2 }
 0x24a   : > { %2279 = vmatprep.subr.mxu1 %v2089_v57  ;;  %2198 = vmatprep.subr.mxu0 %v5962_v44  ;;  %v8423_v57 = vld [vmem:[#allocation12_spill] sm:$0xff] }
 0x24b   : > { %2280 = vmatpush1.msra.mxu1 %v6222_v42  ;;  %2199 = vmatpush1.msra.mxu0 %v5952_v41 }
 0x24c   : > { %v731_v20 = vpop.permute.xlu1 %730  ;;  %2281 = vmatprep.subr.mxu1 %v2085_v26  ;;  %v725_v46 = vpop.permute.xlu0 %724  ;;  %2200 = vmatprep.subr.mxu0 %v5942_v28 }
 0x24d   : > { %v6337_v10 = vsel %vm732_vm3, %v729_v53, %v731_v20  ;;  %754 = vst.msk [vmem:[#allocation2 + $0x2b8] sm:$0xff] %vm732_vm3, %v731_v20  ;;  %v6341_v2 = vsel %vm732_vm3, %v725_v46, %v727_v60  ;;  %2282 = vmatpush1.msra.mxu1 %v6162_v24  ;;  %2201 = vmatpush1.msra.mxu0 %v5936_v22  ;;  %v2034_v24 = vld [vmem:[#allocation2] sm:$0xff] }
 0x24e   : > { %759 = vst.msk [vmem:[#allocation2 + $0x2b8] sm:$0xff] %vm757_vm4, %v725_v46  ;;  %2283 = vmatprep.subr.mxu1 %v6043_v27  ;;  %2202 = vmatprep.subr.mxu0 %v6107_v9  ;;  %v8424_v46 = vld [vmem:[#allocation9_spill] sm:$0xff] }
 0x24f   : > { %2284 = vmatpush1.msra.mxu1 %v6037_v40  ;;  %2203 = vmatpush1.msra.mxu0 %v6104_v8 }
 0x250   : > { %v721_v28 = vpop.permute.xlu1 %720  ;;  %2285 = vmatprep.subr.mxu1 %v6027_v13  ;;  %v719_v41 = vpop.permute.xlu0 %718  ;;  %2204 = vmatprep.subr.mxu0 %v6084_v52  ;;  %v2053_v52 = vld [vmem:[#allocation2 + $0x98] sm:$0xff] }
 0x251   : > { %v6353_v44 = vsel %vm732_vm3, %v719_v41, %v721_v28  ;;  %2286 = vmatpush1.msra.mxu1 %v6021_v6  ;;  %2205 = vmatpush1.msra.mxu0 %v6081_v48  ;;  %v2039_v48 = vld [vmem:[#allocation2 + $0x28] sm:$0xff] }
 0x252   : > { %2287 = vmatprep.subr.mxu1 %v5964_v45  ;;  %2206 = vmatprep.subr.mxu0 %v6065_v35  ;;  %v2065_v45 = vld [vmem:[#allocation2 + $0xf8] sm:$0xff]  ;;  %v2042_v35 = vld [vmem:[#allocation2 + $0x40] sm:$0xff] }
 0x253   : > { %2288 = vmatpush1.msra.mxu1 %v5954_v25  ;;  %2207 = vmatpush1.msra.mxu0 %v6062_v34  ;;  %v2061_v25 = vld [vmem:[#allocation2 + $0xd8] sm:$0xff] }
 0x254   : > { %v723_v22 = vpop.permute.xlu1 %722  ;;  %2289 = vmatprep.subr.mxu1 %v5944_v29  ;;  %v717_v13 = vpop.permute.xlu0 %716  ;;  %2208 = vmatprep.subr.mxu0 %v5990_v51  ;;  %v2046_v29 = vld [vmem:[#allocation2 + $0x60] sm:$0xff]  ;;  %v2043_v51 = vld [vmem:[#allocation2 + $0x48] sm:$0xff] }
 0x255   : > { %v6364_v40 = vsel %vm732_vm3, %v721_v28, %v723_v22  ;;  %750 = vst.msk [vmem:[#allocation2 + $0x298] sm:$0xff] %vm732_vm3, %v723_v22  ;;  %v6368_v6 = vsel %vm732_vm3, %v717_v13, %v719_v41  ;;  %2290 = vmatpush1.msra.mxu1 %v5938_v23  ;;  %2209 = vmatpush1.msra.mxu0 %v5987_v50  ;;  %v2057_v50 = vld [vmem:[#allocation2 + $0xb8] sm:$0xff]  ;;  %v8426_v28 = vld [vmem:[#allocation8_spill] sm:$0xff]  ;;  %v8427_v41 = vld [vmem:[#allocation5_spill] sm:$0xff] }
 0x256   : > { %758 = vst.msk [vmem:[#allocation2 + $0x298] sm:$0xff] %vm757_vm4, %v717_v13  ;;  %2291 = vmatprep.subr.mxu1 %v2065_v45  ;;  %2210 = vmatprep.subr.mxu0 %v5906_v15  ;;  %v2038_v15 = vld [vmem:[#allocation2 + $0x20] sm:$0xff]  ;;  %v2141_v22 = vld [vmem:[#allocation2 + $0x358] sm:$0xff]  ;;  %v8428_v13 = vld [vmem:[#allocation4_spill] sm:$0xff] }
 0x257   : > { %2292 = vmatpush1.msra.mxu1 %v6100_v7  ;;  %2211 = vmatpush1.msra.mxu0 %v2046_v29  ;;  %v2035_v7 = vld [vmem:[#allocation2 + $0x8] sm:$0xff] }
 0x258   : > { %v1111_v27 = vpop.permute.xlu1 %1110  ;;  %2293 = vmatprep.subr.mxu1 %v2061_v25  ;;  %v1109_v34 = vpop.permute.xlu0 %1108  ;;  %2212 = vmatprep.subr.mxu0 %v2043_v51  ;;  %v8429_v51 = vld [vmem:[#allocation13_spill] sm:$0xff] }
 0x259   : > { %v6376_v23 = vsel %vm688_vm5, %v1109_v34, %v1111_v27  ;;  %2294 = vmatpush1.msra.mxu1 %v6077_v47  ;;  %2213 = vmatpush1.msra.mxu0 %v2042_v35  ;;  %v2133_v35 = vld [vmem:[#allocation2 + $0x318] sm:$0xff] }
 0x25a   : > { %2295 = vmatprep.subr.mxu1 %v2057_v50  ;;  %2214 = vmatprep.subr.mxu0 %v2039_v48 }
 0x25b   : > { %2296 = vmatpush1.msra.mxu1 %v6058_v33  ;;  %2215 = vmatpush1.msra.mxu0 %v2038_v15  ;;  %v2048_v33 = vld [vmem:[#allocation2 + $0x70] sm:$0xff] }
 0x25c   : > { %v1999_v8 = vpop.permute.xlu1 %1998  ;;  %2297 = vmatprep.subr.mxu1 %v2053_v52  ;;  %v1995_v9 = vpop.permute.xlu0 %1994  ;;  %2216 = vmatprep.subr.mxu0 %v2035_v7  ;;  %v2129_v52 = vld [vmem:[#allocation2 + $0x2f8] sm:$0xff] }
 0x25d   : > { %v2005_v55 = vsel %vm732_vm3, %v6297_v54, %v1999_v8  ;;  %2021 = vst.msk [vmem:[#allocation2 + $0x3f8] sm:$0xff] %vm732_vm3, %v1999_v8  ;;  %v2003_v47 = vsel %vm732_vm3, %v6299_v56, %v1995_v9  ;;  %v2004_v42 = vsel %vm732_vm3, %v1995_v9, %v6297_v54  ;;  %2298 = vmatpush1.msra.mxu1 %v5983_v49  ;;  %v2121_v9 = vld [vmem:[#allocation2 + $0x2b8] sm:$0xff] }
 0x25e   : > { %2217 = vmatpush1.msra.mxu0 %v2034_v24  ;;  %2025 = vst.msk [vmem:[#allocation2 + $0x3f8] sm:$0xff] %vm757_vm4, %v6299_v56  ;;  %2299 = vmatprep.subr.mxu1 %v5908_v16  ;;  %v2041_v16 = vld [vmem:[#allocation2 + $0x38] sm:$0xff]  ;;  %v2040_v56 = vld [vmem:[#allocation2 + $0x30] sm:$0xff] }
 0x25f   : > { %2218 = vmatprep.subr.mxu0 %v2004_v42  ;;  %2300 = vmatpush1.msra.mxu1 %v2048_v33  ;;  %v2846_v33 = vld [vmem:[%s8406_s5 + $0xf8] sm:$0xff] }
 0x260   : > { %2219 = vmatpush2.msra.mxu0 %v2003_v47  ;;  %v1113_v14 = vpop.permute.xlu1 %1112  ;;  %2301 = vmatprep.subr.mxu1 %v2045_v11  ;;  %v1107_v43 = vpop.permute.xlu0 %1106 }
 0x261   : > { %2220 = vmatprep.subr.mxu0 %v6283_v4  ;;  %v6393_v54 = vsel %vm688_vm5, %v1111_v27, %v1113_v14  ;;  %1135 = vst.msk [vmem:[#allocation2 + $0x278] sm:$0xff] %vm688_vm5, %v1113_v14  ;;  %v6397_v49 = vsel %vm688_vm5, %v1107_v43, %v1109_v34  ;;  %2302 = vmatpush1.msra.mxu1 %v2044_v19  ;;  %v2037_v4 = vld [vmem:[#allocation2 + $0x18] sm:$0xff]  ;;  %v8430_v34 = vld [vmem:[#allocation11_spill] sm:$0xff]  ;;  %v2028_v14 = vld [vmem:[%s8404_s3 + $0x10] sm:$0xff] }
 0x262   : > { %2221 = vmatpush2.msra.mxu0 %v6280_v63  ;;  %1139 = vst.msk [vmem:[#allocation2 + $0x278] sm:$0xff] %vm713_vm6, %v1107_v43  ;;  %2303 = vmatprep.subr.mxu1 %v2041_v16  ;;  %v2137_v27 = vld [vmem:[#allocation2 + $0x338] sm:$0xff]  ;;  %v2031_v19 = vld [vmem:[%s8404_s3 + $0x28] sm:$0xff] }
 0x263   : > { %2222 = vmatprep.subr.mxu0 %v6250_v36  ;;  %2304 = vmatpush1.msra.mxu1 %v2040_v56  ;;  %v2844_v16 = vld [vmem:[%s8406_s5 + $0xe8] sm:$0xff]  ;;  %v2030_v56 = vld [vmem:[%s8404_s3 + $0x20] sm:$0xff] }
 0x264   : > { %2223 = vmatpush2.msra.mxu0 %v6247_v59  ;;  %v1957_v37 = vpop.permute.xlu1 %1956  ;;  %2305 = vmatprep.subr.mxu1 %v2037_v4  ;;  %v1953_v12 = vpop.permute.xlu0 %1952 }
 0x265   : > { %2224 = vmatprep.subr.mxu0 %v6184_v1  ;;  %v1963_v62 = vsel %vm688_vm5, %v6301_v0, %v1957_v37  ;;  %1979 = vst.msk [vmem:[#allocation2 + $0x378] sm:$0xff] %vm688_vm5, %v1957_v37  ;;  %v1961_v63 = vsel %vm688_vm5, %v6303_v21, %v1953_v12  ;;  %v1962_v36 = vsel %vm688_vm5, %v1953_v12, %v6301_v0  ;;  %v2161_v17 = vld [vmem:[#allocation2 + $0x3f8] sm:$0xff] }
 0x266   : > { %2306 = vmatpush1.msra.mxu1 %v2036_v18  ;;  %2225 = vmatpush2.msra.mxu0 %v6181_v61  ;;  %1983 = vst.msk [vmem:[#allocation2 + $0x378] sm:$0xff] %vm713_vm6, %v6303_v21  ;;  %v2157_v1 = vld [vmem:[#allocation2 + $0x3d8] sm:$0xff] }
 0x267   : > { %2307 = vmatprep.subr.mxu1 %v2161_v17  ;;  %2226 = vmatprep.subr.mxu0 %v1962_v36  ;;  %v2153_v0 = vld [vmem:[#allocation2 + $0x3b8] sm:$0xff]  ;;  %v2877_v36 = vld [vmem:[%s8406_s5 + $0x1f0] sm:$0xff]  ;;  %v2843_v17 = vld [vmem:[%s8406_s5 + $0xe0] sm:$0xff] }
 0x268   : > { %2308 = vmatpush2.msra.mxu1 %v2005_v55  ;;  %2227 = vmatpush2.msra.mxu0 %v1961_v63  ;;  %v1103_v59 = vpop.permute.xlu1 %1102  ;;  %v1101_v53 = vpop.permute.xlu0 %1100  ;;  %v8422_v61 = vld [vmem:[#allocation10_spill] sm:$0xff]  ;;  %v2026_v55 = vld [vmem:[%s8404_s3] sm:$0xff]  ;;  %v2032_v63 = vld [vmem:[%s8404_s3 + $0x30] sm:$0xff] }
 0x269   : > { %2309 = vmatprep.subr.mxu1 %v2157_v1  ;;  %2228 = vmatprep.subr.mxu0 %v6294_v58  ;;  %v1115_v60 = vsel %vm688_vm5, %v1101_v53, %v1103_v59  ;;  %v2149_v21 = vld [vmem:[#allocation2 + $0x398] sm:$0xff]  ;;  %v2861_v1 = vld [vmem:[%s8406_s5 + $0x170] sm:$0xff] }
 0x26a   : > { %2310 = vmatpush2.msra.mxu1 %v6276_v3  ;;  %2229 = vmatpush2.msra.mxu0 %v6291_v32  ;;  %v8425_v32 = vld [vmem:[#allocation6_spill] sm:$0xff] }
 0x26b   : > { %2311 = vmatprep.subr.mxu1 %v2153_v0  ;;  %2230 = vmatprep.subr.mxu0 %v6267_v39  ;;  %v2113_v42 = vld [vmem:[#allocation2 + $0x278] sm:$0xff] }
 0x26c   : > { %2312 = vmatpush2.msra.mxu1 %v8422_v61  ;;  %2231 = vmatpush2.msra.mxu0 %v8423_v57  ;;  %v1105_v26 = vpop.permute.xlu1 %1104  ;;  %v1099_v20 = vpop.permute.xlu0 %1098  ;;  %v2033_v37 = vld [vmem:[%s8404_s3 + $0x38] sm:$0xff]  ;;  %v2875_v61 = vld [vmem:[%s8406_s5 + $0x1e0] sm:$0xff] }
 0x26d   : > { %2313 = vmatprep.subr.mxu1 %v2149_v21  ;;  %2232 = vmatprep.subr.mxu0 %v8424_v46  ;;  %v6423_v58 = vsel %vm688_vm5, %v1103_v59, %v1105_v26  ;;  %1131 = vst.msk [vmem:[#allocation2 + $0x258] sm:$0xff] %vm688_vm5, %v1105_v26  ;;  %v1114_v3 = vsel %vm688_vm5, %v1099_v20, %v1101_v53  ;;  %v2145_v39 = vld [vmem:[#allocation2 + $0x378] sm:$0xff]  ;;  %v2876_v59 = vld [vmem:[%s8406_s5 + $0x1e8] sm:$0xff]  ;;  %v2827_v53 = vld [vmem:[%s8406_s5 + $0x60] sm:$0xff] }
 0x26e   : > { %2314 = vmatpush2.msra.mxu1 %v8425_v32  ;;  %2233 = vmatpush2.msra.mxu0 %v8426_v28  ;;  %1138 = vst.msk [vmem:[#allocation2 + $0x258] sm:$0xff] %vm713_vm6, %v1099_v20  ;;  %v2878_v12 = vld [vmem:[%s8406_s5 + $0x1f8] sm:$0xff]  ;;  %v2859_v21 = vld [vmem:[%s8406_s5 + $0x160] sm:$0xff]  ;;  %v2841_v20 = vld [vmem:[%s8406_s5 + $0xd0] sm:$0xff] }
 0x26f   : > { %2315 = vmatprep.subr.mxu1 %v2145_v39  ;;  %2234 = vmatprep.subr.mxu0 %v8427_v41  ;;  %v2862_v18 = vld [vmem:[%s8406_s5 + $0x178] sm:$0xff]  ;;  %v2840_v32 = vld [vmem:[%s8406_s5 + $0xc8] sm:$0xff]  ;;  %v2857_v39 = vld [vmem:[%s8406_s5 + $0x150] sm:$0xff] }
 0x270   : > { %2316 = vmatpush2.msra.mxu1 %v1963_v62  ;;  %2235 = vmatpush2.msra.mxu0 %v8428_v13  ;;  %v685_v45 = vpop.permute.xlu1 %684  ;;  %v683_v29 = vpop.permute.xlu0 %682  ;;  %v2828_v62 = vld [vmem:[%s8406_s5 + $0x68] sm:$0xff]  ;;  %v2842_v0 = vld [vmem:[%s8406_s5 + $0xd8] sm:$0xff] }
 0x271   : > { %2317 = vmatprep.subr.mxu1 %v2141_v22  ;;  %2236 = vmatprep.subr.mxu0 %v6311_v31  ;;  %v693_v25 = vsel %vm688_vm5, %v683_v29, %v685_v45  ;;  %v2826_v57 = vld [vmem:[%s8406_s5 + $0x58] sm:$0xff]  ;;  %v2824_v28 = vld [vmem:[%s8406_s5 + $0x48] sm:$0xff]  ;;  %v2839_v22 = vld [vmem:[%s8406_s5 + $0xc0] sm:$0xff] }
 0x272   : > { %2318 = vmatpush2.msra.mxu1 %v8429_v51  ;;  %2237 = vmatpush2.msra.mxu0 %v6321_v38  ;;  %v8431_v38 = vld [vmem:[#allocation7_spill] sm:$0xff]  ;;  %v2874_v26 = vld [vmem:[%s8406_s5 + $0x1d8] sm:$0xff]  ;;  %v2872_v41 = vld [vmem:[%s8406_s5 + $0x1c8] sm:$0xff] }
 0x273   : > { %2319 = vmatprep.subr.mxu1 %v2137_v27  ;;  %2238 = vmatprep.subr.mxu0 %v6329_v30  ;;  %v8432_v30 = vld [vmem:[#allocation3_spill] sm:$0xff]  ;;  %v2858_v46 = vld [vmem:[%s8406_s5 + $0x158] sm:$0xff]  ;;  %v2856_v13 = vld [vmem:[%s8406_s5 + $0x148] sm:$0xff] }
 0x274   : > { %2320 = vmatpush2.msra.mxu1 %v8430_v34  ;;  %2239 = vmatpush2.msra.mxu0 %v6341_v2  ;;  %v687_v50 = vpop.permute.xlu1 %686  ;;  %v681_v48 = vpop.permute.xlu0 %680  ;;  %v2125_v2 = vld [vmem:[#allocation2 + $0x2d8] sm:$0xff]  ;;  %v2855_v51 = vld [vmem:[%s8406_s5 + $0x140] sm:$0xff] }
 0x275   : > { %2321 = vmatprep.subr.mxu1 %v2133_v35  ;;  %2240 = vmatprep.subr.mxu0 %v6353_v44  ;;  %v694_v31 = vsel %vm688_vm5, %v685_v45, %v687_v50  ;;  %710 = vst.msk [vmem:[#allocation2 + $0x238] sm:$0xff] %vm688_vm5, %v687_v50  ;;  %v692_v15 = vsel %vm688_vm5, %v681_v48, %v683_v29  ;;  %v2109_v11 = vld [vmem:[#allocation2 + $0x258] sm:$0xff]  ;;  %v2823_v45 = vld [vmem:[%s8406_s5 + $0x40] sm:$0xff]  ;;  %v2837_v35 = vld [vmem:[%s8406_s5 + $0xb0] sm:$0xff] }
 0x276   : > { %2322 = vmatpush2.msra.mxu1 %v8431_v38  ;;  %2241 = vmatpush2.msra.mxu0 %v6368_v6  ;;  %715 = vst.msk [vmem:[#allocation2 + $0x238] sm:$0xff] %vm713_vm6, %v681_v48  ;;  %v2117_v6 = vld [vmem:[#allocation2 + $0x298] sm:$0xff]  ;;  %v2871_v29 = vld [vmem:[%s8406_s5 + $0x1c0] sm:$0xff]  ;;  %v2821_v48 = vld [vmem:[%s8406_s5 + $0x30] sm:$0xff] }
 0x277   : > { %2323 = vmatprep.subr.mxu1 %v2129_v52  ;;  %2242 = vmatprep.subr.mxu0 %v6376_v23  ;;  %v2822_v27 = vld [vmem:[%s8406_s5 + $0x38] sm:$0xff]  ;;  %v2853_v38 = vld [vmem:[%s8406_s5 + $0x130] sm:$0xff]  ;;  %v2820_v52 = vld [vmem:[%s8406_s5 + $0x28] sm:$0xff] }
 0x278   : > { %2324 = vmatpush2.msra.mxu1 %v8432_v30  ;;  %2243 = vmatpush2.msra.mxu0 %v6397_v49  ;;  %v677_v44 = vpop.permute.xlu1 %676  ;;  %v675_v7 = vpop.permute.xlu0 %674  ;;  %v2829_v49 = vld [vmem:[%s8406_s5 + $0x70] sm:$0xff]  ;;  %v2870_v34 = vld [vmem:[%s8406_s5 + $0x1b8] sm:$0xff]  ;;  %v2868_v30 = vld [vmem:[%s8406_s5 + $0x1a8] sm:$0xff] }
 0x279   : > { %2325 = vmatprep.subr.mxu1 %v2125_v2  ;;  %2244 = vmatprep.subr.mxu0 %v1115_v60  ;;  %v690_v8 = vsel %vm688_vm5, %v675_v7, %v677_v44  ;;  %v2860_v60 = vld [vmem:[%s8406_s5 + $0x168] sm:$0xff]  ;;  %v2854_v50 = vld [vmem:[%s8406_s5 + $0x138] sm:$0xff] }
 0x27a   : > { %2326 = vmatpush2.msra.mxu1 %v6317_v5  ;;  %2245 = vmatpush2.msra.mxu0 %v1114_v3  ;;  %v2873_v3 = vld [vmem:[%s8406_s5 + $0x1d0] sm:$0xff]  ;;  %v2852_v2 = vld [vmem:[%s8406_s5 + $0x128] sm:$0xff] }
 0x27b   : > { %2327 = vmatprep.subr.mxu1 %v2121_v9  ;;  %2246 = vmatprep.subr.mxu0 %v693_v25  ;;  %v2838_v25 = vld [vmem:[%s8406_s5 + $0xb8] sm:$0xff]  ;;  %v2819_v9 = vld [vmem:[%s8406_s5 + $0x20] sm:$0xff] }
 0x27c   : > { %2328 = vmatpush2.msra.mxu1 %v6337_v10  ;;  %2247 = vmatpush2.msra.mxu0 %v692_v15  ;;  %v679_v23 = vpop.permute.xlu1 %678  ;;  %v673_v24 = vpop.permute.xlu0 %672  ;;  %v2029_v10 = vld [vmem:[%s8404_s3 + $0x18] sm:$0xff]  ;;  %v2836_v15 = vld [vmem:[%s8406_s5 + $0xa8] sm:$0xff] }
 0x27d   : > { %2329 = vmatprep.subr.mxu1 %v2117_v6  ;;  %2248 = vmatprep.subr.mxu0 %v690_v8  ;;  %v691_v47 = vsel %vm688_vm5, %v677_v44, %v679_v23  ;;  %706 = vst.msk [vmem:[#allocation2 + $0x218] sm:$0xff] %vm688_vm5, %v679_v23  ;;  %v689_v5 = vsel %vm688_vm5, %v673_v24, %v675_v7  ;;  %v2105_v43 = vld [vmem:[#allocation2 + $0x238] sm:$0xff]  ;;  %v2867_v44 = vld [vmem:[%s8406_s5 + $0x1a0] sm:$0xff] }
 0x27e   : > { %2330 = vmatpush2.msra.mxu1 %v6364_v40  ;;  %714 = vst.msk [vmem:[#allocation2 + $0x218] sm:$0xff] %vm713_vm6, %v673_v24  ;;  %2249 = vmatpush2.msra.mxu0 %v689_v5  ;;  %v2830_v40 = vld [vmem:[%s8406_s5 + $0x78] sm:$0xff]  ;;  %v2835_v7 = vld [vmem:[%s8406_s5 + $0xa0] sm:$0xff]  ;;  %v2833_v5 = vld [vmem:[%s8406_s5 + $0x90] sm:$0xff] }
 0x27f   : > { %2331 = vmatprep.subr.mxu1 %v2113_v42  ;;  %2251 = vmatmul.mubr.f32.vlgmr.msra.gmra.mxu0 %v2026_v55  ;;  %v2851_v8 = vld [vmem:[%s8406_s5 + $0x120] sm:$0xff]  ;;  %v2866_v6 = vld [vmem:[%s8406_s5 + $0x198] sm:$0xff]  ;;  %v2849_v42 = vld [vmem:[%s8406_s5 + $0x110] sm:$0xff] }
 0x280   : > { %2332 = vmatpush2.msra.mxu1 %v6393_v54  ;;  %2256 = vmatprep.mubr.f32.mxu0 %v2029_v10  ;;  %v2845_v54 = vld [vmem:[%s8406_s5 + $0xf0] sm:$0xff]  ;;  %v2834_v23 = vld [vmem:[%s8406_s5 + $0x98] sm:$0xff] }
 0x281   : > { %2333 = vmatprep.subr.mxu1 %v2109_v11  ;;  %4695 = vmatprep.subr.mxu0 %v2846_v33  ;;  %v2850_v24 = vld [vmem:[%s8406_s5 + $0x118] sm:$0xff]  ;;  %v2864_v33 = vld [vmem:[%s8406_s5 + $0x188] sm:$0xff] }
 0x282   : > { %2334 = vmatpush2.msra.mxu1 %v6423_v58  ;;  %4696 = vmatpush3.msra.mxu0 %v2830_v40  ;;  %v2825_v58 = vld [vmem:[%s8406_s5 + $0x50] sm:$0xff]  ;;  %v2832_v11 = vld [vmem:[%s8406_s5 + $0x88] sm:$0xff] }
 0x283   : > { %2335 = vmatprep.subr.mxu1 %v2105_v43  ;;  %2257 = vmatmul.mubr.f32.gmra.mxu0 %v2028_v14  ;;  %v2848_v40 = vld [vmem:[%s8406_s5 + $0x108] sm:$0xff]  ;;  %v2863_v43 = vld [vmem:[%s8406_s5 + $0x180] sm:$0xff] }
 0x284   : > { %2336 = vmatpush2.msra.mxu1 %v694_v31  ;;  %2262 = vmatprep.mubr.f32.mxu0 %v2031_v19  ;;  %v2869_v31 = vld [vmem:[%s8406_s5 + $0x1b0] sm:$0xff] }
 0x285   : > { %4697 = vmatprep.subr.mxu0 %v2845_v54  ;;  %v2101_v4 = vld [vmem:[#allocation2 + $0x218] sm:$0xff]  ;;  %v2847_v54 = vld [vmem:[%s8406_s5 + $0x100] sm:$0xff] }
 0x286   : > { %4698 = vmatpush3.msra.mxu0 %v2829_v49  ;;  %2337 = vmatprep.subr.mxu1 %v2101_v4  ;;  %v2815_v49 = vld [vmem:[%s8406_s5] sm:$0xff] }
 0x287   : > { %4699 = vmatprep.subr.mxu0 %v2844_v16  ;;  %2338 = vmatpush2.msra.mxu1 %v691_v47  ;;  %v2865_v47 = vld [vmem:[%s8406_s5 + $0x190] sm:$0xff]  ;;  %v2910_v16 = vld [vmem:[%s8406_s5 + $0x2f8] sm:$0xff] }
 0x288   : > { %2263 = vmatmul.mubr.f32.gmra.mxu0 %v2030_v56  ;;  %2340 = vmatmul.mubr.f32.vlgmr.msra.gmra.mxu1 %v2026_v55  ;;  %v2818_v55 = vld [vmem:[%s8406_s5 + $0x18] sm:$0xff] }
 0x289   : > { %2268 = vmatprep.mubr.f32.mxu0 %v2033_v37  ;;  %2345 = vmatprep.mubr.f32.mxu1 %v2029_v10  ;;  %v2817_v10 = vld [vmem:[%s8406_s5 + $0x10] sm:$0xff]  ;;  %v2169_v4 = vpop.permute.xlu0 %2168 }
 0x28a   : > { %4730 = vmatprep.subr.mxu1 %v2878_v12  ;;  %4700 = vmatpush3.msra.mxu0 %v2828_v62 }
 0x28b   : > { %4731 = vmatpush3.msra.mxu1 %v2862_v18  ;;  %4701 = vmatprep.subr.mxu0 %v2843_v17 }
 0x28c   : > { %2269 = vmatmul.mubr.f32.gmra.mxu0 %v2032_v63  ;;  %4732 = vmatprep.subr.mxu1 %v2877_v36  ;;  %v2174_v36 = vpop.permute.xlu1 %2173 }
 0x28d   : > { %2346 = vmatmul.mubr.f32.gmra.mxu1 %v2028_v14  ;;  %4702 = vmatpush3.msra.mxu0 %v2827_v53  ;;  %v2816_v14 = vld [vmem:[%s8406_s5 + $0x8] sm:$0xff] }
 0x28e   : > { %2351 = vmatprep.mubr.f32.mxu1 %v2031_v19  ;;  %4733 = vmatpush3.msra.mxu1 %v2861_v1  ;;  %v2831_v19 = vld [vmem:[%s8406_s5 + $0x80] sm:$0xff] }
 0x28f   : > { %4734 = vmatprep.subr.mxu1 %v2876_v59  ;;  %4703 = vmatprep.subr.mxu0 %v2842_v0 }
 0x290   : > { %4735 = vmatpush3.msra.mxu1 %v2860_v60  ;;  %4704 = vmatpush3.msra.mxu0 %v2826_v57 }
 0x291   : > { %2352 = vmatmul.mubr.f32.gmra.mxu1 %v2030_v56  ;;  %4736 = vmatprep.subr.mxu1 %v2875_v61  ;;  %v2942_v56 = vld [vmem:[%s8406_s5 + $0x3f8] sm:$0xff] }
 0x292   : > { %2357 = vmatprep.mubr.f32.mxu1 %v2033_v37  ;;  %4737 = vmatpush3.msra.mxu1 %v2859_v21 }
 0x293   : > { %4738 = vmatprep.subr.mxu1 %v2874_v26  ;;  %4705 = vmatprep.subr.mxu0 %v2841_v20 }
 0x294   : > { %4739 = vmatpush3.msra.mxu1 %v2858_v46  ;;  %4706 = vmatpush3.msra.mxu0 %v2825_v58 }
 0x295   : > { %2358 = vmatmul.mubr.f32.gmra.mxu1 %v2032_v63  ;;  %4740 = vmatprep.subr.mxu1 %v2873_v3 }
 0x296   : > { %4707 = vmatprep.subr.mxu0 %v2840_v32  ;;  %4741 = vmatpush3.msra.mxu1 %v2857_v39  ;;  %v6693_v32 = vpop.permute.xlu0 %2178 }
 0x297   : > { %4708 = vmatpush3.msra.mxu0 %v2824_v28  ;;  %4742 = vmatprep.subr.mxu1 %v2872_v41 }
 0x298   : > { %4709 = vmatprep.subr.mxu0 %v2839_v22  ;;  %4743 = vmatpush3.msra.mxu1 %v2856_v13 }
 0x299   : > { %4710 = vmatpush3.msra.mxu0 %v2823_v45  ;;  %4744 = vmatprep.subr.mxu1 %v2871_v29 }
 0x29a   : > { %4711 = vmatprep.subr.mxu0 %v2838_v25  ;;  %4745 = vmatpush3.msra.mxu1 %v2855_v51 }
 0x29b   : > { %4712 = vmatpush3.msra.mxu0 %v2822_v27  ;;  %4746 = vmatprep.subr.mxu1 %v2870_v34 }
 0x29c   : > { %4713 = vmatprep.subr.mxu0 %v2837_v35  ;;  %4747 = vmatpush3.msra.mxu1 %v2854_v50 }
 0x29d   : > { %4714 = vmatpush3.msra.mxu0 %v2821_v48  ;;  %4748 = vmatprep.subr.mxu1 %v2869_v31 }
 0x29e   : > { %4715 = vmatprep.subr.mxu0 %v2836_v15  ;;  %4749 = vmatpush3.msra.mxu1 %v2853_v38 }
 0x29f   : > { %4716 = vmatpush3.msra.mxu0 %v2820_v52  ;;  %4750 = vmatprep.subr.mxu1 %v2868_v30 }
 0x2a0   : > { %4751 = vmatpush3.msra.mxu1 %v2852_v2  ;;  %4717 = vmatprep.subr.mxu0 %v2835_v7 }
 0x2a1   : > { %4752 = vmatprep.subr.mxu1 %v2867_v44  ;;  %4718 = vmatpush3.msra.mxu0 %v2819_v9  ;;  %v6716_v44 = vpop.permute.xlu1 %2183 }
 0x2a2   : > { %4753 = vmatpush3.msra.mxu1 %v2851_v8  ;;  %4719 = vmatprep.subr.mxu0 %v2834_v23 }
 0x2a3   : > { %4754 = vmatprep.subr.mxu1 %v2866_v6  ;;  %4720 = vmatpush3.msra.mxu0 %v2818_v55 }
 0x2a4   : > { %4755 = vmatpush3.msra.mxu1 %v2850_v24  ;;  %4721 = vmatprep.subr.mxu0 %v2833_v5 }
 0x2a5   : > { %4756 = vmatprep.subr.mxu1 %v2865_v47  ;;  %4722 = vmatpush3.msra.mxu0 %v2817_v10 }
 0x2a6   : > { %4757 = vmatpush3.msra.mxu1 %v2849_v42  ;;  %4723 = vmatprep.subr.mxu0 %v2832_v11 }
 0x2a7   : > { %4758 = vmatprep.subr.mxu1 %v2864_v33  ;;  %4724 = vmatpush3.msra.mxu0 %v2816_v14 }
 0x2a8   : > { %4759 = vmatpush3.msra.mxu1 %v2848_v40  ;;  %4725 = vmatprep.subr.mxu0 %v2831_v19 }
 0x2a9   : > { %4760 = vmatprep.subr.mxu1 %v2863_v43  ;;  %4726 = vmatpush3.msra.mxu0 %v2815_v49 }
 0x2aa   : > { %4761 = vmatpush3.msra.mxu1 %v2847_v54  ;;  %4765 = vmatprep.subr.mxu0 %v2910_v16 }
 0x2ab   : > { %4800 = vmatprep.subr.mxu1 %v2942_v56 }
 0x33f   : > { %v2252_v37 = vpop.f32.mrf.mxu0 }
 0x340   : > { %v2253_v12 = vadd.f32 %v2252_v37, %v2169_v4 }
 0x341   : > { %v2254_v18 = vpop.f32.mrf.mxu0 }
 0x342   : > { %v6678_v62 = vmax.f32 %v2253_v12, 0.0  ;;  %v2255_v63 = vadd.f32 %v2254_v18, %v2169_v4 }
 0x343   : > { %v2258_v17 = vpop.f32.mrf.mxu0 }
 0x344   : > { %v6680_v1 = vmax.f32 %v2255_v63, 0.0  ;;  %v2259_v59 = vadd.f32 %v2258_v17, %v2174_v36  ;;  %v2381_v53 = vrot.slane %v6678_v62, 1  ;;  %v2385_v60 = vrot.slane %v6678_v62, 3 }
 0x345   : > { %v2260_v0 = vpop.f32.mrf.mxu0  ;;  %v2383_v61 = vrot.slane %v6678_v62, 2  ;;  %v2389_v21 = vrot.slane %v6678_v62, 5  ;;  %v2393_v57 = vrot.slane %v6678_v62, 7  ;;  %v2387_v26 = vrot.slane %v6678_v62, 4 }
 0x346   : > { %v6688_v20 = vmax.f32 %v2259_v59, 0.0  ;;  %v2261_v46 = vadd.f32 %v2260_v0, %v2174_v36  ;;  %v2718_v58 = vsel %vm2716_vm7, %v2381_v53, %v6680_v1  ;;  %v2447_v3 = vrot.slane %v6680_v1, 7 }
 0x347   : > { %v4620_v28 = vrot.slane %v6680_v1, 10  ;;  %v4619_v41 = vrot.slane %v6680_v1, 9  ;;  %v4622_v22 = vrot.slane %v6680_v1, 12  ;;  %v4621_v13 = vrot.slane %v6680_v1, 11 }
 0x348   : > { %v2264_v39 = vpop.f32.mrf.mxu0  ;;  %v2341_v45 = vpop.f32.mrf.mxu1  ;;  %v6699_v29 = vmax.f32 %v2261_v46, 0.0  ;;  %v2717_v51 = vsel %vm2716_vm7, %v6678_v62, %v2447_v3  ;;  %v2542_v27 = vrot.slane %v2447_v3, 7  ;;  %v2391_v6 = vrot.slane %v6678_v62, 6  ;;  %v2909_v3 = vld [vmem:[%s8406_s5 + $0x2f0] sm:$0xff] }
 0x349   : > { %v2265_v25 = vadd.f32 %v2264_v39, %v6693_v32  ;;  %v2342_v34 = vadd.f32 %v2341_v45, %v2169_v4  ;;  %v2720_v50 = vsel %vm2716_vm7, %v2385_v60, %v4620_v28  ;;  %v2719_v48 = vsel %vm2716_vm7, %v2383_v61, %v4619_v41  ;;  %v2893_v45 = vld [vmem:[%s8406_s5 + $0x270] sm:$0xff] }
 0x34a   : > { %v2266_v35 = vpop.f32.mrf.mxu0  ;;  %v2722_v31 = vsel %vm2716_vm7, %v2389_v21, %v4622_v22  ;;  %v2343_v15 = vpop.f32.mrf.mxu1  ;;  %v6711_v30 = vsel %vm2716_vm7, %v2393_v57, %v2542_v27  ;;  %v6714_v2 = vsel %vm2716_vm7, %v2387_v26, %v4621_v13  ;;  %v4623_v23 = vrot.slane %v6680_v1, 13  ;;  %v2894_v21 = vld [vmem:[%s8406_s5 + $0x278] sm:$0xff] }
 0x34b   : > { %v6707_v38 = vmax.f32 %v2265_v25, 0.0  ;;  %v2267_v52 = vadd.f32 %v2266_v35, %v6693_v32  ;;  %v6718_v7 = vmax.f32 %v2342_v34, 0.0  ;;  %v2344_v8 = vadd.f32 %v2343_v15, %v2169_v4  ;;  %v2926_v57 = vld [vmem:[%s8406_s5 + $0x378] sm:$0xff]  ;;  %v2941_v25 = vld [vmem:[%s8406_s5 + $0x3f0] sm:$0xff]  ;;  %v2908_v35 = vld [vmem:[%s8406_s5 + $0x2e8] sm:$0xff] }
 0x34c   : > { %v2270_v9 = vpop.f32.mrf.mxu0  ;;  %v2396_v5 = vrot.slane %v6688_v20, 1  ;;  %v2400_v42 = vrot.slane %v6688_v20, 3 }
 0x34d   : > { %v2347_v24 = vpop.f32.mrf.mxu1  ;;  %v6722_v55 = vmax.f32 %v2267_v52, 0.0  ;;  %v2271_v47 = vadd.f32 %v2270_v9, %v6716_v44  ;;  %v6727_v10 = vmax.f32 %v2344_v8, 0.0  ;;  %v4642_v11 = vrot.slane %v6718_v7, 7  ;;  %v2925_v9 = vld [vmem:[%s8406_s5 + $0x370] sm:$0xff] }
 0x34e   : > { %v2348_v33 = vadd.f32 %v2347_v24, %v2174_v36  ;;  %v2478_v40 = vrot.slane %v6718_v7, 6  ;;  %v4644_v19 = vrot.slane %v6718_v7, 9  ;;  %v2752_v54 = vsel %vm2749_vm8, %v2719_v48, %v6718_v7  ;;  %v2272_v53 = vpop.f32.mrf.mxu0 }
 0x34f   : > { %v2349_v14 = vpop.f32.mrf.mxu1  ;;  %v6731_v43 = vmax.f32 %v2271_v47, 0.0  ;;  %v4646_v49 = vrot.slane %v6718_v7, 11  ;;  %v4666_v4 = vrot.slane %v6727_v10, 6  ;;  %v2751_v37 = vsel %vm2749_vm8, %v2718_v58, %v4642_v11 }
 0x350   : > { %v6737_v16 = vmax.f32 %v2348_v33, 0.0  ;;  %v2350_v56 = vadd.f32 %v2349_v14, %v2174_v36  ;;  %v2509_v18 = vrot.slane %v6727_v10, 5  ;;  %v2750_v63 = vsel %vm2749_vm8, %v2717_v51, %v2478_v40  ;;  %v2940_v33 = vld [vmem:[%s8406_s5 + $0x3e8] sm:$0xff] }
 0x351   : > { %v2353_v12 = vpop.f32.mrf.mxu1  ;;  %v2753_v17 = vsel %vm2749_vm8, %v2720_v50, %v4644_v19  ;;  %v4667_v59 = vrot.slane %v6727_v10, 7  ;;  %v2784_v36 = vsel %vm2782_vm9, %v2751_v37, %v4666_v4  ;;  %v2755_v28 = vsel %vm2749_vm8, %v2722_v31, %v4646_v49  ;;  %v2891_v4 = vld [vmem:[%s8406_s5 + $0x260] sm:$0xff] }
 0x352   : > { %v6745_v60 = vmax.f32 %v2350_v56, 0.0  ;;  %v2354_v0 = vadd.f32 %v2353_v12, %v6693_v32  ;;  %v2786_v61 = vsel %vm2782_vm9, %v2753_v17, %v6727_v10  ;;  %3398 = vmatprep.mubr.f32.mxu0 %v2784_v36  ;;  %v2783_v46 = vsel %vm2782_vm9, %v2750_v63, %v2509_v18  ;;  %v2924_v56 = vld [vmem:[%s8406_s5 + $0x368] sm:$0xff] }
 0x353   : > { %v2355_v26 = vpop.f32.mrf.mxu1  ;;  %3468 = vmatprep.mubr.f32.mxu1 %v2786_v61  ;;  %v2785_v58 = vsel %vm2782_vm9, %v2752_v54, %v4667_v59  ;;  %v2660_v39 = vrot.slane %v2509_v18, 5  ;;  %3399 = vmatmul.mubr.f32.vlgmr.msra.gmra.mxu0 %v2783_v46  ;;  %v2273_v13 = vadd.f32 %v2272_v53, %v6716_v44  ;;  %v4647_v51 = vrot.slane %v6718_v7, 13  ;;  %v2890_v18 = vld [vmem:[%s8406_s5 + $0x258] sm:$0xff]  ;;  %v2905_v53 = vld [vmem:[%s8406_s5 + $0x2d0] sm:$0xff] }
 0x354   : > { %v6763_v41 = vmax.f32 %v2354_v0, 0.0  ;;  %v2356_v22 = vadd.f32 %v2355_v26, %v6693_v32  ;;  %3469 = vmatmul.mubr.f32.vlgmr.msra.gmra.mxu1 %v2785_v58  ;;  %4766 = vmatpush3.msra.mxu0 %v2894_v21  ;;  %v4671_v32 = vrot.slane %v6727_v10, 12  ;;  %v4645_v50 = vrot.slane %v6718_v7, 10  ;;  %v2892_v7 = vld [vmem:[%s8406_s5 + $0x268] sm:$0xff]  ;;  %v2889_v26 = vld [vmem:[%s8406_s5 + $0x250] sm:$0xff] }
 0x355   : > { %v2359_v27 = vpop.f32.mrf.mxu1  ;;  %v2788_v34 = vsel %vm2782_vm9, %v2755_v28, %v2660_v39  ;;  %4801 = vmatpush3.msra.mxu1 %v2926_v57  ;;  %v4669_v48 = vrot.slane %v6727_v10, 9  ;;  %4767 = vmatprep.subr.mxu0 %v2909_v3  ;;  %v6784_v52 = vmax.f32 %v2273_v13, 0.0  ;;  %v2757_v8 = vsel %vm2749_vm8, %v6711_v30, %v4647_v51  ;;  %v2907_v30 = vld [vmem:[%s8406_s5 + $0x2e0] sm:$0xff]  ;;  %v2922_v57 = vld [vmem:[%s8406_s5 + $0x358] sm:$0xff]  ;;  %v2937_v28 = vld [vmem:[%s8406_s5 + $0x3d0] sm:$0xff] }
 0x356   : > { %v6781_v31 = vmax.f32 %v2356_v22, 0.0  ;;  %v2360_v15 = vadd.f32 %v2359_v27, %v6716_v44  ;;  %3538 = vmatprep.mubr.f32.mxu0 %v2788_v34  ;;  %4768 = vmatpush3.msra.mxu0 %v2893_v45  ;;  %v2790_v24 = vsel %vm2782_vm9, %v2757_v8, %v4671_v32  ;;  %v2754_v11 = vsel %vm2749_vm8, %v6714_v2, %v4645_v50  ;;  %v2904_v22 = vld [vmem:[%s8406_s5 + $0x2c8] sm:$0xff]  ;;  %v2921_v51 = vld [vmem:[%s8406_s5 + $0x350] sm:$0xff] }
 0x357   : > { %4802 = vmatprep.subr.mxu1 %v2941_v25  ;;  %v2361_v47 = vpop.f32.mrf.mxu1  ;;  %v2601_v14 = vrot.slane %v2478_v40, 6  ;;  %v4670_v19 = vrot.slane %v6727_v10, 11  ;;  %3608 = vmatprep.mubr.f32.mxu1 %v2790_v24  ;;  %v6814_v37 = vsel %vm2782_vm9, %v2754_v11, %v4669_v48  ;;  %v2723_v2 = vsel %vm2716_vm7, %v2391_v6, %v4623_v23  ;;  %v2906_v10 = vld [vmem:[%s8406_s5 + $0x2d8] sm:$0xff]  ;;  %v2923_v23 = vld [vmem:[%s8406_s5 + $0x360] sm:$0xff]  ;;  %v2888_v27 = vld [vmem:[%s8406_s5 + $0x248] sm:$0xff] }
 0x358   : > { %v6804_v54 = vmax.f32 %v2360_v15, 0.0  ;;  %v2362_v49 = vadd.f32 %v2361_v47, %v6716_v44  ;;  %4769 = vmatprep.subr.mxu0 %v2908_v35  ;;  %4803 = vmatpush3.msra.mxu1 %v2925_v9  ;;  %v2939_v44 = vld [vmem:[%s8406_s5 + $0x3e0] sm:$0xff]  ;;  %v4648_v12 = vrot.slane %v6737_v16, 7  ;;  %v4672_v1 = vrot.slane %v6745_v60, 6  ;;  %v2936_v48 = vld [vmem:[%s8406_s5 + $0x3c8] sm:$0xff] }
 0x359   : > { %4770 = vmatpush3.msra.mxu0 %v2892_v7  ;;  %v2756_v40 = vsel %vm2749_vm8, %v2723_v2, %v2601_v14  ;;  %v2726_v62 = vsel %vm2716_vm7, %v2396_v5, %v6699_v29  ;;  %4804 = vmatprep.subr.mxu1 %v2940_v33  ;;  %v4626_v17 = vrot.slane %v6699_v29, 10  ;;  %v4650_v59 = vrot.slane %v6737_v16, 9  ;;  %v2938_v5 = vld [vmem:[%s8406_s5 + $0x3d8] sm:$0xff]  ;;  %v2903_v15 = vld [vmem:[%s8406_s5 + $0x2c0] sm:$0xff]  ;;  %v2920_v47 = vld [vmem:[%s8406_s5 + $0x348] sm:$0xff] }
 0x35a   : > { %v6834_v6 = vmax.f32 %v2362_v49, 0.0  ;;  %4771 = vmatprep.subr.mxu0 %v2907_v30  ;;  %v6843_v63 = vsel %vm2782_vm9, %v2756_v40, %v4670_v19  ;;  %4805 = vmatpush3.msra.mxu1 %v2924_v56  ;;  %v2759_v0 = vsel %vm2749_vm8, %v2726_v62, %v4648_v12  ;;  %v2455_v36 = vrot.slane %v6699_v29, 7  ;;  %v2887_v33 = vld [vmem:[%s8406_s5 + $0x240] sm:$0xff]  ;;  %v2902_v56 = vld [vmem:[%s8406_s5 + $0x2b8] sm:$0xff] }
 0x35b   : > { %4772 = vmatpush3.msra.mxu0 %v2891_v4  ;;  %v2486_v61 = vrot.slane %v6737_v16, 6  ;;  %v2517_v21 = vrot.slane %v6745_v60, 5  ;;  %4806 = vmatprep.subr.mxu1 %v2939_v44  ;;  %v6864_v46 = vsel %vm2782_vm9, %v2759_v0, %v4672_v1  ;;  %v2728_v58 = vsel %vm2716_vm7, %v2400_v42, %v4626_v17  ;;  %v2935_v49 = vld [vmem:[%s8406_s5 + $0x3c0] sm:$0xff]  ;;  %v2886_v12 = vld [vmem:[%s8406_s5 + $0x238] sm:$0xff] }
 0x35c   : > { %4773 = vmatprep.subr.mxu0 %v2906_v10  ;;  %v2398_v3 = vrot.slane %v6688_v20, 2  ;;  %v4625_v39 = vrot.slane %v6699_v29, 9  ;;  %4807 = vmatpush3.msra.mxu1 %v2923_v23  ;;  %v2761_v13 = vsel %vm2749_vm8, %v2728_v58, %v4650_v59  ;;  %v2725_v45 = vsel %vm2716_vm7, %v6688_v20, %v2455_v36  ;;  %v2919_v40 = vld [vmem:[%s8406_s5 + $0x340] sm:$0xff]  ;;  %v2934_v17 = vld [vmem:[%s8406_s5 + $0x3b8] sm:$0xff]  ;;  %v2901_v59 = vld [vmem:[%s8406_s5 + $0x2b0] sm:$0xff] }
 0x35d   : > { %4774 = vmatpush3.msra.mxu0 %v2890_v18  ;;  %v4673_v42 = vrot.slane %v6745_v60, 7  ;;  %v2404_v25 = vrot.slane %v6688_v20, 5  ;;  %4808 = vmatprep.subr.mxu1 %v2938_v5  ;;  %v6890_v34 = vsel %vm2782_vm9, %v2761_v13, %v6745_v60  ;;  %v2758_v32 = vsel %vm2749_vm8, %v2725_v45, %v2486_v61 }
 0x35e   : > { %4775 = vmatprep.subr.mxu0 %v2905_v53  ;;  %v2727_v35 = vsel %vm2716_vm7, %v2398_v3, %v4625_v39  ;;  %v4628_v50 = vrot.slane %v6699_v29, 12  ;;  %4809 = vmatpush3.msra.mxu1 %v2922_v57  ;;  %v6904_v8 = vsel %vm2782_vm9, %v2758_v32, %v2517_v21  ;;  %v4652_v7 = vrot.slane %v6737_v16, 11  ;;  %v2885_v57 = vld [vmem:[%s8406_s5 + $0x230] sm:$0xff]  ;;  %v2900_v39 = vld [vmem:[%s8406_s5 + $0x2a8] sm:$0xff]  ;;  %v2899_v32 = vld [vmem:[%s8406_s5 + $0x2a0] sm:$0xff] }
 0x35f   : > { %4776 = vmatpush3.msra.mxu0 %v2889_v26  ;;  %v2760_v9 = vsel %vm2749_vm8, %v2727_v35, %v6737_v16  ;;  %v2667_v24 = vrot.slane %v2517_v21, 5  ;;  %4810 = vmatprep.subr.mxu1 %v2937_v28  ;;  %v2408_v14 = vrot.slane %v6688_v20, 7  ;;  %v2549_v19 = vrot.slane %v2455_v36, 7  ;;  %v2918_v21 = vld [vmem:[%s8406_s5 + $0x338] sm:$0xff]  ;;  %v2933_v3 = vld [vmem:[%s8406_s5 + $0x3b0] sm:$0xff] }
 0x360   : > { %4777 = vmatprep.subr.mxu0 %v2904_v22  ;;  %v6916_v30 = vsel %vm2782_vm9, %v2760_v9, %v4673_v42  ;;  %v2730_v11 = vsel %vm2716_vm7, %v2404_v25, %v4628_v50  ;;  %4811 = vmatpush3.msra.mxu1 %v2921_v51  ;;  %v4653_v2 = vrot.slane %v6737_v16, 13  ;;  %v4677_v44 = vrot.slane %v6745_v60, 12  ;;  %v2916_v9 = vld [vmem:[%s8406_s5 + $0x328] sm:$0xff] }
 0x361   : > { %4778 = vmatpush3.msra.mxu0 %v2888_v27  ;;  %v2763_v4 = vsel %vm2749_vm8, %v2730_v11, %v4652_v7  ;;  %v2402_v10 = vrot.slane %v6688_v20, 4  ;;  %4812 = vmatprep.subr.mxu1 %v2936_v48  ;;  %v2732_v62 = vsel %vm2716_vm7, %v2408_v14, %v2549_v19  ;;  %v4627_v23 = vrot.slane %v6699_v29, 11  ;;  %v2932_v27 = vld [vmem:[%s8406_s5 + $0x3a8] sm:$0xff]  ;;  %v2883_v7 = vld [vmem:[%s8406_s5 + $0x220] sm:$0xff]  ;;  %v2898_v19 = vld [vmem:[%s8406_s5 + $0x298] sm:$0xff] }
 0x362   : > { %4779 = vmatprep.subr.mxu0 %v2903_v15  ;;  %v6937_v1 = vsel %vm2782_vm9, %v2763_v4, %v2667_v24  ;;  %v4651_v18 = vrot.slane %v6737_v16, 10  ;;  %4813 = vmatpush3.msra.mxu1 %v2920_v47  ;;  %v2765_v5 = vsel %vm2749_vm8, %v2732_v62, %v4653_v2  ;;  %v4675_v53 = vrot.slane %v6745_v60, 9  ;;  %v2931_v14 = vld [vmem:[%s8406_s5 + $0x3a0] sm:$0xff] }
 0x363   : > { %4780 = vmatpush3.msra.mxu0 %v2887_v33  ;;  %v2406_v0 = vrot.slane %v6688_v20, 6  ;;  %v4629_v36 = vrot.slane %v6699_v29, 13  ;;  %4814 = vmatprep.subr.mxu1 %v2935_v49  ;;  %v6959_v26 = vsel %vm2782_vm9, %v2765_v5, %v4677_v44  ;;  %v2729_v58 = vsel %vm2716_vm7, %v2402_v10, %v4627_v23  ;;  %v2915_v44 = vld [vmem:[%s8406_s5 + $0x320] sm:$0xff]  ;;  %v2882_v10 = vld [vmem:[%s8406_s5 + $0x218] sm:$0xff] }
 0x364   : > { %4781 = vmatprep.subr.mxu0 %v2902_v56  ;;  %v2608_v20 = vrot.slane %v2486_v61, 6  ;;  %v4676_v29 = vrot.slane %v6745_v60, 11  ;;  %4815 = vmatpush3.msra.mxu1 %v2919_v40  ;;  %v2762_v28 = vsel %vm2749_vm8, %v2729_v58, %v4651_v18  ;;  %v2411_v13 = vrot.slane %v6707_v38, 1  ;;  %v2917_v60 = vld [vmem:[%s8406_s5 + $0x330] sm:$0xff]  ;;  %v2884_v61 = vld [vmem:[%s8406_s5 + $0x228] sm:$0xff]  ;;  %v2930_v18 = vld [vmem:[%s8406_s5 + $0x398] sm:$0xff] }
 0x365   : > { %4782 = vmatpush3.msra.mxu0 %v2886_v12  ;;  %v2731_v22 = vsel %vm2716_vm7, %v2406_v0, %v4629_v36  ;;  %v4654_v16 = vrot.slane %v6763_v41, 7  ;;  %4816 = vmatprep.subr.mxu1 %v2934_v17  ;;  %v6982_v45 = vsel %vm2782_vm9, %v2762_v28, %v4675_v53  ;;  %v4678_v25 = vrot.slane %v6781_v31, 6  ;;  %v2897_v17 = vld [vmem:[%s8406_s5 + $0x290] sm:$0xff]  ;;  %v2914_v36 = vld [vmem:[%s8406_s5 + $0x318] sm:$0xff] }
 0x366   : > { %4783 = vmatprep.subr.mxu0 %v2901_v59  ;;  %v2764_v42 = vsel %vm2749_vm8, %v2731_v22, %v2608_v20  ;;  %v2415_v51 = vrot.slane %v6707_v38, 3  ;;  %4817 = vmatpush3.msra.mxu1 %v2918_v21  ;;  %v2734_v50 = vsel %vm2716_vm7, %v2411_v13, %v6722_v55  ;;  %v4632_v48 = vrot.slane %v6722_v55, 10  ;;  %v2881_v21 = vld [vmem:[%s8406_s5 + $0x210] sm:$0xff] }
 0x367   : > { %4784 = vmatpush3.msra.mxu0 %v2885_v57  ;;  %v6994_v35 = vsel %vm2782_vm9, %v2764_v42, %v4676_v29  ;;  %v4656_v15 = vrot.slane %v6763_v41, 9  ;;  %4818 = vmatprep.subr.mxu1 %v2933_v3  ;;  %v2767_v24 = vsel %vm2749_vm8, %v2734_v50, %v4654_v16  ;;  %v2463_v47 = vrot.slane %v6722_v55, 7  ;;  %v2929_v3 = vld [vmem:[%s8406_s5 + $0x390] sm:$0xff]  ;;  %v2895_v50 = vld [vmem:[%s8406_s5 + $0x280] sm:$0xff] }
 0x368   : > { %4785 = vmatprep.subr.mxu0 %v2900_v39  ;;  %v2494_v33 = vrot.slane %v6763_v41, 6  ;;  %v2525_v11 = vrot.slane %v6781_v31, 5  ;;  %4819 = vmatpush3.msra.mxu1 %v2917_v60  ;;  %v7017_v49 = vsel %vm2782_vm9, %v2767_v24, %v4678_v25  ;;  %v2736_v56 = vsel %vm2716_vm7, %v2415_v51, %v4632_v48  ;;  %v2896_v39 = vld [vmem:[%s8406_s5 + $0x288] sm:$0xff]  ;;  %v2913_v60 = vld [vmem:[%s8406_s5 + $0x310] sm:$0xff] }
 0x369   : > { %4786 = vmatpush3.msra.mxu0 %v2884_v61  ;;  %v2413_v4 = vrot.slane %v6707_v38, 2  ;;  %v4631_v2 = vrot.slane %v6722_v55, 9  ;;  %4820 = vmatprep.subr.mxu1 %v2932_v27  ;;  %v2769_v40 = vsel %vm2749_vm8, %v2736_v56, %v4656_v15  ;;  %v2733_v12 = vsel %vm2716_vm7, %v6707_v38, %v2463_v47  ;;  %v2880_v61 = vld [vmem:[%s8406_s5 + $0x208] sm:$0xff] }
 0x36a   : > { %4787 = vmatprep.subr.mxu0 %v2899_v32  ;;  %v4679_v62 = vrot.slane %v6781_v31, 7  ;;  %v2419_v23 = vrot.slane %v6707_v38, 5  ;;  %4821 = vmatpush3.msra.mxu1 %v2916_v9  ;;  %v7041_v59 = vsel %vm2782_vm9, %v2769_v40, %v6781_v31  ;;  %v2766_v5 = vsel %vm2749_vm8, %v2733_v12, %v2494_v33  ;;  %v2928_v32 = vld [vmem:[%s8406_s5 + $0x388] sm:$0xff] }
 0x36b   : > { %4788 = vmatpush3.msra.mxu0 %v2883_v7  ;;  %v2735_v53 = vsel %vm2716_vm7, %v2413_v4, %v4631_v2  ;;  %v4634_v0 = vrot.slane %v6722_v55, 12  ;;  %4822 = vmatprep.subr.mxu1 %v2931_v14  ;;  %v7055_v57 = vsel %vm2782_vm9, %v2766_v5, %v2525_v11  ;;  %v4658_v20 = vrot.slane %v6763_v41, 11  ;;  %v2912_v24 = vld [vmem:[%s8406_s5 + $0x308] sm:$0xff]  ;;  %v2927_v4 = vld [vmem:[%s8406_s5 + $0x380] sm:$0xff] }
 0x36c   : > { %4789 = vmatprep.subr.mxu0 %v2898_v19  ;;  %v2768_v58 = vsel %vm2749_vm8, %v2735_v53, %v6763_v41  ;;  %v2674_v29 = vrot.slane %v2525_v11, 5  ;;  %4823 = vmatpush3.msra.mxu1 %v2915_v44  ;;  %v2423_v13 = vrot.slane %v6707_v38, 7  ;;  %v2556_v16 = vrot.slane %v2463_v47, 7  ;;  %v2879_v47 = vld [vmem:[%s8406_s5 + $0x200] sm:$0xff]  ;;  %v3006_v53 = vld [vmem:[%s8406_s5 + $0x5f8] sm:$0xff] }
 0x36d   : > { %4790 = vmatpush3.msra.mxu0 %v2882_v10  ;;  %v7067_v28 = vsel %vm2782_vm9, %v2768_v58, %v4679_v62  ;;  %v2738_v22 = vsel %vm2716_vm7, %v2419_v23, %v4634_v0  ;;  %4824 = vmatprep.subr.mxu1 %v2930_v18  ;;  %v4659_v25 = vrot.slane %v6763_v41, 13  ;;  %v4683_v51 = vrot.slane %v6781_v31, 12 }
 0x36e   : > { %4791 = vmatprep.subr.mxu0 %v2897_v17  ;;  %v2771_v42 = vsel %vm2749_vm8, %v2738_v22, %v4658_v20  ;;  %v2417_v27 = vrot.slane %v6707_v38, 4  ;;  %4825 = vmatpush3.msra.mxu1 %v2914_v36  ;;  %v2740_v15 = vsel %vm2716_vm7, %v2423_v13, %v2556_v16  ;;  %v4633_v9 = vrot.slane %v6722_v55, 11  ;;  %v2990_v20 = vld [vmem:[%s8406_s5 + $0x578] sm:$0xff]  ;;  %v2957_v13 = vld [vmem:[%s8406_s5 + $0x470] sm:$0xff] }
 0x36f   : > { %4792 = vmatpush3.msra.mxu0 %v2881_v21  ;;  %v7088_v48 = vsel %vm2782_vm9, %v2771_v42, %v2674_v29  ;;  %v4657_v7 = vrot.slane %v6763_v41, 10  ;;  %4826 = vmatprep.subr.mxu1 %v2929_v3  ;;  %v2773_v11 = vsel %vm2749_vm8, %v2740_v15, %v4659_v25  ;;  %v4681_v14 = vrot.slane %v6781_v31, 9  ;;  %v2972_v25 = vld [vmem:[%s8406_s5 + $0x4e8] sm:$0xff] }
 0x370   : > { %4793 = vmatprep.subr.mxu0 %v2896_v39  ;;  %v2421_v19 = vrot.slane %v6707_v38, 6  ;;  %v4635_v56 = vrot.slane %v6722_v55, 13  ;;  %4827 = vmatpush3.msra.mxu1 %v2913_v60  ;;  %v7107_v2 = vsel %vm2782_vm9, %v2773_v11, %v4683_v51  ;;  %v2737_v44 = vsel %vm2716_vm7, %v2417_v27, %v4633_v9  ;;  %v2911_v38 = vld [vmem:[%s8406_s5 + $0x300] sm:$0xff]  ;;  %v2974_v55 = vld [vmem:[%s8406_s5 + $0x4f8] sm:$0xff]  ;;  %v2956_v15 = vld [vmem:[%s8406_s5 + $0x468] sm:$0xff] }
 0x371   : > { %4794 = vmatpush3.msra.mxu0 %v2880_v61  ;;  %v2615_v10 = vrot.slane %v2494_v33, 6  ;;  %v4682_v40 = vrot.slane %v6781_v31, 11  ;;  %4828 = vmatprep.subr.mxu1 %v2928_v32  ;;  %v2770_v12 = vsel %vm2749_vm8, %v2737_v44, %v4657_v7  ;;  %v2426_v23 = vrot.slane %v6731_v43, 1  ;;  %v2958_v31 = vld [vmem:[%s8406_s5 + $0x478] sm:$0xff]  ;;  %v3004_v11 = vld [vmem:[%s8406_s5 + $0x5e8] sm:$0xff] }
 0x372   : > { %4795 = vmatprep.subr.mxu0 %v2895_v50  ;;  %v2739_v62 = vsel %vm2716_vm7, %v2421_v19, %v4635_v56  ;;  %v4660_v41 = vrot.slane %v6804_v54, 7  ;;  %4829 = vmatpush3.msra.mxu1 %v2912_v24  ;;  %v7127_v33 = vsel %vm2782_vm9, %v2770_v12, %v4681_v14  ;;  %v4684_v17 = vrot.slane %v6834_v6, 6  ;;  %v2971_v14 = vld [vmem:[%s8406_s5 + $0x4e0] sm:$0xff] }
 0x373   : > { %4796 = vmatpush3.msra.mxu0 %v2879_v47  ;;  %v2772_v18 = vsel %vm2749_vm8, %v2739_v62, %v2615_v10  ;;  %v2430_v5 = vrot.slane %v6731_v43, 3  ;;  %4830 = vmatprep.subr.mxu1 %v2927_v4  ;;  %v2742_v36 = vsel %vm2716_vm7, %v2426_v23, %v6784_v52  ;;  %v4638_v21 = vrot.slane %v6784_v52, 10  ;;  %v2955_v10 = vld [vmem:[%s8406_s5 + $0x460] sm:$0xff]  ;;  %v2970_v23 = vld [vmem:[%s8406_s5 + $0x4d8] sm:$0xff] }
 0x374   : > { %3539 = vmatmul.mubr.f32.vlgmr.msra.gmra.mxu0 %v6814_v37  ;;  %v7137_v0 = vsel %vm2782_vm9, %v2772_v18, %v4682_v40  ;;  %v4662_v58 = vrot.slane %v6804_v54, 9  ;;  %4831 = vmatpush3.msra.mxu1 %v2911_v38  ;;  %v2973_v37 = vld [vmem:[%s8406_s5 + $0x4f0] sm:$0xff]  ;;  %v2775_v29 = vsel %vm2749_vm8, %v2742_v36, %v4660_v41  ;;  %v2471_v3 = vrot.slane %v6784_v52, 7  ;;  %v3003_v62 = vld [vmem:[%s8406_s5 + $0x5e0] sm:$0xff] }
 0x375   : > { %4835 = vmatprep.subr.mxu0 %v2974_v55  ;;  %v2502_v39 = vrot.slane %v6804_v54, 6  ;;  %v2533_v22 = vrot.slane %v6834_v6, 5  ;;  %3609 = vmatmul.mubr.f32.vlgmr.msra.gmra.mxu1 %v6843_v63  ;;  %v7158_v16 = vsel %vm2782_vm9, %v2775_v29, %v4684_v17  ;;  %v2744_v60 = vsel %vm2716_vm7, %v2430_v5, %v4638_v21  ;;  %v3005_v63 = vld [vmem:[%s8406_s5 + $0x5f0] sm:$0xff]  ;;  %v2987_v5 = vld [vmem:[%s8406_s5 + $0x560] sm:$0xff] }
 0x376   : > { %4836 = vmatpush3.msra.mxu0 %v2958_v31  ;;  %v2428_v61 = vrot.slane %v6731_v43, 2  ;;  %v4637_v42 = vrot.slane %v6784_v52, 9  ;;  %3678 = vmatprep.mubr.f32.mxu0 %v6864_v46  ;;  %v2777_v51 = vsel %vm2749_vm8, %v2744_v60, %v4662_v58  ;;  %v2741_v27 = vsel %vm2716_vm7, %v6731_v43, %v2471_v3  ;;  %v2989_v46 = vld [vmem:[%s8406_s5 + $0x570] sm:$0xff] }
 0x377   : > { %4870 = vmatprep.subr.mxu1 %v3006_v53  ;;  %v4685_v32 = vrot.slane %v6834_v6, 7  ;;  %v2434_v50 = vrot.slane %v6731_v43, 5  ;;  %4837 = vmatprep.subr.mxu0 %v2973_v37  ;;  %v7183_v9 = vsel %vm2782_vm9, %v2777_v51, %v6834_v6  ;;  %v2774_v7 = vsel %vm2749_vm8, %v2741_v27, %v2502_v39  ;;  %v2954_v53 = vld [vmem:[%s8406_s5 + $0x458] sm:$0xff]  ;;  %v2969_v29 = vld [vmem:[%s8406_s5 + $0x4d0] sm:$0xff]  ;;  %v2968_v27 = vld [vmem:[%s8406_s5 + $0x4c8] sm:$0xff] }
 0x378   : > { %4871 = vmatpush3.msra.mxu1 %v2990_v20  ;;  %v2743_v24 = vsel %vm2716_vm7, %v2428_v61, %v4637_v42  ;;  %v4640_v47 = vrot.slane %v6784_v52, 12  ;;  %3748 = vmatprep.mubr.f32.mxu1 %v6890_v34  ;;  %v7198_v19 = vsel %vm2782_vm9, %v2774_v7, %v2533_v22  ;;  %v4664_v4 = vrot.slane %v6804_v54, 11  ;;  %v2988_v34 = vld [vmem:[%s8406_s5 + $0x568] sm:$0xff]  ;;  %v3002_v20 = vld [vmem:[%s8406_s5 + $0x5d8] sm:$0xff]  ;;  %v2953_v42 = vld [vmem:[%s8406_s5 + $0x450] sm:$0xff] }
 0x379   : > { %4838 = vmatpush3.msra.mxu0 %v2957_v13  ;;  %v2776_v56 = vsel %vm2749_vm8, %v2743_v24, %v6804_v54  ;;  %v2681_v44 = vrot.slane %v2533_v22, 5  ;;  %4872 = vmatprep.subr.mxu1 %v3005_v63  ;;  %v2438_v55 = vrot.slane %v6731_v43, 7  ;;  %v2563_v12 = vrot.slane %v2471_v3, 7  ;;  %v2986_v61 = vld [vmem:[%s8406_s5 + $0x558] sm:$0xff]  ;;  %v3001_v51 = vld [vmem:[%s8406_s5 + $0x5d0] sm:$0xff]  ;;  %v2967_v7 = vld [vmem:[%s8406_s5 + $0x4c0] sm:$0xff] }
 0x37a   : > { %4839 = vmatprep.subr.mxu0 %v2972_v25  ;;  %v7210_v40 = vsel %vm2782_vm9, %v2776_v56, %v4685_v32  ;;  %v2746_v38 = vsel %vm2716_vm7, %v2434_v50, %v4640_v47  ;;  %4873 = vmatpush3.msra.mxu1 %v2989_v46  ;;  %v4665_v31 = vrot.slane %v6804_v54, 13  ;;  %v4689_v18 = vrot.slane %v6834_v6, 12  ;;  %v2984_v47 = vld [vmem:[%s8406_s5 + $0x548] sm:$0xff]  ;;  %v2966_v56 = vld [vmem:[%s8406_s5 + $0x4b8] sm:$0xff] }
 0x37b   : > { %4840 = vmatpush3.msra.mxu0 %v2956_v15  ;;  %v2779_v41 = vsel %vm2749_vm8, %v2746_v38, %v4664_v4  ;;  %v2432_v17 = vrot.slane %v6731_v43, 4  ;;  %4874 = vmatprep.subr.mxu1 %v3004_v11  ;;  %v2748_v21 = vsel %vm2716_vm7, %v2438_v55, %v2563_v12  ;;  %v4639_v58 = vrot.slane %v6784_v52, 11  ;;  %v3000_v15 = vld [vmem:[%s8406_s5 + $0x5c8] sm:$0xff]  ;;  %v2951_v11 = vld [vmem:[%s8406_s5 + $0x440] sm:$0xff]  ;;  %v2982_v38 = vld [vmem:[%s8406_s5 + $0x538] sm:$0xff] }
 0x37c   : > { %4841 = vmatprep.subr.mxu0 %v2971_v14  ;;  %v7231_v36 = vsel %vm2782_vm9, %v2779_v41, %v2681_v44  ;;  %v4663_v37 = vrot.slane %v6804_v54, 10  ;;  %4875 = vmatpush3.msra.mxu1 %v2988_v34  ;;  %v2781_v3 = vsel %vm2749_vm8, %v2748_v21, %v4665_v31  ;;  %v4687_v22 = vrot.slane %v6834_v6, 9  ;;  %v2985_v54 = vld [vmem:[%s8406_s5 + $0x550] sm:$0xff]  ;;  %v2999_v14 = vld [vmem:[%s8406_s5 + $0x5c0] sm:$0xff]  ;;  %v2950_v44 = vld [vmem:[%s8406_s5 + $0x438] sm:$0xff] }
 0x37d   : > { %4842 = vmatpush3.msra.mxu0 %v2955_v10  ;;  %v2436_v13 = vrot.slane %v6731_v43, 6  ;;  %v4641_v60 = vrot.slane %v6784_v52, 13  ;;  %4876 = vmatprep.subr.mxu1 %v3003_v62  ;;  %v7253_v63 = vsel %vm2782_vm9, %v2781_v3, %v4689_v18  ;;  %v2745_v25 = vsel %vm2716_vm7, %v2432_v17, %v4639_v58  ;;  %v2983_v4 = vld [vmem:[%s8406_s5 + $0x540] sm:$0xff]  ;;  %v2998_v34 = vld [vmem:[%s8406_s5 + $0x5b8] sm:$0xff]  ;;  %v2965_v10 = vld [vmem:[%s8406_s5 + $0x4b0] sm:$0xff] }
 0x37e   : > { %4843 = vmatprep.subr.mxu0 %v2970_v23  ;;  %v2622_v43 = vrot.slane %v2502_v39, 6  ;;  %v4688_v52 = vrot.slane %v6834_v6, 11  ;;  %4877 = vmatpush3.msra.mxu1 %v2987_v5  ;;  %v2778_v32 = vsel %vm2749_vm8, %v2745_v25, %v4663_v37  ;;  %v2952_v6 = vld [vmem:[%s8406_s5 + $0x448] sm:$0xff]  ;;  %v2949_v55 = vld [vmem:[%s8406_s5 + $0x430] sm:$0xff]  ;;  %v2963_v18 = vld [vmem:[%s8406_s5 + $0x4a0] sm:$0xff] }
 0x37f   : > { %4844 = vmatpush3.msra.mxu0 %v2954_v53  ;;  %v2747_v50 = vsel %vm2716_vm7, %v2436_v13, %v4641_v60  ;;  %4878 = vmatprep.subr.mxu1 %v3002_v20  ;;  %v7274_v39 = vsel %vm2782_vm9, %v2778_v32, %v4687_v22  ;;  %v2997_v12 = vld [vmem:[%s8406_s5 + $0x5b0] sm:$0xff]  ;;  %v2964_v62 = vld [vmem:[%s8406_s5 + $0x4a8] sm:$0xff]  ;;  %v2947_v5 = vld [vmem:[%s8406_s5 + $0x420] sm:$0xff] }
 0x380   : > { %4845 = vmatprep.subr.mxu0 %v2969_v29  ;;  %v2780_v46 = vsel %vm2749_vm8, %v2747_v50, %v2622_v43  ;;  %4879 = vmatpush3.msra.mxu1 %v2986_v61  ;;  %v2981_v23 = vld [vmem:[%s8406_s5 + $0x530] sm:$0xff]  ;;  %v2948_v41 = vld [vmem:[%s8406_s5 + $0x428] sm:$0xff]  ;;  %v2995_v53 = vld [vmem:[%s8406_s5 + $0x5a0] sm:$0xff] }
 0x381   : > { %4846 = vmatpush3.msra.mxu0 %v2953_v42  ;;  %v7284_v24 = vsel %vm2782_vm9, %v2780_v46, %v4688_v52  ;;  %4880 = vmatprep.subr.mxu1 %v3001_v51  ;;  %v2996_v31 = vld [vmem:[%s8406_s5 + $0x5a8] sm:$0xff]  ;;  %v2962_v21 = vld [vmem:[%s8406_s5 + $0x498] sm:$0xff]  ;;  %v2979_v58 = vld [vmem:[%s8406_s5 + $0x520] sm:$0xff] }
 0x382   : > { %4847 = vmatprep.subr.mxu0 %v2968_v27  ;;  %4881 = vmatpush3.msra.mxu1 %v2985_v54  ;;  %v2980_v17 = vld [vmem:[%s8406_s5 + $0x528] sm:$0xff]  ;;  %v2946_v37 = vld [vmem:[%s8406_s5 + $0x418] sm:$0xff]  ;;  %v2961_v29 = vld [vmem:[%s8406_s5 + $0x490] sm:$0xff] }
 0x383   : > { %4848 = vmatpush3.msra.mxu0 %v2952_v6  ;;  %4882 = vmatprep.subr.mxu1 %v3000_v15  ;;  %v2994_v20 = vld [vmem:[%s8406_s5 + $0x598] sm:$0xff]  ;;  %v2945_v22 = vld [vmem:[%s8406_s5 + $0x410] sm:$0xff]  ;;  %v2960_v60 = vld [vmem:[%s8406_s5 + $0x488] sm:$0xff] }
 0x384   : > { %4849 = vmatprep.subr.mxu0 %v2967_v7  ;;  %4883 = vmatpush3.msra.mxu1 %v2984_v47  ;;  %v2978_v3 = vld [vmem:[%s8406_s5 + $0x518] sm:$0xff]  ;;  %v2993_v13 = vld [vmem:[%s8406_s5 + $0x590] sm:$0xff]  ;;  %v2944_v42 = vld [vmem:[%s8406_s5 + $0x408] sm:$0xff] }
 0x385   : > { %4850 = vmatpush3.msra.mxu0 %v2951_v11  ;;  %4884 = vmatprep.subr.mxu1 %v2999_v14  ;;  %v2977_v61 = vld [vmem:[%s8406_s5 + $0x510] sm:$0xff]  ;;  %v2992_v25 = vld [vmem:[%s8406_s5 + $0x588] sm:$0xff]  ;;  %v2959_v43 = vld [vmem:[%s8406_s5 + $0x480] sm:$0xff] }
 0x386   : > { %4851 = vmatprep.subr.mxu0 %v2966_v56  ;;  %4885 = vmatpush3.msra.mxu1 %v2983_v4  ;;  %v2976_v52 = vld [vmem:[%s8406_s5 + $0x508] sm:$0xff]  ;;  %v2943_v51 = vld [vmem:[%s8406_s5 + $0x400] sm:$0xff]  ;;  %v3038_v50 = vld [vmem:[%s8406_s5 + $0x6f8] sm:$0xff] }
 0x387   : > { %4852 = vmatpush3.msra.mxu0 %v2950_v44  ;;  %4886 = vmatprep.subr.mxu1 %v2998_v34  ;;  %v2991_v27 = vld [vmem:[%s8406_s5 + $0x580] sm:$0xff]  ;;  %v3022_v54 = vld [vmem:[%s8406_s5 + $0x678] sm:$0xff]  ;;  %v3037_v46 = vld [vmem:[%s8406_s5 + $0x6f0] sm:$0xff] }
 0x388   : > { %4853 = vmatprep.subr.mxu0 %v2965_v10  ;;  %4887 = vmatpush3.msra.mxu1 %v2982_v38  ;;  %v2975_v32 = vld [vmem:[%s8406_s5 + $0x500] sm:$0xff]  ;;  %v3070_v6 = vld [vmem:[%s8406_s5 + $0x7f8] sm:$0xff]  ;;  %v3069_v7 = vld [vmem:[%s8406_s5 + $0x7f0] sm:$0xff] }
 0x389   : > { %4854 = vmatpush3.msra.mxu0 %v2949_v55  ;;  %4888 = vmatprep.subr.mxu1 %v2997_v12  ;;  %v3054_v15 = vld [vmem:[%s8406_s5 + $0x778] sm:$0xff]  ;;  %v3036_v47 = vld [vmem:[%s8406_s5 + $0x6e8] sm:$0xff]  ;;  %v3035_v14 = vld [vmem:[%s8406_s5 + $0x6e0] sm:$0xff] }
 0x38a   : > { %4855 = vmatprep.subr.mxu0 %v2964_v62  ;;  %4889 = vmatpush3.msra.mxu1 %v2981_v23  ;;  %v3020_v11 = vld [vmem:[%s8406_s5 + $0x668] sm:$0xff]  ;;  %v3019_v4 = vld [vmem:[%s8406_s5 + $0x660] sm:$0xff]  ;;  %v3034_v44 = vld [vmem:[%s8406_s5 + $0x6d8] sm:$0xff] }
 0x38b   : > { %4856 = vmatpush3.msra.mxu0 %v2948_v41  ;;  %4890 = vmatprep.subr.mxu1 %v2996_v31  ;;  %v3052_v56 = vld [vmem:[%s8406_s5 + $0x768] sm:$0xff]  ;;  %v3051_v34 = vld [vmem:[%s8406_s5 + $0x760] sm:$0xff]  ;;  %v3018_v10 = vld [vmem:[%s8406_s5 + $0x658] sm:$0xff] }
 0x38c   : > { %4857 = vmatprep.subr.mxu0 %v2963_v18  ;;  %4891 = vmatpush3.msra.mxu1 %v2980_v17  ;;  %v3066_v38 = vld [vmem:[%s8406_s5 + $0x7d8] sm:$0xff]  ;;  %v3033_v55 = vld [vmem:[%s8406_s5 + $0x6d0] sm:$0xff]  ;;  %v3032_v41 = vld [vmem:[%s8406_s5 + $0x6c8] sm:$0xff] }
 0x38d   : > { %4858 = vmatpush3.msra.mxu0 %v2947_v5  ;;  %4892 = vmatprep.subr.mxu1 %v2995_v53  ;;  %v3050_v12 = vld [vmem:[%s8406_s5 + $0x758] sm:$0xff]  ;;  %v3017_v62 = vld [vmem:[%s8406_s5 + $0x650] sm:$0xff]  ;;  %v3016_v18 = vld [vmem:[%s8406_s5 + $0x648] sm:$0xff] }
 0x38e   : > { %4859 = vmatprep.subr.mxu0 %v2962_v21  ;;  %4893 = vmatpush3.msra.mxu1 %v2979_v58  ;;  %v3065_v23 = vld [vmem:[%s8406_s5 + $0x7d0] sm:$0xff]  ;;  %v3064_v17 = vld [vmem:[%s8406_s5 + $0x7c8] sm:$0xff]  ;;  %v3031_v5 = vld [vmem:[%s8406_s5 + $0x6c0] sm:$0xff] }
 0x38f   : > { %4860 = vmatpush3.msra.mxu0 %v2946_v37  ;;  %4894 = vmatprep.subr.mxu1 %v2994_v20  ;;  %v3049_v31 = vld [vmem:[%s8406_s5 + $0x750] sm:$0xff]  ;;  %v3048_v53 = vld [vmem:[%s8406_s5 + $0x748] sm:$0xff]  ;;  %v3015_v21 = vld [vmem:[%s8406_s5 + $0x640] sm:$0xff] }
 0x390   : > { %4861 = vmatprep.subr.mxu0 %v2961_v29  ;;  %4895 = vmatpush3.msra.mxu1 %v2978_v3  ;;  %v3063_v58 = vld [vmem:[%s8406_s5 + $0x7c0] sm:$0xff]  ;;  %v3030_v37 = vld [vmem:[%s8406_s5 + $0x6b8] sm:$0xff] }
 0x391   : > { %4862 = vmatpush3.msra.mxu0 %v2945_v22  ;;  %4896 = vmatprep.subr.mxu1 %v2993_v13  ;;  %v3047_v20 = vld [vmem:[%s8406_s5 + $0x740] sm:$0xff]  ;;  %v3014_v29 = vld [vmem:[%s8406_s5 + $0x638] sm:$0xff]  ;;  %v3029_v22 = vld [vmem:[%s8406_s5 + $0x6b0] sm:$0xff] }
 0x392   : > { %4863 = vmatprep.subr.mxu0 %v2960_v60  ;;  %4897 = vmatpush3.msra.mxu1 %v2977_v61  ;;  %v3062_v3 = vld [vmem:[%s8406_s5 + $0x7b8] sm:$0xff]  ;;  %v3013_v60 = vld [vmem:[%s8406_s5 + $0x630] sm:$0xff] }
 0x393   : > { %4864 = vmatpush3.msra.mxu0 %v2944_v42  ;;  %4898 = vmatprep.subr.mxu1 %v2992_v25  ;;  %v3046_v13 = vld [vmem:[%s8406_s5 + $0x738] sm:$0xff]  ;;  %v3061_v61 = vld [vmem:[%s8406_s5 + $0x7b0] sm:$0xff]  ;;  %v3028_v42 = vld [vmem:[%s8406_s5 + $0x6a8] sm:$0xff] }
 0x394   : > { %4865 = vmatprep.subr.mxu0 %v2959_v43  ;;  %4899 = vmatpush3.msra.mxu1 %v2976_v52  ;;  %v3045_v25 = vld [vmem:[%s8406_s5 + $0x730] sm:$0xff]  ;;  %v3012_v43 = vld [vmem:[%s8406_s5 + $0x628] sm:$0xff] }
 0x395   : > { %4866 = vmatpush3.msra.mxu0 %v2943_v51  ;;  %4900 = vmatprep.subr.mxu1 %v2991_v27  ;;  %v3060_v52 = vld [vmem:[%s8406_s5 + $0x7a8] sm:$0xff]  ;;  %v3027_v51 = vld [vmem:[%s8406_s5 + $0x6a0] sm:$0xff] }
 0x396   : > { %3679 = vmatmul.mubr.f32.vlgmr.msra.gmra.mxu0 %v6904_v8  ;;  %4901 = vmatpush3.msra.mxu1 %v2975_v32  ;;  %v3021_v8 = vld [vmem:[%s8406_s5 + $0x670] sm:$0xff]  ;;  %v3044_v27 = vld [vmem:[%s8406_s5 + $0x728] sm:$0xff]  ;;  %v3011_v32 = vld [vmem:[%s8406_s5 + $0x620] sm:$0xff] }
 0x397   : > { %4905 = vmatprep.subr.mxu0 %v3038_v50  ;;  %3749 = vmatmul.mubr.f32.vlgmr.msra.gmra.mxu1 %v6916_v30  ;;  %v3053_v30 = vld [vmem:[%s8406_s5 + $0x770] sm:$0xff]  ;;  %v3059_v50 = vld [vmem:[%s8406_s5 + $0x7a0] sm:$0xff] }
 0x398   : > { %4906 = vmatpush3.msra.mxu0 %v3022_v54  ;;  %3818 = vmatprep.mubr.f32.mxu0 %v6937_v1  ;;  %v3068_v1 = vld [vmem:[%s8406_s5 + $0x7e8] sm:$0xff]  ;;  %v3026_v54 = vld [vmem:[%s8406_s5 + $0x698] sm:$0xff] }
 0x399   : > { %4940 = vmatprep.subr.mxu1 %v3070_v6  ;;  %4907 = vmatprep.subr.mxu0 %v3037_v46  ;;  %v3043_v6 = vld [vmem:[%s8406_s5 + $0x720] sm:$0xff]  ;;  %v3010_v46 = vld [vmem:[%s8406_s5 + $0x618] sm:$0xff] }
 0x39a   : > { %4941 = vmatpush3.msra.mxu1 %v3054_v15  ;;  %3888 = vmatprep.mubr.f32.mxu1 %v6959_v26  ;;  %v3067_v26 = vld [vmem:[%s8406_s5 + $0x7e0] sm:$0xff]  ;;  %v3058_v15 = vld [vmem:[%s8406_s5 + $0x798] sm:$0xff] }
 0x39b   : > { %4908 = vmatpush3.msra.mxu0 %v3021_v8  ;;  %4942 = vmatprep.subr.mxu1 %v3069_v7  ;;  %v3025_v8 = vld [vmem:[%s8406_s5 + $0x690] sm:$0xff]  ;;  %v3042_v7 = vld [vmem:[%s8406_s5 + $0x718] sm:$0xff] }
 0x39c   : > { %4909 = vmatprep.subr.mxu0 %v3036_v47  ;;  %4943 = vmatpush3.msra.mxu1 %v3053_v30  ;;  %v3009_v47 = vld [vmem:[%s8406_s5 + $0x610] sm:$0xff] }
 0x39d   : > { %4910 = vmatpush3.msra.mxu0 %v3020_v11  ;;  %4944 = vmatprep.subr.mxu1 %v3068_v1  ;;  %v3057_v30 = vld [vmem:[%s8406_s5 + $0x790] sm:$0xff]  ;;  %v3024_v11 = vld [vmem:[%s8406_s5 + $0x688] sm:$0xff] }
 0x39e   : > { %4911 = vmatprep.subr.mxu0 %v3035_v14  ;;  %4945 = vmatpush3.msra.mxu1 %v3052_v56  ;;  %v3041_v1 = vld [vmem:[%s8406_s5 + $0x710] sm:$0xff]  ;;  %v3008_v14 = vld [vmem:[%s8406_s5 + $0x608] sm:$0xff] }
 0x39f   : > { %4912 = vmatpush3.msra.mxu0 %v3019_v4  ;;  %4946 = vmatprep.subr.mxu1 %v3067_v26  ;;  %v3056_v56 = vld [vmem:[%s8406_s5 + $0x788] sm:$0xff]  ;;  %v3023_v4 = vld [vmem:[%s8406_s5 + $0x680] sm:$0xff] }
 0x3a0   : > { %4913 = vmatprep.subr.mxu0 %v3034_v44  ;;  %4947 = vmatpush3.msra.mxu1 %v3051_v34  ;;  %v3040_v26 = vld [vmem:[%s8406_s5 + $0x708] sm:$0xff]  ;;  %v3007_v44 = vld [vmem:[%s8406_s5 + $0x600] sm:$0xff] }
 0x3a1   : > { %4914 = vmatpush3.msra.mxu0 %v3018_v10  ;;  %4948 = vmatprep.subr.mxu1 %v3066_v38  ;;  %v3055_v34 = vld [vmem:[%s8406_s5 + $0x780] sm:$0xff]  ;;  %v3102_v38 = vld [vmem:[%s8406_s5 + $0x8f8] sm:$0xff] }
 0x3a2   : > { %4915 = vmatprep.subr.mxu0 %v3033_v55  ;;  %4949 = vmatpush3.msra.mxu1 %v3050_v12  ;;  %v3039_v10 = vld [vmem:[%s8406_s5 + $0x700] sm:$0xff]  ;;  %v3086_v55 = vld [vmem:[%s8406_s5 + $0x878] sm:$0xff] }
 0x3a3   : > { %4916 = vmatpush3.msra.mxu0 %v3017_v62  ;;  %4950 = vmatprep.subr.mxu1 %v3065_v23  ;;  %v3134_v12 = vld [vmem:[%s8406_s5 + $0x9f8] sm:$0xff]  ;;  %v3101_v62 = vld [vmem:[%s8406_s5 + $0x8f0] sm:$0xff] }
 0x3a4   : > { %4917 = vmatprep.subr.mxu0 %v3032_v41  ;;  %4951 = vmatpush3.msra.mxu1 %v3049_v31  ;;  %v3118_v23 = vld [vmem:[%s8406_s5 + $0x978] sm:$0xff]  ;;  %v3133_v41 = vld [vmem:[%s8406_s5 + $0x9f0] sm:$0xff]  ;;  %v3100_v31 = vld [vmem:[%s8406_s5 + $0x8e8] sm:$0xff] }
 0x3a5   : > { %4918 = vmatpush3.msra.mxu0 %v3016_v18  ;;  %4952 = vmatprep.subr.mxu1 %v3064_v17  ;;  %v3084_v18 = vld [vmem:[%s8406_s5 + $0x868] sm:$0xff]  ;;  %v3099_v17 = vld [vmem:[%s8406_s5 + $0x8e0] sm:$0xff] }
 0x3a6   : > { %4919 = vmatprep.subr.mxu0 %v3031_v5  ;;  %4953 = vmatpush3.msra.mxu1 %v3048_v53  ;;  %v3116_v5 = vld [vmem:[%s8406_s5 + $0x968] sm:$0xff]  ;;  %v3083_v53 = vld [vmem:[%s8406_s5 + $0x860] sm:$0xff] }
 0x3a7   : > { %4920 = vmatpush3.msra.mxu0 %v3015_v21  ;;  %4954 = vmatprep.subr.mxu1 %v3063_v58  ;;  %v3098_v21 = vld [vmem:[%s8406_s5 + $0x8d8] sm:$0xff]  ;;  %v3115_v58 = vld [vmem:[%s8406_s5 + $0x960] sm:$0xff] }
 0x3a8   : > { %4921 = vmatprep.subr.mxu0 %v3030_v37  ;;  %4955 = vmatpush3.msra.mxu1 %v3047_v20  ;;  %v3082_v37 = vld [vmem:[%s8406_s5 + $0x858] sm:$0xff] }
 0x3a9   : > { %4922 = vmatpush3.msra.mxu0 %v3014_v29  ;;  %4956 = vmatprep.subr.mxu1 %v3062_v3  ;;  %v3130_v20 = vld [vmem:[%s8406_s5 + $0x9d8] sm:$0xff]  ;;  %v3097_v29 = vld [vmem:[%s8406_s5 + $0x8d0] sm:$0xff] }
 0x3aa   : > { %4923 = vmatprep.subr.mxu0 %v3029_v22  ;;  %4957 = vmatpush3.msra.mxu1 %v3046_v13  ;;  %v3114_v3 = vld [vmem:[%s8406_s5 + $0x958] sm:$0xff]  ;;  %v3081_v22 = vld [vmem:[%s8406_s5 + $0x850] sm:$0xff] }
 0x3ab   : > { %4924 = vmatpush3.msra.mxu0 %v3013_v60  ;;  %4958 = vmatprep.subr.mxu1 %v3061_v61  ;;  %v3129_v13 = vld [vmem:[%s8406_s5 + $0x9d0] sm:$0xff]  ;;  %v3096_v60 = vld [vmem:[%s8406_s5 + $0x8c8] sm:$0xff] }
 0x3ac   : > { %4925 = vmatprep.subr.mxu0 %v3028_v42  ;;  %4959 = vmatpush3.msra.mxu1 %v3045_v25  ;;  %v3113_v61 = vld [vmem:[%s8406_s5 + $0x950] sm:$0xff]  ;;  %v3080_v42 = vld [vmem:[%s8406_s5 + $0x848] sm:$0xff] }
 0x3ad   : > { %4926 = vmatpush3.msra.mxu0 %v3012_v43  ;;  %4960 = vmatprep.subr.mxu1 %v3060_v52  ;;  %v3128_v25 = vld [vmem:[%s8406_s5 + $0x9c8] sm:$0xff]  ;;  %v3095_v43 = vld [vmem:[%s8406_s5 + $0x8c0] sm:$0xff] }
 0x3ae   : > { %4927 = vmatprep.subr.mxu0 %v3027_v51  ;;  %4961 = vmatpush3.msra.mxu1 %v3044_v27  ;;  %v3112_v52 = vld [vmem:[%s8406_s5 + $0x948] sm:$0xff]  ;;  %v3079_v51 = vld [vmem:[%s8406_s5 + $0x840] sm:$0xff] }
 0x3af   : > { %4928 = vmatpush3.msra.mxu0 %v3011_v32  ;;  %4962 = vmatprep.subr.mxu1 %v3059_v50  ;;  %v3127_v27 = vld [vmem:[%s8406_s5 + $0x9c0] sm:$0xff]  ;;  %v3094_v32 = vld [vmem:[%s8406_s5 + $0x8b8] sm:$0xff] }
 0x3b0   : > { %4929 = vmatprep.subr.mxu0 %v3026_v54  ;;  %4963 = vmatpush3.msra.mxu1 %v3043_v6  ;;  %v3111_v50 = vld [vmem:[%s8406_s5 + $0x940] sm:$0xff]  ;;  %v3078_v54 = vld [vmem:[%s8406_s5 + $0x838] sm:$0xff] }
 0x3b1   : > { %4930 = vmatpush3.msra.mxu0 %v3010_v46  ;;  %4964 = vmatprep.subr.mxu1 %v3058_v15  ;;  %v3126_v6 = vld [vmem:[%s8406_s5 + $0x9b8] sm:$0xff]  ;;  %v3093_v46 = vld [vmem:[%s8406_s5 + $0x8b0] sm:$0xff] }
 0x3b2   : > { %4931 = vmatprep.subr.mxu0 %v3025_v8  ;;  %4965 = vmatpush3.msra.mxu1 %v3042_v7  ;;  %v3110_v15 = vld [vmem:[%s8406_s5 + $0x938] sm:$0xff]  ;;  %v3077_v8 = vld [vmem:[%s8406_s5 + $0x830] sm:$0xff] }
 0x3b3   : > { %4932 = vmatpush3.msra.mxu0 %v3009_v47  ;;  %4966 = vmatprep.subr.mxu1 %v3057_v30  ;;  %v3125_v7 = vld [vmem:[%s8406_s5 + $0x9b0] sm:$0xff]  ;;  %v3092_v47 = vld [vmem:[%s8406_s5 + $0x8a8] sm:$0xff] }
 0x3b4   : > { %4933 = vmatprep.subr.mxu0 %v3024_v11  ;;  %4967 = vmatpush3.msra.mxu1 %v3041_v1  ;;  %v3109_v30 = vld [vmem:[%s8406_s5 + $0x930] sm:$0xff]  ;;  %v3076_v11 = vld [vmem:[%s8406_s5 + $0x828] sm:$0xff] }
 0x3b5   : > { %4934 = vmatpush3.msra.mxu0 %v3008_v14  ;;  %4968 = vmatprep.subr.mxu1 %v3056_v56  ;;  %v3124_v1 = vld [vmem:[%s8406_s5 + $0x9a8] sm:$0xff]  ;;  %v3091_v14 = vld [vmem:[%s8406_s5 + $0x8a0] sm:$0xff] }
 0x3b6   : > { %4935 = vmatprep.subr.mxu0 %v3023_v4  ;;  %4969 = vmatpush3.msra.mxu1 %v3040_v26  ;;  %v3108_v56 = vld [vmem:[%s8406_s5 + $0x928] sm:$0xff]  ;;  %v3075_v4 = vld [vmem:[%s8406_s5 + $0x820] sm:$0xff] }
 0x3b7   : > { %4936 = vmatpush3.msra.mxu0 %v3007_v44  ;;  %4970 = vmatprep.subr.mxu1 %v3055_v34  ;;  %v3123_v26 = vld [vmem:[%s8406_s5 + $0x9a0] sm:$0xff]  ;;  %v3090_v44 = vld [vmem:[%s8406_s5 + $0x898] sm:$0xff] }
 0x3b8   : > { %3819 = vmatmul.mubr.f32.vlgmr.msra.gmra.mxu0 %v6982_v45  ;;  %4971 = vmatpush3.msra.mxu1 %v3039_v10  ;;  %v3085_v45 = vld [vmem:[%s8406_s5 + $0x870] sm:$0xff]  ;;  %v3107_v34 = vld [vmem:[%s8406_s5 + $0x920] sm:$0xff]  ;;  %v3074_v10 = vld [vmem:[%s8406_s5 + $0x818] sm:$0xff] }
 0x3b9   : > { %4975 = vmatprep.subr.mxu0 %v3102_v38  ;;  %3889 = vmatmul.mubr.f32.vlgmr.msra.gmra.mxu1 %v6994_v35  ;;  %v3117_v35 = vld [vmem:[%s8406_s5 + $0x970] sm:$0xff]  ;;  %v3122_v38 = vld [vmem:[%s8406_s5 + $0x998] sm:$0xff] }
 0x3ba   : > { %4976 = vmatpush3.msra.mxu0 %v3086_v55  ;;  %3958 = vmatprep.mubr.f32.mxu0 %v7017_v49  ;;  %v3132_v49 = vld [vmem:[%s8406_s5 + $0x9e8] sm:$0xff]  ;;  %v3089_v55 = vld [vmem:[%s8406_s5 + $0x890] sm:$0xff] }
 0x3bb   : > { %5010 = vmatprep.subr.mxu1 %v3134_v12  ;;  %4977 = vmatprep.subr.mxu0 %v3101_v62  ;;  %v3106_v12 = vld [vmem:[%s8406_s5 + $0x918] sm:$0xff]  ;;  %v3073_v62 = vld [vmem:[%s8406_s5 + $0x810] sm:$0xff] }
 0x3bc   : > { %5011 = vmatpush3.msra.mxu1 %v3118_v23  ;;  %4028 = vmatprep.mubr.f32.mxu1 %v7041_v59  ;;  %v3131_v59 = vld [vmem:[%s8406_s5 + $0x9e0] sm:$0xff]  ;;  %v3121_v23 = vld [vmem:[%s8406_s5 + $0x990] sm:$0xff] }
 0x3bd   : > { %4978 = vmatpush3.msra.mxu0 %v3085_v45  ;;  %5012 = vmatprep.subr.mxu1 %v3133_v41  ;;  %v3088_v45 = vld [vmem:[%s8406_s5 + $0x888] sm:$0xff]  ;;  %v3105_v41 = vld [vmem:[%s8406_s5 + $0x910] sm:$0xff] }
 0x3be   : > { %4979 = vmatprep.subr.mxu0 %v3100_v31  ;;  %5013 = vmatpush3.msra.mxu1 %v3117_v35  ;;  %v3072_v31 = vld [vmem:[%s8406_s5 + $0x808] sm:$0xff] }
 0x3bf   : > { %4980 = vmatpush3.msra.mxu0 %v3084_v18  ;;  %5014 = vmatprep.subr.mxu1 %v3132_v49  ;;  %v3120_v35 = vld [vmem:[%s8406_s5 + $0x988] sm:$0xff]  ;;  %v3087_v18 = vld [vmem:[%s8406_s5 + $0x880] sm:$0xff] }
 0x3c0   : > { %4981 = vmatprep.subr.mxu0 %v3099_v17  ;;  %5015 = vmatpush3.msra.mxu1 %v3116_v5  ;;  %v3104_v49 = vld [vmem:[%s8406_s5 + $0x908] sm:$0xff]  ;;  %v3071_v17 = vld [vmem:[%s8406_s5 + $0x800] sm:$0xff] }
 0x3c1   : > { %4982 = vmatpush3.msra.mxu0 %v3083_v53  ;;  %5016 = vmatprep.subr.mxu1 %v3131_v59  ;;  %v3119_v5 = vld [vmem:[%s8406_s5 + $0x980] sm:$0xff]  ;;  %v3166_v59 = vld [vmem:[%s8406_s5 + $0xaf8] sm:$0xff] }
 0x3c2   : > { %4983 = vmatprep.subr.mxu0 %v3098_v21  ;;  %5017 = vmatpush3.msra.mxu1 %v3115_v58  ;;  %v3103_v53 = vld [vmem:[%s8406_s5 + $0x900] sm:$0xff]  ;;  %v3150_v21 = vld [vmem:[%s8406_s5 + $0xa78] sm:$0xff] }
 0x3c3   : > { %4984 = vmatpush3.msra.mxu0 %v3082_v37  ;;  %5018 = vmatprep.subr.mxu1 %v3130_v20  ;;  %v3198_v58 = vld [vmem:[%s8406_s5 + $0xbf8] sm:$0xff]  ;;  %v3165_v37 = vld [vmem:[%s8406_s5 + $0xaf0] sm:$0xff] }
 0x3c4   : > { %4985 = vmatprep.subr.mxu0 %v3097_v29  ;;  %5019 = vmatpush3.msra.mxu1 %v3114_v3  ;;  %v3182_v20 = vld [vmem:[%s8406_s5 + $0xb78] sm:$0xff]  ;;  %v3197_v29 = vld [vmem:[%s8406_s5 + $0xbf0] sm:$0xff]  ;;  %v3164_v3 = vld [vmem:[%s8406_s5 + $0xae8] sm:$0xff] }
 0x3c5   : > { %4986 = vmatpush3.msra.mxu0 %v3081_v22  ;;  %5020 = vmatprep.subr.mxu1 %v3129_v13  ;;  %v3148_v22 = vld [vmem:[%s8406_s5 + $0xa68] sm:$0xff]  ;;  %v3163_v13 = vld [vmem:[%s8406_s5 + $0xae0] sm:$0xff] }
 0x3c6   : > { %4987 = vmatprep.subr.mxu0 %v3096_v60  ;;  %5021 = vmatpush3.msra.mxu1 %v3113_v61  ;;  %v3180_v60 = vld [vmem:[%s8406_s5 + $0xb68] sm:$0xff]  ;;  %v3147_v61 = vld [vmem:[%s8406_s5 + $0xa60] sm:$0xff] }
 0x3c7   : > { %4988 = vmatpush3.msra.mxu0 %v3080_v42  ;;  %5022 = vmatprep.subr.mxu1 %v3128_v25  ;;  %v3162_v42 = vld [vmem:[%s8406_s5 + $0xad8] sm:$0xff]  ;;  %v3179_v25 = vld [vmem:[%s8406_s5 + $0xb60] sm:$0xff] }
 0x3c8   : > { %4989 = vmatprep.subr.mxu0 %v3095_v43  ;;  %5023 = vmatpush3.msra.mxu1 %v3112_v52  ;;  %v3146_v43 = vld [vmem:[%s8406_s5 + $0xa58] sm:$0xff] }
 0x3c9   : > { %4990 = vmatpush3.msra.mxu0 %v3079_v51  ;;  %5024 = vmatprep.subr.mxu1 %v3127_v27  ;;  %v3194_v52 = vld [vmem:[%s8406_s5 + $0xbd8] sm:$0xff]  ;;  %v3161_v51 = vld [vmem:[%s8406_s5 + $0xad0] sm:$0xff] }
 0x3ca   : > { %4991 = vmatprep.subr.mxu0 %v3094_v32  ;;  %5025 = vmatpush3.msra.mxu1 %v3111_v50  ;;  %v3178_v27 = vld [vmem:[%s8406_s5 + $0xb58] sm:$0xff]  ;;  %v3145_v32 = vld [vmem:[%s8406_s5 + $0xa50] sm:$0xff] }
 0x3cb   : > { %4992 = vmatpush3.msra.mxu0 %v3078_v54  ;;  %5026 = vmatprep.subr.mxu1 %v3126_v6  ;;  %v3193_v50 = vld [vmem:[%s8406_s5 + $0xbd0] sm:$0xff]  ;;  %v3160_v54 = vld [vmem:[%s8406_s5 + $0xac8] sm:$0xff] }
 0x3cc   : > { %4993 = vmatprep.subr.mxu0 %v3093_v46  ;;  %5027 = vmatpush3.msra.mxu1 %v3110_v15  ;;  %v3177_v6 = vld [vmem:[%s8406_s5 + $0xb50] sm:$0xff]  ;;  %v3144_v46 = vld [vmem:[%s8406_s5 + $0xa48] sm:$0xff] }
 0x3cd   : > { %4994 = vmatpush3.msra.mxu0 %v3077_v8  ;;  %5028 = vmatprep.subr.mxu1 %v3125_v7  ;;  %v3192_v15 = vld [vmem:[%s8406_s5 + $0xbc8] sm:$0xff]  ;;  %v3159_v8 = vld [vmem:[%s8406_s5 + $0xac0] sm:$0xff] }
 0x3ce   : > { %4995 = vmatprep.subr.mxu0 %v3092_v47  ;;  %5029 = vmatpush3.msra.mxu1 %v3109_v30  ;;  %v3176_v7 = vld [vmem:[%s8406_s5 + $0xb48] sm:$0xff]  ;;  %v3143_v47 = vld [vmem:[%s8406_s5 + $0xa40] sm:$0xff] }
 0x3cf   : > { %4996 = vmatpush3.msra.mxu0 %v3076_v11  ;;  %5030 = vmatprep.subr.mxu1 %v3124_v1  ;;  %v3191_v30 = vld [vmem:[%s8406_s5 + $0xbc0] sm:$0xff]  ;;  %v3158_v11 = vld [vmem:[%s8406_s5 + $0xab8] sm:$0xff] }
 0x3d0   : > { %4997 = vmatprep.subr.mxu0 %v3091_v14  ;;  %5031 = vmatpush3.msra.mxu1 %v3108_v56  ;;  %v3175_v1 = vld [vmem:[%s8406_s5 + $0xb40] sm:$0xff]  ;;  %v3142_v14 = vld [vmem:[%s8406_s5 + $0xa38] sm:$0xff] }
 0x3d1   : > { %4998 = vmatpush3.msra.mxu0 %v3075_v4  ;;  %5032 = vmatprep.subr.mxu1 %v3123_v26  ;;  %v3190_v56 = vld [vmem:[%s8406_s5 + $0xbb8] sm:$0xff]  ;;  %v3157_v4 = vld [vmem:[%s8406_s5 + $0xab0] sm:$0xff] }
 0x3d2   : > { %4999 = vmatprep.subr.mxu0 %v3090_v44  ;;  %5033 = vmatpush3.msra.mxu1 %v3107_v34  ;;  %v3174_v26 = vld [vmem:[%s8406_s5 + $0xb38] sm:$0xff]  ;;  %v3141_v44 = vld [vmem:[%s8406_s5 + $0xa30] sm:$0xff] }
 0x3d3   : > { %5000 = vmatpush3.msra.mxu0 %v3074_v10  ;;  %5034 = vmatprep.subr.mxu1 %v3122_v38  ;;  %v3189_v34 = vld [vmem:[%s8406_s5 + $0xbb0] sm:$0xff]  ;;  %v3156_v10 = vld [vmem:[%s8406_s5 + $0xaa8] sm:$0xff] }
 0x3d4   : > { %5001 = vmatprep.subr.mxu0 %v3089_v55  ;;  %5035 = vmatpush3.msra.mxu1 %v3106_v12  ;;  %v3173_v38 = vld [vmem:[%s8406_s5 + $0xb30] sm:$0xff]  ;;  %v3140_v55 = vld [vmem:[%s8406_s5 + $0xa28] sm:$0xff] }
 0x3d5   : > { %5002 = vmatpush3.msra.mxu0 %v3073_v62  ;;  %5036 = vmatprep.subr.mxu1 %v3121_v23  ;;  %v3188_v12 = vld [vmem:[%s8406_s5 + $0xba8] sm:$0xff]  ;;  %v3155_v62 = vld [vmem:[%s8406_s5 + $0xaa0] sm:$0xff] }
 0x3d6   : > { %5003 = vmatprep.subr.mxu0 %v3088_v45  ;;  %5037 = vmatpush3.msra.mxu1 %v3105_v41  ;;  %v3172_v23 = vld [vmem:[%s8406_s5 + $0xb28] sm:$0xff]  ;;  %v3139_v45 = vld [vmem:[%s8406_s5 + $0xa20] sm:$0xff] }
 0x3d7   : > { %5004 = vmatpush3.msra.mxu0 %v3072_v31  ;;  %5038 = vmatprep.subr.mxu1 %v3120_v35  ;;  %v3187_v41 = vld [vmem:[%s8406_s5 + $0xba0] sm:$0xff]  ;;  %v3154_v31 = vld [vmem:[%s8406_s5 + $0xa98] sm:$0xff] }
 0x3d8   : > { %5005 = vmatprep.subr.mxu0 %v3087_v18  ;;  %5039 = vmatpush3.msra.mxu1 %v3104_v49  ;;  %v3171_v35 = vld [vmem:[%s8406_s5 + $0xb20] sm:$0xff]  ;;  %v3138_v18 = vld [vmem:[%s8406_s5 + $0xa18] sm:$0xff] }
 0x3d9   : > { %5006 = vmatpush3.msra.mxu0 %v3071_v17  ;;  %5040 = vmatprep.subr.mxu1 %v3119_v5  ;;  %v3186_v49 = vld [vmem:[%s8406_s5 + $0xb98] sm:$0xff]  ;;  %v3153_v17 = vld [vmem:[%s8406_s5 + $0xa90] sm:$0xff] }
 0x3da   : > { %3959 = vmatmul.mubr.f32.vlgmr.msra.gmra.mxu0 %v7055_v57  ;;  %5041 = vmatpush3.msra.mxu1 %v3103_v53  ;;  %v3149_v57 = vld [vmem:[%s8406_s5 + $0xa70] sm:$0xff]  ;;  %v3170_v5 = vld [vmem:[%s8406_s5 + $0xb18] sm:$0xff] }
 0x3db   : > { %5045 = vmatprep.subr.mxu0 %v3166_v59  ;;  %4029 = vmatmul.mubr.f32.vlgmr.msra.gmra.mxu1 %v7067_v28  ;;  %v3181_v28 = vld [vmem:[%s8406_s5 + $0xb70] sm:$0xff] }
 0x3dc   : > { %5046 = vmatpush3.msra.mxu0 %v3150_v21  ;;  %4098 = vmatprep.mubr.f32.mxu0 %v7088_v48  ;;  %v3196_v48 = vld [vmem:[%s8406_s5 + $0xbe8] sm:$0xff]  ;;  %v3137_v53 = vld [vmem:[%s8406_s5 + $0xa10] sm:$0xff] }
 0x3dd   : > { %5080 = vmatprep.subr.mxu1 %v3198_v58  ;;  %5047 = vmatprep.subr.mxu0 %v3165_v37  ;;  %v3185_v59 = vld [vmem:[%s8406_s5 + $0xb90] sm:$0xff]  ;;  %v3152_v21 = vld [vmem:[%s8406_s5 + $0xa88] sm:$0xff] }
 0x3de   : > { %5081 = vmatpush3.msra.mxu1 %v3182_v20  ;;  %4168 = vmatprep.mubr.f32.mxu1 %v7107_v2  ;;  %v3195_v2 = vld [vmem:[%s8406_s5 + $0xbe0] sm:$0xff]  ;;  %v3169_v58 = vld [vmem:[%s8406_s5 + $0xb10] sm:$0xff]  ;;  %v3136_v37 = vld [vmem:[%s8406_s5 + $0xa08] sm:$0xff] }
 0x3df   : > { %5048 = vmatpush3.msra.mxu0 %v3149_v57  ;;  %5082 = vmatprep.subr.mxu1 %v3197_v29  ;;  %v3184_v20 = vld [vmem:[%s8406_s5 + $0xb88] sm:$0xff]  ;;  %v3151_v57 = vld [vmem:[%s8406_s5 + $0xa80] sm:$0xff] }
 0x3e0   : > { %5049 = vmatprep.subr.mxu0 %v3164_v3  ;;  %5083 = vmatpush3.msra.mxu1 %v3181_v28  ;;  %v3168_v29 = vld [vmem:[%s8406_s5 + $0xb08] sm:$0xff]  ;;  %v3135_v3 = vld [vmem:[%s8406_s5 + $0xa00] sm:$0xff] }
 0x3e1   : > { %5050 = vmatpush3.msra.mxu0 %v3148_v22  ;;  %5084 = vmatprep.subr.mxu1 %v3196_v48  ;;  %v3183_v28 = vld [vmem:[%s8406_s5 + $0xb80] sm:$0xff]  ;;  %v3230_v48 = vld [vmem:[%s8406_s5 + $0xcf8] sm:$0xff] }
 0x3e2   : > { %5051 = vmatprep.subr.mxu0 %v3163_v13  ;;  %5085 = vmatpush3.msra.mxu1 %v3180_v60  ;;  %v3167_v22 = vld [vmem:[%s8406_s5 + $0xb00] sm:$0xff]  ;;  %v3214_v13 = vld [vmem:[%s8406_s5 + $0xc78] sm:$0xff] }
 0x3e3   : > { %5052 = vmatpush3.msra.mxu0 %v3147_v61  ;;  %5086 = vmatprep.subr.mxu1 %v3195_v2  ;;  %v3262_v60 = vld [vmem:[%s8406_s5 + $0xdf8] sm:$0xff]  ;;  %v3229_v61 = vld [vmem:[%s8406_s5 + $0xcf0] sm:$0xff] }
 0x3e4   : > { %5053 = vmatprep.subr.mxu0 %v3162_v42  ;;  %5087 = vmatpush3.msra.mxu1 %v3179_v25  ;;  %v3246_v2 = vld [vmem:[%s8406_s5 + $0xd78] sm:$0xff]  ;;  %v3261_v42 = vld [vmem:[%s8406_s5 + $0xdf0] sm:$0xff]  ;;  %v3228_v25 = vld [vmem:[%s8406_s5 + $0xce8] sm:$0xff] }
 0x3e5   : > { %5054 = vmatpush3.msra.mxu0 %v3146_v43  ;;  %5088 = vmatprep.subr.mxu1 %v3194_v52  ;;  %v3212_v43 = vld [vmem:[%s8406_s5 + $0xc68] sm:$0xff]  ;;  %v3227_v52 = vld [vmem:[%s8406_s5 + $0xce0] sm:$0xff] }
 0x3e6   : > { %5055 = vmatprep.subr.mxu0 %v3161_v51  ;;  %5089 = vmatpush3.msra.mxu1 %v3178_v27  ;;  %v3244_v51 = vld [vmem:[%s8406_s5 + $0xd68] sm:$0xff]  ;;  %v3211_v27 = vld [vmem:[%s8406_s5 + $0xc60] sm:$0xff] }
 0x3e7   : > { %5056 = vmatpush3.msra.mxu0 %v3145_v32  ;;  %5090 = vmatprep.subr.mxu1 %v3193_v50  ;;  %v3226_v32 = vld [vmem:[%s8406_s5 + $0xcd8] sm:$0xff]  ;;  %v3243_v50 = vld [vmem:[%s8406_s5 + $0xd60] sm:$0xff] }
 0x3e8   : > { %5057 = vmatprep.subr.mxu0 %v3160_v54  ;;  %5091 = vmatpush3.msra.mxu1 %v3177_v6  ;;  %v3210_v54 = vld [vmem:[%s8406_s5 + $0xc58] sm:$0xff] }
 0x3e9   : > { %5058 = vmatpush3.msra.mxu0 %v3144_v46  ;;  %5092 = vmatprep.subr.mxu1 %v3192_v15  ;;  %v3258_v6 = vld [vmem:[%s8406_s5 + $0xdd8] sm:$0xff]  ;;  %v3225_v46 = vld [vmem:[%s8406_s5 + $0xcd0] sm:$0xff] }
 0x3ea   : > { %5059 = vmatprep.subr.mxu0 %v3159_v8  ;;  %5093 = vmatpush3.msra.mxu1 %v3176_v7  ;;  %v3242_v15 = vld [vmem:[%s8406_s5 + $0xd58] sm:$0xff]  ;;  %v3209_v8 = vld [vmem:[%s8406_s5 + $0xc50] sm:$0xff] }
 0x3eb   : > { %5060 = vmatpush3.msra.mxu0 %v3143_v47  ;;  %5094 = vmatprep.subr.mxu1 %v3191_v30  ;;  %v3257_v7 = vld [vmem:[%s8406_s5 + $0xdd0] sm:$0xff]  ;;  %v3224_v47 = vld [vmem:[%s8406_s5 + $0xcc8] sm:$0xff] }
 0x3ec   : > { %5061 = vmatprep.subr.mxu0 %v3158_v11  ;;  %5095 = vmatpush3.msra.mxu1 %v3175_v1  ;;  %v3241_v30 = vld [vmem:[%s8406_s5 + $0xd50] sm:$0xff]  ;;  %v3208_v11 = vld [vmem:[%s8406_s5 + $0xc48] sm:$0xff] }
 0x3ed   : > { %5062 = vmatpush3.msra.mxu0 %v3142_v14  ;;  %5096 = vmatprep.subr.mxu1 %v3190_v56  ;;  %v3256_v1 = vld [vmem:[%s8406_s5 + $0xdc8] sm:$0xff]  ;;  %v3223_v14 = vld [vmem:[%s8406_s5 + $0xcc0] sm:$0xff] }
 0x3ee   : > { %5063 = vmatprep.subr.mxu0 %v3157_v4  ;;  %5097 = vmatpush3.msra.mxu1 %v3174_v26  ;;  %v3240_v56 = vld [vmem:[%s8406_s5 + $0xd48] sm:$0xff]  ;;  %v3207_v4 = vld [vmem:[%s8406_s5 + $0xc40] sm:$0xff] }
 0x3ef   : > { %5064 = vmatpush3.msra.mxu0 %v3141_v44  ;;  %5098 = vmatprep.subr.mxu1 %v3189_v34  ;;  %v3255_v26 = vld [vmem:[%s8406_s5 + $0xdc0] sm:$0xff]  ;;  %v3222_v44 = vld [vmem:[%s8406_s5 + $0xcb8] sm:$0xff] }
 0x3f0   : > { %5065 = vmatprep.subr.mxu0 %v3156_v10  ;;  %5099 = vmatpush3.msra.mxu1 %v3173_v38  ;;  %v3239_v34 = vld [vmem:[%s8406_s5 + $0xd40] sm:$0xff]  ;;  %v3206_v10 = vld [vmem:[%s8406_s5 + $0xc38] sm:$0xff] }
 0x3f1   : > { %5066 = vmatpush3.msra.mxu0 %v3140_v55  ;;  %5100 = vmatprep.subr.mxu1 %v3188_v12  ;;  %v3254_v38 = vld [vmem:[%s8406_s5 + $0xdb8] sm:$0xff]  ;;  %v3221_v55 = vld [vmem:[%s8406_s5 + $0xcb0] sm:$0xff] }
 0x3f2   : > { %5067 = vmatprep.subr.mxu0 %v3155_v62  ;;  %5101 = vmatpush3.msra.mxu1 %v3172_v23  ;;  %v3238_v12 = vld [vmem:[%s8406_s5 + $0xd38] sm:$0xff]  ;;  %v3205_v62 = vld [vmem:[%s8406_s5 + $0xc30] sm:$0xff] }
 0x3f3   : > { %5068 = vmatpush3.msra.mxu0 %v3139_v45  ;;  %5102 = vmatprep.subr.mxu1 %v3187_v41  ;;  %v3253_v23 = vld [vmem:[%s8406_s5 + $0xdb0] sm:$0xff]  ;;  %v3220_v45 = vld [vmem:[%s8406_s5 + $0xca8] sm:$0xff] }
 0x3f4   : > { %5069 = vmatprep.subr.mxu0 %v3154_v31  ;;  %5103 = vmatpush3.msra.mxu1 %v3171_v35  ;;  %v3237_v41 = vld [vmem:[%s8406_s5 + $0xd30] sm:$0xff]  ;;  %v3204_v31 = vld [vmem:[%s8406_s5 + $0xc28] sm:$0xff] }
 0x3f5   : > { %5070 = vmatpush3.msra.mxu0 %v3138_v18  ;;  %5104 = vmatprep.subr.mxu1 %v3186_v49  ;;  %v3252_v35 = vld [vmem:[%s8406_s5 + $0xda8] sm:$0xff]  ;;  %v3219_v18 = vld [vmem:[%s8406_s5 + $0xca0] sm:$0xff] }
 0x3f6   : > { %5071 = vmatprep.subr.mxu0 %v3153_v17  ;;  %5105 = vmatpush3.msra.mxu1 %v3170_v5  ;;  %v3236_v49 = vld [vmem:[%s8406_s5 + $0xd28] sm:$0xff]  ;;  %v3203_v17 = vld [vmem:[%s8406_s5 + $0xc20] sm:$0xff] }
 0x3f7   : > { %5072 = vmatpush3.msra.mxu0 %v3137_v53  ;;  %5106 = vmatprep.subr.mxu1 %v3185_v59  ;;  %v3251_v5 = vld [vmem:[%s8406_s5 + $0xda0] sm:$0xff]  ;;  %v3218_v53 = vld [vmem:[%s8406_s5 + $0xc98] sm:$0xff] }
 0x3f8   : > { %5073 = vmatprep.subr.mxu0 %v3152_v21  ;;  %5107 = vmatpush3.msra.mxu1 %v3169_v58  ;;  %v3235_v59 = vld [vmem:[%s8406_s5 + $0xd20] sm:$0xff]  ;;  %v3202_v21 = vld [vmem:[%s8406_s5 + $0xc18] sm:$0xff] }
 0x3f9   : > { %5074 = vmatpush3.msra.mxu0 %v3136_v37  ;;  %5108 = vmatprep.subr.mxu1 %v3184_v20  ;;  %v3250_v58 = vld [vmem:[%s8406_s5 + $0xd98] sm:$0xff]  ;;  %v3217_v37 = vld [vmem:[%s8406_s5 + $0xc90] sm:$0xff] }
 0x3fa   : > { %5075 = vmatprep.subr.mxu0 %v3151_v57  ;;  %5109 = vmatpush3.msra.mxu1 %v3168_v29  ;;  %v3234_v20 = vld [vmem:[%s8406_s5 + $0xd18] sm:$0xff]  ;;  %v3201_v57 = vld [vmem:[%s8406_s5 + $0xc10] sm:$0xff] }
 0x3fb   : > { %5076 = vmatpush3.msra.mxu0 %v3135_v3  ;;  %5110 = vmatprep.subr.mxu1 %v3183_v28  ;;  %v3249_v29 = vld [vmem:[%s8406_s5 + $0xd90] sm:$0xff]  ;;  %v3216_v3 = vld [vmem:[%s8406_s5 + $0xc88] sm:$0xff] }
 0x3fc   : > { %4099 = vmatmul.mubr.f32.vlgmr.msra.gmra.mxu0 %v7127_v33  ;;  %5111 = vmatpush3.msra.mxu1 %v3167_v22  ;;  %v3213_v33 = vld [vmem:[%s8406_s5 + $0xc70] sm:$0xff]  ;;  %v3200_v22 = vld [vmem:[%s8406_s5 + $0xc08] sm:$0xff] }
 0x3fd   : > { %5115 = vmatprep.subr.mxu0 %v3230_v48  ;;  %4169 = vmatmul.mubr.f32.vlgmr.msra.gmra.mxu1 %v7137_v0  ;;  %v3245_v0 = vld [vmem:[%s8406_s5 + $0xd70] sm:$0xff]  ;;  %v3248_v48 = vld [vmem:[%s8406_s5 + $0xd88] sm:$0xff] }
 0x3fe   : > { %5116 = vmatpush3.msra.mxu0 %v3214_v13  ;;  %4238 = vmatprep.mubr.f32.mxu0 %v7158_v16  ;;  %v3260_v16 = vld [vmem:[%s8406_s5 + $0xde8] sm:$0xff]  ;;  %v3233_v28 = vld [vmem:[%s8406_s5 + $0xd10] sm:$0xff]  ;;  %v3215_v13 = vld [vmem:[%s8406_s5 + $0xc80] sm:$0xff] }
 0x3ff   : > { %5150 = vmatprep.subr.mxu1 %v3262_v60  ;;  %5117 = vmatprep.subr.mxu0 %v3229_v61  ;;  %v3232_v60 = vld [vmem:[%s8406_s5 + $0xd08] sm:$0xff]  ;;  %v3199_v61 = vld [vmem:[%s8406_s5 + $0xc00] sm:$0xff] }
 0x400   : > { %5151 = vmatpush3.msra.mxu1 %v3246_v2  ;;  %4308 = vmatprep.mubr.f32.mxu1 %v7183_v9  ;;  %v3259_v9 = vld [vmem:[%s8406_s5 + $0xde0] sm:$0xff] }
 0x401   : > { %5118 = vmatpush3.msra.mxu0 %v3213_v33  ;;  %5152 = vmatprep.subr.mxu1 %v3261_v42  ;;  %v3247_v2 = vld [vmem:[%s8406_s5 + $0xd80] sm:$0xff]  ;;  %v3294_v42 = vld [vmem:[%s8406_s5 + $0xef8] sm:$0xff] }
 0x402   : > { %5119 = vmatprep.subr.mxu0 %v3228_v25  ;;  %5153 = vmatpush3.msra.mxu1 %v3245_v0  ;;  %v3231_v33 = vld [vmem:[%s8406_s5 + $0xd00] sm:$0xff]  ;;  %v3278_v25 = vld [vmem:[%s8406_s5 + $0xe78] sm:$0xff] }
 0x403   : > { %5120 = vmatpush3.msra.mxu0 %v3212_v43  ;;  %5154 = vmatprep.subr.mxu1 %v3260_v16  ;;  %v3326_v0 = vld [vmem:[%s8406_s5 + $0xff8] sm:$0xff]  ;;  %v3293_v43 = vld [vmem:[%s8406_s5 + $0xef0] sm:$0xff] }
 0x404   : > { %5121 = vmatprep.subr.mxu0 %v3227_v52  ;;  %5155 = vmatpush3.msra.mxu1 %v3244_v51  ;;  %v3310_v16 = vld [vmem:[%s8406_s5 + $0xf78] sm:$0xff]  ;;  %v3325_v52 = vld [vmem:[%s8406_s5 + $0xff0] sm:$0xff]  ;;  %v3292_v51 = vld [vmem:[%s8406_s5 + $0xee8] sm:$0xff] }
 0x405   : > { %5122 = vmatpush3.msra.mxu0 %v3211_v27  ;;  %5156 = vmatprep.subr.mxu1 %v3259_v9  ;;  %v3276_v27 = vld [vmem:[%s8406_s5 + $0xe68] sm:$0xff]  ;;  %v3291_v9 = vld [vmem:[%s8406_s5 + $0xee0] sm:$0xff] }
 0x406   : > { %5123 = vmatprep.subr.mxu0 %v3226_v32  ;;  %5157 = vmatpush3.msra.mxu1 %v3243_v50  ;;  %v3308_v32 = vld [vmem:[%s8406_s5 + $0xf68] sm:$0xff]  ;;  %v3275_v50 = vld [vmem:[%s8406_s5 + $0xe60] sm:$0xff] }
 0x407   : > { %5124 = vmatpush3.msra.mxu0 %v3210_v54  ;;  %5158 = vmatprep.subr.mxu1 %v3258_v6  ;;  %v3290_v54 = vld [vmem:[%s8406_s5 + $0xed8] sm:$0xff]  ;;  %v3307_v6 = vld [vmem:[%s8406_s5 + $0xf60] sm:$0xff] }
 0x408   : > { %5125 = vmatprep.subr.mxu0 %v3225_v46  ;;  %5159 = vmatpush3.msra.mxu1 %v3242_v15  ;;  %v3274_v46 = vld [vmem:[%s8406_s5 + $0xe58] sm:$0xff] }
 0x409   : > { %5126 = vmatpush3.msra.mxu0 %v3209_v8  ;;  %5160 = vmatprep.subr.mxu1 %v3257_v7  ;;  %v3322_v15 = vld [vmem:[%s8406_s5 + $0xfd8] sm:$0xff]  ;;  %v3289_v8 = vld [vmem:[%s8406_s5 + $0xed0] sm:$0xff] }
 0x40a   : > { %5127 = vmatprep.subr.mxu0 %v3224_v47  ;;  %5161 = vmatpush3.msra.mxu1 %v3241_v30  ;;  %v3306_v7 = vld [vmem:[%s8406_s5 + $0xf58] sm:$0xff]  ;;  %v3273_v47 = vld [vmem:[%s8406_s5 + $0xe50] sm:$0xff] }
 0x40b   : > { %5128 = vmatpush3.msra.mxu0 %v3208_v11  ;;  %5162 = vmatprep.subr.mxu1 %v3256_v1  ;;  %v3321_v30 = vld [vmem:[%s8406_s5 + $0xfd0] sm:$0xff]  ;;  %v3288_v11 = vld [vmem:[%s8406_s5 + $0xec8] sm:$0xff] }
 0x40c   : > { %5129 = vmatprep.subr.mxu0 %v3223_v14  ;;  %5163 = vmatpush3.msra.mxu1 %v3240_v56  ;;  %v3305_v1 = vld [vmem:[%s8406_s5 + $0xf50] sm:$0xff]  ;;  %v3272_v14 = vld [vmem:[%s8406_s5 + $0xe48] sm:$0xff] }
 0x40d   : > { %5130 = vmatpush3.msra.mxu0 %v3207_v4  ;;  %5164 = vmatprep.subr.mxu1 %v3255_v26  ;;  %v3320_v56 = vld [vmem:[%s8406_s5 + $0xfc8] sm:$0xff]  ;;  %v3287_v4 = vld [vmem:[%s8406_s5 + $0xec0] sm:$0xff] }
 0x40e   : > { %5131 = vmatprep.subr.mxu0 %v3222_v44  ;;  %5165 = vmatpush3.msra.mxu1 %v3239_v34  ;;  %v3304_v26 = vld [vmem:[%s8406_s5 + $0xf48] sm:$0xff]  ;;  %v3271_v44 = vld [vmem:[%s8406_s5 + $0xe40] sm:$0xff] }
 0x40f   : > { %5132 = vmatpush3.msra.mxu0 %v3206_v10  ;;  %5166 = vmatprep.subr.mxu1 %v3254_v38  ;;  %v3319_v34 = vld [vmem:[%s8406_s5 + $0xfc0] sm:$0xff]  ;;  %v3286_v10 = vld [vmem:[%s8406_s5 + $0xeb8] sm:$0xff] }
 0x410   : > { %5133 = vmatprep.subr.mxu0 %v3221_v55  ;;  %5167 = vmatpush3.msra.mxu1 %v3238_v12  ;;  %v3303_v38 = vld [vmem:[%s8406_s5 + $0xf40] sm:$0xff]  ;;  %v3270_v55 = vld [vmem:[%s8406_s5 + $0xe38] sm:$0xff] }
 0x411   : > { %5134 = vmatpush3.msra.mxu0 %v3205_v62  ;;  %5168 = vmatprep.subr.mxu1 %v3253_v23  ;;  %v3318_v12 = vld [vmem:[%s8406_s5 + $0xfb8] sm:$0xff]  ;;  %v3285_v62 = vld [vmem:[%s8406_s5 + $0xeb0] sm:$0xff] }
 0x412   : > { %5135 = vmatprep.subr.mxu0 %v3220_v45  ;;  %5169 = vmatpush3.msra.mxu1 %v3237_v41  ;;  %v3302_v23 = vld [vmem:[%s8406_s5 + $0xf38] sm:$0xff]  ;;  %v3269_v45 = vld [vmem:[%s8406_s5 + $0xe30] sm:$0xff] }
 0x413   : > { %5136 = vmatpush3.msra.mxu0 %v3204_v31  ;;  %5170 = vmatprep.subr.mxu1 %v3252_v35  ;;  %v3317_v41 = vld [vmem:[%s8406_s5 + $0xfb0] sm:$0xff]  ;;  %v3284_v31 = vld [vmem:[%s8406_s5 + $0xea8] sm:$0xff] }
 0x414   : > { %5137 = vmatprep.subr.mxu0 %v3219_v18  ;;  %5171 = vmatpush3.msra.mxu1 %v3236_v49  ;;  %v3301_v35 = vld [vmem:[%s8406_s5 + $0xf30] sm:$0xff]  ;;  %v3268_v18 = vld [vmem:[%s8406_s5 + $0xe28] sm:$0xff] }
 0x415   : > { %5138 = vmatpush3.msra.mxu0 %v3203_v17  ;;  %5172 = vmatprep.subr.mxu1 %v3251_v5  ;;  %v3316_v49 = vld [vmem:[%s8406_s5 + $0xfa8] sm:$0xff]  ;;  %v3283_v17 = vld [vmem:[%s8406_s5 + $0xea0] sm:$0xff] }
 0x416   : > { %5139 = vmatprep.subr.mxu0 %v3218_v53  ;;  %5173 = vmatpush3.msra.mxu1 %v3235_v59  ;;  %v3300_v5 = vld [vmem:[%s8406_s5 + $0xf28] sm:$0xff]  ;;  %v3267_v53 = vld [vmem:[%s8406_s5 + $0xe20] sm:$0xff] }
 0x417   : > { %5140 = vmatpush3.msra.mxu0 %v3202_v21  ;;  %5174 = vmatprep.subr.mxu1 %v3250_v58  ;;  %v3315_v59 = vld [vmem:[%s8406_s5 + $0xfa0] sm:$0xff]  ;;  %v3282_v21 = vld [vmem:[%s8406_s5 + $0xe98] sm:$0xff] }
 0x418   : > { %5141 = vmatprep.subr.mxu0 %v3217_v37  ;;  %5175 = vmatpush3.msra.mxu1 %v3234_v20  ;;  %v3299_v58 = vld [vmem:[%s8406_s5 + $0xf20] sm:$0xff]  ;;  %v3266_v37 = vld [vmem:[%s8406_s5 + $0xe18] sm:$0xff] }
 0x419   : > { %5142 = vmatpush3.msra.mxu0 %v3201_v57  ;;  %5176 = vmatprep.subr.mxu1 %v3249_v29  ;;  %v3314_v20 = vld [vmem:[%s8406_s5 + $0xf98] sm:$0xff]  ;;  %v3281_v57 = vld [vmem:[%s8406_s5 + $0xe90] sm:$0xff] }
 0x41a   : > { %5143 = vmatprep.subr.mxu0 %v3216_v3  ;;  %5177 = vmatpush3.msra.mxu1 %v3233_v28  ;;  %v3298_v29 = vld [vmem:[%s8406_s5 + $0xf18] sm:$0xff]  ;;  %v3265_v3 = vld [vmem:[%s8406_s5 + $0xe10] sm:$0xff] }
 0x41b   : > { %5144 = vmatpush3.msra.mxu0 %v3200_v22  ;;  %5178 = vmatprep.subr.mxu1 %v3248_v48  ;;  %v3313_v28 = vld [vmem:[%s8406_s5 + $0xf90] sm:$0xff]  ;;  %v3280_v22 = vld [vmem:[%s8406_s5 + $0xe88] sm:$0xff] }
 0x41c   : > { %5145 = vmatprep.subr.mxu0 %v3215_v13  ;;  %5179 = vmatpush3.msra.mxu1 %v3232_v60  ;;  %v3297_v48 = vld [vmem:[%s8406_s5 + $0xf10] sm:$0xff]  ;;  %v3264_v13 = vld [vmem:[%s8406_s5 + $0xe08] sm:$0xff] }
 0x41d   : > { %5146 = vmatpush3.msra.mxu0 %v3199_v61  ;;  %5180 = vmatprep.subr.mxu1 %v3247_v2  ;;  %v3312_v60 = vld [vmem:[%s8406_s5 + $0xf88] sm:$0xff]  ;;  %v3279_v61 = vld [vmem:[%s8406_s5 + $0xe80] sm:$0xff] }
 0x41e   : > { %4239 = vmatmul.mubr.f32.vlgmr.msra.gmra.mxu0 %v7198_v19  ;;  %5181 = vmatpush3.msra.mxu1 %v3231_v33  ;;  %v3277_v19 = vld [vmem:[%s8406_s5 + $0xe70] sm:$0xff]  ;;  %v3296_v2 = vld [vmem:[%s8406_s5 + $0xf08] sm:$0xff]  ;;  %v3263_v33 = vld [vmem:[%s8406_s5 + $0xe00] sm:$0xff] }
 0x41f   : > { %5185 = vmatprep.subr.mxu0 %v3294_v42  ;;  %4309 = vmatmul.mubr.f32.vlgmr.msra.gmra.mxu1 %v7210_v40  ;;  %v3309_v40 = vld [vmem:[%s8406_s5 + $0xf70] sm:$0xff]  ;;  %v3311_v42 = vld [vmem:[%s8406_s5 + $0xf80] sm:$0xff] }
 0x420   : > { %5186 = vmatpush3.msra.mxu0 %v3278_v25  ;;  %4378 = vmatprep.mubr.f32.mxu0 %v7231_v36  ;;  %v3324_v36 = vld [vmem:[%s8406_s5 + $0xfe8] sm:$0xff]  ;;  %v3295_v25 = vld [vmem:[%s8406_s5 + $0xf00] sm:$0xff] }
 0x421   : > { %5220 = vmatprep.subr.mxu1 %v3326_v0  ;;  %5187 = vmatprep.subr.mxu0 %v3293_v43  ;;  %v4458_v0 = vld [vmem:[%s8408_s7 + $0x18] sm:$0xff]  ;;  %v5302_v43 = vmov 0.0  }
 0x422   : > { %5221 = vmatpush3.msra.mxu1 %v3310_v16  ;;  %4448 = vmatprep.mubr.f32.mxu1 %v7253_v63  ;;  %v3323_v63 = vld [vmem:[%s8406_s5 + $0xfe0] sm:$0xff]  ;;  %v4457_v16 = vld [vmem:[%s8408_s7 + $0x10] sm:$0xff] }
 0x423   : > { %5188 = vmatpush3.msra.mxu0 %v3277_v19  ;;  %5222 = vmatprep.subr.mxu1 %v3325_v52  ;;  %v4727_v19 = vpop.f32.mrf.mxu0 }
 0x424   : > { %5189 = vmatprep.subr.mxu0 %v3292_v51  ;;  %5223 = vmatpush3.msra.mxu1 %v3309_v40  ;;  %v4762_v51 = vpop.f32.mrf.mxu1 }
 0x425   : > { %5190 = vmatpush3.msra.mxu0 %v3276_v27  ;;  %5224 = vmatprep.subr.mxu1 %v3324_v36  ;;  %v4728_v52 = vpop.f32.mrf.mxu0  ;;  %v4690_v36 = vld [vmem:[%s8407_s6] ss:$0 sm:$0xff] }
 0x426   : > { %5191 = vmatprep.subr.mxu0 %v3291_v9  ;;  %5225 = vmatpush3.msra.mxu1 %v3308_v32  ;;  %v4729_v27 = vadd.f32 %v4728_v52, %v4727_v19  ;;  %v4763_v9 = vpop.f32.mrf.mxu1 }
 0x427   : > { %5192 = vmatpush3.msra.mxu0 %v3275_v50  ;;  %5226 = vmatprep.subr.mxu1 %v3323_v63 }
 0x428   : > { %5193 = vmatprep.subr.mxu0 %v3290_v54  ;;  %5227 = vmatpush3.msra.mxu1 %v3307_v6  ;;  %v3401_v50 = vadd.f32 %v4729_v27, %v4690_v36  ;;  %v4764_v6 = vadd.f32 %v4763_v9, %v4762_v51  ;;  %v4691_v51 = vld [vmem:[%s8409_s8] ss:$0 sm:$0xff] }
 0x429   : > { %5194 = vmatpush3.msra.mxu0 %v3274_v46  ;;  %5228 = vmatprep.subr.mxu1 %v3322_v15 }
 0x42a   : > { %5195 = vmatprep.subr.mxu0 %v3289_v8  ;;  %5229 = vmatpush3.msra.mxu1 %v3306_v7  ;;  %v3471_v15 = vadd.f32 %v4764_v6, %v3401_v50 }
 0x42b   : > { %5196 = vmatpush3.msra.mxu0 %v3273_v47  ;;  %5230 = vmatprep.subr.mxu1 %v3321_v30 }
 0x42c   : > { %5197 = vmatprep.subr.mxu0 %v3288_v11  ;;  %5231 = vmatpush3.msra.mxu1 %v3305_v1 }
 0x42d   : > { %5198 = vmatpush3.msra.mxu0 %v3272_v14  ;;  %5232 = vmatprep.subr.mxu1 %v3320_v56 }
 0x42e   : > { %5199 = vmatprep.subr.mxu0 %v3287_v4  ;;  %5233 = vmatpush3.msra.mxu1 %v3304_v26 }
 0x42f   : > { %5200 = vmatpush3.msra.mxu0 %v3271_v44  ;;  %5234 = vmatprep.subr.mxu1 %v3319_v34 }
 0x430   : > { %5201 = vmatprep.subr.mxu0 %v3286_v10  ;;  %5235 = vmatpush3.msra.mxu1 %v3303_v38 }
 0x431   : > { %5202 = vmatpush3.msra.mxu0 %v3270_v55  ;;  %5236 = vmatprep.subr.mxu1 %v3318_v12 }
 0x432   : > { %5203 = vmatprep.subr.mxu0 %v3285_v62  ;;  %5237 = vmatpush3.msra.mxu1 %v3302_v23 }
 0x433   : > { %5204 = vmatpush3.msra.mxu0 %v3269_v45  ;;  %5238 = vmatprep.subr.mxu1 %v3317_v41 }
 0x434   : > { %5205 = vmatprep.subr.mxu0 %v3284_v31  ;;  %5239 = vmatpush3.msra.mxu1 %v3301_v35  ;;  %v4797_v40 = vpop.f32.mrf.mxu0 }
 0x435   : > { %5206 = vmatpush3.msra.mxu0 %v3268_v18  ;;  %5240 = vmatprep.subr.mxu1 %v3316_v49  ;;  %v4832_v63 = vpop.f32.mrf.mxu1 }
 0x436   : > { %5207 = vmatprep.subr.mxu0 %v3283_v17  ;;  %5241 = vmatpush3.msra.mxu1 %v3300_v5  ;;  %v4798_v32 = vpop.f32.mrf.mxu0 }
 0x437   : > { %5208 = vmatpush3.msra.mxu0 %v3267_v53  ;;  %5242 = vmatprep.subr.mxu1 %v3315_v59  ;;  %v4799_v46 = vadd.f32 %v4798_v32, %v4797_v40  ;;  %v4833_v8 = vpop.f32.mrf.mxu1 }
 0x438   : > { %5209 = vmatprep.subr.mxu0 %v3282_v21  ;;  %5243 = vmatpush3.msra.mxu1 %v3299_v58  ;;  %v4834_v1 = vadd.f32 %v4833_v8, %v4832_v63 }
 0x439   : > { %5210 = vmatpush3.msra.mxu0 %v3266_v37  ;;  %5244 = vmatprep.subr.mxu1 %v3314_v20  ;;  %v3541_v47 = vadd.f32 %v4799_v46, %v3471_v15 }
 0x43a   : > { %5211 = vmatprep.subr.mxu0 %v3281_v57  ;;  %5245 = vmatpush3.msra.mxu1 %v3298_v29 }
 0x43b   : > { %5212 = vmatpush3.msra.mxu0 %v3265_v3  ;;  %5246 = vmatprep.subr.mxu1 %v3313_v28  ;;  %v3611_v56 = vadd.f32 %v4834_v1, %v3541_v47 }
 0x43c   : > { %5213 = vmatprep.subr.mxu0 %v3280_v22  ;;  %5247 = vmatpush3.msra.mxu1 %v3297_v48 }
 0x43d   : > { %5214 = vmatpush3.msra.mxu0 %v3264_v13  ;;  %5248 = vmatprep.subr.mxu1 %v3312_v60 }
 0x43e   : > { %5215 = vmatprep.subr.mxu0 %v3279_v61  ;;  %5249 = vmatpush3.msra.mxu1 %v3296_v2 }
 0x43f   : > { %5216 = vmatpush3.msra.mxu0 %v3263_v33  ;;  %5250 = vmatprep.subr.mxu1 %v3311_v42 }
 0x440   : > { %4379 = vmatmul.mubr.f32.vlgmr.msra.gmra.mxu0 %v7274_v39  ;;  %5251 = vmatpush3.msra.mxu1 %v3295_v25  ;;  %v4456_v39 = vld [vmem:[%s8408_s7 + $0x8] sm:$0xff] }
 0x441   : > { %4449 = vmatmul.mubr.f32.vlgmr.msra.gmra.mxu1 %v7284_v24  ;;  %5260 = vmatprep.subr.mxu0 %v5302_v43  ;;  %v4455_v24 = vld [vmem:[%s8408_s7] sm:$0xff] }
 0x442   : > { %5268 = vmatprep.mubr.msk.f32.mxu0 %vm5303_vm10, %v5302_v43  ;;  %5261 = vmatpush3.msra.mxu0 %v4458_v0 }
 0x443   : > { %5262 = vmatprep.subr.mxu0 %v5302_v43 }
 0x444   : > { %5263 = vmatpush3.msra.mxu0 %v4457_v16 }
 0x445   : > { %5264 = vmatprep.subr.mxu0 %v5302_v43 }
 0x446   : > { %5265 = vmatpush3.msra.mxu0 %v4456_v39 }
 0x447   : > { %5266 = vmatprep.subr.mxu0 %v5302_v43 }
 0x448   : > { %5267 = vmatpush3.msra.mxu0 %v4455_v24 }
 0x456   : > { %v4867_v54 = vpop.f32.mrf.mxu0 }
 0x457   : > { %v4902_v30 = vpop.f32.mrf.mxu1 }
 0x458   : > { %v4868_v7 = vpop.f32.mrf.mxu0 }
 0x459   : > { %v4869_v14 = vadd.f32 %v4868_v7, %v4867_v54  ;;  %v4903_v4 = vpop.f32.mrf.mxu1 }
 0x45a   : > { %v4904_v38 = vadd.f32 %v4903_v4, %v4902_v30 }
 0x45b   : > { %v3681_v44 = vadd.f32 %v4869_v14, %v3611_v56 }
 0x45d   : > { %v3751_v12 = vadd.f32 %v4904_v38, %v3681_v44 }
 0x478   : > { %v4937_v11 = vpop.f32.mrf.mxu0 }
 0x479   : > { %v4972_v34 = vpop.f32.mrf.mxu1 }
 0x47a   : > { %v4938_v26 = vpop.f32.mrf.mxu0 }
 0x47b   : > { %v4939_v55 = vadd.f32 %v4938_v26, %v4937_v11  ;;  %v4973_v62 = vpop.f32.mrf.mxu1 }
 0x47c   : > { %v4974_v35 = vadd.f32 %v4973_v62, %v4972_v34 }
 0x47d   : > { %v3821_v45 = vadd.f32 %v4939_v55, %v3751_v12 }
 0x47f   : > { %v3891_v49 = vadd.f32 %v4974_v35, %v3821_v45 }
 0x49a   : > { %v5007_v10 = vpop.f32.mrf.mxu0 }
 0x49b   : > { %v5042_v41 = vpop.f32.mrf.mxu1 }
 0x49c   : > { %v5008_v23 = vpop.f32.mrf.mxu0 }
 0x49d   : > { %v5009_v18 = vadd.f32 %v5008_v23, %v5007_v10  ;;  %v5043_v17 = vpop.f32.mrf.mxu1 }
 0x49e   : > { %v5044_v58 = vadd.f32 %v5043_v17, %v5042_v41 }
 0x49f   : > { %v3961_v53 = vadd.f32 %v5009_v18, %v3891_v49 }
 0x4a1   : > { %v4031_v20 = vadd.f32 %v5044_v58, %v3961_v53 }
 0x4bc   : > { %v5077_v31 = vpop.f32.mrf.mxu0 }
 0x4bd   : > { %v5112_v59 = vpop.f32.mrf.mxu1 }
 0x4be   : > { %v5078_v5 = vpop.f32.mrf.mxu0 }
 0x4bf   : > { %v5079_v37 = vadd.f32 %v5078_v5, %v5077_v31  ;;  %v5113_v57 = vpop.f32.mrf.mxu1 }
 0x4c0   : > { %v5114_v22 = vadd.f32 %v5113_v57, %v5112_v59 }
 0x4c1   : > { %v4101_v3 = vadd.f32 %v5079_v37, %v4031_v20 }
 0x4c3   : > { %v4171_v13 = vadd.f32 %v5114_v22, %v4101_v3 }
 0x4de   : > { %v5147_v21 = vpop.f32.mrf.mxu0 }
 0x4df   : > { %v5182_v28 = vpop.f32.mrf.mxu1 }
 0x4e0   : > { %v5148_v29 = vpop.f32.mrf.mxu0 }
 0x4e1   : > { %v5149_v48 = vadd.f32 %v5148_v29, %v5147_v21  ;;  %v5183_v60 = vpop.f32.mrf.mxu1 }
 0x4e2   : > { %v5184_v33 = vadd.f32 %v5183_v60, %v5182_v28 }
 0x4e3   : > { %v4241_v61 = vadd.f32 %v5149_v48, %v4171_v13 }
 0x4e5   : > { %v4311_v0 = vadd.f32 %v5184_v33, %v4241_v61 }
 0x500   : > { %v5217_v2 = vpop.f32.mrf.mxu0 }
 0x501   : > { %v5252_v42 = vpop.f32.mrf.mxu1 }
 0x502   : > { %v5218_v25 = vpop.f32.mrf.mxu0 }
 0x503   : > { %v5219_v43 = vadd.f32 %v5218_v25, %v5217_v2  ;;  %v5253_v16 = vpop.f32.mrf.mxu1 }
 0x504   : > { %v5254_v24 = vadd.f32 %v5253_v16, %v5252_v42 }
 0x505   : > { %v4381_v39 = vadd.f32 %v5219_v43, %v4311_v0 }
 0x507   : > { %v4451_v19 = vadd.f32 %v5254_v24, %v4381_v39 }
 0x509   : > { %v4454_v52 = vmax.f32 %v4451_v19, 0.0 }
 0x50b   : > { %5269 = vmatmul.mubr.msk.f32.vlgmr.msra.gmra.mxu0 %vm4466_vm11, %v4454_v52 }
 0x5cb   : > { %v4536_v40 = vpop.f32.mrf.mxu0 }
 0x5cc   : > { %v4537_v27 = vadd.f32 %v4691_v51, %v4536_v40 }
 0x5cd   : > { %v5270_v36 = vpop.f32.mrf.mxu0 }
 0x5ce   : > { %4541 = vst.msk [vmem:[%s330_s18] sm:$0xf] %vm4540_vm12, %v4537_v27 }
 0x5cf PF: > { %s19_s30 = sadd.s32 1, %s5296_s30  }
 0x5d0   : > { %p16_p4 = scmp.ge.s32.totalorder %s19_s30, 4  }
 0x5d2   :  { %18 = sbr.rel (!%p16_p4) target bundleno = 1 (0x1), region = 86 }

</bundles_post_ra>
